<compile_context>
chip_gen: v6e
topology: v6e:2x2x1
jax: 0.10.0
libtpu: 0.0.40
codegen_flags: <defaults>
</compile_context>

<pallas_src>
import functools

import jax
import jax.numpy as jnp
import numpy as np
from jax.experimental import pallas as pl
from jax.experimental.pallas import tpu as pltpu


def _round_up(n, m):
  return ((n + m - 1) // m) * m


def _resblock_kernel(*refs, H, W, Cp, Cop, stride, Ho, Wo, has_proj):
  """Processes one batch image per grid step. Channel dims are lane-padded."""
  f32 = jnp.float32
  bf16 = jnp.bfloat16
  M = Ho * Wo

  if has_proj:
    (x_ref, w1_ref, s1_ref, b1_ref, w2_ref, s2_ref, b2_ref,
     wsc_ref, ssc_ref, bsc_ref, o_ref,
     xpad, opad, col1, col2) = refs
  else:
    (x_ref, w1_ref, s1_ref, b1_ref, w2_ref, s2_ref, b2_ref,
     o_ref, xpad, opad, col1, col2) = refs

  x = x_ref[0]                                          # (H, W, Cp) bf16

  # ---- zero-pad input (padding=1): zero ONLY the halo strips ----
  xpad[0:1, :, :] = jnp.zeros((1, W + 2, Cp), f32)
  xpad[H + 1:H + 2, :, :] = jnp.zeros((1, W + 2, Cp), f32)
  xpad[:, 0:1, :] = jnp.zeros((H + 2, 1, Cp), f32)
  xpad[:, W + 1:W + 2, :] = jnp.zeros((H + 2, 1, Cp), f32)
  xpad[1:H + 1, 1:W + 1, :] = x.astype(f32)

  # ---- conv1: im2col -> single (M, 9*Cp) x (9*Cp, Cop) MXU matmul ----
  for kh in range(3):
    for kw in range(3):
      t = kh * 3 + kw
      if stride == 1:
        patch = xpad[kh:kh + Ho, kw:kw + Wo, :]
      else:
        patch = xpad[pl.ds(kh, Ho, stride), pl.ds(kw, Wo, stride), :]
      col1[:, t * Cp:(t + 1) * Cp] = patch.reshape(M, Cp).astype(bf16)

  acc1 = jnp.dot(col1[...], w1_ref[...], preferred_element_type=f32)
  out1 = jnp.maximum(acc1 * s1_ref[...] + b1_ref[...], 0.0)       # bn1 + relu

  # ---- zero-pad intermediate for conv2 (halo strips only) ----
  opad[0:1, :, :] = jnp.zeros((1, Wo + 2, Cop), f32)
  opad[Ho + 1:Ho + 2, :, :] = jnp.zeros((1, Wo + 2, Cop), f32)
  opad[:, 0:1, :] = jnp.zeros((Ho + 2, 1, Cop), f32)
  opad[:, Wo + 1:Wo + 2, :] = jnp.zeros((Ho + 2, 1, Cop), f32)
  opad[1:Ho + 1, 1:Wo + 1, :] = out1.reshape(Ho, Wo, Cop)

  # ---- conv2: im2col -> single (M, 9*Cop) x (9*Cop, Cop) MXU matmul ----
  for kh in range(3):
    for kw in range(3):
      t = kh * 3 + kw
      patch = opad[kh:kh + Ho, kw:kw + Wo, :]
      col2[:, t * Cop:(t + 1) * Cop] = patch.reshape(M, Cop).astype(bf16)

  acc2 = jnp.dot(col2[...], w2_ref[...], preferred_element_type=f32)
  out2 = acc2 * s2_ref[...] + b2_ref[...]                         # bn2

  # ---- shortcut ----
  if has_proj:
    if stride == 1:
      xs = x
    else:
      xs = x_ref[0, pl.ds(0, Ho, stride), pl.ds(0, Wo, stride), :]
    sc = jnp.dot(xs.reshape(M, Cp), wsc_ref[...], preferred_element_type=f32)
    sc = sc * ssc_ref[...] + bsc_ref[...]
  else:
    # identity shortcut: no matmul at all (trace-time branch)
    sc = x.reshape(M, Cp).astype(f32)

  o_ref[...] = jnp.maximum(out2 + sc, 0.0).reshape(1, Ho, Wo, Cop)


def _fold_bn(gamma, beta, mean, var, eps=1e-5):
  scale = gamma / jnp.sqrt(var + eps)
  bias = beta - mean * scale
  return (scale.reshape(1, -1).astype(jnp.float32),
          bias.reshape(1, -1).astype(jnp.float32))


def make_params(key, in_channels, out_channels, stride):
  ks = jax.random.split(key, 16)

  def rnd(k, shape, scale=0.1):
    return (scale * jax.random.normal(k, shape)).astype(jnp.float32)

  p = {}
  # conv1: PyTorch weight layout (Cout, Cin, 3, 3) -> HWIO
  w1_oihw = rnd(ks[0], (out_channels, in_channels, 3, 3))
  p['w1_hwio'] = jnp.transpose(w1_oihw, (2, 3, 1, 0))
  p['s1'], p['b1'] = _fold_bn(
      1.0 + rnd(ks[1], (out_channels,)), rnd(ks[2], (out_channels,)),
      rnd(ks[3], (out_channels,)),
      0.5 + jax.random.uniform(ks[4], (out_channels,), dtype=jnp.float32))

  w2_oihw = rnd(ks[5], (out_channels, out_channels, 3, 3))
  p['w2_hwio'] = jnp.transpose(w2_oihw, (2, 3, 1, 0))
  p['s2'], p['b2'] = _fold_bn(
      1.0 + rnd(ks[6], (out_channels,)), rnd(ks[7], (out_channels,)),
      rnd(ks[8], (out_channels,)),
      0.5 + jax.random.uniform(ks[9], (out_channels,), dtype=jnp.float32))

  p['has_proj'] = (stride != 1) or (in_channels != out_channels)
  if p['has_proj']:
    wsc_oihw = rnd(ks[10], (out_channels, in_channels, 1, 1))
    p['wsc_hwio'] = jnp.transpose(wsc_oihw, (2, 3, 1, 0))       # (1,1,Cin,Cout)
    p['ssc'], p['bsc'] = _fold_bn(
        1.0 + rnd(ks[11], (out_channels,)), rnd(ks[12], (out_channels,)),
        rnd(ks[13], (out_channels,)),
        0.5 + jax.random.uniform(ks[14], (out_channels,), dtype=jnp.float32))
  return p


def residual_block_pallas(x_nchw, p, stride):
  # NCHW -> NHWC (channel on the lane axis).  In a full model, keep
  # activations NHWC + lane-padded end-to-end so this pass disappears.
  x = jnp.transpose(x_nchw, (0, 2, 3, 1)).astype(jnp.float32)
  N, H, W, Cin = x.shape
  Cout = p['w1_hwio'].shape[-1]
  Ho = (H - 1) // stride + 1
  Wo = (W - 1) // stride + 1
  Cp = _round_up(Cin, 128)          # lane-padded channel widths
  Cop = _round_up(Cout, 128)
  has_proj = bool(p['has_proj'])
  if not has_proj:
    assert stride == 1 and Cin == Cout

  bf16 = jnp.bfloat16

  # lane-pad + bf16 the MXU inputs; BN scale/bias stay f32
  xp = jnp.pad(x, ((0, 0), (0, 0), (0, 0), (0, Cp - Cin))).astype(bf16)

  def pad_w3x3(w_hwio, cip, cop):
    ci, co = w_hwio.shape[2], w_hwio.shape[3]
    w = jnp.pad(w_hwio, ((0, 0), (0, 0), (0, cip - ci), (0, cop - co)))
    return w.reshape(9 * cip, cop).astype(bf16)   # tap-major K = 9*C (im2col)

  def pad_sb(v, cop):
    return jnp.pad(v, ((0, 0), (0, cop - v.shape[1])))

  w1 = pad_w3x3(p['w1_hwio'], Cp, Cop)
  w2 = pad_w3x3(p['w2_hwio'], Cop, Cop)
  s1, b1 = pad_sb(p['s1'], Cop), pad_sb(p['b1'], Cop)
  s2, b2 = pad_sb(p['s2'], Cop), pad_sb(p['b2'], Cop)

  args = [xp, w1, s1, b1, w2, s2, b2]
  full2d = lambda n: (0, 0)
  in_specs = [
      pl.BlockSpec((1, H, W, Cp), lambda n: (n, 0, 0, 0)),
      pl.BlockSpec((9 * Cp, Cop), full2d),
      pl.BlockSpec((1, Cop), full2d),
      pl.BlockSpec((1, Cop), full2d),
      pl.BlockSpec((9 * Cop, Cop), full2d),
      pl.BlockSpec((1, Cop), full2d),
      pl.BlockSpec((1, Cop), full2d),
  ]
  if has_proj:
    wsc = jnp.pad(p['wsc_hwio'].reshape(Cin, Cout),
                  ((0, Cp - Cin), (0, Cop - Cout))).astype(bf16)
    ssc, bsc = pad_sb(p['ssc'], Cop), pad_sb(p['bsc'], Cop)
    args += [wsc, ssc, bsc]
    in_specs += [pl.BlockSpec((Cp, Cop), full2d),
                 pl.BlockSpec((1, Cop), full2d),
                 pl.BlockSpec((1, Cop), full2d)]

  kernel = functools.partial(
      _resblock_kernel, H=H, W=W, Cp=Cp, Cop=Cop,
      stride=stride, Ho=Ho, Wo=Wo, has_proj=has_proj)

  out_padded = pl.pallas_call(
      kernel,
      out_shape=jax.ShapeDtypeStruct((N, Ho, Wo, Cop), jnp.float32),
      grid=(N,),
      in_specs=in_specs,
      out_specs=pl.BlockSpec((1, Ho, Wo, Cop), lambda n: (n, 0, 0, 0)),
      scratch_shapes=[
          pltpu.VMEM((H + 2, W + 2, Cp), jnp.float32),     # padded x
          pltpu.VMEM((Ho + 2, Wo + 2, Cop), jnp.float32),  # padded conv1 out
          pltpu.VMEM((Ho * Wo, 9 * Cp), bf16),             # im2col for conv1
          pltpu.VMEM((Ho * Wo, 9 * Cop), bf16),            # im2col for conv2
      ],
      compiler_params=pltpu.CompilerParams(
          dimension_semantics=("parallel",),
          vmem_limit_bytes=64 * 1024 * 1024),
  )(*args)

  out = out_padded[..., :Cout]                    # drop lane padding
  return jnp.transpose(out, (0, 3, 1, 2))         # back to NCHW


def residual_block_ref(x_nchw, p, stride):
  """Pure-JAX reference mirroring the kernel numerics (bf16 MXU inputs,
  f32 accumulation, eval-mode folded BN)."""
  bf16 = jnp.bfloat16
  x = jnp.transpose(x_nchw, (0, 2, 3, 1)).astype(bf16)

  def conv(v, w, s, pad):
    return jax.lax.conv_general_dilated(
        v.astype(bf16), w.astype(bf16), (s, s), ((pad, pad), (pad, pad)),
        dimension_numbers=('NHWC', 'HWIO', 'NHWC'),
        preferred_element_type=jnp.float32)

  out = jnp.maximum(conv(x, p['w1_hwio'], stride, 1) * p['s1'] + p['b1'], 0.0)
  out = conv(out, p['w2_hwio'], 1, 1) * p['s2'] + p['b2']
  if p['has_proj']:
    sc = conv(x, p['wsc_hwio'], stride, 0) * p['ssc'] + p['bsc']
  else:
    sc = x.astype(jnp.float32)
  out = jnp.maximum(out + sc, 0.0)
  return jnp.transpose(out, (0, 3, 1, 2))


if __name__ == "__main__":
  key = jax.random.PRNGKey(0)
  kx, kp = jax.random.split(key, 2)

  configs = [
      dict(in_channels=4, out_channels=8, stride=1),   # projection shortcut
      dict(in_channels=4, out_channels=4, stride=1),   # identity shortcut
  ]

  ok = True
  for idx, cfg in enumerate(configs):
    x = jax.random.normal(jax.random.fold_in(kx, idx),
                          (2, cfg['in_channels'], 16, 16), dtype=jnp.float32)
    p = make_params(jax.random.fold_in(kp, idx),
                    cfg['in_channels'], cfg['out_channels'], cfg['stride'])

    out = jax.block_until_ready(residual_block_pallas(x, p, cfg['stride']))
    ref = jax.block_until_ready(residual_block_ref(x, p, cfg['stride']))

    if not np.allclose(np.asarray(out), np.asarray(ref),
                       rtol=1e-3, atol=1e-3):
      ok = False
      print(f"config {cfg}: max abs err = "
            f"{np.max(np.abs(np.asarray(out) - np.asarray(ref)))}")

  if ok:
    print("KERNEL_OK")
</pallas_src>

<mosaic_0001>
module attributes {stable_mosaic.version = 11 : i64} {
  func.func @_resblock_kernel(%arg0: i32, %arg1: memref<1x16x16x128xbf16, #tpu.memory_space<vmem>>, %arg2: memref<1152x128xbf16, #tpu.memory_space<vmem>>, %arg3: memref<1x128xf32, #tpu.memory_space<vmem>>, %arg4: memref<1x128xf32, #tpu.memory_space<vmem>>, %arg5: memref<1152x128xbf16, #tpu.memory_space<vmem>>, %arg6: memref<1x128xf32, #tpu.memory_space<vmem>>, %arg7: memref<1x128xf32, #tpu.memory_space<vmem>>, %arg8: memref<128x128xbf16, #tpu.memory_space<vmem>>, %arg9: memref<1x128xf32, #tpu.memory_space<vmem>>, %arg10: memref<1x128xf32, #tpu.memory_space<vmem>>, %arg11: memref<1x16x16x128xf32, #tpu.memory_space<vmem>>, %arg12: memref<18x18x128xf32, #tpu.memory_space<vmem>>, %arg13: memref<18x18x128xf32, #tpu.memory_space<vmem>>, %arg14: memref<256x1152xbf16, #tpu.memory_space<vmem>>, %arg15: memref<256x1152xbf16, #tpu.memory_space<vmem>>) attributes {dimension_semantics = [#tpu.dimension_semantics<parallel>], iteration_bounds = array<i64: 2>, scalar_prefetch = 0 : i64, scratch_operands = 4 : i64, tpu.core_type = #tpu.core_type<tc>, window_params = [{transform_indices = @transform_0, window_bounds = array<i64: 1, 16, 16, 128>}, {pipeline_mode = #tpu.pipeline_mode<synchronous>, transform_indices = @transform_1, window_bounds = array<i64: 1152, 128>}, {pipeline_mode = #tpu.pipeline_mode<synchronous>, transform_indices = @transform_2, window_bounds = array<i64: 1, 128>}, {pipeline_mode = #tpu.pipeline_mode<synchronous>, transform_indices = @transform_3, window_bounds = array<i64: 1, 128>}, {pipeline_mode = #tpu.pipeline_mode<synchronous>, transform_indices = @transform_4, window_bounds = array<i64: 1152, 128>}, {pipeline_mode = #tpu.pipeline_mode<synchronous>, transform_indices = @transform_5, window_bounds = array<i64: 1, 128>}, {pipeline_mode = #tpu.pipeline_mode<synchronous>, transform_indices = @transform_6, window_bounds = array<i64: 1, 128>}, {pipeline_mode = #tpu.pipeline_mode<synchronous>, transform_indices = @transform_7, window_bounds = array<i64: 128, 128>}, {pipeline_mode = #tpu.pipeline_mode<synchronous>, transform_indices = @transform_8, window_bounds = array<i64: 1, 128>}, {pipeline_mode = #tpu.pipeline_mode<synchronous>, transform_indices = @transform_9, window_bounds = array<i64: 1, 128>}, {transform_indices = @transform_10, window_bounds = array<i64: 1, 16, 16, 128>}]} {
    %c0 = arith.constant 0 : index
    %c0_0 = arith.constant 0 : index
    %c0_1 = arith.constant 0 : index
    %c0_2 = arith.constant 0 : index
    %0 = vector.load %arg1[%c0, %c0_0, %c0_1, %c0_2] : memref<1x16x16x128xbf16, #tpu.memory_space<vmem>>, vector<1x16x16x128xbf16>
    %1 = vector.shape_cast %0 : vector<1x16x16x128xbf16> to vector<16x16x128xbf16>
    %cst = arith.constant 0.000000e+00 : f32
    %2 = vector.broadcast %cst : f32 to vector<1x18x128xf32>
    %c0_3 = arith.constant 0 : index
    %c0_4 = arith.constant 0 : index
    %c0_5 = arith.constant 0 : index
    %3 = vector.load %arg12[%c0_3, %c0_4, %c0_5] : memref<18x18x128xf32, #tpu.memory_space<vmem>>, vector<1x18x128xf32>
    tpu.vector_store %arg12[%c0_3, %c0_4, %c0_5], %2 {strides = array<i32>} : memref<18x18x128xf32, #tpu.memory_space<vmem>>, vector<1x18x128xf32>,
    %cst_6 = arith.constant 0.000000e+00 : f32
    %4 = vector.broadcast %cst_6 : f32 to vector<1x18x128xf32>
    %c17 = arith.constant 17 : index
    %c0_7 = arith.constant 0 : index
    %c0_8 = arith.constant 0 : index
    %5 = vector.load %arg12[%c17, %c0_7, %c0_8] : memref<18x18x128xf32, #tpu.memory_space<vmem>>, vector<1x18x128xf32>
    tpu.vector_store %arg12[%c17, %c0_7, %c0_8], %4 {strides = array<i32>} : memref<18x18x128xf32, #tpu.memory_space<vmem>>, vector<1x18x128xf32>,
    %cst_9 = arith.constant 0.000000e+00 : f32
    %6 = vector.broadcast %cst_9 : f32 to vector<18x1x128xf32>
    %c0_10 = arith.constant 0 : index
    %c0_11 = arith.constant 0 : index
    %c0_12 = arith.constant 0 : index
    %7 = vector.load %arg12[%c0_10, %c0_11, %c0_12] : memref<18x18x128xf32, #tpu.memory_space<vmem>>, vector<18x1x128xf32>
    tpu.vector_store %arg12[%c0_10, %c0_11, %c0_12], %6 {strides = array<i32>} : memref<18x18x128xf32, #tpu.memory_space<vmem>>, vector<18x1x128xf32>,
    %cst_13 = arith.constant 0.000000e+00 : f32
    %8 = vector.broadcast %cst_13 : f32 to vector<18x1x128xf32>
    %c0_14 = arith.constant 0 : index
    %c17_15 = arith.constant 17 : index
    %c0_16 = arith.constant 0 : index
    %9 = vector.load %arg12[%c0_14, %c17_15, %c0_16] : memref<18x18x128xf32, #tpu.memory_space<vmem>>, vector<18x1x128xf32>
    tpu.vector_store %arg12[%c0_14, %c17_15, %c0_16], %8 {strides = array<i32>} : memref<18x18x128xf32, #tpu.memory_space<vmem>>, vector<18x1x128xf32>,
    %10 = arith.extf %1 : vector<16x16x128xbf16> to vector<16x16x128xf32>
    %c1 = arith.constant 1 : index
    %c1_17 = arith.constant 1 : index
    %c0_18 = arith.constant 0 : index
    %11 = vector.load %arg12[%c1, %c1_17, %c0_18] : memref<18x18x128xf32, #tpu.memory_space<vmem>>, vector<16x16x128xf32>
    tpu.vector_store %arg12[%c1, %c1_17, %c0_18], %10 {strides = array<i32>} : memref<18x18x128xf32, #tpu.memory_space<vmem>>, vector<16x16x128xf32>,
    %c0_19 = arith.constant 0 : index
    %c0_20 = arith.constant 0 : index
    %c0_21 = arith.constant 0 : index
    %12 = vector.load %arg12[%c0_19, %c0_20, %c0_21] : memref<18x18x128xf32, #tpu.memory_space<vmem>>, vector<16x16x128xf32>
    %13 = vector.shape_cast %12 : vector<16x16x128xf32> to vector<256x128xf32>
    %14 = arith.truncf %13 : vector<256x128xf32> to vector<256x128xbf16>
    %c0_22 = arith.constant 0 : index
    %c0_23 = arith.constant 0 : index
    %15 = vector.load %arg14[%c0_22, %c0_23] : memref<256x1152xbf16, #tpu.memory_space<vmem>>, vector<256x128xbf16>
    tpu.vector_store %arg14[%c0_22, %c0_23], %14 {strides = array<i32>} : memref<256x1152xbf16, #tpu.memory_space<vmem>>, vector<256x128xbf16>,
    %c0_24 = arith.constant 0 : index
    %c1_25 = arith.constant 1 : index
    %c0_26 = arith.constant 0 : index
    %16 = vector.load %arg12[%c0_24, %c1_25, %c0_26] : memref<18x18x128xf32, #tpu.memory_space<vmem>>, vector<16x16x128xf32>
    %17 = vector.shape_cast %16 : vector<16x16x128xf32> to vector<256x128xf32>
    %18 = arith.truncf %17 : vector<256x128xf32> to vector<256x128xbf16>
    %c0_27 = arith.constant 0 : index
    %c128 = arith.constant 128 : index
    %19 = vector.load %arg14[%c0_27, %c128] : memref<256x1152xbf16, #tpu.memory_space<vmem>>, vector<256x128xbf16>
    tpu.vector_store %arg14[%c0_27, %c128], %18 {strides = array<i32>} : memref<256x1152xbf16, #tpu.memory_space<vmem>>, vector<256x128xbf16>,
    %c0_28 = arith.constant 0 : index
    %c2 = arith.constant 2 : index
    %c0_29 = arith.constant 0 : index
    %20 = vector.load %arg12[%c0_28, %c2, %c0_29] : memref<18x18x128xf32, #tpu.memory_space<vmem>>, vector<16x16x128xf32>
    %21 = vector.shape_cast %20 : vector<16x16x128xf32> to vector<256x128xf32>
    %22 = arith.truncf %21 : vector<256x128xf32> to vector<256x128xbf16>
    %c0_30 = arith.constant 0 : index
    %c256 = arith.constant 256 : index
    %23 = vector.load %arg14[%c0_30, %c256] : memref<256x1152xbf16, #tpu.memory_space<vmem>>, vector<256x128xbf16>
    tpu.vector_store %arg14[%c0_30, %c256], %22 {strides = array<i32>} : memref<256x1152xbf16, #tpu.memory_space<vmem>>, vector<256x128xbf16>,
    %c1_31 = arith.constant 1 : index
    %c0_32 = arith.constant 0 : index
    %c0_33 = arith.constant 0 : index
    %24 = vector.load %arg12[%c1_31, %c0_32, %c0_33] : memref<18x18x128xf32, #tpu.memory_space<vmem>>, vector<16x16x128xf32>
    %25 = vector.shape_cast %24 : vector<16x16x128xf32> to vector<256x128xf32>
    %26 = arith.truncf %25 : vector<256x128xf32> to vector<256x128xbf16>
    %c0_34 = arith.constant 0 : index
    %c384 = arith.constant 384 : index
    %27 = vector.load %arg14[%c0_34, %c384] : memref<256x1152xbf16, #tpu.memory_space<vmem>>, vector<256x128xbf16>
    tpu.vector_store %arg14[%c0_34, %c384], %26 {strides = array<i32>} : memref<256x1152xbf16, #tpu.memory_space<vmem>>, vector<256x128xbf16>,
    %c1_35 = arith.constant 1 : index
    %c1_36 = arith.constant 1 : index
    %c0_37 = arith.constant 0 : index
    %28 = vector.load %arg12[%c1_35, %c1_36, %c0_37] : memref<18x18x128xf32, #tpu.memory_space<vmem>>, vector<16x16x128xf32>
    %29 = vector.shape_cast %28 : vector<16x16x128xf32> to vector<256x128xf32>
    %30 = arith.truncf %29 : vector<256x128xf32> to vector<256x128xbf16>
    %c0_38 = arith.constant 0 : index
    %c512 = arith.constant 512 : index
    %31 = vector.load %arg14[%c0_38, %c512] : memref<256x1152xbf16, #tpu.memory_space<vmem>>, vector<256x128xbf16>
    tpu.vector_store %arg14[%c0_38, %c512], %30 {strides = array<i32>} : memref<256x1152xbf16, #tpu.memory_space<vmem>>, vector<256x128xbf16>,
    %c1_39 = arith.constant 1 : index
    %c2_40 = arith.constant 2 : index
    %c0_41 = arith.constant 0 : index
    %32 = vector.load %arg12[%c1_39, %c2_40, %c0_41] : memref<18x18x128xf32, #tpu.memory_space<vmem>>, vector<16x16x128xf32>
    %33 = vector.shape_cast %32 : vector<16x16x128xf32> to vector<256x128xf32>
    %34 = arith.truncf %33 : vector<256x128xf32> to vector<256x128xbf16>
    %c0_42 = arith.constant 0 : index
    %c640 = arith.constant 640 : index
    %35 = vector.load %arg14[%c0_42, %c640] : memref<256x1152xbf16, #tpu.memory_space<vmem>>, vector<256x128xbf16>
    tpu.vector_store %arg14[%c0_42, %c640], %34 {strides = array<i32>} : memref<256x1152xbf16, #tpu.memory_space<vmem>>, vector<256x128xbf16>,
    %c2_43 = arith.constant 2 : index
    %c0_44 = arith.constant 0 : index
    %c0_45 = arith.constant 0 : index
    %36 = vector.load %arg12[%c2_43, %c0_44, %c0_45] : memref<18x18x128xf32, #tpu.memory_space<vmem>>, vector<16x16x128xf32>
    %37 = vector.shape_cast %36 : vector<16x16x128xf32> to vector<256x128xf32>
    %38 = arith.truncf %37 : vector<256x128xf32> to vector<256x128xbf16>
    %c0_46 = arith.constant 0 : index
    %c768 = arith.constant 768 : index
    %39 = vector.load %arg14[%c0_46, %c768] : memref<256x1152xbf16, #tpu.memory_space<vmem>>, vector<256x128xbf16>
    tpu.vector_store %arg14[%c0_46, %c768], %38 {strides = array<i32>} : memref<256x1152xbf16, #tpu.memory_space<vmem>>, vector<256x128xbf16>,
    %c2_47 = arith.constant 2 : index
    %c1_48 = arith.constant 1 : index
    %c0_49 = arith.constant 0 : index
    %40 = vector.load %arg12[%c2_47, %c1_48, %c0_49] : memref<18x18x128xf32, #tpu.memory_space<vmem>>, vector<16x16x128xf32>
    %41 = vector.shape_cast %40 : vector<16x16x128xf32> to vector<256x128xf32>
    %42 = arith.truncf %41 : vector<256x128xf32> to vector<256x128xbf16>
    %c0_50 = arith.constant 0 : index
    %c896 = arith.constant 896 : index
    %43 = vector.load %arg14[%c0_50, %c896] : memref<256x1152xbf16, #tpu.memory_space<vmem>>, vector<256x128xbf16>
    tpu.vector_store %arg14[%c0_50, %c896], %42 {strides = array<i32>} : memref<256x1152xbf16, #tpu.memory_space<vmem>>, vector<256x128xbf16>,
    %c2_51 = arith.constant 2 : index
    %c2_52 = arith.constant 2 : index
    %c0_53 = arith.constant 0 : index
    %44 = vector.load %arg12[%c2_51, %c2_52, %c0_53] : memref<18x18x128xf32, #tpu.memory_space<vmem>>, vector<16x16x128xf32>
    %45 = vector.shape_cast %44 : vector<16x16x128xf32> to vector<256x128xf32>
    %46 = arith.truncf %45 : vector<256x128xf32> to vector<256x128xbf16>
    %c0_54 = arith.constant 0 : index
    %c1024 = arith.constant 1024 : index
    %47 = vector.load %arg14[%c0_54, %c1024] : memref<256x1152xbf16, #tpu.memory_space<vmem>>, vector<256x128xbf16>
    tpu.vector_store %arg14[%c0_54, %c1024], %46 {strides = array<i32>} : memref<256x1152xbf16, #tpu.memory_space<vmem>>, vector<256x128xbf16>,
    %c0_55 = arith.constant 0 : index
    %c0_56 = arith.constant 0 : index
    %48 = vector.load %arg14[%c0_55, %c0_56] : memref<256x1152xbf16, #tpu.memory_space<vmem>>, vector<256x1152xbf16>
    %c0_57 = arith.constant 0 : index
    %c0_58 = arith.constant 0 : index
    %49 = vector.load %arg2[%c0_57, %c0_58] : memref<1152x128xbf16, #tpu.memory_space<vmem>>, vector<1152x128xbf16>
    %cst_59 = arith.constant dense<0.000000e+00> : vector<256x128xf32>
    %50 = tpu.matmul %48, %49, %cst_59 {dimension_numbers = #tpu.dot_dimension_numbers<[1], [0], [0], [1], [0, 0, 1, 1], [], []>} : vector<256x1152xbf16>, vector<1152x128xbf16>, vector<256x128xf32> -> vector<256x128xf32>
    %c0_60 = arith.constant 0 : index
    %c0_61 = arith.constant 0 : index
    %51 = vector.load %arg3[%c0_60, %c0_61] : memref<1x128xf32, #tpu.memory_space<vmem>>, vector<1x128xf32>
    %52 = vector.broadcast %51 : vector<1x128xf32> to vector<256x128xf32>
    %53 = arith.mulf %50, %52 : vector<256x128xf32>
    %c0_62 = arith.constant 0 : index
    %c0_63 = arith.constant 0 : index
    %54 = vector.load %arg4[%c0_62, %c0_63] : memref<1x128xf32, #tpu.memory_space<vmem>>, vector<1x128xf32>
    %55 = vector.broadcast %54 : vector<1x128xf32> to vector<256x128xf32>
    %56 = arith.addf %53, %55 : vector<256x128xf32>
    %cst_64 = arith.constant 0.000000e+00 : f32
    %57 = vector.broadcast %cst_64 : f32 to vector<256x128xf32>
    %58 = arith.maximumf %56, %57 : vector<256x128xf32>
    %cst_65 = arith.constant 0.000000e+00 : f32
    %59 = vector.broadcast %cst_65 : f32 to vector<1x18x128xf32>
    %c0_66 = arith.constant 0 : index
    %c0_67 = arith.constant 0 : index
    %c0_68 = arith.constant 0 : index
    %60 = vector.load %arg13[%c0_66, %c0_67, %c0_68] : memref<18x18x128xf32, #tpu.memory_space<vmem>>, vector<1x18x128xf32>
    tpu.vector_store %arg13[%c0_66, %c0_67, %c0_68], %59 {strides = array<i32>} : memref<18x18x128xf32, #tpu.memory_space<vmem>>, vector<1x18x128xf32>,
    %cst_69 = arith.constant 0.000000e+00 : f32
    %61 = vector.broadcast %cst_69 : f32 to vector<1x18x128xf32>
    %c17_70 = arith.constant 17 : index
    %c0_71 = arith.constant 0 : index
    %c0_72 = arith.constant 0 : index
    %62 = vector.load %arg13[%c17_70, %c0_71, %c0_72] : memref<18x18x128xf32, #tpu.memory_space<vmem>>, vector<1x18x128xf32>
    tpu.vector_store %arg13[%c17_70, %c0_71, %c0_72], %61 {strides = array<i32>} : memref<18x18x128xf32, #tpu.memory_space<vmem>>, vector<1x18x128xf32>,
    %cst_73 = arith.constant 0.000000e+00 : f32
    %63 = vector.broadcast %cst_73 : f32 to vector<18x1x128xf32>
    %c0_74 = arith.constant 0 : index
    %c0_75 = arith.constant 0 : index
    %c0_76 = arith.constant 0 : index
    %64 = vector.load %arg13[%c0_74, %c0_75, %c0_76] : memref<18x18x128xf32, #tpu.memory_space<vmem>>, vector<18x1x128xf32>
    tpu.vector_store %arg13[%c0_74, %c0_75, %c0_76], %63 {strides = array<i32>} : memref<18x18x128xf32, #tpu.memory_space<vmem>>, vector<18x1x128xf32>,
    %cst_77 = arith.constant 0.000000e+00 : f32
    %65 = vector.broadcast %cst_77 : f32 to vector<18x1x128xf32>
    %c0_78 = arith.constant 0 : index
    %c17_79 = arith.constant 17 : index
    %c0_80 = arith.constant 0 : index
    %66 = vector.load %arg13[%c0_78, %c17_79, %c0_80] : memref<18x18x128xf32, #tpu.memory_space<vmem>>, vector<18x1x128xf32>
    tpu.vector_store %arg13[%c0_78, %c17_79, %c0_80], %65 {strides = array<i32>} : memref<18x18x128xf32, #tpu.memory_space<vmem>>, vector<18x1x128xf32>,
    %67 = vector.shape_cast %58 : vector<256x128xf32> to vector<16x16x128xf32>
    %c1_81 = arith.constant 1 : index
    %c1_82 = arith.constant 1 : index
    %c0_83 = arith.constant 0 : index
    %68 = vector.load %arg13[%c1_81, %c1_82, %c0_83] : memref<18x18x128xf32, #tpu.memory_space<vmem>>, vector<16x16x128xf32>
    tpu.vector_store %arg13[%c1_81, %c1_82, %c0_83], %67 {strides = array<i32>} : memref<18x18x128xf32, #tpu.memory_space<vmem>>, vector<16x16x128xf32>,
    %c0_84 = arith.constant 0 : index
    %c0_85 = arith.constant 0 : index
    %c0_86 = arith.constant 0 : index
    %69 = vector.load %arg13[%c0_84, %c0_85, %c0_86] : memref<18x18x128xf32, #tpu.memory_space<vmem>>, vector<16x16x128xf32>
    %70 = vector.shape_cast %69 : vector<16x16x128xf32> to vector<256x128xf32>
    %71 = arith.truncf %70 : vector<256x128xf32> to vector<256x128xbf16>
    %c0_87 = arith.constant 0 : index
    %c0_88 = arith.constant 0 : index
    %72 = vector.load %arg15[%c0_87, %c0_88] : memref<256x1152xbf16, #tpu.memory_space<vmem>>, vector<256x128xbf16>
    tpu.vector_store %arg15[%c0_87, %c0_88], %71 {strides = array<i32>} : memref<256x1152xbf16, #tpu.memory_space<vmem>>, vector<256x128xbf16>,
    %c0_89 = arith.constant 0 : index
    %c1_90 = arith.constant 1 : index
    %c0_91 = arith.constant 0 : index
    %73 = vector.load %arg13[%c0_89, %c1_90, %c0_91] : memref<18x18x128xf32, #tpu.memory_space<vmem>>, vector<16x16x128xf32>
    %74 = vector.shape_cast %73 : vector<16x16x128xf32> to vector<256x128xf32>
    %75 = arith.truncf %74 : vector<256x128xf32> to vector<256x128xbf16>
    %c0_92 = arith.constant 0 : index
    %c128_93 = arith.constant 128 : index
    %76 = vector.load %arg15[%c0_92, %c128_93] : memref<256x1152xbf16, #tpu.memory_space<vmem>>, vector<256x128xbf16>
    tpu.vector_store %arg15[%c0_92, %c128_93], %75 {strides = array<i32>} : memref<256x1152xbf16, #tpu.memory_space<vmem>>, vector<256x128xbf16>,
    %c0_94 = arith.constant 0 : index
    %c2_95 = arith.constant 2 : index
    %c0_96 = arith.constant 0 : index
    %77 = vector.load %arg13[%c0_94, %c2_95, %c0_96] : memref<18x18x128xf32, #tpu.memory_space<vmem>>, vector<16x16x128xf32>
    %78 = vector.shape_cast %77 : vector<16x16x128xf32> to vector<256x128xf32>
    %79 = arith.truncf %78 : vector<256x128xf32> to vector<256x128xbf16>
    %c0_97 = arith.constant 0 : index
    %c256_98 = arith.constant 256 : index
    %80 = vector.load %arg15[%c0_97, %c256_98] : memref<256x1152xbf16, #tpu.memory_space<vmem>>, vector<256x128xbf16>
    tpu.vector_store %arg15[%c0_97, %c256_98], %79 {strides = array<i32>} : memref<256x1152xbf16, #tpu.memory_space<vmem>>, vector<256x128xbf16>,
    %c1_99 = arith.constant 1 : index
    %c0_100 = arith.constant 0 : index
    %c0_101 = arith.constant 0 : index
    %81 = vector.load %arg13[%c1_99, %c0_100, %c0_101] : memref<18x18x128xf32, #tpu.memory_space<vmem>>, vector<16x16x128xf32>
    %82 = vector.shape_cast %81 : vector<16x16x128xf32> to vector<256x128xf32>
    %83 = arith.truncf %82 : vector<256x128xf32> to vector<256x128xbf16>
    %c0_102 = arith.constant 0 : index
    %c384_103 = arith.constant 384 : index
    %84 = vector.load %arg15[%c0_102, %c384_103] : memref<256x1152xbf16, #tpu.memory_space<vmem>>, vector<256x128xbf16>
    tpu.vector_store %arg15[%c0_102, %c384_103], %83 {strides = array<i32>} : memref<256x1152xbf16, #tpu.memory_space<vmem>>, vector<256x128xbf16>,
    %c1_104 = arith.constant 1 : index
    %c1_105 = arith.constant 1 : index
    %c0_106 = arith.constant 0 : index
    %85 = vector.load %arg13[%c1_104, %c1_105, %c0_106] : memref<18x18x128xf32, #tpu.memory_space<vmem>>, vector<16x16x128xf32>
    %86 = vector.shape_cast %85 : vector<16x16x128xf32> to vector<256x128xf32>
    %87 = arith.truncf %86 : vector<256x128xf32> to vector<256x128xbf16>
    %c0_107 = arith.constant 0 : index
    %c512_108 = arith.constant 512 : index
    %88 = vector.load %arg15[%c0_107, %c512_108] : memref<256x1152xbf16, #tpu.memory_space<vmem>>, vector<256x128xbf16>
    tpu.vector_store %arg15[%c0_107, %c512_108], %87 {strides = array<i32>} : memref<256x1152xbf16, #tpu.memory_space<vmem>>, vector<256x128xbf16>,
    %c1_109 = arith.constant 1 : index
    %c2_110 = arith.constant 2 : index
    %c0_111 = arith.constant 0 : index
    %89 = vector.load %arg13[%c1_109, %c2_110, %c0_111] : memref<18x18x128xf32, #tpu.memory_space<vmem>>, vector<16x16x128xf32>
    %90 = vector.shape_cast %89 : vector<16x16x128xf32> to vector<256x128xf32>
    %91 = arith.truncf %90 : vector<256x128xf32> to vector<256x128xbf16>
    %c0_112 = arith.constant 0 : index
    %c640_113 = arith.constant 640 : index
    %92 = vector.load %arg15[%c0_112, %c640_113] : memref<256x1152xbf16, #tpu.memory_space<vmem>>, vector<256x128xbf16>
    tpu.vector_store %arg15[%c0_112, %c640_113], %91 {strides = array<i32>} : memref<256x1152xbf16, #tpu.memory_space<vmem>>, vector<256x128xbf16>,
    %c2_114 = arith.constant 2 : index
    %c0_115 = arith.constant 0 : index
    %c0_116 = arith.constant 0 : index
    %93 = vector.load %arg13[%c2_114, %c0_115, %c0_116] : memref<18x18x128xf32, #tpu.memory_space<vmem>>, vector<16x16x128xf32>
    %94 = vector.shape_cast %93 : vector<16x16x128xf32> to vector<256x128xf32>
    %95 = arith.truncf %94 : vector<256x128xf32> to vector<256x128xbf16>
    %c0_117 = arith.constant 0 : index
    %c768_118 = arith.constant 768 : index
    %96 = vector.load %arg15[%c0_117, %c768_118] : memref<256x1152xbf16, #tpu.memory_space<vmem>>, vector<256x128xbf16>
    tpu.vector_store %arg15[%c0_117, %c768_118], %95 {strides = array<i32>} : memref<256x1152xbf16, #tpu.memory_space<vmem>>, vector<256x128xbf16>,
    %c2_119 = arith.constant 2 : index
    %c1_120 = arith.constant 1 : index
    %c0_121 = arith.constant 0 : index
    %97 = vector.load %arg13[%c2_119, %c1_120, %c0_121] : memref<18x18x128xf32, #tpu.memory_space<vmem>>, vector<16x16x128xf32>
    %98 = vector.shape_cast %97 : vector<16x16x128xf32> to vector<256x128xf32>
    %99 = arith.truncf %98 : vector<256x128xf32> to vector<256x128xbf16>
    %c0_122 = arith.constant 0 : index
    %c896_123 = arith.constant 896 : index
    %100 = vector.load %arg15[%c0_122, %c896_123] : memref<256x1152xbf16, #tpu.memory_space<vmem>>, vector<256x128xbf16>
    tpu.vector_store %arg15[%c0_122, %c896_123], %99 {strides = array<i32>} : memref<256x1152xbf16, #tpu.memory_space<vmem>>, vector<256x128xbf16>,
    %c2_124 = arith.constant 2 : index
    %c2_125 = arith.constant 2 : index
    %c0_126 = arith.constant 0 : index
    %101 = vector.load %arg13[%c2_124, %c2_125, %c0_126] : memref<18x18x128xf32, #tpu.memory_space<vmem>>, vector<16x16x128xf32>
    %102 = vector.shape_cast %101 : vector<16x16x128xf32> to vector<256x128xf32>
    %103 = arith.truncf %102 : vector<256x128xf32> to vector<256x128xbf16>
    %c0_127 = arith.constant 0 : index
    %c1024_128 = arith.constant 1024 : index
    %104 = vector.load %arg15[%c0_127, %c1024_128] : memref<256x1152xbf16, #tpu.memory_space<vmem>>, vector<256x128xbf16>
    tpu.vector_store %arg15[%c0_127, %c1024_128], %103 {strides = array<i32>} : memref<256x1152xbf16, #tpu.memory_space<vmem>>, vector<256x128xbf16>,
    %c0_129 = arith.constant 0 : index
    %c0_130 = arith.constant 0 : index
    %105 = vector.load %arg15[%c0_129, %c0_130] : memref<256x1152xbf16, #tpu.memory_space<vmem>>, vector<256x1152xbf16>
    %c0_131 = arith.constant 0 : index
    %c0_132 = arith.constant 0 : index
    %106 = vector.load %arg5[%c0_131, %c0_132] : memref<1152x128xbf16, #tpu.memory_space<vmem>>, vector<1152x128xbf16>
    %cst_133 = arith.constant dense<0.000000e+00> : vector<256x128xf32>
    %107 = tpu.matmul %105, %106, %cst_133 {dimension_numbers = #tpu.dot_dimension_numbers<[1], [0], [0], [1], [0, 0, 1, 1], [], []>} : vector<256x1152xbf16>, vector<1152x128xbf16>, vector<256x128xf32> -> vector<256x128xf32>
    %c0_134 = arith.constant 0 : index
    %c0_135 = arith.constant 0 : index
    %108 = vector.load %arg6[%c0_134, %c0_135] : memref<1x128xf32, #tpu.memory_space<vmem>>, vector<1x128xf32>
    %109 = vector.broadcast %108 : vector<1x128xf32> to vector<256x128xf32>
    %110 = arith.mulf %107, %109 : vector<256x128xf32>
    %c0_136 = arith.constant 0 : index
    %c0_137 = arith.constant 0 : index
    %111 = vector.load %arg7[%c0_136, %c0_137] : memref<1x128xf32, #tpu.memory_space<vmem>>, vector<1x128xf32>
    %112 = vector.broadcast %111 : vector<1x128xf32> to vector<256x128xf32>
    %113 = arith.addf %110, %112 : vector<256x128xf32>
    %114 = vector.shape_cast %1 : vector<16x16x128xbf16> to vector<256x128xbf16>
    %c0_138 = arith.constant 0 : index
    %c0_139 = arith.constant 0 : index
    %115 = vector.load %arg8[%c0_138, %c0_139] : memref<128x128xbf16, #tpu.memory_space<vmem>>, vector<128x128xbf16>
    %cst_140 = arith.constant dense<0.000000e+00> : vector<256x128xf32>
    %116 = tpu.matmul %114, %115, %cst_140 {dimension_numbers = #tpu.dot_dimension_numbers<[1], [0], [0], [1], [0, 0, 1, 1], [], []>} : vector<256x128xbf16>, vector<128x128xbf16>, vector<256x128xf32> -> vector<256x128xf32>
    %c0_141 = arith.constant 0 : index
    %c0_142 = arith.constant 0 : index
    %117 = vector.load %arg9[%c0_141, %c0_142] : memref<1x128xf32, #tpu.memory_space<vmem>>, vector<1x128xf32>
    %118 = vector.broadcast %117 : vector<1x128xf32> to vector<256x128xf32>
    %119 = arith.mulf %116, %118 : vector<256x128xf32>
    %c0_143 = arith.constant 0 : index
    %c0_144 = arith.constant 0 : index
    %120 = vector.load %arg10[%c0_143, %c0_144] : memref<1x128xf32, #tpu.memory_space<vmem>>, vector<1x128xf32>
    %121 = vector.broadcast %120 : vector<1x128xf32> to vector<256x128xf32>
    %122 = arith.addf %119, %121 : vector<256x128xf32>
    %123 = arith.addf %113, %122 : vector<256x128xf32>
    %cst_145 = arith.constant 0.000000e+00 : f32
    %124 = vector.broadcast %cst_145 : f32 to vector<256x128xf32>
    %125 = arith.maximumf %123, %124 : vector<256x128xf32>
    %126 = vector.shape_cast %125 : vector<256x128xf32> to vector<1x16x16x128xf32>
    %c0_146 = arith.constant 0 : index
    %c0_147 = arith.constant 0 : index
    %c0_148 = arith.constant 0 : index
    %c0_149 = arith.constant 0 : index
    %127 = vector.load %arg11[%c0_146, %c0_147, %c0_148, %c0_149] : memref<1x16x16x128xf32, #tpu.memory_space<vmem>>, vector<1x16x16x128xf32>
    tpu.vector_store %arg11[%c0_146, %c0_147, %c0_148, %c0_149], %126 {strides = array<i32>} : memref<1x16x16x128xf32, #tpu.memory_space<vmem>>, vector<1x16x16x128xf32>,
    return
  }
  func.func @transform_0(%arg0: i32) -> (i32, i32, i32, i32) {
    %c0_i32 = arith.constant 0 : i32
    %c0_i32_0 = arith.constant 0 : i32
    %c0_i32_1 = arith.constant 0 : i32
    %c0_i32_2 = arith.constant 0 : i32
    return %arg0, %c0_i32, %c0_i32_0, %c0_i32_1 : i32, i32, i32, i32
  }
  func.func @transform_1(%arg0: i32) -> (i32, i32) {
    %c0_i32 = arith.constant 0 : i32
    %c0_i32_0 = arith.constant 0 : i32
    %c0_i32_1 = arith.constant 0 : i32
    return %c0_i32, %c0_i32_0 : i32, i32
  }
  func.func @transform_2(%arg0: i32) -> (i32, i32) {
    %c0_i32 = arith.constant 0 : i32
    %c0_i32_0 = arith.constant 0 : i32
    %c0_i32_1 = arith.constant 0 : i32
    return %c0_i32, %c0_i32_0 : i32, i32
  }
  func.func @transform_3(%arg0: i32) -> (i32, i32) {
    %c0_i32 = arith.constant 0 : i32
    %c0_i32_0 = arith.constant 0 : i32
    %c0_i32_1 = arith.constant 0 : i32
    return %c0_i32, %c0_i32_0 : i32, i32
  }
  func.func @transform_4(%arg0: i32) -> (i32, i32) {
    %c0_i32 = arith.constant 0 : i32
    %c0_i32_0 = arith.constant 0 : i32
    %c0_i32_1 = arith.constant 0 : i32
    return %c0_i32, %c0_i32_0 : i32, i32
  }
  func.func @transform_5(%arg0: i32) -> (i32, i32) {
    %c0_i32 = arith.constant 0 : i32
    %c0_i32_0 = arith.constant 0 : i32
    %c0_i32_1 = arith.constant 0 : i32
    return %c0_i32, %c0_i32_0 : i32, i32
  }
  func.func @transform_6(%arg0: i32) -> (i32, i32) {
    %c0_i32 = arith.constant 0 : i32
    %c0_i32_0 = arith.constant 0 : i32
    %c0_i32_1 = arith.constant 0 : i32
    return %c0_i32, %c0_i32_0 : i32, i32
  }
  func.func @transform_7(%arg0: i32) -> (i32, i32) {
    %c0_i32 = arith.constant 0 : i32
    %c0_i32_0 = arith.constant 0 : i32
    %c0_i32_1 = arith.constant 0 : i32
    return %c0_i32, %c0_i32_0 : i32, i32
  }
  func.func @transform_8(%arg0: i32) -> (i32, i32) {
    %c0_i32 = arith.constant 0 : i32
    %c0_i32_0 = arith.constant 0 : i32
    %c0_i32_1 = arith.constant 0 : i32
    return %c0_i32, %c0_i32_0 : i32, i32
  }
  func.func @transform_9(%arg0: i32) -> (i32, i32) {
    %c0_i32 = arith.constant 0 : i32
    %c0_i32_0 = arith.constant 0 : i32
    %c0_i32_1 = arith.constant 0 : i32
    return %c0_i32, %c0_i32_0 : i32, i32
  }
  func.func @transform_10(%arg0: i32) -> (i32, i32, i32, i32) {
    %c0_i32 = arith.constant 0 : i32
    %c0_i32_0 = arith.constant 0 : i32
    %c0_i32_1 = arith.constant 0 : i32
    %c0_i32_2 = arith.constant 0 : i32
    return %arg0, %c0_i32, %c0_i32_0, %c0_i32_1 : i32, i32, i32, i32
  }
}

</mosaic_0001>

<bundles_post_ra>
// kernel: tpu_custom_call.1
= control target key start
LH: loop header
LB: loop body
LE: loop exit
PB: predicated region body
PF: predicated region fallthrough
CT: control target
= control target key end

     0   :  { %s14787_s0 = inlined_call_operand.hbm [shape: bf16[2,16,16,128], index: 0, kind: input, shape index: {}]   ;;  %s14788_s1 = inlined_call_operand.hbm [shape: bf16[1152,128], index: 1, kind: input, shape index: {}]   ;;  %s14789_s2 = inlined_call_operand.vmem [shape: f32[1,128], index: 2, kind: input, shape index: {}]   ;;  %s14790_s3 = inlined_call_operand.vmem [shape: f32[1,128], index: 3, kind: input, shape index: {}]   ;;  %s14791_s4 = inlined_call_operand.hbm [shape: bf16[1152,128], index: 4, kind: input, shape index: {}]   ;;  %s14792_s5 = inlined_call_operand.vmem [shape: f32[1,128], index: 5, kind: input, shape index: {}]   ;;  %s14793_s6 = inlined_call_operand.vmem [shape: f32[1,128], index: 6, kind: input, shape index: {}]   ;;  %s14794_s7 = inlined_call_operand.hbm [shape: bf16[128,128], index: 7, kind: input, shape index: {}]   ;;  %s14795_s8 = inlined_call_operand.vmem [shape: f32[1,128], index: 8, kind: input, shape index: {}]   ;;  %s14796_s9 = inlined_call_operand.vmem [shape: f32[1,128], index: 9, kind: input, shape index: {}]   ;;  %s14797_s10 = inlined_call_operand.hbm [shape: f32[2,16,16,128], index: 10, kind: output, shape index: {}]  }
   0x1   :  { %14804 = sst [smem:[#allocation30_spill]] %s14788_s1 }
   0x2   :  { %14805 = sst [smem:[#allocation31_spill]] %s14791_s4 }
   0x3   :  { %14806 = sst [smem:[#allocation32_spill]] %s14794_s7 }
   0x4   :  { %15 = vsyncpa [#allocation7], 0 }
   0x5   :  { %17 = vsyncpa [#allocation7 + $0x1], 0 }
   0x6   :  { %18 = vsyncpa [#allocation10], 0 }
   0x7   :  { %19 = vsyncpa [#allocation13], 0 }
   0x8   :  { %20 = vsyncpa [#allocation8], 0 }
   0x9   :  { %22 = vsyncpa [#allocation8 + $0x1], 0  ;;  %s13215_s13 = smov 0   ;;  %s13217_s14 = smov 0  }
   0xa   :  { %s13219_s15 = smov 0   ;;  %s13221_s16 = smov 0  }
   0xb LB: > { %s13236_s17 = sadd.s32 4294967295, %s13147_s16   ;;  %s9450_s18 = sadd.s32 4294967294, %s13147_s16   ;;  %s13147_s16 = sphi %s13221_s16, %s14852_s16   ;;  %s13143_s15 = sphi %s13219_s15, %s14851_s15   ;;  %s13139_s14 = sphi %s13217_s14, %s14850_s14   ;;  %s13135_s13 = sphi %s13215_s13, %s14849_s13  }
   0xc   : > { %p48_p0 = scmp.ne.s32.totalorder %s13139_s14, %s13135_s13  ;;  %p14798_p1 = scmp.eq.s32.totalorder %s13236_s17, 0 }
   0xd   : > { %p261_p2 = scmp.eq.s32.totalorder %s13236_s17, 1  ;;  %p267_p3 = scmp.eq.s32.totalorder %s9450_s18, 1 }
   0xe   : > { %p13245_p4 = por %p14798_p1, %p48_p0  ;;  %p9451_p5 = scmp.ge.s32.totalorder %s13147_s16, 1 }
   0xf   : > { %p13250_p6 = por %p267_p3, %p48_p0  ;;  %p274_p7 = scmp.lt.s32.totalorder %s13147_s16, 3 }
  0x10   : > { %s14807_s19 = scalar_select %p13245_p4, 1, 0 }
  0x11   : > { %s14808_s20 = scalar_select %p13250_p6, 1, 0 }
  0x12   : > { %p13255_p8 = pnand %p9451_p5, %p274_p7  ;;  %s13149_s22 = smov [#allocation9]  }
  0x13   : > { %s286_s23 = sshll.u32 %s13149_s22, 4  ;;  %s13150_s25 = smov [#allocation11]   ;;  %s287_s23 = int_to_ptr.vmem [resolvable:$true] %s286_s23 }
  0x14   : > { %s14809_s21 = scalar_select %p13255_p8, 1, 0 }
  0x15   : > { %p12230_p9 = pneg %p13255_p8  ;;  %s305_s26 = sshll.u32 %s13150_s25, 4  ;;  %s306_s26 = int_to_ptr.vmem [resolvable:$true] %s305_s26 }
  0x16   : > { %s13151_s27 = smov [#allocation12]   ;;  %s12980_s29 = scalar_lea.vmem %s287_s23, 9216 }
  0x17   : > { %p13264_p11 = pnand %p12230_p9, %p14798_p1  ;;  %s324_s28 = sshll.u32 %s13151_s27, 4  ;;  %s325_s28 = int_to_ptr.vmem [resolvable:$true] %s324_s28 }
  0x18   : > { %p12981_p13 = scmp.ne.s32.totalorder %s287_s23, %s12980_s29  ;;  %p12988_p5 = scmp.lt.s32.totalorder %s287_s23, %s287_s23 }
  0x19   : > { %p12971_p12 = pneg %p13264_p11  ;;  %p12989_p7 = scmp.lt.s32.totalorder %s12980_s29, %s12980_s29 }
  0x1b   : > { %p12983_p0 = pnand %p12981_p13, %p12971_p12  ;;  %p12990_p9 = por %p12989_p7, %p12988_p5 }
  0x1d   : > { %p12984_p3 = pneg %p12983_p0 }
  0x1f   : > { %p12991_p10 = pnand %p12990_p9, %p12984_p3 }
  0x21   : > { %12994 = shalt.err (!%p12991_p10)
}
  0x22   : > { %s14799_s30 = smov 64   ;;  %s14800_s11 = smov 4  }
  0x23   : > { %s14811_s1 = sld [smem:[#allocation30_spill]]  ;;  %s13006_s22 = scalar_lea.vmem %s306_s26, 9216 }
  0x24   : > { %p13007_p13 = scmp.ne.s32.totalorder %s306_s26, %s13006_s22  ;;  %p13014_p3 = scmp.lt.s32.totalorder %s306_s26, %s306_s26 }
  0x25   : > { %p13015_p10 = scmp.lt.s32.totalorder %s13006_s22, %s13006_s22 }
  0x26   : > { %p13009_p0 = pnand %p13007_p13, %p12971_p12 }
  0x27   : > { %p13016_p7 = por %p13015_p10, %p13014_p3 }
  0x28   : > { %p13010_p5 = pneg %p13009_p0 }
  0x29   : > { %12233 = dma.hbm_to_vmem [thread:$0]  (!%p13264_p11), %s14811_s1, 9216, %s287_s23, [#allocation10], %s14799_s30, %s14799_s30, %s14800_s11  }
  0x2a   : > { %p13017_p9 = pnand %p13016_p7, %p13010_p5 }
  0x2c   : > { %13020 = shalt.err (!%p13017_p9)
}
  0x2d   : > { %s14812_s4 = sld [smem:[#allocation31_spill]]  ;;  %s13032_s23 = scalar_lea.vmem %s325_s28, 1024 }
  0x2e   : > { %p13033_p1 = scmp.ne.s32.totalorder %s325_s28, %s13032_s23  ;;  %p13040_p3 = scmp.lt.s32.totalorder %s325_s28, %s325_s28 }
  0x2f   : > { %p13041_p5 = scmp.lt.s32.totalorder %s13032_s23, %s13032_s23 }
  0x30   : > { %p13035_p13 = pnand %p13033_p1, %p12971_p12 }
  0x31   : > { %p13042_p10 = por %p13041_p5, %p13040_p3 }
  0x32   : > { %p13036_p0 = pneg %p13035_p13 }
  0x33   : > { %12236 = dma.hbm_to_vmem [thread:$0]  (!%p13264_p11), %s14812_s4, 9216, %s306_s26, [#allocation10], %s14799_s30, %s14799_s30, %s14800_s11  }
  0x34   : > { %p13043_p7 = pnand %p13042_p10, %p13036_p0 }
  0x36   : > { %13046 = shalt.err (!%p13043_p7)
}
  0x37   : > { %s14813_s7 = sld [smem:[#allocation32_spill]]  ;;  %s13304_s26 = sadd.s32 1, %s13147_s16  }
  0x38   : > { %s32_s24 = ssub.s32 %s13147_s16, %s13304_s26  ;;  %s35_s18 = sadd.s32 1, %s13143_s15 }
  0x39   : > { %p33_p1 = scmp.eq.s32.totalorder %s32_s24, 0  ;;  %p42_p12 = scmp.ne.s32.totalorder %s13143_s15, %s13139_s14 }
  0x3a   : > { %p43_p9 = scmp.eq.s32.totalorder %s13147_s16, 0  ;;  %p12251_p13 = scmp.lt.s32.totalorder %s13147_s16, 2 }
  0x3b   : > { %s13314_s22 = scalar_select %p33_p1, %s13143_s15, %s35_s18  }
  0x3c   : > { %p44_p0 = por %p43_p9, %p42_p12  ;;  %p13318_p3 = por %p261_p2, %p42_p12 }
  0x3d   : > { %12239 = dma.hbm_to_vmem [thread:$0]  (!%p13264_p11), %s14813_s7, 1024, %s325_s28, [#allocation13], %s14799_s30, %s14799_s30, %s14800_s11  }
  0x3e   : > { %14814 = sst [smem:[#allocation19_spill]] %s13314_s22  ;;  %s344_s27 = sand.u32 1, %s13143_s15  }
  0x3f   : > { %s14815_s25 = scalar_select %p13318_p3, 1, 0 }
  0x40   : > { %s10508_s23 = sshll.u32 %s13147_s16, 11  ;;  %s9456_s28 = sshll.u32 %s344_s27, 7 }
  0x41   : > { %s13327_s30 = scalar_lea.hbm %s14787_s0, %s10508_s23  ;;  %s348_s24 = scalar_lea.vmem [#allocation6], %s9456_s28 }
  0x42   : > { %s355_s18 = sshll.u32 %s348_s24, 4  ;;  %p13329_p11 = pnand %p12251_p13, %p44_p0  ;;  %s13333_s18 = int_to_ptr.vmem [resolvable:$true] %s355_s18 }
  0x43   : > { %s13335_s1 = scalar_lea.sflag [#allocation7], %s344_s27  ;;  %s13047_s4 = scalar_lea.hbm %s13327_s30, 2048 }
  0x44   : > { %p13048_p2 = scmp.ne.s32.totalorder %s13327_s30, %s13047_s4  ;;  %p13049_p5 = pneg %p13329_p11 }
  0x45   : > { %s13052_s28 = scalar_lea.hbm %s14787_s0, 4096  ;;  %p13053_p1 = scmp.lt.s32.totalorder %s13327_s30, %s14787_s0 }
  0x46   : > { %p13050_p10 = pnand %p13049_p5, %p13048_p2  ;;  %p13054_p12 = scmp.lt.s32.totalorder %s13052_s28, %s13047_s4 }
  0x48   : > { %p13051_p7 = pneg %p13050_p10  ;;  %p13055_p9 = por %p13054_p12, %p13053_p1 }
  0x4a   : > { %p13056_p13 = pnand %p13055_p9, %p13051_p7 }
  0x4c   : > { %13059 = shalt.err (!%p13056_p13)
}
  0x4d   : > { %s13060_s27 = scalar_lea.vmem %s13333_s18, 2048  ;;  %s13154_s7 = smov [#allocation6]  }
  0x4e   : > { %p13061_p0 = scmp.ne.s32.totalorder %s13333_s18, %s13060_s27  ;;  %s13065_s22 = sshll.u32 %s13154_s7, 4  ;;  %s13066_s22 = int_to_ptr.vmem [resolvable:$false] %s13065_s22 }
  0x4f   : > { %s13067_s23 = scalar_lea.vmem %s13066_s22, 4096  ;;  %p13068_p10 = scmp.lt.s32.totalorder %s13333_s18, %s13066_s22 }
  0x50   : > { %p13063_p6 = pnand %p13061_p0, %p13049_p5  ;;  %p13069_p3 = scmp.lt.s32.totalorder %s13067_s23, %s13060_s27 }
  0x52   : > { %p13064_p2 = pneg %p13063_p6  ;;  %p13070_p4 = por %p13069_p3, %p13068_p10 }
  0x54   : > { %p13071_p8 = pnand %p13070_p4, %p13064_p2 }
  0x56   : > { %13074 = shalt.err (!%p13071_p8)
}
  0x57   : > { %s14817_s4 = smov 4   ;;  %s14818_s29 = smov 64  }
  0x58   : > { %12243 = dma.hbm_to_vmem [thread:$0]  (!%p13329_p11), %s13327_s30, 2048, %s13333_s18, %s13335_s1, %s14818_s29, %s14818_s29, %s14817_s4  }
  0x59   : > { %p14819_p6 = scmp.ne.s32.totalorder %s14809_s21, 0 }
  0x5b   : > { %367 = sbr.rel (%p14819_p6) target bundleno = 1195 (0x4ab), region = 60 }
  0x60   : > { %s13362_s7 = sand.u32 1, %s13139_s14   ;;  %p14820_p4 = scmp.ne.s32.totalorder %s14807_s19, 0 }
  0x61   : > { %s9460_s22 = sshll.u32 %s13362_s7, 7  ;;  %s370_s28 = scalar_lea.sflag [#allocation7], %s13362_s7 }
  0x62   : > { %s13366_s12 = scalar_lea.vmem [#allocation6], %s9460_s22 }
  0x63   : > { %13118 = dma.done.wait (%p14820_p4), %s370_s28, 2048  }
  0x64   : > { %13120 = vsyncadd (%p14820_p4), %s370_s28, 4294965248  ;;  %p14821_p8 = scmp.eq.s32.totalorder %s13236_s17, 0 }
  0x66   : > { %13122 = dma.done.wait (%p14821_p8), [#allocation10], 18432   ;;  %p14822_p3 = pmov %p14821_p8 }
  0x68   : > { %13124 = vsyncadd (%p14822_p3), [#allocation10], 4294948864  ;;  %p14823_p11 = pmov %p14822_p3 }
  0x69   : > { %p14824_p5 = pmov %p14822_p3 }
  0x6a   : > { %13126 = dma.done.wait (%p14823_p11), [#allocation13], 1024  }
  0x6b   : > { %13128 = vsyncadd (%p14824_p5), [#allocation13], 4294966272  ;;  %v13155_v0 = vmov 0.0   ;;  %v13156_v1 = vmov 0.0|0.0   ;;  %v12296_v2 = vld [vmem:[#allocation9 + $0x78] sm:$0xff]   ;;  %v12298_v4 = vld [vmem:[#allocation9 + $0x70] sm:$0xff]  }
  0x6c   : > { %455 = vst [vmem:[#allocation2] sm:$0xff] %v13155_v0  ;;  %456 = vst [vmem:[#allocation2 + $0x8] sm:$0xff] %v13155_v0  ;;  %v12297_v3 = vld [vmem:[#allocation9 + $0x38] sm:$0xff]   ;;  %11086 = vmatprep.subr.bf16.mxu0 %v12296_v2  ;;  %12198 = vmatprep.subr.bf16.mxu1 %v12296_v2  ;;  %v12299_v5 = vld [vmem:[#allocation9 + $0x30] sm:$0xff]   ;;  %s9464_s21 = sshll.u32 %s13362_s7, 8  ;;  %s11085_s11 = sshll.u32 %s13236_s17, 12 }
  0x6d   : > { %457 = vst [vmem:[#allocation2 + $0x10] sm:$0x3] %v13155_v0  ;;  %459 = vst [vmem:[#allocation2 + $0x198] sm:$0xff] %v13155_v0  ;;  %11087 = vmatpush3.bf16.msra.mxu0 %v12297_v3  ;;  %12206 = vmatpush3.bf16.msra.mxu1 %v12297_v3  ;;  %v12300_v6 = vld [vmem:[#allocation9 + $0x68] sm:$0xff]   ;;  %v12302_v8 = vld [vmem:[#allocation9 + $0x60] sm:$0xff]   ;;  %s14560_s30 = scalar_lea.vmem [#allocation14], %s9464_s21  ;;  %s14740_s23 = scalar_lea.hbm %s14797_s10, %s11085_s11 }
  0x6e   : > { %460 = vst [vmem:[#allocation2 + $0x1a0] sm:$0xff] %v13155_v0  ;;  %461 = vst [vmem:[#allocation2 + $0x1a8] sm:$0x3] %v13155_v0  ;;  %11088 = vmatprep.subr.bf16.mxu0 %v12298_v4  ;;  %12199 = vmatprep.subr.bf16.mxu1 %v12298_v4  ;;  %v12301_v7 = vld [vmem:[#allocation9 + $0x28] sm:$0xff]   ;;  %v12303_v9 = vld [vmem:[#allocation9 + $0x20] sm:$0xff]   ;;  %s9348_s18 = sshll.u32 %s14560_s30, 4  ;;  %s14742_s18 = int_to_ptr.vmem [resolvable:$true] %s9348_s18 }
  0x6f   : > { %463 = vst [vmem:[#allocation2 + $0x18] sm:$0x1] %v13155_v0  ;;  %464 = vst [vmem:[#allocation2 + $0x30] sm:$0x1] %v13155_v0  ;;  %v12304_v10 = vld [vmem:[#allocation9 + $0x58] sm:$0xff]   ;;  %v12306_v12 = vld [vmem:[#allocation9 + $0x50] sm:$0xff]  }
  0x70   : > { %465 = vst [vmem:[#allocation2 + $0x48] sm:$0x1] %v13155_v0  ;;  %466 = vst [vmem:[#allocation2 + $0x60] sm:$0x1] %v13155_v0  ;;  %v12305_v11 = vld [vmem:[#allocation9 + $0x18] sm:$0xff]   ;;  %v12307_v24 = vld [vmem:[#allocation9 + $0x10] sm:$0xff]  }
  0x71   : > { %467 = vst [vmem:[#allocation2 + $0x78] sm:$0x1] %v13155_v0  ;;  %468 = vst [vmem:[#allocation2 + $0x90] sm:$0x1] %v13155_v0  ;;  %11089 = vmatpush3.bf16.msra.mxu0 %v12299_v5  ;;  %12207 = vmatpush3.bf16.msra.mxu1 %v12299_v5  ;;  %v445_v19 = vld [vmem:[%s13366_s12 + $0x58] sm:$0xff]   ;;  %v12308_v25 = vld [vmem:[#allocation9 + $0x48] sm:$0xff]  }
  0x72   : > { %469 = vst [vmem:[#allocation2 + $0xa8] sm:$0x1] %v13155_v0  ;;  %470 = vst [vmem:[#allocation2 + $0xc0] sm:$0x1] %v13155_v0  ;;  %11090 = vmatprep.subr.bf16.mxu0 %v12300_v6  ;;  %12200 = vmatprep.subr.bf16.mxu1 %v12300_v6  ;;  %v12315_v20 = vld [vmem:[%s13366_s12 + $0x58] ss:$0 sps:$4 sm:$0xff]   ;;  %v520_v22 = vunpack.c.l.bf16 %v445_v19  ;;  %v521_v23 = vunpack.c.h.bf16 %v445_v19 }
  0x73   : > { %471 = vst [vmem:[#allocation2 + $0xd8] sm:$0x1] %v13155_v0  ;;  %472 = vst [vmem:[#allocation2 + $0xf0] sm:$0x1] %v13155_v0  ;;  %v755_v14 = vld [vmem:[#allocation2 + $0x1] sm:$0xff]  ;;  %v12320_v37 = vld [vmem:[#allocation9 + $0xf8] sm:$0xff]  }
  0x74   : > { %473 = vst [vmem:[#allocation2 + $0x108] sm:$0x1] %v13155_v0  ;;  %474 = vst [vmem:[#allocation2 + $0x120] sm:$0x1] %v13155_v0  ;;  %v756_v15 = vld [vmem:[#allocation2 + $0x9] sm:$0xff]  ;;  %v10541_v17 = vpack.c.bf16 %v755_v14, %v755_v14  ;;  %v12310_v27 = vld [vmem:[#allocation9 + $0x40] sm:$0xff]  }
  0x75   : > { %475 = vst [vmem:[#allocation2 + $0x138] sm:$0x1] %v13155_v0  ;;  %476 = vst [vmem:[#allocation2 + $0x150] sm:$0x1] %v13155_v0  ;;  %11091 = vmatpush3.bf16.msra.mxu0 %v12301_v7  ;;  %12208 = vmatpush3.bf16.msra.mxu1 %v12301_v7  ;;  %v10542_v18 = vpack.c.bf16 %v756_v15, %v756_v15  ;;  %v12316_v21 = vld [vmem:[%s13366_s12 + $0x5c] ss:$0 sps:$4 sm:$0xff]  }
  0x76   : > { %477 = vst [vmem:[#allocation2 + $0x168] sm:$0x1] %v13155_v0  ;;  %478 = vst [vmem:[#allocation2 + $0x180] sm:$0x1] %v13155_v0  ;;  %11092 = vmatprep.subr.bf16.mxu0 %v12302_v8  ;;  %12201 = vmatprep.subr.bf16.mxu1 %v12302_v8  ;;  %v12309_v26 = vld [vmem:[#allocation9 + $0x8] sm:$0xff]   ;;  %v423_v28 = vld [vmem:[%s13366_s12] sm:$0xff]  }
  0x77   : > { %481 = vst [vmem:[#allocation2 + $0x29] sm:$0x1] %v13155_v0  ;;  %482 = vst [vmem:[#allocation2 + $0x41] sm:$0x1] %v13155_v0  ;;  %v12326_v29 = vld [vmem:[%s13366_s12] ss:$0 sps:$4 sm:$0xff]   ;;  %v498_v32 = vunpack.c.l.bf16 %v423_v28  ;;  %v499_v33 = vunpack.c.h.bf16 %v423_v28 }
  0x78   : > { %483 = vst [vmem:[#allocation2 + $0x59] sm:$0x1] %v13155_v0  ;;  %484 = vst [vmem:[#allocation2 + $0x71] sm:$0x1] %v13155_v0  ;;  %v12327_v30 = vld [vmem:[%s13366_s12 + $0x4] ss:$0 sps:$4 sm:$0xff]  }
  0x79   : > { %485 = vst [vmem:[#allocation2 + $0x89] sm:$0x1] %v13155_v0  ;;  %486 = vst [vmem:[#allocation2 + $0xa1] sm:$0x1] %v13155_v0  ;;  %11093 = vmatpush3.bf16.msra.mxu0 %v12303_v9  ;;  %12209 = vmatpush3.bf16.msra.mxu1 %v12303_v9  ;;  %v12311_v31 = vld [vmem:[#allocation9] sm:$0xff]   ;;  %v12321_v45 = vld [vmem:[#allocation9 + $0x178] sm:$0xff]  }
  0x7a   : > { %487 = vst [vmem:[#allocation2 + $0xb9] sm:$0x1] %v13155_v0  ;;  %488 = vst [vmem:[#allocation2 + $0xd1] sm:$0x1] %v13155_v0  ;;  %11094 = vmatprep.subr.bf16.mxu0 %v12304_v10  ;;  %12202 = vmatprep.subr.bf16.mxu1 %v12304_v10  ;;  %v447_v34 = vld [vmem:[%s13366_s12 + $0x60] sm:$0xff]   ;;  %v12323_v47 = vld [vmem:[#allocation9 + $0x138] sm:$0xff]  }
  0x7b   : > { %489 = vst [vmem:[#allocation2 + $0xe9] sm:$0x1] %v13155_v0  ;;  %490 = vst [vmem:[#allocation2 + $0x101] sm:$0x1] %v13155_v0  ;;  %v12330_v35 = vld [vmem:[%s13366_s12 + $0x60] ss:$0 sps:$4 sm:$0xff]   ;;  %v522_v38 = vunpack.c.l.bf16 %v447_v34  ;;  %v523_v39 = vunpack.c.h.bf16 %v447_v34 }
  0x7c   : > { %491 = vst [vmem:[#allocation2 + $0x119] sm:$0x1] %v13155_v0  ;;  %492 = vst [vmem:[#allocation2 + $0x131] sm:$0x1] %v13155_v0  ;;  %v12331_v36 = vld [vmem:[%s13366_s12 + $0x64] ss:$0 sps:$4 sm:$0xff]  }
  0x7d   : > { %493 = vst [vmem:[#allocation2 + $0x149] sm:$0x1] %v13155_v0  ;;  %494 = vst [vmem:[#allocation2 + $0x161] sm:$0x1] %v13155_v0  ;;  %11095 = vmatpush3.bf16.msra.mxu0 %v12305_v11  ;;  %12210 = vmatpush3.bf16.msra.mxu1 %v12305_v11  ;;  %v12339_v48 = vld [vmem:[#allocation9 + $0x170] sm:$0xff]   ;;  %v425_v52 = vld [vmem:[%s13366_s12 + $0x8] sm:$0xff]  }
  0x7e   : > { %495 = vst [vmem:[#allocation2 + $0x179] sm:$0x1] %v13155_v0  ;;  %496 = vst [vmem:[#allocation2 + $0x191] sm:$0x1] %v13155_v0  ;;  %11096 = vmatprep.subr.bf16.mxu0 %v12306_v12  ;;  %12203 = vmatprep.subr.bf16.mxu1 %v12306_v12  ;;  %v12341_v49 = vld [vmem:[#allocation9 + $0x130] sm:$0xff]   ;;  %v500_v57 = vunpack.c.l.bf16 %v425_v52  ;;  %v501_v58 = vunpack.c.h.bf16 %v425_v52  ;;  %v12322_v60 = vld [vmem:[#allocation9 + $0xb8] sm:$0xff]  }
  0x7f   : > { %4679 = vst [vmem:[#allocation3] sm:$0xff] %v13155_v0  ;;  %4680 = vst [vmem:[#allocation3 + $0x8] sm:$0xff] %v13155_v0  ;;  %v12342_v59 = vld [vmem:[%s13366_s12 + $0x8] ss:$0 sps:$4 sm:$0xff]   ;;  %v12343_v63 = vld [vmem:[%s13366_s12 + $0xc] ss:$0 sps:$4 sm:$0xff]  }
  0x80   : > { %4681 = vst [vmem:[#allocation3 + $0x10] sm:$0x3] %v13155_v0  ;;  %4683 = vst [vmem:[#allocation3 + $0x198] sm:$0xff] %v13155_v0  ;;  %v12347_v6 = vld [vmem:[%s13366_s12 + $0x6c] ss:$0 sps:$4 sm:$0xff]   ;;  %v12324_v7 = vld [vmem:[#allocation9 + $0xf0] sm:$0xff]  }
  0x81   : > { %4684 = vst [vmem:[#allocation3 + $0x1a0] sm:$0xff] %v13155_v0  ;;  %4685 = vst [vmem:[#allocation3 + $0x1a8] sm:$0x3] %v13155_v0  ;;  %11097 = vmatpush3.bf16.msra.mxu0 %v12307_v24  ;;  %12211 = vmatpush3.bf16.msra.mxu1 %v12307_v24  ;;  %v12325_v8 = vld [vmem:[#allocation9 + $0xb0] sm:$0xff]   ;;  %v12336_v9 = vld [vmem:[#allocation9 + $0xe8] sm:$0xff]   ;;  %s9335_s4 = scalar_lea.sflag [#allocation8], %s13362_s7 }
  0x82   : > { %4687 = vst [vmem:[#allocation3 + $0x18] sm:$0x1] %v13155_v0  ;;  %4688 = vst [vmem:[#allocation3 + $0x30] sm:$0x1] %v13155_v0  ;;  %11098 = vmatprep.subr.bf16.mxu0 %v12308_v25  ;;  %12204 = vmatprep.subr.bf16.mxu1 %v12308_v25  ;;  %v427_v10 = vld [vmem:[%s13366_s12 + $0x10] sm:$0xff]   ;;  %v12340_v34 = vld [vmem:[#allocation9 + $0xa0] sm:$0xff]  }
  0x83   : > { %4689 = vst [vmem:[#allocation3 + $0x48] sm:$0x1] %v13155_v0  ;;  %4690 = vst [vmem:[#allocation3 + $0x60] sm:$0x1] %v13155_v0  ;;  %v502_v11 = vunpack.c.l.bf16 %v427_v10  ;;  %v503_v12 = vunpack.c.h.bf16 %v427_v10  ;;  %v12357_v14 = vld [vmem:[%s13366_s12 + $0x14] ss:$0 sps:$4 sm:$0xff]  }
  0x84   : > { %4691 = vst [vmem:[#allocation3 + $0x78] sm:$0x1] %v13155_v0  ;;  %4692 = vst [vmem:[#allocation3 + $0x90] sm:$0x1] %v13155_v0  ;;  %v451_v15 = vld [vmem:[%s13366_s12 + $0x70] sm:$0xff]   ;;  %v12366_v52 = vld [vmem:[#allocation9 + $0xc8] sm:$0xff]  }
  0x85   : > { %4693 = vst [vmem:[#allocation3 + $0xa8] sm:$0x1] %v13155_v0  ;;  %4694 = vst [vmem:[#allocation3 + $0xc0] sm:$0x1] %v13155_v0  ;;  %11099 = vmatpush3.bf16.msra.mxu0 %v12309_v26  ;;  %12212 = vmatpush3.bf16.msra.mxu1 %v12309_v26  ;;  %v527_v19 = vunpack.c.h.bf16 %v451_v15  ;;  %v12383_v10 = vld [vmem:[%s13366_s12 + $0x24] ss:$0 sps:$4 sm:$0xff]  }
  0x86   : > { %4695 = vst [vmem:[#allocation3 + $0xd8] sm:$0x1] %v13155_v0  ;;  %4696 = vst [vmem:[#allocation3 + $0xf0] sm:$0x1] %v13155_v0  ;;  %11100 = vmatprep.subr.bf16.mxu0 %v12310_v27  ;;  %12205 = vmatprep.subr.bf16.mxu1 %v12310_v27  ;;  %s13075_s29 = scalar_lea.vmem %s14742_s18, 4096  ;;  %p14845_p1 = scmp.ne.s32.totalorder %s14815_s25, 0 }
  0x87   : > { %4697 = vst [vmem:[#allocation3 + $0x108] sm:$0x1] %v13155_v0  ;;  %4698 = vst [vmem:[#allocation3 + $0x120] sm:$0x1] %v13155_v0  ;;  %p13076_p7 = scmp.ne.s32.totalorder %s14742_s18, %s13075_s29  ;;  %s13157_s17 = smov [#allocation14]  }
  0x88   : > { %4699 = vst [vmem:[#allocation3 + $0x138] sm:$0x1] %v13155_v0  ;;  %4700 = vst [vmem:[#allocation3 + $0x150] sm:$0x1] %v13155_v0  ;;  %s13079_s22 = sshll.u32 %s13157_s17, 4  ;;  %s13080_s22 = int_to_ptr.vmem [resolvable:$false] %s13079_s22 }
  0x89   : > { %4701 = vst [vmem:[#allocation3 + $0x168] sm:$0x1] %v13155_v0  ;;  %4702 = vst [vmem:[#allocation3 + $0x180] sm:$0x1] %v13155_v0  ;;  %11101 = vmatpush3.bf16.msra.mxu0 %v12311_v31  ;;  %12213 = vmatpush3.bf16.msra.mxu1 %v12311_v31  ;;  %p13077_p12 = pnand %p13076_p7, %p14845_p1  ;;  %s13081_s28 = scalar_lea.vmem %s13080_s22, 8192 }
  0x8a   : > { %4705 = vst [vmem:[#allocation3 + $0x29] sm:$0x1] %v13155_v0  ;;  %4706 = vst [vmem:[#allocation3 + $0x41] sm:$0x1] %v13155_v0  ;;  %11198 = vmatprep.subr.bf16.mxu1 %v12320_v37  ;;  %11310 = vmatprep.subr.bf16.mxu0 %v12321_v45  ;;  %p13082_p13 = scmp.lt.s32.totalorder %s14742_s18, %s13080_s22  ;;  %p13083_p0 = scmp.lt.s32.totalorder %s13081_s28, %s13075_s29 }
  0x8b   : > { %4707 = vst [vmem:[#allocation3 + $0x59] sm:$0x1] %v13155_v0  ;;  %4708 = vst [vmem:[#allocation3 + $0x71] sm:$0x1] %v13155_v0  ;;  %p13078_p9 = pneg %p13077_p12 }
  0x8c   : > { %4709 = vst [vmem:[#allocation3 + $0x89] sm:$0x1] %v13155_v0  ;;  %4710 = vst [vmem:[#allocation3 + $0xa1] sm:$0x1] %v13155_v0  ;;  %p13084_p2 = por %p13083_p0, %p13082_p13 }
  0x8d   : > { %4711 = vst [vmem:[#allocation3 + $0xb9] sm:$0x1] %v13155_v0  ;;  %4712 = vst [vmem:[#allocation3 + $0xd1] sm:$0x1] %v13155_v0 }
  0x8e   : > { %4713 = vst [vmem:[#allocation3 + $0xe9] sm:$0x1] %v13155_v0  ;;  %4714 = vst [vmem:[#allocation3 + $0x101] sm:$0x1] %v13155_v0  ;;  %p13085_p10 = pnand %p13084_p2, %p13078_p9 }
  0x8f   : > { %4715 = vst [vmem:[#allocation3 + $0x119] sm:$0x1] %v13155_v0  ;;  %4716 = vst [vmem:[#allocation3 + $0x131] sm:$0x1] %v13155_v0 }
  0x90   : > { %4717 = vst [vmem:[#allocation3 + $0x149] sm:$0x1] %v13155_v0  ;;  %4718 = vst [vmem:[#allocation3 + $0x161] sm:$0x1] %v13155_v0 }
  0x91   : > { %4719 = vst [vmem:[#allocation3 + $0x179] sm:$0x1] %v13155_v0  ;;  %4720 = vst [vmem:[#allocation3 + $0x191] sm:$0x1] %v13155_v0 }
  0x92   : > { %462 = vst [vmem:[#allocation2] sm:$0x1] %v13155_v0  ;;  %480 = vst [vmem:[#allocation2 + $0x11] sm:$0x1] %v13155_v0 }
  0x93   : > { %479 = vst [vmem:[#allocation2 + $0x198] sm:$0x1] %v13155_v0  ;;  %497 = vst [vmem:[#allocation2 + $0x1a9] sm:$0x1] %v13155_v0 }
  0x94   : > { %4686 = vst [vmem:[#allocation3] sm:$0x1] %v13155_v0  ;;  %4703 = vst [vmem:[#allocation3 + $0x198] sm:$0x1] %v13155_v0 }
  0x95   : > { %4704 = vst [vmem:[#allocation3 + $0x11] sm:$0x1] %v13155_v0  ;;  %4721 = vst [vmem:[#allocation3 + $0x1a9] sm:$0x1] %v13155_v0  ;;  %v449_v0 = vld [vmem:[%s13366_s12 + $0x68] sm:$0xff]  }
  0x96   : > { %724 = vst [vmem:[#allocation4 + $0x24] sm:$0xf] %v13156_v1  ;;  %915 = vst [vmem:[#allocation4 + $0x4] sm:$0xf] %v10541_v17  ;;  %v12346_v1 = vld [vmem:[%s13366_s12 + $0x68] ss:$0 sps:$4 sm:$0xff]   ;;  %v524_v3 = vunpack.c.l.bf16 %v449_v0  ;;  %v525_v4 = vunpack.c.h.bf16 %v449_v0 }
  0x97   : > { %916 = vst [vmem:[#allocation4 + $0x28] sm:$0xf] %v10542_v18  ;;  %939 = vst [vmem:[#allocation4 + $0x364] sm:$0xf] %v12315_v20  ;;  %v12337_v17 = vld [vmem:[#allocation9 + $0xa8] sm:$0xff]   ;;  %v526_v18 = vunpack.c.l.bf16 %v451_v15 }
  0x98   : > { %940 = vst [vmem:[#allocation4 + $0x388] sm:$0xf] %v12316_v21  ;;  %553 = vst [vmem:[#allocation2 + $0x121] sm:$0xff] %v520_v22  ;;  %v12338_v21 = vld [vmem:[#allocation9 + $0xe0] sm:$0xff]  }
  0x99   : > { %v563_v13 = vld [vmem:[#allocation2] sm:$0xff]  ;;  %554 = vst [vmem:[#allocation2 + $0x129] sm:$0xff] %v521_v23  ;;  %917 = vst [vmem:[#allocation4 + $0x4c] sm:$0xf] %v12326_v29 }
  0x9a   : > { %v10509_v16 = vpack.c.bf16 %v563_v13, %v563_v13  ;;  %918 = vst [vmem:[#allocation4 + $0x70] sm:$0xf] %v12327_v30  ;;  %531 = vst [vmem:[#allocation2 + $0x19] sm:$0xff] %v498_v32  ;;  %v12356_v13 = vld [vmem:[%s13366_s12 + $0x10] ss:$0 sps:$4 sm:$0xff]  }
  0x9b   : > { %532 = vst [vmem:[#allocation2 + $0x21] sm:$0xff] %v499_v33  ;;  %941 = vst [vmem:[#allocation4 + $0x3ac] sm:$0xf] %v12330_v35  ;;  %v12360_v32 = vld [vmem:[%s13366_s12 + $0x70] ss:$0 sps:$4 sm:$0xff]   ;;  %v12367_v35 = vld [vmem:[#allocation9 + $0x168] sm:$0xff]  }
  0x9c   : > { %723 = vst [vmem:[#allocation4] sm:$0xf] %v10509_v16  ;;  %942 = vst [vmem:[#allocation4 + $0x3d0] sm:$0xf] %v12331_v36  ;;  %v12361_v33 = vld [vmem:[%s13366_s12 + $0x74] ss:$0 sps:$4 sm:$0xff]  }
  0x9d   : > { %555 = vst [vmem:[#allocation2 + $0x139] sm:$0xff] %v522_v38  ;;  %556 = vst [vmem:[#allocation2 + $0x141] sm:$0xff] %v523_v39  ;;  %v12352_v36 = vld [vmem:[#allocation9 + $0xd8] sm:$0xff]  }
  0x9e   : > { %v12314_v40 = vld [vmem:[#allocation4 + $0x4] ss:$36 sps:$4 sm:$0xff]   ;;  %533 = vst [vmem:[#allocation2 + $0x31] sm:$0xff] %v500_v57  ;;  %534 = vst [vmem:[#allocation2 + $0x39] sm:$0xff] %v501_v58  ;;  %v12373_v58 = vld [vmem:[%s13366_s12 + $0x1c] ss:$0 sps:$4 sm:$0xff]  }
  0x9f   : > { %v587_v41 = vld [vmem:[#allocation2 + $0x120] sm:$0xff]  ;;  %3796 = vmatprep.mubr.bf16.mxu0 %v12314_v40  ;;  %919 = vst [vmem:[#allocation4 + $0x94] sm:$0xf] %v12342_v59  ;;  %920 = vst [vmem:[#allocation4 + $0xb8] sm:$0xf] %v12343_v63 }
  0xa0   : > { %v588_v42 = vld [vmem:[#allocation2 + $0x128] sm:$0xff]  ;;  %v10533_v43 = vpack.c.bf16 %v587_v41, %v587_v41  ;;  %943 = vst [vmem:[#allocation4 + $0x3f4] sm:$0xf] %v12346_v1  ;;  %557 = vst [vmem:[#allocation2 + $0x151] sm:$0xff] %v524_v3  ;;  %v12370_v63 = vld [vmem:[#allocation9 + $0xc0] sm:$0xff]  }
  0xa1   : > { %v10534_v44 = vpack.c.bf16 %v588_v42, %v588_v42  ;;  %v565_v50 = vld [vmem:[#allocation2 + $0x18] sm:$0xff]  ;;  %v12319_v5 = vld [vmem:[#allocation4 + $0x364] ss:$36 sps:$4 sm:$0xff]   ;;  %558 = vst [vmem:[#allocation2 + $0x159] sm:$0xff] %v525_v4  ;;  %944 = vst [vmem:[#allocation4 + $0x418] sm:$0xf] %v12347_v6 }
  0xa2   : > { %747 = vst [vmem:[#allocation4 + $0x360] sm:$0xf] %v10533_v43  ;;  %v566_v51 = vld [vmem:[#allocation2 + $0x20] sm:$0xff]  ;;  %v10511_v53 = vpack.c.bf16 %v565_v50, %v565_v50  ;;  %3892 = vmatprep.mubr.bf16.mxu1 %v12319_v5  ;;  %v12328_v16 = vld [vmem:[#allocation4 + $0x4c] ss:$36 sps:$4 sm:$0xff]   ;;  %535 = vst [vmem:[#allocation2 + $0x49] sm:$0xff] %v502_v11 }
  0xa3   : > { %v12312_v46 = vld [vmem:[#allocation4] ss:$36 sps:$4 sm:$0xff]   ;;  %748 = vst [vmem:[#allocation4 + $0x384] sm:$0xf] %v10534_v44  ;;  %v10512_v54 = vpack.c.bf16 %v566_v51, %v566_v51  ;;  %v12332_v20 = vld [vmem:[#allocation4 + $0x3ac] ss:$36 sps:$4 sm:$0xff]  }
  0xa4   : > { %3797 = vmatmul.mubr.bf16.vlgmr.msra.gmra.mxu0 %v12312_v46  ;;  %v589_v55 = vld [vmem:[#allocation2 + $0x138] sm:$0xff]  ;;  %v590_v56 = vld [vmem:[#allocation2 + $0x140] sm:$0xff]  ;;  %725 = vst [vmem:[#allocation4 + $0x48] sm:$0xf] %v10511_v53  ;;  %1299 = vst [vmem:[#allocation4 + $0xc] sm:$0xf] %v10511_v53 }
  0xa5   : > { %11311 = vmatpush3.bf16.msra.mxu0 %v12323_v47  ;;  %v10535_v61 = vpack.c.bf16 %v589_v55, %v589_v55  ;;  %v10536_v62 = vpack.c.bf16 %v590_v56, %v590_v56  ;;  %726 = vst [vmem:[#allocation4 + $0x6c] sm:$0xf] %v10512_v54  ;;  %1300 = vst [vmem:[#allocation4 + $0x30] sm:$0xf] %v10512_v54  ;;  %3804 = vmatprep.mubr.bf16.mxu0 %v12328_v16  ;;  %v567_v24 = vld [vmem:[#allocation2 + $0x30] sm:$0xff]  ;;  %v568_v25 = vld [vmem:[#allocation2 + $0x38] sm:$0xff] }
  0xa6   : > { %11312 = vmatprep.subr.bf16.mxu0 %v12339_v48  ;;  %536 = vst [vmem:[#allocation2 + $0x51] sm:$0xff] %v503_v12  ;;  %921 = vst [vmem:[#allocation4 + $0xdc] sm:$0xf] %v12356_v13  ;;  %v10513_v26 = vpack.c.bf16 %v567_v24, %v567_v24  ;;  %v10514_v29 = vpack.c.bf16 %v568_v25, %v568_v25  ;;  %v12369_v43 = vld [vmem:[#allocation9 + $0x128] sm:$0xff]   ;;  %v12353_v44 = vld [vmem:[#allocation9 + $0x98] sm:$0xff]  }
  0xa7   : > { %749 = vst [vmem:[#allocation4 + $0x3a8] sm:$0xf] %v10535_v61  ;;  %750 = vst [vmem:[#allocation4 + $0x3cc] sm:$0xf] %v10536_v62  ;;  %v591_v27 = vld [vmem:[#allocation2 + $0x150] sm:$0xff]  ;;  %v947_v59 = vld [vmem:[#allocation2 + $0x2] sm:$0xff] }
  0xa8   : > { %922 = vst [vmem:[#allocation4 + $0x100] sm:$0xf] %v12357_v14  ;;  %559 = vst [vmem:[#allocation2 + $0x169] sm:$0xff] %v526_v18  ;;  %v592_v28 = vld [vmem:[#allocation2 + $0x158] sm:$0xff]  ;;  %v10537_v30 = vpack.c.bf16 %v591_v27, %v591_v27  ;;  %v12354_v47 = vld [vmem:[#allocation9 + $0xd0] sm:$0xff]   ;;  %v10573_v62 = vpack.c.bf16 %v947_v59, %v947_v59 }
  0xa9   : > { %11313 = vmatpush3.bf16.msra.mxu0 %v12341_v49  ;;  %560 = vst [vmem:[#allocation2 + $0x171] sm:$0xff] %v527_v19  ;;  %v10538_v31 = vpack.c.bf16 %v592_v28, %v592_v28  ;;  %727 = vst [vmem:[#allocation4 + $0x90] sm:$0xf] %v10513_v26  ;;  %v569_v37 = vld [vmem:[#allocation2 + $0x48] sm:$0xff]  ;;  %v12355_v48 = vld [vmem:[#allocation9 + $0x90] sm:$0xff]  }
  0xaa   : > { %v12317_v2 = vld [vmem:[#allocation4 + $0x360] ss:$36 sps:$4 sm:$0xff]   ;;  %1301 = vst [vmem:[#allocation4 + $0x54] sm:$0xf] %v10513_v26  ;;  %728 = vst [vmem:[#allocation4 + $0xb4] sm:$0xf] %v10514_v29  ;;  %11314 = vmatprep.subr.bf16.mxu0 %v12367_v35  ;;  %v10515_v39 = vpack.c.bf16 %v569_v37, %v569_v37 }
  0xab   : > { %3893 = vmatmul.mubr.bf16.vlgmr.msra.gmra.mxu1 %v12317_v2  ;;  %751 = vst [vmem:[#allocation4 + $0x3f0] sm:$0xf] %v10537_v30  ;;  %752 = vst [vmem:[#allocation4 + $0x414] sm:$0xf] %v10538_v31  ;;  %v429_v49 = vld [vmem:[%s13366_s12 + $0x18] sm:$0xff]   ;;  %v948_v61 = vld [vmem:[#allocation2 + $0xa] sm:$0xff] }
  0xac   : > { %11199 = vmatpush3.bf16.msra.mxu1 %v12322_v60  ;;  %v12334_v22 = vld [vmem:[#allocation4 + $0x48] ss:$36 sps:$4 sm:$0xff]   ;;  %3900 = vmatprep.mubr.bf16.mxu1 %v12332_v20  ;;  %945 = vst [vmem:[#allocation4 + $0x43c] sm:$0xf] %v12360_v32  ;;  %946 = vst [vmem:[#allocation4 + $0x460] sm:$0xf] %v12361_v33  ;;  %v504_v53 = vunpack.c.l.bf16 %v429_v49  ;;  %v505_v54 = vunpack.c.h.bf16 %v429_v49  ;;  %v10574_v0 = vpack.c.bf16 %v948_v61, %v948_v61 }
  0xad   : > { %11200 = vmatprep.subr.bf16.mxu1 %v12324_v7  ;;  %3805 = vmatmul.mubr.bf16.gmra.mxu0 %v12334_v22  ;;  %1302 = vst [vmem:[#allocation4 + $0x78] sm:$0xf] %v10514_v29  ;;  %v570_v38 = vld [vmem:[#allocation2 + $0x50] sm:$0xff]  ;;  %729 = vst [vmem:[#allocation4 + $0xd8] sm:$0xf] %v10515_v39  ;;  %v12368_v60 = vld [vmem:[#allocation9 + $0x88] sm:$0xff]  }
  0xae   : > { %v12335_v23 = vld [vmem:[#allocation4 + $0x3a8] ss:$36 sps:$4 sm:$0xff]   ;;  %v10516_v40 = vpack.c.bf16 %v570_v38, %v570_v38  ;;  %11315 = vmatpush3.bf16.msra.mxu0 %v12369_v43  ;;  %1303 = vst [vmem:[#allocation4 + $0x9c] sm:$0xf] %v10515_v39  ;;  %v12372_v50 = vld [vmem:[%s13366_s12 + $0x18] ss:$0 sps:$4 sm:$0xff]  }
  0xaf   : > { %v593_v41 = vld [vmem:[#allocation2 + $0x168] sm:$0xff]  ;;  %v12344_v51 = vld [vmem:[#allocation4 + $0x94] ss:$36 sps:$4 sm:$0xff]   ;;  %923 = vst [vmem:[#allocation4 + $0x124] sm:$0xf] %v12372_v50  ;;  %537 = vst [vmem:[#allocation2 + $0x61] sm:$0xff] %v504_v53 }
  0xb0   : > { %11201 = vmatpush3.bf16.msra.mxu1 %v12325_v8  ;;  %v594_v42 = vld [vmem:[#allocation2 + $0x170] sm:$0xff]  ;;  %v10539_v45 = vpack.c.bf16 %v593_v41, %v593_v41  ;;  %730 = vst [vmem:[#allocation4 + $0xfc] sm:$0xf] %v10516_v40  ;;  %1304 = vst [vmem:[#allocation4 + $0xc0] sm:$0xf] %v10516_v40  ;;  %3812 = vmatprep.mubr.bf16.mxu0 %v12344_v51  ;;  %v12380_v1 = vld [vmem:[#allocation9 + $0x160] sm:$0xff]  }
  0xb1   : > { %11202 = vmatprep.subr.bf16.mxu1 %v12336_v9  ;;  %v10540_v46 = vpack.c.bf16 %v594_v42, %v594_v42  ;;  %v12348_v55 = vld [vmem:[#allocation4 + $0x3f4] ss:$36 sps:$4 sm:$0xff]   ;;  %538 = vst [vmem:[#allocation2 + $0x69] sm:$0xff] %v505_v54  ;;  %924 = vst [vmem:[#allocation4 + $0x148] sm:$0xf] %v12373_v58  ;;  %11316 = vmatprep.subr.bf16.mxu0 %v12380_v1  ;;  %v12371_v6 = vld [vmem:[#allocation9 + $0x80] sm:$0xff]  }
  0xb2   : > { %753 = vst [vmem:[#allocation4 + $0x438] sm:$0xf] %v10539_v45  ;;  %v12350_v56 = vld [vmem:[#allocation4 + $0x90] ss:$36 sps:$4 sm:$0xff]   ;;  %v12358_v2 = vld [vmem:[#allocation4 + $0xdc] ss:$36 sps:$4 sm:$0xff]  }
  0xb3   : > { %3901 = vmatmul.mubr.bf16.gmra.mxu1 %v12335_v23  ;;  %754 = vst [vmem:[#allocation4 + $0x45c] sm:$0xf] %v10540_v46  ;;  %v12351_v57 = vld [vmem:[#allocation4 + $0x3f0] ss:$36 sps:$4 sm:$0xff]   ;;  %1107 = vst [vmem:[#allocation4 + $0x8] sm:$0xf] %v10573_v62 }
  0xb4   : > { %11203 = vmatpush3.bf16.msra.mxu1 %v12337_v17  ;;  %3908 = vmatprep.mubr.bf16.mxu1 %v12348_v55  ;;  %v12362_v3 = vld [vmem:[#allocation4 + $0x43c] ss:$36 sps:$4 sm:$0xff]   ;;  %1108 = vst [vmem:[#allocation4 + $0x2c] sm:$0xf] %v10574_v0  ;;  %926 = vst [vmem:[#allocation4 + $0x190] sm:$0xf] %v12383_v10 }
  0xb5   : > { %11204 = vmatprep.subr.bf16.mxu1 %v12338_v21  ;;  %3813 = vmatmul.mubr.bf16.gmra.mxu0 %v12350_v56  ;;  %v12381_v7 = vld [vmem:[#allocation9 + $0x120] sm:$0xff]   ;;  %v433_v20 = vld [vmem:[%s13366_s12 + $0x28] sm:$0xff]   ;;  %v951_v26 = vld [vmem:[#allocation2 + $0x32] sm:$0xff] }
  0xb6   : > { %3820 = vmatprep.mubr.bf16.mxu0 %v12358_v2  ;;  %v431_v8 = vld [vmem:[%s13366_s12 + $0x20] sm:$0xff]   ;;  %11317 = vmatpush3.bf16.msra.mxu0 %v12381_v7  ;;  %v12390_v21 = vld [vmem:[%s13366_s12 + $0x28] ss:$0 sps:$4 sm:$0xff]   ;;  %v508_v23 = vunpack.c.l.bf16 %v433_v20  ;;  %v509_v24 = vunpack.c.h.bf16 %v433_v20  ;;  %v12391_v25 = vld [vmem:[%s13366_s12 + $0x2c] ss:$0 sps:$4 sm:$0xff]   ;;  %v10577_v28 = vpack.c.bf16 %v951_v26, %v951_v26 }
  0xb7   : > { %v12364_v4 = vld [vmem:[#allocation4 + $0xd8] ss:$36 sps:$4 sm:$0xff]   ;;  %v12382_v9 = vld [vmem:[%s13366_s12 + $0x20] ss:$0 sps:$4 sm:$0xff]   ;;  %v506_v13 = vunpack.c.l.bf16 %v431_v8  ;;  %v507_v14 = vunpack.c.h.bf16 %v431_v8  ;;  %v950_v18 = vld [vmem:[#allocation2 + $0x22] sm:$0xff] }
  0xb8   : > { %11205 = vmatpush3.bf16.msra.mxu1 %v12340_v34  ;;  %v571_v11 = vld [vmem:[#allocation2 + $0x60] sm:$0xff]  ;;  %v572_v12 = vld [vmem:[#allocation2 + $0x68] sm:$0xff]  ;;  %925 = vst [vmem:[#allocation4 + $0x16c] sm:$0xf] %v12382_v9  ;;  %v10576_v22 = vpack.c.bf16 %v950_v18, %v950_v18  ;;  %927 = vst [vmem:[#allocation4 + $0x1b4] sm:$0xf] %v12390_v21 }
  0xb9   : > { %11206 = vmatprep.subr.bf16.mxu1 %v12352_v36  ;;  %v949_v15 = vld [vmem:[#allocation2 + $0x1a] sm:$0xff]  ;;  %v10517_v16 = vpack.c.bf16 %v571_v11, %v571_v11  ;;  %v10518_v17 = vpack.c.bf16 %v572_v12, %v572_v12  ;;  %539 = vst [vmem:[#allocation2 + $0x79] sm:$0xff] %v506_v13  ;;  %540 = vst [vmem:[#allocation2 + $0x81] sm:$0xff] %v507_v14  ;;  %v12378_v30 = vld [vmem:[#allocation4 + $0xc] ss:$36 sps:$4 sm:$0xff]  }
  0xba   : > { %v12365_v5 = vld [vmem:[#allocation4 + $0x438] ss:$36 sps:$4 sm:$0xff]   ;;  %v10575_v19 = vpack.c.bf16 %v949_v15, %v949_v15  ;;  %1110 = vst [vmem:[#allocation4 + $0x74] sm:$0xf] %v10576_v22  ;;  %541 = vst [vmem:[#allocation2 + $0x91] sm:$0xff] %v508_v23  ;;  %v435_v34 = vld [vmem:[%s13366_s12 + $0x30] sm:$0xff]  }
  0xbb   : > { %3909 = vmatmul.mubr.bf16.gmra.mxu1 %v12351_v57  ;;  %v952_v27 = vld [vmem:[#allocation2 + $0x3a] sm:$0xff]  ;;  %731 = vst [vmem:[#allocation4 + $0x120] sm:$0xf] %v10517_v16  ;;  %732 = vst [vmem:[#allocation4 + $0x144] sm:$0xf] %v10518_v17  ;;  %v510_v36 = vunpack.c.l.bf16 %v435_v34  ;;  %v511_v37 = vunpack.c.h.bf16 %v435_v34  ;;  %v953_v39 = vld [vmem:[#allocation2 + $0x4a] sm:$0xff] }
  0xbc   : > { %11207 = vmatpush3.bf16.msra.mxu1 %v12353_v44  ;;  %3916 = vmatprep.mubr.bf16.mxu1 %v12362_v3  ;;  %1109 = vst [vmem:[#allocation4 + $0x50] sm:$0xf] %v10575_v19  ;;  %v10578_v29 = vpack.c.bf16 %v952_v27, %v952_v27  ;;  %1305 = vst [vmem:[#allocation4 + $0xe4] sm:$0xf] %v10517_v16  ;;  %v12376_v31 = vld [vmem:[#allocation4 + $0x8] ss:$36 sps:$4 sm:$0xff]   ;;  %v10579_v41 = vpack.c.bf16 %v953_v39, %v953_v39 }
  0xbd   : > { %11208 = vmatprep.subr.bf16.mxu1 %v12354_v47  ;;  %3821 = vmatmul.mubr.bf16.gmra.mxu0 %v12364_v4  ;;  %1306 = vst [vmem:[#allocation4 + $0x108] sm:$0xf] %v10518_v17  ;;  %1683 = vst [vmem:[#allocation4 + $0x14] sm:$0xf] %v10575_v19  ;;  %v12398_v32 = vld [vmem:[#allocation9 + $0x158] sm:$0xff]   ;;  %v12408_v43 = vld [vmem:[#allocation9 + $0x150] sm:$0xff]  }
  0xbe   : > { %542 = vst [vmem:[#allocation2 + $0x99] sm:$0xff] %v509_v24  ;;  %928 = vst [vmem:[#allocation4 + $0x1d8] sm:$0xf] %v12391_v25  ;;  %v12399_v33 = vld [vmem:[#allocation9 + $0x118] sm:$0xff]   ;;  %v12400_v35 = vld [vmem:[%s13366_s12 + $0x30] ss:$0 sps:$4 sm:$0xff]   ;;  %11318 = vmatprep.subr.bf16.mxu0 %v12398_v32 }
  0xbf   : > { %1684 = vst [vmem:[#allocation4 + $0x38] sm:$0xf] %v10576_v22  ;;  %1111 = vst [vmem:[#allocation4 + $0x98] sm:$0xf] %v10577_v28  ;;  %v12401_v38 = vld [vmem:[%s13366_s12 + $0x34] ss:$0 sps:$4 sm:$0xff]   ;;  %11319 = vmatpush3.bf16.msra.mxu0 %v12399_v33 }
  0xc0   : > { %11209 = vmatpush3.bf16.msra.mxu1 %v12355_v48  ;;  %1112 = vst [vmem:[#allocation4 + $0xbc] sm:$0xf] %v10578_v29  ;;  %1685 = vst [vmem:[#allocation4 + $0x5c] sm:$0xf] %v10577_v28  ;;  %v954_v40 = vld [vmem:[#allocation2 + $0x52] sm:$0xff]  ;;  %v574_v45 = vld [vmem:[#allocation2 + $0x80] sm:$0xff]  ;;  %11320 = vmatprep.subr.bf16.mxu0 %v12408_v43 }
  0xc1   : > { %11210 = vmatprep.subr.bf16.mxu1 %v12366_v52  ;;  %1686 = vst [vmem:[#allocation4 + $0x80] sm:$0xf] %v10578_v29  ;;  %929 = vst [vmem:[#allocation4 + $0x1fc] sm:$0xf] %v12400_v35  ;;  %v10580_v42 = vpack.c.bf16 %v954_v40, %v954_v40  ;;  %v573_v44 = vld [vmem:[#allocation2 + $0x78] sm:$0xff]  ;;  %v10520_v48 = vpack.c.bf16 %v574_v45, %v574_v45  ;;  %v575_v51 = vld [vmem:[#allocation2 + $0x90] sm:$0xff] }
  0xc2   : > { %1503 = vst [vmem:[#allocation4 + $0x1c0] sm:$0xf] %v12400_v35  ;;  %543 = vst [vmem:[#allocation2 + $0xa9] sm:$0xff] %v510_v36  ;;  %v12374_v46 = vld [vmem:[#allocation4 + $0x124] ss:$36 sps:$4 sm:$0xff]   ;;  %v10519_v47 = vpack.c.bf16 %v573_v44, %v573_v44  ;;  %v10521_v53 = vpack.c.bf16 %v575_v51, %v575_v51  ;;  %v12409_v57 = vld [vmem:[#allocation9 + $0x110] sm:$0xff]  }
  0xc3   : > { %3917 = vmatmul.mubr.bf16.gmra.mxu1 %v12365_v5  ;;  %544 = vst [vmem:[#allocation2 + $0xb1] sm:$0xff] %v511_v37  ;;  %930 = vst [vmem:[#allocation4 + $0x220] sm:$0xf] %v12401_v38  ;;  %v12379_v49 = vld [vmem:[#allocation4 + $0x120] ss:$36 sps:$4 sm:$0xff]   ;;  %3828 = vmatprep.mubr.bf16.mxu0 %v12374_v46  ;;  %v437_v58 = vld [vmem:[%s13366_s12 + $0x38] sm:$0xff]  }
  0xc4   : > { %11211 = vmatpush3.bf16.msra.mxu1 %v12368_v60  ;;  %3957 = vmatprep.mubr.bf16.mxu1 %v12378_v30  ;;  %1504 = vst [vmem:[#allocation4 + $0x1e4] sm:$0xf] %v12401_v38  ;;  %1113 = vst [vmem:[#allocation4 + $0xe0] sm:$0xf] %v10579_v41  ;;  %v12386_v50 = vld [vmem:[#allocation4 + $0x54] ss:$36 sps:$4 sm:$0xff]   ;;  %v512_v62 = vunpack.c.l.bf16 %v437_v58 }
  0xc5   : > { %11212 = vmatprep.subr.bf16.mxu1 %v12370_v63  ;;  %1114 = vst [vmem:[#allocation4 + $0x104] sm:$0xf] %v10580_v42  ;;  %1687 = vst [vmem:[#allocation4 + $0xa4] sm:$0xf] %v10579_v41  ;;  %3829 = vmatmul.mubr.bf16.gmra.mxu0 %v12379_v49  ;;  %v576_v52 = vld [vmem:[#allocation2 + $0x98] sm:$0xff]  ;;  %v513_v63 = vunpack.c.h.bf16 %v437_v58  ;;  %v955_v3 = vld [vmem:[#allocation2 + $0x62] sm:$0xff] }
  0xc6   : > { %1688 = vst [vmem:[#allocation4 + $0xc8] sm:$0xf] %v10580_v42  ;;  %733 = vst [vmem:[#allocation4 + $0x168] sm:$0xf] %v10519_v47  ;;  %v12389_v54 = vld [vmem:[#allocation4 + $0x50] ss:$36 sps:$4 sm:$0xff]   ;;  %v10522_v55 = vpack.c.bf16 %v576_v52, %v576_v52  ;;  %11321 = vmatpush3.bf16.msra.mxu0 %v12409_v57 }
  0xc7   : > { %734 = vst [vmem:[#allocation4 + $0x18c] sm:$0xf] %v10520_v48  ;;  %1307 = vst [vmem:[#allocation4 + $0x12c] sm:$0xf] %v10519_v47  ;;  %v12394_v56 = vld [vmem:[#allocation4 + $0x9c] ss:$36 sps:$4 sm:$0xff]  }
  0xc8   : > { %11213 = vmatpush3.bf16.msra.mxu1 %v12371_v6  ;;  %1308 = vst [vmem:[#allocation4 + $0x150] sm:$0xf] %v10520_v48  ;;  %735 = vst [vmem:[#allocation4 + $0x1b0] sm:$0xf] %v10521_v53  ;;  %v12410_v59 = vld [vmem:[%s13366_s12 + $0x38] ss:$0 sps:$4 sm:$0xff]   ;;  %v10581_v6 = vpack.c.bf16 %v955_v3, %v955_v3 }
  0xc9   : > { %1309 = vst [vmem:[#allocation4 + $0x174] sm:$0xf] %v10521_v53  ;;  %736 = vst [vmem:[#allocation4 + $0x1d4] sm:$0xf] %v10522_v55  ;;  %v577_v60 = vld [vmem:[#allocation2 + $0xa8] sm:$0xff]  ;;  %v439_v9 = vld [vmem:[%s13366_s12 + $0x40] sm:$0xff]  }
  0xca   : > { %v578_v61 = vld [vmem:[#allocation2 + $0xb0] sm:$0xff]  ;;  %v12411_v0 = vld [vmem:[%s13366_s12 + $0x3c] ss:$0 sps:$4 sm:$0xff]   ;;  %1310 = vst [vmem:[#allocation4 + $0x198] sm:$0xf] %v10522_v55  ;;  %v10523_v1 = vpack.c.bf16 %v577_v60, %v577_v60  ;;  %545 = vst [vmem:[#allocation2 + $0xc1] sm:$0xff] %v512_v62  ;;  %v514_v12 = vunpack.c.l.bf16 %v439_v9  ;;  %v515_v13 = vunpack.c.h.bf16 %v439_v9 }
  0xcb   : > { %3958 = vmatmul.mubr.bf16.vlgmr.msra.gmra.mxu1 %v12376_v31  ;;  %v10524_v2 = vpack.c.bf16 %v578_v61, %v578_v61  ;;  %931 = vst [vmem:[#allocation4 + $0x244] sm:$0xf] %v12410_v59  ;;  %546 = vst [vmem:[#allocation2 + $0xc9] sm:$0xff] %v513_v63  ;;  %v956_v4 = vld [vmem:[#allocation2 + $0x6a] sm:$0xff]  ;;  %v12418_v10 = vld [vmem:[%s13366_s12 + $0x40] ss:$0 sps:$4 sm:$0xff]  }
  0xcc   : > { %3965 = vmatprep.mubr.bf16.mxu1 %v12386_v50  ;;  %932 = vst [vmem:[#allocation4 + $0x268] sm:$0xf] %v12411_v0  ;;  %v12384_v5 = vld [vmem:[#allocation4 + $0x16c] ss:$36 sps:$4 sm:$0xff]   ;;  %737 = vst [vmem:[#allocation4 + $0x1f8] sm:$0xf] %v10523_v1  ;;  %v10582_v7 = vpack.c.bf16 %v956_v4, %v956_v4 }
  0xcd   : > { %738 = vst [vmem:[#allocation4 + $0x21c] sm:$0xf] %v10524_v2  ;;  %1311 = vst [vmem:[#allocation4 + $0x1bc] sm:$0xf] %v10523_v1  ;;  %3836 = vmatprep.mubr.bf16.mxu0 %v12384_v5  ;;  %v12397_v11 = vld [vmem:[#allocation4 + $0x98] ss:$36 sps:$4 sm:$0xff]  }
  0xce   : > { %1312 = vst [vmem:[#allocation4 + $0x1e0] sm:$0xf] %v10524_v2  ;;  %v12388_v8 = vld [vmem:[#allocation4 + $0x168] ss:$36 sps:$4 sm:$0xff]   ;;  %1115 = vst [vmem:[#allocation4 + $0x128] sm:$0xf] %v10581_v6 }
  0xcf   : > { %1116 = vst [vmem:[#allocation4 + $0x14c] sm:$0xf] %v10582_v7  ;;  %v12419_v14 = vld [vmem:[%s13366_s12 + $0x44] ss:$0 sps:$4 sm:$0xff]   ;;  %v957_v15 = vld [vmem:[#allocation2 + $0x7a] sm:$0xff]  ;;  %3837 = vmatmul.mubr.bf16.gmra.mxu0 %v12388_v8  ;;  %547 = vst [vmem:[#allocation2 + $0xd9] sm:$0xff] %v514_v12 }
  0xd0   : > { %v958_v16 = vld [vmem:[#allocation2 + $0x82] sm:$0xff]  ;;  %1689 = vst [vmem:[#allocation4 + $0xec] sm:$0xf] %v10581_v6  ;;  %1690 = vst [vmem:[#allocation4 + $0x110] sm:$0xf] %v10582_v7  ;;  %v10583_v17 = vpack.c.bf16 %v957_v15, %v957_v15  ;;  %v959_v34 = vld [vmem:[#allocation2 + $0x92] sm:$0xff] }
  0xd1   : > { %933 = vst [vmem:[#allocation4 + $0x28c] sm:$0xf] %v12418_v10  ;;  %v10584_v18 = vpack.c.bf16 %v958_v16, %v958_v16  ;;  %v12392_v19 = vld [vmem:[#allocation4 + $0x1b4] ss:$36 sps:$4 sm:$0xff]   ;;  %v12404_v20 = vld [vmem:[#allocation4 + $0xe4] ss:$36 sps:$4 sm:$0xff]   ;;  %v10585_v38 = vpack.c.bf16 %v959_v34, %v959_v34 }
  0xd2   : > { %548 = vst [vmem:[#allocation2 + $0xe1] sm:$0xff] %v515_v13  ;;  %934 = vst [vmem:[#allocation4 + $0x2b0] sm:$0xf] %v12419_v14  ;;  %v12426_v21 = vld [vmem:[#allocation9 + $0x148] sm:$0xff]   ;;  %3844 = vmatprep.mubr.bf16.mxu0 %v12392_v19  ;;  %v579_v22 = vld [vmem:[#allocation2 + $0xc0] sm:$0xff] }
  0xd3   : > { %3966 = vmatmul.mubr.bf16.gmra.mxu1 %v12389_v54  ;;  %1117 = vst [vmem:[#allocation4 + $0x170] sm:$0xf] %v10583_v17  ;;  %1118 = vst [vmem:[#allocation4 + $0x194] sm:$0xf] %v10584_v18  ;;  %v580_v23 = vld [vmem:[#allocation2 + $0xc8] sm:$0xff]  ;;  %v10525_v26 = vpack.c.bf16 %v579_v22, %v579_v22  ;;  %11322 = vmatprep.subr.bf16.mxu0 %v12426_v21  ;;  %v960_v37 = vld [vmem:[#allocation2 + $0x9a] sm:$0xff] }
  0xd4   : > { %3973 = vmatprep.mubr.bf16.mxu1 %v12394_v56  ;;  %1691 = vst [vmem:[#allocation4 + $0x134] sm:$0xf] %v10583_v17  ;;  %1692 = vst [vmem:[#allocation4 + $0x158] sm:$0xf] %v10584_v18  ;;  %v12427_v24 = vld [vmem:[#allocation9 + $0x108] sm:$0xff]   ;;  %v10526_v27 = vpack.c.bf16 %v580_v23, %v580_v23  ;;  %v10586_v42 = vpack.c.bf16 %v960_v37, %v960_v37  ;;  %v12436_v45 = vld [vmem:[#allocation9 + $0x140] sm:$0xff]  }
  0xd5   : > { %v12396_v25 = vld [vmem:[#allocation4 + $0x1b0] ss:$36 sps:$4 sm:$0xff]   ;;  %v12402_v28 = vld [vmem:[#allocation4 + $0x1fc] ss:$36 sps:$4 sm:$0xff]   ;;  %11323 = vmatpush3.bf16.msra.mxu0 %v12427_v24  ;;  %v441_v29 = vld [vmem:[%s13366_s12 + $0x48] sm:$0xff]  }
  0xd6   : > { %v12428_v30 = vld [vmem:[%s13366_s12 + $0x48] ss:$0 sps:$4 sm:$0xff]   ;;  %739 = vst [vmem:[#allocation4 + $0x240] sm:$0xf] %v10525_v26  ;;  %740 = vst [vmem:[#allocation4 + $0x264] sm:$0xf] %v10526_v27  ;;  %v516_v31 = vunpack.c.l.bf16 %v441_v29  ;;  %v517_v32 = vunpack.c.h.bf16 %v441_v29  ;;  %11324 = vmatprep.subr.bf16.mxu0 %v12436_v45 }
  0xd7   : > { %1313 = vst [vmem:[#allocation4 + $0x204] sm:$0xf] %v10525_v26  ;;  %1314 = vst [vmem:[#allocation4 + $0x228] sm:$0xf] %v10526_v27  ;;  %v12429_v33 = vld [vmem:[%s13366_s12 + $0x4c] ss:$0 sps:$4 sm:$0xff]   ;;  %3845 = vmatmul.mubr.bf16.gmra.mxu0 %v12396_v25 }
  0xd8   : > { %935 = vst [vmem:[#allocation4 + $0x2d4] sm:$0xf] %v12428_v30  ;;  %1509 = vst [vmem:[#allocation4 + $0x298] sm:$0xf] %v12428_v30  ;;  %v581_v35 = vld [vmem:[#allocation2 + $0xd8] sm:$0xff]  ;;  %3852 = vmatprep.mubr.bf16.mxu0 %v12402_v28  ;;  %v12437_v46 = vld [vmem:[#allocation9 + $0x100] sm:$0xff]  }
  0xd9   : > { %v582_v36 = vld [vmem:[#allocation2 + $0xe0] sm:$0xff]  ;;  %549 = vst [vmem:[#allocation2 + $0xf1] sm:$0xff] %v516_v31  ;;  %550 = vst [vmem:[#allocation2 + $0xf9] sm:$0xff] %v517_v32  ;;  %v10527_v40 = vpack.c.bf16 %v581_v35, %v581_v35  ;;  %v12406_v43 = vld [vmem:[#allocation4 + $0x1f8] ss:$36 sps:$4 sm:$0xff]   ;;  %11325 = vmatpush3.bf16.msra.mxu0 %v12437_v46 }
  0xda   : > { %v12407_v39 = vld [vmem:[#allocation4 + $0xe0] ss:$36 sps:$4 sm:$0xff]   ;;  %v10528_v41 = vpack.c.bf16 %v582_v36, %v582_v36  ;;  %936 = vst [vmem:[#allocation4 + $0x2f8] sm:$0xf] %v12429_v33  ;;  %1510 = vst [vmem:[#allocation4 + $0x2bc] sm:$0xf] %v12429_v33 }
  0xdb   : > { %3974 = vmatmul.mubr.bf16.gmra.mxu1 %v12397_v11  ;;  %v12414_v44 = vld [vmem:[#allocation4 + $0x12c] ss:$36 sps:$4 sm:$0xff]   ;;  %1119 = vst [vmem:[#allocation4 + $0x1b8] sm:$0xf] %v10585_v38  ;;  %1693 = vst [vmem:[#allocation4 + $0x17c] sm:$0xf] %v10585_v38 }
  0xdc   : > { %3981 = vmatprep.mubr.bf16.mxu1 %v12404_v20  ;;  %741 = vst [vmem:[#allocation4 + $0x288] sm:$0xf] %v10527_v40  ;;  %742 = vst [vmem:[#allocation4 + $0x2ac] sm:$0xf] %v10528_v41  ;;  %v443_v47 = vld [vmem:[%s13366_s12 + $0x50] sm:$0xff]   ;;  %v12446_v62 = vld [vmem:[#allocation9 + $0x1f8] sm:$0xff]  }
  0xdd   : > { %1120 = vst [vmem:[#allocation4 + $0x1dc] sm:$0xf] %v10586_v42  ;;  %1315 = vst [vmem:[#allocation4 + $0x24c] sm:$0xf] %v10527_v40  ;;  %v12438_v48 = vld [vmem:[%s13366_s12 + $0x50] ss:$0 sps:$4 sm:$0xff]   ;;  %v518_v50 = vunpack.c.l.bf16 %v443_v47  ;;  %v519_v51 = vunpack.c.h.bf16 %v443_v47  ;;  %11422 = vmatprep.subr.bf16.mxu1 %v12446_v62 }
  0xde   : > { %1316 = vst [vmem:[#allocation4 + $0x270] sm:$0xf] %v10528_v41  ;;  %1694 = vst [vmem:[#allocation4 + $0x1a0] sm:$0xf] %v10586_v42  ;;  %v12412_v49 = vld [vmem:[#allocation4 + $0x244] ss:$36 sps:$4 sm:$0xff]  }
  0xdf   : > { %v12439_v52 = vld [vmem:[%s13366_s12 + $0x54] ss:$0 sps:$4 sm:$0xff]   ;;  %937 = vst [vmem:[#allocation4 + $0x31c] sm:$0xf] %v12438_v48  ;;  %v961_v53 = vld [vmem:[#allocation2 + $0xaa] sm:$0xff]  ;;  %551 = vst [vmem:[#allocation2 + $0x109] sm:$0xff] %v518_v50  ;;  %3853 = vmatmul.mubr.bf16.gmra.mxu0 %v12406_v43 }
  0xe0   : > { %1511 = vst [vmem:[#allocation4 + $0x2e0] sm:$0xf] %v12438_v48  ;;  %v12417_v54 = vld [vmem:[#allocation4 + $0x128] ss:$36 sps:$4 sm:$0xff]   ;;  %v583_v55 = vld [vmem:[#allocation2 + $0xf0] sm:$0xff]  ;;  %v584_v56 = vld [vmem:[#allocation2 + $0xf8] sm:$0xff]  ;;  %v10587_v58 = vpack.c.bf16 %v961_v53, %v961_v53  ;;  %3860 = vmatprep.mubr.bf16.mxu0 %v12412_v49 }
  0xe1   : > { %552 = vst [vmem:[#allocation2 + $0x111] sm:$0xff] %v519_v51  ;;  %v962_v57 = vld [vmem:[#allocation2 + $0xb2] sm:$0xff]  ;;  %v10529_v59 = vpack.c.bf16 %v583_v55, %v583_v55  ;;  %v10530_v60 = vpack.c.bf16 %v584_v56, %v584_v56  ;;  %938 = vst [vmem:[#allocation4 + $0x340] sm:$0xf] %v12439_v52  ;;  %v12416_v0 = vld [vmem:[#allocation4 + $0x240] ss:$36 sps:$4 sm:$0xff]  }
  0xe2   : > { %v10588_v61 = vpack.c.bf16 %v962_v57, %v962_v57  ;;  %1512 = vst [vmem:[#allocation4 + $0x304] sm:$0xf] %v12439_v52  ;;  %1121 = vst [vmem:[#allocation4 + $0x200] sm:$0xf] %v10587_v58  ;;  %v12422_v63 = vld [vmem:[#allocation4 + $0x174] ss:$36 sps:$4 sm:$0xff]  }
  0xe3   : > { %3982 = vmatmul.mubr.bf16.gmra.mxu1 %v12407_v39  ;;  %1695 = vst [vmem:[#allocation4 + $0x1c4] sm:$0xf] %v10587_v58  ;;  %743 = vst [vmem:[#allocation4 + $0x2d0] sm:$0xf] %v10529_v59  ;;  %v12420_v1 = vld [vmem:[#allocation4 + $0x28c] ss:$36 sps:$4 sm:$0xff]  }
  0xe4   : > { %3989 = vmatprep.mubr.bf16.mxu1 %v12414_v44  ;;  %744 = vst [vmem:[#allocation4 + $0x2f4] sm:$0xf] %v10530_v60  ;;  %1122 = vst [vmem:[#allocation4 + $0x224] sm:$0xf] %v10588_v61  ;;  %v12447_v2 = vld [vmem:[#allocation9 + $0x1b8] sm:$0xff]   ;;  %v963_v3 = vld [vmem:[#allocation2 + $0xc2] sm:$0xff] }
  0xe5   : > { %1317 = vst [vmem:[#allocation4 + $0x294] sm:$0xf] %v10529_v59  ;;  %1318 = vst [vmem:[#allocation4 + $0x2b8] sm:$0xf] %v10530_v60  ;;  %v964_v4 = vld [vmem:[#allocation2 + $0xca] sm:$0xff]  ;;  %v10589_v5 = vpack.c.bf16 %v963_v3, %v963_v3  ;;  %v1331_v6 = vld [vmem:[#allocation2 + $0x19] sm:$0xff]  ;;  %11423 = vmatpush3.bf16.msra.mxu1 %v12447_v2 }
  0xe6   : > { %1696 = vst [vmem:[#allocation4 + $0x1e8] sm:$0xf] %v10588_v61  ;;  %v1332_v7 = vld [vmem:[#allocation2 + $0x21] sm:$0xff]  ;;  %v10590_v10 = vpack.c.bf16 %v964_v4, %v964_v4  ;;  %v10637_v11 = vpack.c.bf16 %v1331_v6, %v1331_v6  ;;  %v13509_v15 = vld [vmem:[#allocation9 + $0x238] sm:$0xff]   ;;  %v12425_v20 = vld [vmem:[#allocation4 + $0x170] ss:$36 sps:$4 sm:$0xff]  }
  0xe7   : > { %v585_v8 = vld [vmem:[#allocation2 + $0x108] sm:$0xff]  ;;  %v10638_v12 = vpack.c.bf16 %v1332_v7, %v1332_v7  ;;  %1123 = vst [vmem:[#allocation4 + $0x248] sm:$0xf] %v10589_v5  ;;  %v965_v16 = vld [vmem:[#allocation2 + $0xda] sm:$0xff]  ;;  %1697 = vst [vmem:[#allocation4 + $0x20c] sm:$0xf] %v10589_v5  ;;  %3861 = vmatmul.mubr.bf16.gmra.mxu0 %v12416_v0  ;;  %12054 = vmatprep.subr.bf16.mxu0 %v13509_v15 }
  0xe8   : > { %v586_v9 = vld [vmem:[#allocation2 + $0x110] sm:$0xff]  ;;  %v10531_v13 = vpack.c.bf16 %v585_v8, %v585_v8  ;;  %1124 = vst [vmem:[#allocation4 + $0x26c] sm:$0xf] %v10590_v10  ;;  %1491 = vst [vmem:[#allocation4 + $0x10] sm:$0xf] %v10637_v11  ;;  %v966_v17 = vld [vmem:[#allocation2 + $0xe2] sm:$0xff]  ;;  %v10591_v18 = vpack.c.bf16 %v965_v16, %v965_v16  ;;  %3868 = vmatprep.mubr.bf16.mxu0 %v12420_v1 }
  0xe9   : > { %v10532_v14 = vpack.c.bf16 %v586_v9, %v586_v9  ;;  %1492 = vst [vmem:[#allocation4 + $0x34] sm:$0xf] %v10638_v12  ;;  %v1333_v19 = vld [vmem:[#allocation2 + $0x31] sm:$0xff]  ;;  %1698 = vst [vmem:[#allocation4 + $0x230] sm:$0xf] %v10590_v10  ;;  %v10592_v21 = vpack.c.bf16 %v966_v17, %v966_v17  ;;  %v1334_v26 = vld [vmem:[#allocation2 + $0x39] sm:$0xff] }
  0xea   : > { %745 = vst [vmem:[#allocation4 + $0x318] sm:$0xf] %v10531_v13  ;;  %v10639_v22 = vpack.c.bf16 %v1333_v19, %v1333_v19  ;;  %1319 = vst [vmem:[#allocation4 + $0x2dc] sm:$0xf] %v10531_v13  ;;  %v12424_v23 = vld [vmem:[#allocation4 + $0x288] ss:$36 sps:$4 sm:$0xff]   ;;  %v10640_v27 = vpack.c.bf16 %v1334_v26, %v1334_v26 }
  0xeb   : > { %3990 = vmatmul.mubr.bf16.gmra.mxu1 %v12417_v54  ;;  %746 = vst [vmem:[#allocation4 + $0x33c] sm:$0xf] %v10532_v14  ;;  %1320 = vst [vmem:[#allocation4 + $0x300] sm:$0xf] %v10532_v14  ;;  %v12432_v24 = vld [vmem:[#allocation4 + $0x1bc] ss:$36 sps:$4 sm:$0xff]  }
  0xec   : > { %3997 = vmatprep.mubr.bf16.mxu1 %v12422_v63  ;;  %1125 = vst [vmem:[#allocation4 + $0x290] sm:$0xf] %v10591_v18  ;;  %1699 = vst [vmem:[#allocation4 + $0x254] sm:$0xf] %v10591_v18  ;;  %v12430_v25 = vld [vmem:[#allocation4 + $0x2d4] ss:$36 sps:$4 sm:$0xff]  }
  0xed   : > { %1126 = vst [vmem:[#allocation4 + $0x2b4] sm:$0xf] %v10592_v21  ;;  %1493 = vst [vmem:[#allocation4 + $0x58] sm:$0xf] %v10639_v22  ;;  %v12461_v28 = vld [vmem:[#allocation9 + $0x1f0] sm:$0xff]   ;;  %v968_v31 = vld [vmem:[#allocation2 + $0xfa] sm:$0xff] }
  0xee   : > { %1700 = vst [vmem:[#allocation4 + $0x278] sm:$0xf] %v10592_v21  ;;  %2068 = vst [vmem:[#allocation4 + $0x1c] sm:$0xf] %v10639_v22  ;;  %v12462_v29 = vld [vmem:[#allocation9 + $0x1b0] sm:$0xff]   ;;  %11424 = vmatprep.subr.bf16.mxu1 %v12461_v28  ;;  %v10594_v34 = vpack.c.bf16 %v968_v31, %v968_v31  ;;  %v1161_v45 = vld [vmem:[#allocation2 + $0x120] sm:$0xff] }
  0xef   : > { %v967_v30 = vld [vmem:[#allocation2 + $0xf2] sm:$0xff]  ;;  %1494 = vst [vmem:[#allocation4 + $0x7c] sm:$0xf] %v10640_v27  ;;  %v1335_v33 = vld [vmem:[#allocation2 + $0x49] sm:$0xff]  ;;  %2069 = vst [vmem:[#allocation4 + $0x40] sm:$0xf] %v10640_v27  ;;  %11425 = vmatpush3.bf16.msra.mxu1 %v12462_v29  ;;  %3869 = vmatmul.mubr.bf16.gmra.mxu0 %v12424_v23  ;;  %v10627_v48 = vpack.c.bf16 %v1161_v45, %v1161_v45 }
  0xf0   : > { %v10593_v32 = vpack.c.bf16 %v967_v30, %v967_v30  ;;  %v10641_v35 = vpack.c.bf16 %v1335_v33, %v1335_v33  ;;  %3876 = vmatprep.mubr.bf16.mxu0 %v12430_v25  ;;  %v12435_v36 = vld [vmem:[#allocation4 + $0x1b8] ss:$36 sps:$4 sm:$0xff]   ;;  %1128 = vst [vmem:[#allocation4 + $0x2fc] sm:$0xf] %v10594_v34  ;;  %1702 = vst [vmem:[#allocation4 + $0x2c0] sm:$0xf] %v10594_v34 }
  0xf1   : > { %v12442_v37 = vld [vmem:[#allocation4 + $0x204] ss:$36 sps:$4 sm:$0xff]   ;;  %v12434_v38 = vld [vmem:[#allocation4 + $0x2d0] ss:$36 sps:$4 sm:$0xff]   ;;  %v12440_v40 = vld [vmem:[#allocation4 + $0x31c] ss:$36 sps:$4 sm:$0xff]  }
  0xf2   : > { %1127 = vst [vmem:[#allocation4 + $0x2d8] sm:$0xf] %v10593_v32  ;;  %1701 = vst [vmem:[#allocation4 + $0x29c] sm:$0xf] %v10593_v32  ;;  %v1336_v39 = vld [vmem:[#allocation2 + $0x51] sm:$0xff]  ;;  %v1162_v50 = vld [vmem:[#allocation2 + $0x128] sm:$0xff] }
  0xf3   : > { %3998 = vmatmul.mubr.bf16.gmra.mxu1 %v12425_v20  ;;  %1495 = vst [vmem:[#allocation4 + $0xa0] sm:$0xf] %v10641_v35  ;;  %2070 = vst [vmem:[#allocation4 + $0x64] sm:$0xf] %v10641_v35  ;;  %v10642_v41 = vpack.c.bf16 %v1336_v39, %v1336_v39  ;;  %v969_v42 = vld [vmem:[#allocation2 + $0x10a] sm:$0xff]  ;;  %v970_v43 = vld [vmem:[#allocation2 + $0x112] sm:$0xff]  ;;  %v10628_v53 = vpack.c.bf16 %v1162_v50, %v1162_v50 }
  0xf4   : > { %4005 = vmatprep.mubr.bf16.mxu1 %v12432_v24  ;;  %v10595_v44 = vpack.c.bf16 %v969_v42, %v969_v42  ;;  %v12445_v46 = vld [vmem:[#allocation4 + $0x200] ss:$36 sps:$4 sm:$0xff]   ;;  %v10596_v47 = vpack.c.bf16 %v970_v43, %v970_v43  ;;  %v12448_v49 = vld [vmem:[#allocation4 + $0x24c] ss:$36 sps:$4 sm:$0xff]   ;;  %v12444_v52 = vld [vmem:[#allocation4 + $0x318] ss:$36 sps:$4 sm:$0xff]  }
  0xf5   : > { %1496 = vst [vmem:[#allocation4 + $0xc4] sm:$0xf] %v10642_v41  ;;  %2071 = vst [vmem:[#allocation4 + $0x88] sm:$0xf] %v10642_v41  ;;  %v1337_v51 = vld [vmem:[#allocation2 + $0x61] sm:$0xff]  ;;  %v1338_v54 = vld [vmem:[#allocation2 + $0x69] sm:$0xff] }
  0xf6   : > { %1129 = vst [vmem:[#allocation4 + $0x320] sm:$0xf] %v10595_v44  ;;  %1703 = vst [vmem:[#allocation4 + $0x2e4] sm:$0xf] %v10595_v44  ;;  %v10643_v55 = vpack.c.bf16 %v1337_v51, %v1337_v51  ;;  %v12452_v56 = vld [vmem:[#allocation4 + $0x14] ss:$36 sps:$4 sm:$0xff]   ;;  %v10644_v57 = vpack.c.bf16 %v1338_v54, %v1338_v54 }
  0xf7   : > { %3877 = vmatmul.mubr.bf16.gmra.mxu0 %v12434_v38  ;;  %1130 = vst [vmem:[#allocation4 + $0x344] sm:$0xf] %v10596_v47  ;;  %1321 = vst [vmem:[#allocation4 + $0x324] sm:$0xf] %v10627_v48  ;;  %v12476_v58 = vld [vmem:[#allocation9 + $0x1e8] sm:$0xff]   ;;  %v1163_v0 = vld [vmem:[#allocation2 + $0x138] sm:$0xff] }
  0xf8   : > { %3884 = vmatprep.mubr.bf16.mxu0 %v12440_v40  ;;  %1704 = vst [vmem:[#allocation4 + $0x308] sm:$0xf] %v10596_v47  ;;  %1322 = vst [vmem:[#allocation4 + $0x348] sm:$0xf] %v10628_v53  ;;  %v12477_v59 = vld [vmem:[#allocation9 + $0x1a8] sm:$0xff]   ;;  %11426 = vmatprep.subr.bf16.mxu1 %v12476_v58  ;;  %v1164_v1 = vld [vmem:[#allocation2 + $0x140] sm:$0xff]  ;;  %v10629_v3 = vpack.c.bf16 %v1163_v0, %v1163_v0 }
  0xf9   : > { %1497 = vst [vmem:[#allocation4 + $0xe8] sm:$0xf] %v10643_v55  ;;  %v971_v60 = vld [vmem:[#allocation2 + $0x122] sm:$0xff]  ;;  %v972_v61 = vld [vmem:[#allocation2 + $0x12a] sm:$0xff]  ;;  %2072 = vst [vmem:[#allocation4 + $0xac] sm:$0xf] %v10643_v55  ;;  %11427 = vmatpush3.bf16.msra.mxu1 %v12477_v59  ;;  %v10630_v4 = vpack.c.bf16 %v1164_v1, %v1164_v1 }
  0xfa   : > { %1498 = vst [vmem:[#allocation4 + $0x10c] sm:$0xf] %v10644_v57  ;;  %v10597_v62 = vpack.c.bf16 %v971_v60, %v971_v60  ;;  %v10598_v63 = vpack.c.bf16 %v972_v61, %v972_v61  ;;  %v1339_v2 = vld [vmem:[#allocation2 + $0x79] sm:$0xff]  ;;  %2073 = vst [vmem:[#allocation4 + $0xd0] sm:$0xf] %v10644_v57  ;;  %v1340_v7 = vld [vmem:[#allocation2 + $0x81] sm:$0xff] }
  0xfb   : > { %4006 = vmatmul.mubr.bf16.gmra.mxu1 %v12435_v36  ;;  %v10645_v5 = vpack.c.bf16 %v1339_v2, %v1339_v2  ;;  %v12453_v6 = vld [vmem:[#allocation4 + $0x248] ss:$36 sps:$4 sm:$0xff]   ;;  %v12455_v8 = vld [vmem:[#allocation4 + $0x294] ss:$36 sps:$4 sm:$0xff]   ;;  %1323 = vst [vmem:[#allocation4 + $0x36c] sm:$0xf] %v10629_v3  ;;  %v10646_v9 = vpack.c.bf16 %v1340_v7, %v1340_v7 }
  0xfc   : > { %4013 = vmatprep.mubr.bf16.mxu1 %v12442_v37  ;;  %1131 = vst [vmem:[#allocation4 + $0x368] sm:$0xf] %v10597_v62  ;;  %1132 = vst [vmem:[#allocation4 + $0x38c] sm:$0xf] %v10598_v63  ;;  %v973_v10 = vld [vmem:[#allocation2 + $0x13a] sm:$0xff]  ;;  %v974_v11 = vld [vmem:[#allocation2 + $0x142] sm:$0xff] }
  0xfd   : > { %1705 = vst [vmem:[#allocation4 + $0x32c] sm:$0xf] %v10597_v62  ;;  %1706 = vst [vmem:[#allocation4 + $0x350] sm:$0xf] %v10598_v63  ;;  %v10599_v12 = vpack.c.bf16 %v973_v10, %v973_v10  ;;  %v10600_v13 = vpack.c.bf16 %v974_v11, %v974_v11  ;;  %v1165_v14 = vld [vmem:[#allocation2 + $0x150] sm:$0xff]  ;;  %v1166_v16 = vld [vmem:[#allocation2 + $0x158] sm:$0xff] }
  0xfe   : > { %1324 = vst [vmem:[#allocation4 + $0x390] sm:$0xf] %v10630_v4  ;;  %1499 = vst [vmem:[#allocation4 + $0x130] sm:$0xf] %v10645_v5  ;;  %v10631_v17 = vpack.c.bf16 %v1165_v14, %v1165_v14  ;;  %v10632_v18 = vpack.c.bf16 %v1166_v16, %v1166_v16  ;;  %v1341_v19 = vld [vmem:[#allocation2 + $0x91] sm:$0xff]  ;;  %v1342_v20 = vld [vmem:[#allocation2 + $0x99] sm:$0xff] }
  0xff   : > { %3885 = vmatmul.mubr.bf16.gmra.mxu0 %v12444_v52  ;;  %2074 = vst [vmem:[#allocation4 + $0xf4] sm:$0xf] %v10645_v5  ;;  %1500 = vst [vmem:[#allocation4 + $0x154] sm:$0xf] %v10646_v9  ;;  %v10647_v21 = vpack.c.bf16 %v1341_v19, %v1341_v19  ;;  %v10648_v22 = vpack.c.bf16 %v1342_v20, %v1342_v20  ;;  %v12450_v23 = vld [vmem:[#allocation4 + $0x10] ss:$36 sps:$4 sm:$0xff]  }
 0x100   : > { %4118 = vmatprep.mubr.bf16.mxu0 %v12452_v56  ;;  %2075 = vst [vmem:[#allocation4 + $0x118] sm:$0xf] %v10646_v9  ;;  %1133 = vst [vmem:[#allocation4 + $0x3b0] sm:$0xf] %v10599_v12  ;;  %v12457_v24 = vld [vmem:[#allocation4 + $0x5c] ss:$36 sps:$4 sm:$0xff]  }
 0x101   : > { %1134 = vst [vmem:[#allocation4 + $0x3d4] sm:$0xf] %v10600_v13  ;;  %1707 = vst [vmem:[#allocation4 + $0x374] sm:$0xf] %v10599_v12  ;;  %v12469_v25 = vld [vmem:[#allocation9 + $0x230] sm:$0xff]   ;;  %v12491_v26 = vld [vmem:[#allocation9 + $0x1e0] sm:$0xff]  }
 0x102   : > { %1708 = vst [vmem:[#allocation4 + $0x398] sm:$0xf] %v10600_v13  ;;  %1325 = vst [vmem:[#allocation4 + $0x3b4] sm:$0xf] %v10631_v17  ;;  %v12492_v27 = vld [vmem:[#allocation9 + $0x1a0] sm:$0xff]   ;;  %11428 = vmatprep.subr.bf16.mxu1 %v12491_v26  ;;  %v975_v29 = vld [vmem:[#allocation2 + $0x152] sm:$0xff] }
 0x103   : > { %4014 = vmatmul.mubr.bf16.gmra.mxu1 %v12445_v46  ;;  %1326 = vst [vmem:[#allocation4 + $0x3d8] sm:$0xf] %v10632_v18  ;;  %1501 = vst [vmem:[#allocation4 + $0x178] sm:$0xf] %v10647_v21  ;;  %v12459_v28 = vld [vmem:[#allocation4 + $0x290] ss:$36 sps:$4 sm:$0xff]   ;;  %v10601_v32 = vpack.c.bf16 %v975_v29, %v975_v29 }
 0x104   : > { %4021 = vmatprep.mubr.bf16.mxu1 %v12448_v49  ;;  %1502 = vst [vmem:[#allocation4 + $0x19c] sm:$0xf] %v10648_v22  ;;  %2076 = vst [vmem:[#allocation4 + $0x13c] sm:$0xf] %v10647_v21  ;;  %11429 = vmatpush3.bf16.msra.mxu1 %v12492_v27  ;;  %v12463_v30 = vld [vmem:[#allocation4 + $0x2dc] ss:$36 sps:$4 sm:$0xff]  }
 0x105   : > { %2077 = vst [vmem:[#allocation4 + $0x160] sm:$0xf] %v10648_v22  ;;  %v12484_v31 = vld [vmem:[#allocation9 + $0x228] sm:$0xff]   ;;  %v976_v33 = vld [vmem:[#allocation2 + $0x15a] sm:$0xff]  ;;  %v1168_v35 = vld [vmem:[#allocation2 + $0x170] sm:$0xff] }
 0x106   : > { %v1167_v34 = vld [vmem:[#allocation2 + $0x168] sm:$0xff]  ;;  %v10602_v36 = vpack.c.bf16 %v976_v33, %v976_v33  ;;  %1135 = vst [vmem:[#allocation4 + $0x3f8] sm:$0xf] %v10601_v32  ;;  %v10634_v38 = vpack.c.bf16 %v1168_v35, %v1168_v35  ;;  %1709 = vst [vmem:[#allocation4 + $0x3bc] sm:$0xf] %v10601_v32  ;;  %v12499_v41 = vld [vmem:[#allocation9 + $0x1d8] sm:$0xff]  }
 0x107   : > { %4119 = vmatmul.mubr.bf16.vlgmr.msra.gmra.mxu0 %v12450_v23  ;;  %v10633_v37 = vpack.c.bf16 %v1167_v34, %v1167_v34  ;;  %v12460_v39 = vld [vmem:[#allocation4 + $0x58] ss:$36 sps:$4 sm:$0xff]   ;;  %v12465_v40 = vld [vmem:[#allocation4 + $0xa4] ss:$36 sps:$4 sm:$0xff]   ;;  %11430 = vmatprep.subr.bf16.mxu1 %v12499_v41  ;;  %v12502_v45 = vld [vmem:[#allocation9 + $0x1d0] sm:$0xff]  }
 0x108   : > { %12055 = vmatpush3.bf16.msra.mxu0 %v13509_v15  ;;  %4126 = vmatprep.mubr.bf16.mxu0 %v12457_v24  ;;  %1136 = vst [vmem:[#allocation4 + $0x41c] sm:$0xf] %v10602_v36  ;;  %1328 = vst [vmem:[#allocation4 + $0x420] sm:$0xf] %v10634_v38  ;;  %v12467_v15 = vld [vmem:[#allocation4 + $0x2d8] ss:$36 sps:$4 sm:$0xff]  }
 0x109   : > { %12056 = vmatprep.subr.bf16.mxu0 %v12469_v25  ;;  %1327 = vst [vmem:[#allocation4 + $0x3fc] sm:$0xf] %v10633_v37  ;;  %1710 = vst [vmem:[#allocation4 + $0x3e0] sm:$0xf] %v10602_v36  ;;  %v12470_v42 = vld [vmem:[#allocation4 + $0x324] ss:$36 sps:$4 sm:$0xff]  }
 0x10a   : > { %v12500_v43 = vld [vmem:[#allocation9 + $0x220] sm:$0xff]   ;;  %v12501_v44 = vld [vmem:[#allocation9 + $0x198] sm:$0xff]   ;;  %v12503_v46 = vld [vmem:[#allocation9 + $0x190] sm:$0xff]  }
 0x10b   : > { %4022 = vmatmul.mubr.bf16.gmra.mxu1 %v12453_v6  ;;  %v12468_v47 = vld [vmem:[#allocation4 + $0xa0] ss:$36 sps:$4 sm:$0xff]   ;;  %v12472_v48 = vld [vmem:[#allocation4 + $0xec] ss:$36 sps:$4 sm:$0xff]   ;;  %v453_v49 = vld [vmem:[%s13366_s12 + $0x78] sm:$0xff]  }
 0x10c   : > { %4029 = vmatprep.mubr.bf16.mxu1 %v12455_v8  ;;  %12057 = vmatpush3.bf16.msra.mxu0 %v12469_v25  ;;  %v977_v50 = vld [vmem:[#allocation2 + $0x16a] sm:$0xff]  ;;  %v528_v51 = vunpack.c.l.bf16 %v453_v49  ;;  %v529_v52 = vunpack.c.h.bf16 %v453_v49  ;;  %v978_v53 = vld [vmem:[#allocation2 + $0x172] sm:$0xff]  ;;  %v1345_v55 = vld [vmem:[#allocation2 + $0xc1] sm:$0xff] }
 0x10d   : > { %12058 = vmatprep.subr.bf16.mxu0 %v12484_v31  ;;  %11431 = vmatpush3.bf16.msra.mxu1 %v12501_v44  ;;  %v10603_v54 = vpack.c.bf16 %v977_v50, %v977_v50  ;;  %v1346_v56 = vld [vmem:[#allocation2 + $0xc9] sm:$0xff]  ;;  %v12474_v57 = vld [vmem:[#allocation4 + $0x320] ss:$36 sps:$4 sm:$0xff]   ;;  %v10604_v58 = vpack.c.bf16 %v978_v53, %v978_v53  ;;  %v10651_v59 = vpack.c.bf16 %v1345_v55, %v1345_v55  ;;  %v12480_v3 = vld [vmem:[#allocation4 + $0x134] ss:$36 sps:$4 sm:$0xff]  }
 0x10e   : > { %11432 = vmatprep.subr.bf16.mxu1 %v12502_v45  ;;  %v10652_v60 = vpack.c.bf16 %v1346_v56, %v1346_v56  ;;  %v12510_v61 = vld [vmem:[#allocation9 + $0x1c8] sm:$0xff]   ;;  %561 = vst [vmem:[#allocation2 + $0x181] sm:$0xff] %v528_v51  ;;  %562 = vst [vmem:[#allocation2 + $0x189] sm:$0xff] %v529_v52  ;;  %v12512_v0 = vld [vmem:[#allocation9 + $0x1c0] sm:$0xff]  }
 0x10f   : > { %4127 = vmatmul.mubr.bf16.gmra.mxu0 %v12460_v39  ;;  %v12478_v62 = vld [vmem:[#allocation4 + $0x36c] ss:$36 sps:$4 sm:$0xff]   ;;  %1137 = vst [vmem:[#allocation4 + $0x440] sm:$0xf] %v10603_v54  ;;  %1711 = vst [vmem:[#allocation4 + $0x404] sm:$0xf] %v10603_v54 }
 0x110   : > { %4134 = vmatprep.mubr.bf16.mxu0 %v12465_v40  ;;  %12059 = vmatpush3.bf16.msra.mxu0 %v12484_v31  ;;  %v12511_v63 = vld [vmem:[#allocation9 + $0x188] sm:$0xff]   ;;  %1138 = vst [vmem:[#allocation4 + $0x464] sm:$0xf] %v10604_v58  ;;  %1505 = vst [vmem:[#allocation4 + $0x208] sm:$0xf] %v10651_v59  ;;  %v12513_v2 = vld [vmem:[#allocation9 + $0x180] sm:$0xff]  }
 0x111   : > { %12060 = vmatprep.subr.bf16.mxu0 %v12500_v43  ;;  %11433 = vmatpush3.bf16.msra.mxu1 %v12503_v46  ;;  %1506 = vst [vmem:[#allocation4 + $0x22c] sm:$0xf] %v10652_v60  ;;  %1712 = vst [vmem:[#allocation4 + $0x428] sm:$0xf] %v10604_v58  ;;  %v12475_v1 = vld [vmem:[#allocation4 + $0xe8] ss:$36 sps:$4 sm:$0xff]  }
 0x112   : > { %11434 = vmatprep.subr.bf16.mxu1 %v12510_v61  ;;  %2080 = vst [vmem:[#allocation4 + $0x1cc] sm:$0xf] %v10651_v59  ;;  %2081 = vst [vmem:[#allocation4 + $0x1f0] sm:$0xf] %v10652_v60  ;;  %v1347_v4 = vld [vmem:[#allocation2 + $0xd9] sm:$0xff]  ;;  %v1348_v5 = vld [vmem:[#allocation2 + $0xe1] sm:$0xff] }
 0x113   : > { %4030 = vmatmul.mubr.bf16.gmra.mxu1 %v12459_v28  ;;  %v1716_v6 = vld [vmem:[#allocation2 + $0x30] sm:$0xff]  ;;  %v10653_v7 = vpack.c.bf16 %v1347_v4, %v1347_v4  ;;  %v10654_v8 = vpack.c.bf16 %v1348_v5, %v1348_v5  ;;  %v1717_v9 = vld [vmem:[#allocation2 + $0x38] sm:$0xff]  ;;  %v1718_v13 = vld [vmem:[#allocation2 + $0x48] sm:$0xff] }
 0x114   : > { %4037 = vmatprep.mubr.bf16.mxu1 %v12463_v30  ;;  %12061 = vmatpush3.bf16.msra.mxu0 %v12500_v43  ;;  %v10701_v10 = vpack.c.bf16 %v1716_v6, %v1716_v6  ;;  %v10702_v11 = vpack.c.bf16 %v1717_v9, %v1717_v9  ;;  %v12520_v12 = vld [vmem:[#allocation9 + $0x218] sm:$0xff]   ;;  %v1719_v14 = vld [vmem:[#allocation2 + $0x50] sm:$0xff]  ;;  %v10703_v18 = vpack.c.bf16 %v1718_v13, %v1718_v13  ;;  %v12482_v22 = vld [vmem:[#allocation4 + $0x368] ss:$36 sps:$4 sm:$0xff]  }
 0x115   : > { %11435 = vmatpush3.bf16.msra.mxu1 %v12511_v63  ;;  %1507 = vst [vmem:[#allocation4 + $0x250] sm:$0xf] %v10653_v7  ;;  %1508 = vst [vmem:[#allocation4 + $0x274] sm:$0xf] %v10654_v8  ;;  %v1169_v16 = vld [vmem:[#allocation2 + $0x180] sm:$0xff]  ;;  %v1170_v17 = vld [vmem:[#allocation2 + $0x188] sm:$0xff]  ;;  %12062 = vmatprep.subr.bf16.mxu0 %v12520_v12  ;;  %v10704_v19 = vpack.c.bf16 %v1719_v14, %v1719_v14 }
 0x116   : > { %11436 = vmatprep.subr.bf16.mxu1 %v12512_v0  ;;  %1876 = vst [vmem:[#allocation4 + $0x18] sm:$0xf] %v10701_v10  ;;  %2082 = vst [vmem:[#allocation4 + $0x214] sm:$0xf] %v10653_v7  ;;  %v10635_v20 = vpack.c.bf16 %v1169_v16, %v1169_v16  ;;  %v10636_v21 = vpack.c.bf16 %v1170_v17, %v1170_v17  ;;  %v12485_v23 = vld [vmem:[#allocation4 + $0x3b4] ss:$36 sps:$4 sm:$0xff]  }
 0x117   : > { %4135 = vmatmul.mubr.bf16.gmra.mxu0 %v12468_v47  ;;  %2083 = vst [vmem:[#allocation4 + $0x238] sm:$0xf] %v10654_v8  ;;  %1877 = vst [vmem:[#allocation4 + $0x3c] sm:$0xf] %v10702_v11  ;;  %v1720_v24 = vld [vmem:[#allocation2 + $0x60] sm:$0xff]  ;;  %v1721_v25 = vld [vmem:[#allocation2 + $0x68] sm:$0xff] }
 0x118   : > { %4142 = vmatprep.mubr.bf16.mxu0 %v12472_v48  ;;  %12063 = vmatpush3.bf16.msra.mxu0 %v12520_v12  ;;  %1878 = vst [vmem:[#allocation4 + $0x60] sm:$0xf] %v10703_v18  ;;  %1879 = vst [vmem:[#allocation4 + $0x84] sm:$0xf] %v10704_v19  ;;  %v12483_v26 = vld [vmem:[#allocation4 + $0x130] ss:$36 sps:$4 sm:$0xff]   ;;  %v10705_v27 = vpack.c.bf16 %v1720_v24, %v1720_v24  ;;  %v10706_v28 = vpack.c.bf16 %v1721_v25, %v1721_v25 }
 0x119   : > { %11437 = vmatpush3.bf16.msra.mxu1 %v12513_v2  ;;  %1329 = vst [vmem:[#allocation4 + $0x444] sm:$0xf] %v10635_v20  ;;  %1330 = vst [vmem:[#allocation4 + $0x468] sm:$0xf] %v10636_v21  ;;  %v12533_v29 = vld [vmem:[#allocation9 + $0x210] sm:$0xff]   ;;  %v1353_v30 = vld [vmem:[#allocation2 + $0x121] sm:$0xff] }
 0x11a   : > { %v1354_v31 = vld [vmem:[#allocation2 + $0x129] sm:$0xff]  ;;  %v12487_v32 = vld [vmem:[#allocation4 + $0x17c] ss:$36 sps:$4 sm:$0xff]   ;;  %1880 = vst [vmem:[#allocation4 + $0xa8] sm:$0xf] %v10705_v27  ;;  %v10659_v33 = vpack.c.bf16 %v1353_v30, %v1353_v30  ;;  %12064 = vmatprep.subr.bf16.mxu0 %v12533_v29  ;;  %v1357_v53 = vld [vmem:[#allocation2 + $0x151] sm:$0xff] }
 0x11b   : > { %4038 = vmatmul.mubr.bf16.gmra.mxu1 %v12467_v15  ;;  %1881 = vst [vmem:[#allocation4 + $0xcc] sm:$0xf] %v10706_v28  ;;  %v10660_v34 = vpack.c.bf16 %v1354_v31, %v1354_v31  ;;  %v1722_v35 = vld [vmem:[#allocation2 + $0x78] sm:$0xff]  ;;  %v12489_v37 = vld [vmem:[#allocation4 + $0x3b0] ss:$36 sps:$4 sm:$0xff]   ;;  %v1723_v39 = vld [vmem:[#allocation2 + $0x80] sm:$0xff]  ;;  %v10663_v56 = vpack.c.bf16 %v1357_v53, %v1357_v53 }
 0x11c   : > { %4045 = vmatprep.mubr.bf16.mxu1 %v12470_v42  ;;  %12065 = vmatpush3.bf16.msra.mxu0 %v12533_v29  ;;  %1513 = vst [vmem:[#allocation4 + $0x328] sm:$0xf] %v10659_v33  ;;  %2088 = vst [vmem:[#allocation4 + $0x2ec] sm:$0xf] %v10659_v33  ;;  %v10707_v36 = vpack.c.bf16 %v1722_v35, %v1722_v35  ;;  %v12493_v38 = vld [vmem:[#allocation4 + $0x3fc] ss:$36 sps:$4 sm:$0xff]   ;;  %v10708_v40 = vpack.c.bf16 %v1723_v39, %v1723_v39 }
 0x11d   : > { %1514 = vst [vmem:[#allocation4 + $0x34c] sm:$0xf] %v10660_v34  ;;  %2089 = vst [vmem:[#allocation4 + $0x310] sm:$0xf] %v10660_v34  ;;  %v1355_v15 = vld [vmem:[#allocation2 + $0x139] sm:$0xff]  ;;  %v1356_v41 = vld [vmem:[#allocation2 + $0x141] sm:$0xff] }
 0x11e   : > { %1882 = vst [vmem:[#allocation4 + $0xf0] sm:$0xf] %v10707_v36  ;;  %v1724_v42 = vld [vmem:[#allocation2 + $0x90] sm:$0xff]  ;;  %v12490_v43 = vld [vmem:[#allocation4 + $0x178] ss:$36 sps:$4 sm:$0xff]   ;;  %v10661_v44 = vpack.c.bf16 %v1355_v15, %v1355_v15  ;;  %v10662_v45 = vpack.c.bf16 %v1356_v41, %v1356_v41  ;;  %v12546_v51 = vld [vmem:[#allocation9 + $0x208] sm:$0xff]  }
 0x11f   : > { %4143 = vmatmul.mubr.bf16.gmra.mxu0 %v12475_v1  ;;  %v10709_v46 = vpack.c.bf16 %v1724_v42, %v1724_v42  ;;  %v12495_v47 = vld [vmem:[#allocation4 + $0x1c4] ss:$36 sps:$4 sm:$0xff]   ;;  %1883 = vst [vmem:[#allocation4 + $0x114] sm:$0xf] %v10708_v40  ;;  %v1725_v48 = vld [vmem:[#allocation2 + $0x98] sm:$0xff]  ;;  %12066 = vmatprep.subr.bf16.mxu0 %v12546_v51  ;;  %v1727_v58 = vld [vmem:[#allocation2 + $0xb0] sm:$0xff] }
 0x120   : > { %4150 = vmatprep.mubr.bf16.mxu0 %v12480_v3  ;;  %1515 = vst [vmem:[#allocation4 + $0x370] sm:$0xf] %v10661_v44  ;;  %1516 = vst [vmem:[#allocation4 + $0x394] sm:$0xf] %v10662_v45  ;;  %v10710_v49 = vpack.c.bf16 %v1725_v48, %v1725_v48  ;;  %v12497_v50 = vld [vmem:[#allocation4 + $0x3f8] ss:$36 sps:$4 sm:$0xff]   ;;  %12067 = vmatpush3.bf16.msra.mxu0 %v12546_v51  ;;  %v10712_v61 = vpack.c.bf16 %v1727_v58, %v1727_v58 }
 0x121   : > { %1884 = vst [vmem:[#allocation4 + $0x138] sm:$0xf] %v10709_v46  ;;  %2090 = vst [vmem:[#allocation4 + $0x334] sm:$0xf] %v10661_v44  ;;  %v12504_v52 = vld [vmem:[#allocation4 + $0x444] ss:$36 sps:$4 sm:$0xff]  }
 0x122   : > { %2091 = vst [vmem:[#allocation4 + $0x358] sm:$0xf] %v10662_v45  ;;  %1885 = vst [vmem:[#allocation4 + $0x15c] sm:$0xf] %v10710_v49  ;;  %v1358_v54 = vld [vmem:[#allocation2 + $0x159] sm:$0xff]  ;;  %v1726_v55 = vld [vmem:[#allocation2 + $0xa8] sm:$0xff] }
 0x123   : > { %4046 = vmatmul.mubr.bf16.gmra.mxu1 %v12474_v57  ;;  %v10664_v57 = vpack.c.bf16 %v1358_v54, %v1358_v54  ;;  %v10711_v59 = vpack.c.bf16 %v1726_v55, %v1726_v55  ;;  %v1918_v60 = vld [vmem:[#allocation2 + $0xa9] sm:$0xff]  ;;  %v1360_v1 = vld [vmem:[#allocation2 + $0x171] sm:$0xff]  ;;  %1517 = vst [vmem:[#allocation4 + $0x3b8] sm:$0xf] %v10663_v56  ;;  %v1728_v5 = vld [vmem:[#allocation2 + $0xc0] sm:$0xff] }
 0x124   : > { %4053 = vmatprep.mubr.bf16.mxu1 %v12478_v62  ;;  %v1919_v62 = vld [vmem:[#allocation2 + $0xb1] sm:$0xff]  ;;  %v10743_v63 = vpack.c.bf16 %v1918_v60, %v1918_v60  ;;  %v1359_v0 = vld [vmem:[#allocation2 + $0x169] sm:$0xff]  ;;  %v10666_v4 = vpack.c.bf16 %v1360_v1, %v1360_v1  ;;  %2092 = vst [vmem:[#allocation4 + $0x37c] sm:$0xf] %v10663_v56  ;;  %v12498_v7 = vld [vmem:[#allocation4 + $0x1c0] ss:$36 sps:$4 sm:$0xff]   ;;  %v10713_v8 = vpack.c.bf16 %v1728_v5, %v1728_v5 }
 0x125   : > { %1518 = vst [vmem:[#allocation4 + $0x3dc] sm:$0xf] %v10664_v57  ;;  %1886 = vst [vmem:[#allocation4 + $0x180] sm:$0xf] %v10711_v59  ;;  %v10744_v2 = vpack.c.bf16 %v1919_v62, %v1919_v62  ;;  %v10665_v3 = vpack.c.bf16 %v1359_v0, %v1359_v0  ;;  %v1729_v6 = vld [vmem:[#allocation2 + $0xc8] sm:$0xff]  ;;  %v12559_v14 = vld [vmem:[#allocation9 + $0x200] sm:$0xff]  }
 0x126   : > { %2093 = vst [vmem:[#allocation4 + $0x3a0] sm:$0xf] %v10664_v57  ;;  %1887 = vst [vmem:[#allocation4 + $0x1a4] sm:$0xf] %v10712_v61  ;;  %v10714_v9 = vpack.c.bf16 %v1729_v6, %v1729_v6  ;;  %v12928_v10 = vld [vmem:[#allocation2 + $0x8] sm:$0xff]  ;;  %v1730_v20 = vld [vmem:[#allocation2 + $0xd8] sm:$0xff]  ;;  %12068 = vmatprep.subr.bf16.mxu0 %v12559_v14 }
 0x127   : > { %4151 = vmatmul.mubr.bf16.gmra.mxu0 %v12483_v26  ;;  %2078 = vst [vmem:[#allocation4 + $0x184] sm:$0xf] %v10743_v63  ;;  %v10732_v11 = vpack.c.bf16 %v12928_v10, %v12928_v10  ;;  %v12506_v12 = vld [vmem:[#allocation4 + $0x20c] ss:$36 sps:$4 sm:$0xff]   ;;  %2079 = vst [vmem:[#allocation4 + $0x1a8] sm:$0xf] %v10744_v2  ;;  %v10715_v24 = vpack.c.bf16 %v1730_v20, %v1730_v20 }
 0x128   : > { %4158 = vmatprep.mubr.bf16.mxu0 %v12487_v32  ;;  %1519 = vst [vmem:[#allocation4 + $0x400] sm:$0xf] %v10665_v3  ;;  %1520 = vst [vmem:[#allocation4 + $0x424] sm:$0xf] %v10666_v4  ;;  %v12508_v13 = vld [vmem:[#allocation4 + $0x440] ss:$36 sps:$4 sm:$0xff]   ;;  %12069 = vmatpush3.bf16.msra.mxu0 %v12559_v14 }
 0x129   : > { %2094 = vst [vmem:[#allocation4 + $0x3c4] sm:$0xf] %v10665_v3  ;;  %2095 = vst [vmem:[#allocation4 + $0x3e8] sm:$0xf] %v10666_v4  ;;  %v12560_v16 = vld [vmem:[%s13366_s12 + $0x78] ss:$0 sps:$4 sm:$0xff]  }
 0x12a   : > { %1888 = vst [vmem:[#allocation4 + $0x1c8] sm:$0xf] %v10713_v8  ;;  %1889 = vst [vmem:[#allocation4 + $0x1ec] sm:$0xf] %v10714_v9  ;;  %v12561_v17 = vld [vmem:[%s13366_s12 + $0x7c] ss:$0 sps:$4 sm:$0xff]  }
 0x12b   : > { %4054 = vmatmul.mubr.bf16.gmra.mxu1 %v12482_v22  ;;  %1907 = vst [vmem:[#allocation4 + $0x474] sm:$0xf] %v10732_v11  ;;  %v1553_v18 = vld [vmem:[#allocation2 + $0x182] sm:$0xff]  ;;  %v1554_v19 = vld [vmem:[#allocation2 + $0x18a] sm:$0xff]  ;;  %1521 = vst [vmem:[#allocation4 + $0x448] sm:$0xf] %v12560_v16 }
 0x12c   : > { %4061 = vmatprep.mubr.bf16.mxu1 %v12485_v23  ;;  %v12518_v21 = vld [vmem:[#allocation4 + $0x1c] ss:$36 sps:$4 sm:$0xff]   ;;  %1522 = vst [vmem:[#allocation4 + $0x46c] sm:$0xf] %v12561_v17  ;;  %v10699_v22 = vpack.c.bf16 %v1553_v18, %v1553_v18  ;;  %v10700_v23 = vpack.c.bf16 %v1554_v19, %v1554_v19  ;;  %v12509_v26 = vld [vmem:[#allocation4 + $0x208] ss:$36 sps:$4 sm:$0xff]  }
 0x12d   : > { %v1731_v25 = vld [vmem:[#allocation2 + $0xe0] sm:$0xff]  ;;  %1890 = vst [vmem:[#allocation4 + $0x210] sm:$0xf] %v10715_v24  ;;  %v12514_v28 = vld [vmem:[#allocation4 + $0x254] ss:$36 sps:$4 sm:$0xff]   ;;  %v2102_v15 = vld [vmem:[#allocation2 + $0x4a] sm:$0xff] }
 0x12e   : > { %1713 = vst [vmem:[#allocation4 + $0x44c] sm:$0xf] %v10699_v22  ;;  %1714 = vst [vmem:[#allocation4 + $0x470] sm:$0xf] %v10700_v23  ;;  %v10716_v27 = vpack.c.bf16 %v1731_v25, %v1731_v25  ;;  %v12516_v29 = vld [vmem:[#allocation4 + $0x18] ss:$36 sps:$4 sm:$0xff]   ;;  %v10767_v44 = vpack.c.bf16 %v2102_v15, %v2102_v15 }
 0x12f   : > { %4159 = vmatmul.mubr.bf16.gmra.mxu0 %v12490_v43  ;;  %2288 = vst [vmem:[#allocation4 + $0x410] sm:$0xf] %v10699_v22  ;;  %2289 = vst [vmem:[#allocation4 + $0x434] sm:$0xf] %v10700_v23  ;;  %v1732_v30 = vld [vmem:[#allocation2 + $0xf0] sm:$0xff]  ;;  %v1733_v32 = vld [vmem:[#allocation2 + $0xf8] sm:$0xff] }
 0x130   : > { %4166 = vmatprep.mubr.bf16.mxu0 %v12495_v47  ;;  %1891 = vst [vmem:[#allocation4 + $0x234] sm:$0xf] %v10716_v27  ;;  %v12523_v31 = vld [vmem:[#allocation4 + $0x64] ss:$36 sps:$4 sm:$0xff]   ;;  %v10717_v33 = vpack.c.bf16 %v1732_v30, %v1732_v30  ;;  %v1924_v34 = vld [vmem:[#allocation2 + $0xf1] sm:$0xff]  ;;  %v1925_v35 = vld [vmem:[#allocation2 + $0xf9] sm:$0xff]  ;;  %v10718_v36 = vpack.c.bf16 %v1733_v32, %v1733_v32 }
 0x131   : > { %v2100_v39 = vld [vmem:[#allocation2 + $0x32] sm:$0xff]  ;;  %v2101_v40 = vld [vmem:[#allocation2 + $0x3a] sm:$0xff]  ;;  %v1734_v45 = vld [vmem:[#allocation2 + $0x108] sm:$0xff]  ;;  %2262 = vst [vmem:[#allocation4 + $0x68] sm:$0xf] %v10767_v44 }
 0x132   : > { %1892 = vst [vmem:[#allocation4 + $0x258] sm:$0xf] %v10717_v33  ;;  %v10765_v41 = vpack.c.bf16 %v2100_v39, %v2100_v39  ;;  %v10766_v42 = vpack.c.bf16 %v2101_v40, %v2101_v40  ;;  %v2103_v43 = vld [vmem:[#allocation2 + $0x52] sm:$0xff]  ;;  %1893 = vst [vmem:[#allocation4 + $0x27c] sm:$0xf] %v10718_v36  ;;  %v10719_v48 = vpack.c.bf16 %v1734_v45, %v1734_v45  ;;  %v1926_v51 = vld [vmem:[#allocation2 + $0x109] sm:$0xff] }
 0x133   : > { %4062 = vmatmul.mubr.bf16.gmra.mxu1 %v12489_v37  ;;  %v10749_v37 = vpack.c.bf16 %v1924_v34, %v1924_v34  ;;  %v1735_v46 = vld [vmem:[#allocation2 + $0x110] sm:$0xff]  ;;  %v10768_v47 = vpack.c.bf16 %v2103_v43, %v2103_v43  ;;  %v10751_v53 = vpack.c.bf16 %v1926_v51, %v1926_v51  ;;  %v2104_v55 = vld [vmem:[#allocation2 + $0x62] sm:$0xff]  ;;  %v2106_v61 = vld [vmem:[#allocation2 + $0x7a] sm:$0xff] }
 0x134   : > { %4069 = vmatprep.mubr.bf16.mxu1 %v12493_v38  ;;  %v10750_v38 = vpack.c.bf16 %v1925_v35, %v1925_v35  ;;  %v10720_v49 = vpack.c.bf16 %v1735_v46, %v1735_v46  ;;  %2260 = vst [vmem:[#allocation4 + $0x20] sm:$0xf] %v10765_v41  ;;  %2261 = vst [vmem:[#allocation4 + $0x44] sm:$0xf] %v10766_v42  ;;  %v1927_v54 = vld [vmem:[#allocation2 + $0x111] sm:$0xff]  ;;  %v10769_v59 = vpack.c.bf16 %v2104_v55, %v2104_v55  ;;  %v2107_v62 = vld [vmem:[#allocation2 + $0x82] sm:$0xff] }
 0x135   : > { %2084 = vst [vmem:[#allocation4 + $0x25c] sm:$0xf] %v10749_v37  ;;  %2263 = vst [vmem:[#allocation4 + $0x8c] sm:$0xf] %v10768_v47  ;;  %v2105_v56 = vld [vmem:[#allocation2 + $0x6a] sm:$0xff]  ;;  %v10752_v58 = vpack.c.bf16 %v1927_v54, %v1927_v54  ;;  %v1736_v63 = vld [vmem:[#allocation2 + $0x120] sm:$0xff]  ;;  %v10771_v0 = vpack.c.bf16 %v2106_v61, %v2106_v61  ;;  %v10772_v1 = vpack.c.bf16 %v2107_v62, %v2107_v62 }
 0x136   : > { %2085 = vst [vmem:[#allocation4 + $0x280] sm:$0xf] %v10750_v38  ;;  %1894 = vst [vmem:[#allocation4 + $0x2a0] sm:$0xf] %v10719_v48  ;;  %v12526_v57 = vld [vmem:[#allocation4 + $0x60] ss:$36 sps:$4 sm:$0xff]   ;;  %v10770_v60 = vpack.c.bf16 %v2105_v56, %v2105_v56  ;;  %v10721_v3 = vpack.c.bf16 %v1736_v63, %v1736_v63 }
 0x137   : > { %4167 = vmatmul.mubr.bf16.gmra.mxu0 %v12498_v7  ;;  %1895 = vst [vmem:[#allocation4 + $0x2c4] sm:$0xf] %v10720_v49  ;;  %2086 = vst [vmem:[#allocation4 + $0x2a4] sm:$0xf] %v10751_v53  ;;  %v1737_v2 = vld [vmem:[#allocation2 + $0x128] sm:$0xff]  ;;  %v2108_v4 = vld [vmem:[#allocation2 + $0x92] sm:$0xff] }
 0x138   : > { %4174 = vmatprep.mubr.bf16.mxu0 %v12506_v12  ;;  %v2109_v5 = vld [vmem:[#allocation2 + $0x9a] sm:$0xff]  ;;  %2087 = vst [vmem:[#allocation4 + $0x2c8] sm:$0xf] %v10752_v58  ;;  %2264 = vst [vmem:[#allocation4 + $0xb0] sm:$0xf] %v10769_v59  ;;  %v10722_v6 = vpack.c.bf16 %v1737_v2, %v1737_v2  ;;  %v10773_v7 = vpack.c.bf16 %v2108_v4, %v2108_v4  ;;  %v2110_v9 = vld [vmem:[#allocation2 + $0xaa] sm:$0xff] }
 0x139   : > { %2265 = vst [vmem:[#allocation4 + $0xd4] sm:$0xf] %v10770_v60  ;;  %v10774_v8 = vpack.c.bf16 %v2109_v5, %v2109_v5  ;;  %v2111_v10 = vld [vmem:[#allocation2 + $0xb2] sm:$0xff]  ;;  %2266 = vst [vmem:[#allocation4 + $0xf8] sm:$0xf] %v10771_v0  ;;  %v1739_v19 = vld [vmem:[#allocation2 + $0x140] sm:$0xff] }
 0x13a   : > { %v1738_v11 = vld [vmem:[#allocation2 + $0x138] sm:$0xff]  ;;  %v12529_v12 = vld [vmem:[#allocation4 + $0xac] ss:$36 sps:$4 sm:$0xff]   ;;  %2267 = vst [vmem:[#allocation4 + $0x11c] sm:$0xf] %v10772_v1  ;;  %v10776_v14 = vpack.c.bf16 %v2111_v10, %v2111_v10  ;;  %v2112_v20 = vld [vmem:[#allocation2 + $0xc2] sm:$0xff] }
 0x13b   : > { %4070 = vmatmul.mubr.bf16.gmra.mxu1 %v12497_v50  ;;  %v12519_v50 = vld [vmem:[#allocation4 + $0x250] ss:$36 sps:$4 sm:$0xff]   ;;  %1896 = vst [vmem:[#allocation4 + $0x2e8] sm:$0xf] %v10721_v3  ;;  %v10723_v16 = vpack.c.bf16 %v1738_v11, %v1738_v11  ;;  %1897 = vst [vmem:[#allocation4 + $0x30c] sm:$0xf] %v10722_v6  ;;  %v10777_v23 = vpack.c.bf16 %v2112_v20, %v2112_v20 }
 0x13c   : > { %4077 = vmatprep.mubr.bf16.mxu1 %v12504_v52  ;;  %v12521_v52 = vld [vmem:[#allocation4 + $0x29c] ss:$36 sps:$4 sm:$0xff]   ;;  %2268 = vst [vmem:[#allocation4 + $0x140] sm:$0xf] %v10773_v7  ;;  %2269 = vst [vmem:[#allocation4 + $0x164] sm:$0xf] %v10774_v8 }
 0x13d   : > { %v12525_v17 = vld [vmem:[#allocation4 + $0x298] ss:$36 sps:$4 sm:$0xff]   ;;  %2271 = vst [vmem:[#allocation4 + $0x1ac] sm:$0xf] %v10776_v14  ;;  %1898 = vst [vmem:[#allocation4 + $0x330] sm:$0xf] %v10723_v16 }
 0x13e   : > { %v12527_v18 = vld [vmem:[#allocation4 + $0x2e4] ss:$36 sps:$4 sm:$0xff]   ;;  %v2114_v24 = vld [vmem:[#allocation2 + $0xda] sm:$0xff]  ;;  %2272 = vst [vmem:[#allocation4 + $0x1d0] sm:$0xf] %v10777_v23  ;;  %v2116_v37 = vld [vmem:[#allocation2 + $0xf2] sm:$0xff] }
 0x13f   : > { %4175 = vmatmul.mubr.bf16.gmra.mxu0 %v12509_v26  ;;  %v2113_v22 = vld [vmem:[#allocation2 + $0xca] sm:$0xff]  ;;  %v2115_v26 = vld [vmem:[#allocation2 + $0xe2] sm:$0xff]  ;;  %v10779_v27 = vpack.c.bf16 %v2114_v24, %v2114_v24  ;;  %v12536_v34 = vld [vmem:[#allocation4 + $0xf4] ss:$36 sps:$4 sm:$0xff]   ;;  %v10781_v38 = vpack.c.bf16 %v2116_v37, %v2116_v37 }
 0x140   : > { %4182 = vmatprep.mubr.bf16.mxu0 %v12514_v28  ;;  %v10778_v25 = vpack.c.bf16 %v2113_v22, %v2113_v22  ;;  %v1740_v28 = vld [vmem:[#allocation2 + $0x150] sm:$0xff]  ;;  %v10780_v30 = vpack.c.bf16 %v2115_v26, %v2115_v26  ;;  %v12532_v33 = vld [vmem:[#allocation4 + $0xa8] ss:$36 sps:$4 sm:$0xff]   ;;  %v12531_v35 = vld [vmem:[#allocation4 + $0x2e0] ss:$36 sps:$4 sm:$0xff]  }
 0x141   : > { %2274 = vst [vmem:[#allocation4 + $0x218] sm:$0xf] %v10779_v27  ;;  %v12534_v36 = vld [vmem:[#allocation4 + $0x32c] ss:$36 sps:$4 sm:$0xff]   ;;  %2276 = vst [vmem:[#allocation4 + $0x260] sm:$0xf] %v10781_v38 }
 0x142   : > { %2273 = vst [vmem:[#allocation4 + $0x1f4] sm:$0xf] %v10778_v25  ;;  %2275 = vst [vmem:[#allocation4 + $0x23c] sm:$0xf] %v10780_v30  ;;  %v12539_v39 = vld [vmem:[#allocation4 + $0xf0] ss:$36 sps:$4 sm:$0xff]  }
 0x143   : > { %4078 = vmatmul.mubr.bf16.gmra.mxu1 %v12508_v13  ;;  %v10775_v13 = vpack.c.bf16 %v2110_v9, %v2110_v9  ;;  %v12538_v40 = vld [vmem:[#allocation4 + $0x328] ss:$36 sps:$4 sm:$0xff]   ;;  %v12542_v15 = vld [vmem:[#allocation4 + $0x13c] ss:$36 sps:$4 sm:$0xff]   ;;  %v12540_v42 = vld [vmem:[#allocation4 + $0x374] ss:$36 sps:$4 sm:$0xff]  }
 0x144   : > { %4279 = vmatprep.mubr.bf16.mxu1 %v12518_v21  ;;  %v10724_v21 = vpack.c.bf16 %v1739_v19, %v1739_v19  ;;  %v2117_v43 = vld [vmem:[#allocation2 + $0xfa] sm:$0xff]  ;;  %v2118_v44 = vld [vmem:[#allocation2 + $0x10a] sm:$0xff]  ;;  %v2119_v47 = vld [vmem:[#allocation2 + $0x112] sm:$0xff] }
 0x145   : > { %2270 = vst [vmem:[#allocation4 + $0x188] sm:$0xf] %v10775_v13  ;;  %v10782_v46 = vpack.c.bf16 %v2117_v43, %v2117_v43  ;;  %v10783_v48 = vpack.c.bf16 %v2118_v44, %v2118_v44  ;;  %v1742_v49 = vld [vmem:[#allocation2 + $0x168] sm:$0xff]  ;;  %v1744_v63 = vld [vmem:[#allocation2 + $0x180] sm:$0xff]  ;;  %v12545_v1 = vld [vmem:[#allocation4 + $0x138] ss:$36 sps:$4 sm:$0xff]  }
 0x146   : > { %1899 = vst [vmem:[#allocation4 + $0x354] sm:$0xf] %v10724_v21  ;;  %v10727_v53 = vpack.c.bf16 %v1742_v49, %v1742_v49  ;;  %v2120_v55 = vld [vmem:[#allocation2 + $0x122] sm:$0xff]  ;;  %v2121_v56 = vld [vmem:[#allocation2 + $0x12a] sm:$0xff]  ;;  %v10729_v3 = vpack.c.bf16 %v1744_v63, %v1744_v63  ;;  %v2124_v7 = vld [vmem:[#allocation2 + $0x152] sm:$0xff] }
 0x147   : > { %4183 = vmatmul.mubr.bf16.gmra.mxu0 %v12519_v50  ;;  %v1743_v50 = vld [vmem:[#allocation2 + $0x170] sm:$0xff]  ;;  %2277 = vst [vmem:[#allocation4 + $0x284] sm:$0xf] %v10782_v46  ;;  %2278 = vst [vmem:[#allocation4 + $0x2a8] sm:$0xf] %v10783_v48  ;;  %v10785_v59 = vpack.c.bf16 %v2120_v55, %v2120_v55  ;;  %v10786_v60 = vpack.c.bf16 %v2121_v56, %v2121_v56  ;;  %v2123_v61 = vld [vmem:[#allocation2 + $0x142] sm:$0xff]  ;;  %v10789_v13 = vpack.c.bf16 %v2124_v7, %v2124_v7 }
 0x148   : > { %4190 = vmatprep.mubr.bf16.mxu0 %v12521_v52  ;;  %v10784_v52 = vpack.c.bf16 %v2119_v47, %v2119_v47  ;;  %v10728_v54 = vpack.c.bf16 %v1743_v50, %v1743_v50  ;;  %v1745_v0 = vld [vmem:[#allocation2 + $0x188] sm:$0xff]  ;;  %1902 = vst [vmem:[#allocation4 + $0x3c0] sm:$0xf] %v10727_v53  ;;  %v10788_v2 = vpack.c.bf16 %v2123_v61, %v2123_v61  ;;  %1904 = vst [vmem:[#allocation4 + $0x408] sm:$0xf] %v10729_v3  ;;  %v2127_v19 = vld [vmem:[#allocation2 + $0x172] sm:$0xff] }
 0x149   : > { %v10730_v4 = vpack.c.bf16 %v1745_v0, %v1745_v0  ;;  %v1936_v5 = vld [vmem:[#allocation2 + $0x181] sm:$0xff]  ;;  %v1937_v6 = vld [vmem:[#allocation2 + $0x189] sm:$0xff]  ;;  %2280 = vst [vmem:[#allocation4 + $0x2f0] sm:$0xf] %v10785_v59  ;;  %2281 = vst [vmem:[#allocation4 + $0x314] sm:$0xf] %v10786_v60  ;;  %v10792_v23 = vpack.c.bf16 %v2127_v19, %v2127_v19 }
 0x14a   : > { %2279 = vst [vmem:[#allocation4 + $0x2cc] sm:$0xf] %v10784_v52  ;;  %1903 = vst [vmem:[#allocation4 + $0x3e4] sm:$0xf] %v10728_v54  ;;  %v12549_v9 = vld [vmem:[#allocation4 + $0x184] ss:$36 sps:$4 sm:$0xff]   ;;  %v10761_v10 = vpack.c.bf16 %v1936_v5, %v1936_v5  ;;  %v10762_v11 = vpack.c.bf16 %v1937_v6, %v1937_v6 }
 0x14b   : > { %4280 = vmatmul.mubr.bf16.vlgmr.msra.gmra.mxu1 %v12516_v29  ;;  %v1741_v29 = vld [vmem:[#allocation2 + $0x158] sm:$0xff]  ;;  %v2126_v14 = vld [vmem:[#allocation2 + $0x16a] sm:$0xff]  ;;  %2283 = vst [vmem:[#allocation4 + $0x35c] sm:$0xf] %v10788_v2  ;;  %1905 = vst [vmem:[#allocation4 + $0x42c] sm:$0xf] %v10730_v4 }
 0x14c   : > { %4287 = vmatprep.mubr.bf16.mxu1 %v12523_v31  ;;  %v10725_v31 = vpack.c.bf16 %v1740_v28, %v1740_v28  ;;  %v10726_v32 = vpack.c.bf16 %v1741_v29, %v1741_v29  ;;  %v10791_v20 = vpack.c.bf16 %v2126_v14, %v2126_v14  ;;  %v1746_v21 = vld [vmem:[#allocation2 + $0x198] sm:$0xff]  ;;  %2096 = vst [vmem:[#allocation4 + $0x40c] sm:$0xf] %v10761_v10  ;;  %2097 = vst [vmem:[#allocation4 + $0x430] sm:$0xf] %v10762_v11  ;;  %v1939_v25 = vld [vmem:[#allocation2 + $0x1a1] sm:$0xff] }
 0x14d   : > { %v1938_v22 = vld [vmem:[#allocation2 + $0x199] sm:$0xff]  ;;  %2284 = vst [vmem:[#allocation4 + $0x380] sm:$0xf] %v10789_v13  ;;  %v10731_v24 = vpack.c.bf16 %v1746_v21, %v1746_v21  ;;  %v12544_v27 = vld [vmem:[#allocation4 + $0x370] ss:$36 sps:$4 sm:$0xff]   ;;  %v10764_v29 = vpack.c.bf16 %v1939_v25, %v1939_v25 }
 0x14e   : > { %1900 = vst [vmem:[#allocation4 + $0x378] sm:$0xf] %v10725_v31  ;;  %1901 = vst [vmem:[#allocation4 + $0x39c] sm:$0xf] %v10726_v32  ;;  %v10763_v26 = vpack.c.bf16 %v1938_v22, %v1938_v22  ;;  %v2130_v30 = vld [vmem:[#allocation2 + $0x19a] sm:$0xff]  ;;  %v2131_v31 = vld [vmem:[#allocation2 + $0x1a2] sm:$0xff] }
 0x14f   : > { %4191 = vmatmul.mubr.bf16.gmra.mxu0 %v12525_v17  ;;  %2286 = vst [vmem:[#allocation4 + $0x3c8] sm:$0xf] %v10791_v20  ;;  %2287 = vst [vmem:[#allocation4 + $0x3ec] sm:$0xf] %v10792_v23  ;;  %v12553_v49 = vld [vmem:[#allocation4 + $0x404] ss:$36 sps:$4 sm:$0xff]  }
 0x150   : > { %4198 = vmatprep.mubr.bf16.mxu0 %v12527_v18  ;;  %1906 = vst [vmem:[#allocation4 + $0x450] sm:$0xf] %v10731_v24  ;;  %2098 = vst [vmem:[#allocation4 + $0x454] sm:$0xf] %v10763_v26  ;;  %v12558_v54 = vld [vmem:[#allocation4 + $0x1c8] ss:$36 sps:$4 sm:$0xff]  }
 0x151   : > { %2099 = vst [vmem:[#allocation4 + $0x478] sm:$0xf] %v10764_v29  ;;  %v12608_v55 = vld [vmem:[#allocation11 + $0x78] sm:$0xff]   ;;  %v12557_v59 = vld [vmem:[#allocation4 + $0x400] ss:$36 sps:$4 sm:$0xff]  }
 0x152   : > { %11558 = vmatprep.subr.bf16.mxu1 %v12608_v55  ;;  %v12562_v60 = vld [vmem:[#allocation4 + $0x44c] ss:$36 sps:$4 sm:$0xff]   ;;  %v12570_v5 = vld [vmem:[#allocation4 + $0x25c] ss:$36 sps:$4 sm:$0xff]   ;;  %v12575_v25 = vld [vmem:[#allocation4 + $0x2a4] ss:$36 sps:$4 sm:$0xff]  }
 0x153   : > { %4288 = vmatmul.mubr.bf16.gmra.mxu1 %v12526_v57  ;;  %v2122_v57 = vld [vmem:[#allocation2 + $0x13a] sm:$0xff]  ;;  %v12567_v2 = vld [vmem:[#allocation4 + $0x210] ss:$36 sps:$4 sm:$0xff]   ;;  %v12612_v55 = vld [vmem:[#allocation11 + $0x68] sm:$0xff]  }
 0x154   : > { %4295 = vmatprep.mubr.bf16.mxu1 %v12529_v12  ;;  %v10787_v62 = vpack.c.bf16 %v2122_v57, %v2122_v57  ;;  %v2125_v12 = vld [vmem:[#allocation2 + $0x15a] sm:$0xff] }
 0x155   : > { %v10790_v18 = vpack.c.bf16 %v2125_v12, %v2125_v12  ;;  %v12564_v57 = vld [vmem:[#allocation4 + $0x214] ss:$36 sps:$4 sm:$0xff]   ;;  %v12571_v11 = vld [vmem:[#allocation4 + $0x20] ss:$36 sps:$4 sm:$0xff]  }
 0x156   : > { %2282 = vst [vmem:[#allocation4 + $0x338] sm:$0xf] %v10787_v62  ;;  %v12568_v22 = vld [vmem:[#allocation4 + $0x258] ss:$36 sps:$4 sm:$0xff]  }
 0x157   : > { %4199 = vmatmul.mubr.bf16.gmra.mxu0 %v12531_v35  ;;  %2285 = vst [vmem:[#allocation4 + $0x3a4] sm:$0xf] %v10790_v18  ;;  %v12611_v18 = vld [vmem:[#allocation11 + $0x30] sm:$0xff]  }
 0x158   : > { %4206 = vmatprep.mubr.bf16.mxu0 %v12534_v36  ;;  %v12547_v36 = vld [vmem:[#allocation4 + $0x3bc] ss:$36 sps:$4 sm:$0xff]  }
 0x15b   : > { %4296 = vmatmul.mubr.bf16.gmra.mxu1 %v12532_v33  ;;  %v10795_v33 = vpack.c.bf16 %v2130_v30, %v2130_v30 }
 0x15c   : > { %4303 = vmatprep.mubr.bf16.mxu1 %v12536_v34  ;;  %v10796_v34 = vpack.c.bf16 %v2131_v31, %v2131_v31  ;;  %v12576_v31 = vld [vmem:[#allocation4 + $0xb0] ss:$36 sps:$4 sm:$0xff]  }
 0x15d   : > { %2290 = vst [vmem:[#allocation4 + $0x458] sm:$0xf] %v10795_v33 }
 0x15e   : > { %2291 = vst [vmem:[#allocation4 + $0x47c] sm:$0xf] %v10796_v34 }
 0x15f   : > { %4207 = vmatmul.mubr.bf16.gmra.mxu0 %v12538_v40 }
 0x160   : > { %4214 = vmatprep.mubr.bf16.mxu0 %v12540_v42  ;;  %v12555_v42 = vld [vmem:[#allocation4 + $0x1cc] ss:$36 sps:$4 sm:$0xff]  }
 0x163   : > { %4304 = vmatmul.mubr.bf16.gmra.mxu1 %v12539_v39 }
 0x164   : > { %v11102_v41 = vpop.f32.mrf.mxu0  ;;  %4311 = vmatprep.mubr.bf16.mxu1 %v12542_v15  ;;  %v12552_v15 = vld [vmem:[#allocation4 + $0x180] ss:$36 sps:$4 sm:$0xff]  }
 0x166   : > { %v11103_v45 = vpop.f32.mrf.mxu0 }
 0x167   : > { %v13516_v51 = vadd.f32 %v11103_v45, %v11102_v41  ;;  %4215 = vmatmul.mubr.bf16.gmra.mxu0 %v12544_v27  ;;  %v12551_v45 = vld [vmem:[#allocation4 + $0x3b8] ss:$36 sps:$4 sm:$0xff]  }
 0x168   : > { %v11105_v58 = vpop.f32.mrf.mxu0  ;;  %4222 = vmatprep.mubr.bf16.mxu0 %v12547_v36 }
 0x16a   : > { %v11106_v8 = vpop.f32.mrf.mxu0 }
 0x16b   : > { %v11174_v16 = vpop.f32.mrf.mxu1  ;;  %v13518_v17 = vadd.f32 %v11106_v8, %v11105_v58  ;;  %4312 = vmatmul.mubr.bf16.gmra.mxu1 %v12545_v1  ;;  %v12609_v58 = vld [vmem:[#allocation11 + $0x38] sm:$0xff]   ;;  %v12566_v8 = vld [vmem:[#allocation4 + $0x448] ss:$36 sps:$4 sm:$0xff]  }
 0x16c   : > { %4319 = vmatprep.mubr.bf16.mxu1 %v12549_v9  ;;  %11559 = vmatpush3.bf16.msra.mxu1 %v12609_v58 }
 0x16d   : > { %v11175_v28 = vpop.f32.mrf.mxu1  ;;  %v11108_v39 = vpop.f32.mrf.mxu0 }
 0x16e   : > { %v13520_v32 = vadd.f32 %v11175_v28, %v11174_v16  ;;  %v12610_v16 = vld [vmem:[#allocation11 + $0x70] sm:$0xff]   ;;  %v12572_v28 = vld [vmem:[#allocation4 + $0x68] ss:$36 sps:$4 sm:$0xff]  }
 0x16f   : > { %v11177_v35 = vpop.f32.mrf.mxu1  ;;  %v11109_v41 = vpop.f32.mrf.mxu0  ;;  %4223 = vmatmul.mubr.bf16.gmra.mxu0 %v12551_v45  ;;  %11560 = vmatprep.subr.bf16.mxu1 %v12610_v16  ;;  %v12577_v45 = vld [vmem:[#allocation4 + $0xf8] ss:$36 sps:$4 sm:$0xff]  }
 0x170   : > { %v13524_v43 = vadd.f32 %v11109_v41, %v11108_v39  ;;  %4230 = vmatprep.mubr.bf16.mxu0 %v12553_v49  ;;  %11561 = vmatpush3.bf16.msra.mxu1 %v12611_v18  ;;  %v12581_v49 = vld [vmem:[#allocation4 + $0x140] ss:$36 sps:$4 sm:$0xff]  }
 0x171   : > { %v11178_v37 = vpop.f32.mrf.mxu1  ;;  %v11111_v47 = vpop.f32.mrf.mxu0  ;;  %11562 = vmatprep.subr.bf16.mxu1 %v12612_v55 }
 0x172   : > { %v13522_v38 = vadd.f32 %v11178_v37, %v11177_v35  ;;  %v12573_v37 = vld [vmem:[#allocation4 + $0x2a0] ss:$36 sps:$4 sm:$0xff]  }
 0x173   : > { %v11180_v40 = vpop.f32.mrf.mxu1  ;;  %4320 = vmatmul.mubr.bf16.gmra.mxu1 %v12552_v15  ;;  %v11112_v50 = vpop.f32.mrf.mxu0 }
 0x174   : > { %4327 = vmatprep.mubr.bf16.mxu1 %v12555_v42  ;;  %v13528_v52 = vadd.f32 %v11112_v50, %v11111_v47 }
 0x175   : > { %v11181_v44 = vpop.f32.mrf.mxu1  ;;  %v11114_v61 = vpop.f32.mrf.mxu0 }
 0x176   : > { %v13526_v46 = vadd.f32 %v11181_v44, %v11180_v40  ;;  %v12580_v40 = vld [vmem:[#allocation4 + $0x2ec] ss:$36 sps:$4 sm:$0xff]  }
 0x177   : > { %v11183_v48 = vpop.f32.mrf.mxu1  ;;  %v11115_v63 = vpop.f32.mrf.mxu0  ;;  %4231 = vmatmul.mubr.bf16.gmra.mxu0 %v12557_v59 }
 0x178   : > { %v13532_v0 = vadd.f32 %v11115_v63, %v11114_v61  ;;  %4238 = vmatprep.mubr.bf16.mxu0 %v12562_v60  ;;  %v12578_v61 = vld [vmem:[#allocation4 + $0x2e8] ss:$36 sps:$4 sm:$0xff]   ;;  %v12585_v63 = vld [vmem:[#allocation4 + $0x334] ss:$36 sps:$4 sm:$0xff]  }
 0x179   : > { %v11184_v53 = vpop.f32.mrf.mxu1  ;;  %v11117_v4 = vpop.f32.mrf.mxu0 }
 0x17a   : > { %v13530_v56 = vadd.f32 %v11184_v53, %v11183_v48 }
 0x17b   : > { %v11186_v62 = vpop.f32.mrf.mxu1  ;;  %4328 = vmatmul.mubr.bf16.gmra.mxu1 %v12558_v54  ;;  %v11118_v7 = vpop.f32.mrf.mxu0 }
 0x17c   : > { %4335 = vmatprep.mubr.bf16.mxu1 %v12564_v57  ;;  %v13536_v9 = vadd.f32 %v11118_v7, %v11117_v4  ;;  %v12613_v57 = vld [vmem:[#allocation11 + $0x28] sm:$0xff]   ;;  %v12586_v7 = vld [vmem:[#allocation4 + $0x1d0] ss:$36 sps:$4 sm:$0xff]  }
 0x17d   : > { %v11187_v1 = vpop.f32.mrf.mxu1  ;;  %v11120_v13 = vpop.f32.mrf.mxu0  ;;  %11563 = vmatpush3.bf16.msra.mxu1 %v12613_v57  ;;  %v12596_v57 = vld [vmem:[#allocation4 + $0x2f0] ss:$36 sps:$4 sm:$0xff]  }
 0x17e   : > { %v13534_v3 = vadd.f32 %v11187_v1, %v11186_v62 }
 0x17f   : > { %v11189_v6 = vpop.f32.mrf.mxu1  ;;  %v11121_v19 = vpop.f32.mrf.mxu0  ;;  %4239 = vmatmul.mubr.bf16.gmra.mxu0 %v12566_v8 }
 0x180   : > { %v13540_v20 = vadd.f32 %v11121_v19, %v11120_v13  ;;  %12070 = vmatprep.mubr.bf16.mxu0 %v12571_v11  ;;  %v12583_v19 = vld [vmem:[#allocation4 + $0x330] ss:$36 sps:$4 sm:$0xff]  }
 0x181   : > { %v11190_v10 = vpop.f32.mrf.mxu1  ;;  %v11123_v24 = vpop.f32.mrf.mxu0 }
 0x182   : > { %v13538_v12 = vadd.f32 %v11190_v10, %v11189_v6 }
 0x183   : > { %v11192_v14 = vpop.f32.mrf.mxu1  ;;  %4336 = vmatmul.mubr.bf16.gmra.mxu1 %v12567_v2  ;;  %v11124_v27 = vpop.f32.mrf.mxu0 }
 0x184   : > { %4343 = vmatprep.mubr.bf16.mxu1 %v12570_v5  ;;  %v13544_v29 = vadd.f32 %v11124_v27, %v11123_v24  ;;  %v12582_v5 = vld [vmem:[#allocation4 + $0x188] ss:$36 sps:$4 sm:$0xff]   ;;  %v12587_v27 = vld [vmem:[#allocation4 + $0x218] ss:$36 sps:$4 sm:$0xff]  }
 0x185   : > { %v11193_v21 = vpop.f32.mrf.mxu1  ;;  %v11126_v35 = vpop.f32.mrf.mxu0 }
 0x186   : > { %v13542_v23 = vadd.f32 %v11193_v21, %v11192_v14 }
 0x187   : > { %v11195_v26 = vpop.f32.mrf.mxu1  ;;  %12071 = vmatmul.mubr.bf16.vlgmr.msra.gmra.mxu0 %v12572_v28  ;;  %v11127_v15 = vpop.f32.mrf.mxu0 }
 0x188   : > { %12074 = vmatprep.mubr.bf16.mxu0 %v12576_v31  ;;  %v13548_v42 = vadd.f32 %v11127_v15, %v11126_v35 }
 0x189   : > { %v11196_v30 = vpop.f32.mrf.mxu1  ;;  %v11129_v47 = vpop.f32.mrf.mxu0 }
 0x18a   : > { %v13546_v33 = vadd.f32 %v11196_v30, %v11195_v26  ;;  %v12591_v30 = vld [vmem:[#allocation4 + $0x260] ss:$36 sps:$4 sm:$0xff]  }
 0x18b   : > { %v11214_v34 = vpop.f32.mrf.mxu1  ;;  %4344 = vmatmul.mubr.bf16.gmra.mxu1 %v12568_v22  ;;  %v11130_v53 = vpop.f32.mrf.mxu0  ;;  %v12590_v22 = vld [vmem:[#allocation4 + $0x37c] ss:$36 sps:$4 sm:$0xff]  }
 0x18c   : > { %4351 = vmatprep.mubr.bf16.mxu1 %v12575_v25  ;;  %v13553_v58 = vadd.f32 %v11130_v53, %v11129_v47 }
 0x18d   : > { %v11215_v36 = vpop.f32.mrf.mxu1 }
 0x18e   : > { %v11216_v39 = vadd.f32 %v11215_v36, %v11214_v34  ;;  %v12614_v36 = vld [vmem:[#allocation11 + $0x60] sm:$0xff]  }
 0x18f   : > { %v11217_v41 = vpop.f32.mrf.mxu1  ;;  %12075 = vmatmul.mubr.bf16.gmra.mxu0 %v12577_v45  ;;  %11564 = vmatprep.subr.bf16.mxu1 %v12614_v36 }
 0x190   : > { %v13551_v44 = vadd.f32 %v11216_v39, %v13516_v51  ;;  %v11132_v51 = vpop.f32.mrf.mxu0  ;;  %12078 = vmatprep.mubr.bf16.mxu0 %v12581_v49 }
 0x191   : > { %v11218_v48 = vpop.f32.mrf.mxu1 }
 0x192   : > { %v11219_v50 = vadd.f32 %v11218_v48, %v11217_v41  ;;  %v11133_v2 = vpop.f32.mrf.mxu0  ;;  %v12588_v41 = vld [vmem:[#allocation4 + $0x378] ss:$36 sps:$4 sm:$0xff]   ;;  %v12595_v48 = vld [vmem:[#allocation4 + $0x3c4] ss:$36 sps:$4 sm:$0xff]  }
 0x193   : > { %v11220_v54 = vpop.f32.mrf.mxu1  ;;  %4352 = vmatmul.mubr.bf16.gmra.mxu1 %v12573_v37  ;;  %v13561_v6 = vadd.f32 %v11133_v2, %v11132_v51  ;;  %v12615_v37 = vld [vmem:[#allocation11 + $0x20] sm:$0xff]  }
 0x194   : > { %v13556_v59 = vadd.f32 %v11219_v50, %v13518_v17  ;;  %4359 = vmatprep.mubr.bf16.mxu1 %v12580_v40  ;;  %v11135_v8 = vpop.f32.mrf.mxu0  ;;  %11565 = vmatpush3.bf16.msra.mxu1 %v12615_v37  ;;  %v12598_v37 = vld [vmem:[#allocation4 + $0x408] ss:$36 sps:$4 sm:$0xff]  }
 0x195   : > { %v11221_v60 = vpop.f32.mrf.mxu1 }
 0x196   : > { %v11222_v62 = vadd.f32 %v11221_v60, %v11220_v54  ;;  %v11136_v13 = vpop.f32.mrf.mxu0  ;;  %v12592_v54 = vld [vmem:[#allocation4 + $0x2a8] ss:$36 sps:$4 sm:$0xff]  }
 0x197   : > { %v11223_v1 = vpop.f32.mrf.mxu1  ;;  %v13566_v16 = vadd.f32 %v11136_v13, %v11135_v8  ;;  %12079 = vmatmul.mubr.bf16.gmra.mxu0 %v12582_v5 }
 0x198   : > { %v13559_v4 = vadd.f32 %v11222_v62, %v13524_v43  ;;  %v11138_v43 = vpop.f32.mrf.mxu0  ;;  %12082 = vmatprep.mubr.bf16.mxu0 %v12586_v7  ;;  %v12593_v7 = vld [vmem:[#allocation4 + $0x3c0] ss:$36 sps:$4 sm:$0xff]  }
 0x199   : > { %v11224_v17 = vpop.f32.mrf.mxu1 }
 0x19a   : > { %v11225_v10 = vadd.f32 %v11224_v17, %v11223_v1  ;;  %v11139_v25 = vpop.f32.mrf.mxu0 }
 0x19b   : > { %v11226_v11 = vpop.f32.mrf.mxu1  ;;  %4360 = vmatmul.mubr.bf16.gmra.mxu1 %v12578_v61  ;;  %v13571_v28 = vadd.f32 %v11139_v25, %v11138_v43  ;;  %v12597_v43 = vld [vmem:[#allocation4 + $0x338] ss:$36 sps:$4 sm:$0xff]  }
 0x19c   : > { %v13564_v14 = vadd.f32 %v11225_v10, %v13528_v52  ;;  %4367 = vmatprep.mubr.bf16.mxu1 %v12585_v63  ;;  %v11141_v31 = vpop.f32.mrf.mxu0  ;;  %v12617_v25 = vld [vmem:[#allocation11 + $0x18] sm:$0xff]  }
 0x19d   : > { %v11227_v18 = vpop.f32.mrf.mxu1 }
 0x19e   : > { %v11228_v21 = vadd.f32 %v11227_v18, %v11226_v11  ;;  %v11142_v39 = vpop.f32.mrf.mxu0  ;;  %v12600_v11 = vld [vmem:[#allocation4 + $0x40c] ss:$36 sps:$4 sm:$0xff]  }
 0x19f   : > { %v11229_v24 = vpop.f32.mrf.mxu1  ;;  %v13576_v15 = vadd.f32 %v11142_v39, %v11141_v31  ;;  %12083 = vmatmul.mubr.bf16.gmra.mxu0 %v12587_v27  ;;  %v12618_v27 = vld [vmem:[#allocation11 + $0xf8] sm:$0xff]  }
 0x1a0   : > { %v13569_v26 = vadd.f32 %v11228_v21, %v13532_v0  ;;  %v11144_v45 = vpop.f32.mrf.mxu0  ;;  %12086 = vmatprep.mubr.bf16.mxu0 %v12591_v30  ;;  %v12601_v21 = vld [vmem:[#allocation4 + $0x380] ss:$36 sps:$4 sm:$0xff]   ;;  %11670 = vmatprep.subr.bf16.mxu0 %v12618_v27  ;;  %v12625_v27 = vld [vmem:[#allocation11 + $0xa8] sm:$0xff]  }
 0x1a1   : > { %v11230_v52 = vpop.f32.mrf.mxu1 }
 0x1a2   : > { %v11231_v34 = vadd.f32 %v11230_v52, %v11229_v24  ;;  %v11145_v50 = vpop.f32.mrf.mxu0  ;;  %v12616_v24 = vld [vmem:[#allocation11 + $0x58] sm:$0xff]  }
 0x1a3   : > { %v11232_v35 = vpop.f32.mrf.mxu1  ;;  %4368 = vmatmul.mubr.bf16.gmra.mxu1 %v12583_v19  ;;  %11566 = vmatprep.subr.bf16.mxu1 %v12616_v24 }
 0x1a4   : > { %v13574_v40 = vadd.f32 %v11231_v34, %v13536_v9  ;;  %4375 = vmatprep.mubr.bf16.mxu1 %v12590_v22  ;;  %v13581_v9 = vadd.f32 %v11145_v50, %v11144_v45  ;;  %v11147_v60 = vpop.f32.mrf.mxu0  ;;  %11567 = vmatpush3.bf16.msra.mxu1 %v12617_v25 }
 0x1a5   : > { %v11233_v0 = vpop.f32.mrf.mxu1 }
 0x1a6   : > { %v11234_v47 = vadd.f32 %v11233_v0, %v11232_v35  ;;  %v11148_v62 = vpop.f32.mrf.mxu0 }
 0x1a7   : > { %v11235_v49 = vpop.f32.mrf.mxu1  ;;  %v13586_v1 = vadd.f32 %v11148_v62, %v11147_v60  ;;  %12087 = vmatmul.mubr.bf16.gmra.mxu0 %v12592_v54  ;;  %v12606_v54 = vld [vmem:[#allocation4 + $0x410] ss:$36 sps:$4 sm:$0xff]  }
 0x1a8   : > { %v13579_v53 = vadd.f32 %v11234_v47, %v13540_v20  ;;  %v11150_v5 = vpop.f32.mrf.mxu0  ;;  %12090 = vmatprep.mubr.bf16.mxu0 %v12596_v57  ;;  %v12621_v57 = vld [vmem:[#allocation11 + $0xb0] sm:$0xff]  }
 0x1a9   : > { %v11236_v55 = vpop.f32.mrf.mxu1 }
 0x1aa   : > { %v11237_v61 = vadd.f32 %v11236_v55, %v11235_v49  ;;  %v11151_v8 = vpop.f32.mrf.mxu0  ;;  %v12602_v49 = vld [vmem:[#allocation4 + $0x3c8] ss:$36 sps:$4 sm:$0xff]   ;;  %v12620_v55 = vld [vmem:[#allocation11 + $0xf0] sm:$0xff]  }
 0x1ab   : > { %v11238_v51 = vpop.f32.mrf.mxu1  ;;  %4376 = vmatmul.mubr.bf16.gmra.mxu1 %v12588_v41  ;;  %v13591_v13 = vadd.f32 %v11151_v8, %v11150_v5  ;;  %v12605_v41 = vld [vmem:[#allocation4 + $0x454] ss:$36 sps:$4 sm:$0xff]  }
 0x1ac   : > { %v13584_v63 = vadd.f32 %v11237_v61, %v13544_v29  ;;  %4383 = vmatprep.mubr.bf16.mxu1 %v12595_v48  ;;  %v13593_v29 = vpop.f32.mrf.mxu0  ;;  %v12603_v5 = vld [vmem:[#allocation4 + $0x450] ss:$36 sps:$4 sm:$0xff]  }
 0x1ad   : > { %v11239_v2 = vpop.f32.mrf.mxu1 }
 0x1ae   : > { %v11240_v20 = vadd.f32 %v11239_v2, %v11238_v51  ;;  %v13595_v52 = vpop.f32.mrf.mxu0 }
 0x1af   : > { %v11241_v17 = vpop.f32.mrf.mxu1  ;;  %12091 = vmatmul.mubr.bf16.gmra.mxu0 %v12597_v43  ;;  %v12622_v43 = vld [vmem:[#allocation11 + $0x50] sm:$0xff]  }
 0x1b0   : > { %v13589_v10 = vadd.f32 %v11240_v20, %v13548_v42  ;;  %v12619_v42 = vld [vmem:[#allocation11 + $0xb8] sm:$0xff]   ;;  %v11156_v34 = vpop.f32.mrf.mxu0  ;;  %12094 = vmatprep.mubr.bf16.mxu0 %v12601_v21  ;;  %v12623_v21 = vld [vmem:[#allocation11 + $0x10] sm:$0xff]   ;;  %11568 = vmatprep.subr.bf16.mxu1 %v12622_v43 }
 0x1b1   : > { %v11242_v18 = vpop.f32.mrf.mxu1  ;;  %11671 = vmatpush3.bf16.msra.mxu0 %v12619_v42  ;;  %11569 = vmatpush3.bf16.msra.mxu1 %v12623_v21 }
 0x1b2   : > { %v11243_v19 = vadd.f32 %v11242_v18, %v11241_v17  ;;  %v11157_v39 = vpop.f32.mrf.mxu0  ;;  %11672 = vmatprep.subr.bf16.mxu0 %v12620_v55  ;;  %v12607_v18 = vld [vmem:[#allocation4 + $0x458] ss:$36 sps:$4 sm:$0xff]  }
 0x1b3   : > { %v11244_v22 = vpop.f32.mrf.mxu1  ;;  %4384 = vmatmul.mubr.bf16.gmra.mxu1 %v12593_v7 }
 0x1b4   : > { %v13598_v30 = vadd.f32 %v11243_v19, %v13553_v58  ;;  %4391 = vmatprep.mubr.bf16.mxu1 %v12600_v11  ;;  %v13603_v58 = vadd.f32 %v11157_v39, %v11156_v34  ;;  %v13605_v47 = vpop.f32.mrf.mxu0 }
 0x1b5   : > { %v11245_v31 = vpop.f32.mrf.mxu1  ;;  %11673 = vmatpush3.bf16.msra.mxu0 %v12621_v57 }
 0x1b6   : > { %v11246_v35 = vadd.f32 %v11245_v31, %v11244_v22  ;;  %v13607_v60 = vpop.f32.mrf.mxu0  ;;  %v12624_v22 = vld [vmem:[#allocation11 + $0xe8] sm:$0xff]  }
 0x1b7   : > { %v11247_v36 = vpop.f32.mrf.mxu1  ;;  %12095 = vmatmul.mubr.bf16.gmra.mxu0 %v12602_v49  ;;  %11674 = vmatprep.subr.bf16.mxu0 %v12624_v22  ;;  %v12627_v49 = vld [vmem:[#allocation11 + $0xa0] sm:$0xff]  }
 0x1b8   : > { %v13601_v0 = vadd.f32 %v11246_v35, %v13561_v6  ;;  %v11162_v51 = vpop.f32.mrf.mxu0  ;;  %12098 = vmatprep.mubr.bf16.mxu0 %v12606_v54 }
 0x1b9   : > { %v11248_v45 = vpop.f32.mrf.mxu1  ;;  %11675 = vmatpush3.bf16.msra.mxu0 %v12625_v27 }
 0x1ba   : > { %v11249_v48 = vadd.f32 %v11248_v45, %v11247_v36  ;;  %v11163_v20 = vpop.f32.mrf.mxu0 }
 0x1bb   : > { %v11250_v50 = vpop.f32.mrf.mxu1  ;;  %4392 = vmatmul.mubr.bf16.gmra.mxu1 %v12598_v37  ;;  %v13615_v7 = vadd.f32 %v11163_v20, %v11162_v51  ;;  %v11155_v20 = vadd.f32 %v13595_v52, %v13593_v29 }
 0x1bc   : > { %v13610_v61 = vadd.f32 %v11249_v48, %v13566_v16  ;;  %4399 = vmatprep.mubr.bf16.mxu1 %v12605_v41  ;;  %v13617_v11 = vpop.f32.mrf.mxu0  ;;  %v12626_v48 = vld [vmem:[#allocation11 + $0xe0] sm:$0xff]  }
 0x1bd   : > { %v11251_v6 = vpop.f32.mrf.mxu1  ;;  %11676 = vmatprep.subr.bf16.mxu0 %v12626_v48 }
 0x1be   : > { %v11252_v62 = vadd.f32 %v11251_v6, %v11250_v50  ;;  %v13619_v24 = vpop.f32.mrf.mxu0  ;;  %11677 = vmatpush3.bf16.msra.mxu0 %v12627_v49  ;;  %v4755_v49 = vld [vmem:[#allocation3] sm:$0xff] }
 0x1bf   : > { %v11253_v2 = vpop.f32.mrf.mxu1  ;;  %12099 = vmatmul.mubr.bf16.gmra.mxu0 %v12607_v18 }
 0x1c0   : > { %v13613_v17 = vadd.f32 %v11252_v62, %v13571_v28  ;;  %v11168_v42 = vpop.f32.mrf.mxu0 }
 0x1c1   : > { %v11254_v8 = vpop.f32.mrf.mxu1 }
 0x1c2   : > { %v11255_v16 = vadd.f32 %v11254_v8, %v11253_v2  ;;  %v11169_v35 = vpop.f32.mrf.mxu0 }
 0x1c3   : > { %v11256_v19 = vpop.f32.mrf.mxu1  ;;  %4400 = vmatmul.mubr.bf16.gmra.mxu1 %v12603_v5  ;;  %v13627_v37 = vadd.f32 %v11169_v35, %v11168_v42 }
 0x1c4   : > { %v13622_v25 = vadd.f32 %v11255_v16, %v13576_v15  ;;  %v13629_v41 = vpop.f32.mrf.mxu0 }
 0x1c5   : > { %v11257_v28 = vpop.f32.mrf.mxu1 }
 0x1c6   : > { %v11258_v31 = vadd.f32 %v11257_v28, %v11256_v19  ;;  %v13631_v50 = vpop.f32.mrf.mxu0 }
 0x1c7   : > { %v11259_v34 = vpop.f32.mrf.mxu1 }
 0x1c8   : > { %v13625_v36 = vadd.f32 %v11258_v31, %v13581_v9  ;;  %v11326_v57 = vpop.f32.mrf.mxu0 }
 0x1c9   : > { %v11260_v39 = vpop.f32.mrf.mxu1 }
 0x1ca   : > { %v11261_v15 = vadd.f32 %v11260_v39, %v11259_v34  ;;  %v11327_v62 = vpop.f32.mrf.mxu0 }
 0x1cb   : > { %v11262_v45 = vpop.f32.mrf.mxu1  ;;  %v11328_v2 = vadd.f32 %v11327_v62, %v11326_v57  ;;  %v4948_v57 = vld [vmem:[#allocation3 + $0x9] sm:$0xff]  ;;  %v12929_v62 = vld [vmem:[#allocation2 + $0x8] sm:$0xff] }
 0x1cc   : > { %v13634_v54 = vadd.f32 %v11261_v15, %v13586_v1  ;;  %v11329_v8 = vpop.f32.mrf.mxu0 }
 0x1cd   : > { %v11263_v55 = vpop.f32.mrf.mxu1  ;;  %v13642_v1 = vadd.f32 %v11328_v2, %v13551_v44  ;;  %v11161_v44 = vadd.f32 %v13607_v60, %v13605_v47  ;;  %v10798_v2 = vpack.c.bf16 %v12929_v62, %v12929_v62  ;;  %v10830_v60 = vpack.c.bf16 %v4948_v57, %v4948_v57  ;;  %v12635_v57 = vld [vmem:[#allocation11] sm:$0xff]  }
 0x1ce   : > { %v11264_v6 = vadd.f32 %v11263_v55, %v11262_v45  ;;  %v11330_v43 = vpop.f32.mrf.mxu0  ;;  %v4947_v55 = vld [vmem:[#allocation3 + $0x1] sm:$0xff] }
 0x1cf   : > { %v11265_v9 = vpop.f32.mrf.mxu1  ;;  %v11331_v21 = vadd.f32 %v11330_v43, %v11329_v8  ;;  %4916 = vst [vmem:[#allocation5 + $0x24] sm:$0xf] %v10798_v2  ;;  %5108 = vst [vmem:[#allocation5 + $0x28] sm:$0xf] %v10830_v60 }
 0x1d0   : > { %v13637_v51 = vadd.f32 %v11264_v6, %v13591_v13  ;;  %v11332_v27 = vpop.f32.mrf.mxu0 }
 0x1d1   : > { %v11266_v5 = vpop.f32.mrf.mxu1  ;;  %v13647_v28 = vadd.f32 %v11331_v21, %v13556_v59 }
 0x1d2   : > { %v11267_v16 = vadd.f32 %v11266_v5, %v11265_v9  ;;  %v11333_v29 = vpop.f32.mrf.mxu0  ;;  %v10797_v9 = vpack.c.bf16 %v4755_v49, %v4755_v49  ;;  %v10829_v5 = vpack.c.bf16 %v4947_v55, %v4947_v55  ;;  %v12633_v55 = vld [vmem:[#allocation11 + $0x90] sm:$0xff]  }
 0x1d3   : > { %v11268_v18 = vpop.f32.mrf.mxu1  ;;  %v11334_v52 = vadd.f32 %v11333_v29, %v11332_v27  ;;  %v12631_v27 = vld [vmem:[#allocation11 + $0x98] sm:$0xff]  }
 0x1d4   : > { %v13644_v19 = vadd.f32 %v11267_v16, %v11155_v20  ;;  %v11335_v35 = vpop.f32.mrf.mxu0  ;;  %v12628_v16 = vld [vmem:[#allocation11 + $0x48] sm:$0xff]   ;;  %4915 = vst [vmem:[#allocation5] sm:$0xf] %v10797_v9  ;;  %5107 = vst [vmem:[#allocation5 + $0x4] sm:$0xf] %v10829_v5  ;;  %v5139_v29 = vld [vmem:[#allocation3 + $0x2] sm:$0xff] }
 0x1d5   : > { %v11269_v22 = vpop.f32.mrf.mxu1  ;;  %v13655_v15 = vadd.f32 %v11334_v52, %v13559_v4  ;;  %11570 = vmatprep.subr.bf16.mxu1 %v12628_v16  ;;  %v12636_v5 = vld [vmem:[#allocation11 + $0xc8] sm:$0xff]  }
 0x1d6   : > { %v11270_v13 = vadd.f32 %v11269_v22, %v11268_v18  ;;  %v11336_v59 = vpop.f32.mrf.mxu0  ;;  %v12630_v18 = vld [vmem:[#allocation11 + $0xd8] sm:$0xff]   ;;  %v12629_v22 = vld [vmem:[#allocation11 + $0x8] sm:$0xff]  }
 0x1d7   : > { %v11271_v42 = vpop.f32.mrf.mxu1  ;;  %11678 = vmatprep.subr.bf16.mxu0 %v12630_v18  ;;  %11571 = vmatpush3.bf16.msra.mxu1 %v12629_v22  ;;  %v11173_v22 = vadd.f32 %v13631_v50, %v13629_v41 }
 0x1d8   : > { %v13650_v31 = vadd.f32 %v11270_v13, %v13603_v58  ;;  %v11337_v58 = vadd.f32 %v11336_v59, %v11335_v35  ;;  %v11338_v20 = vpop.f32.mrf.mxu0  ;;  %11679 = vmatpush3.bf16.msra.mxu0 %v12631_v27 }
 0x1d9   : > { %v11272_v34 = vpop.f32.mrf.mxu1 }
 0x1da   : > { %v11273_v39 = vadd.f32 %v11272_v34, %v11271_v42  ;;  %v13660_v8 = vadd.f32 %v11337_v58, %v13564_v14  ;;  %v11339_v21 = vpop.f32.mrf.mxu0  ;;  %v11167_v14 = vadd.f32 %v13619_v24, %v13617_v11  ;;  %v5140_v11 = vld [vmem:[#allocation3 + $0xa] sm:$0xff] }
 0x1db   : > { %v11274_v45 = vpop.f32.mrf.mxu1  ;;  %v11340_v13 = vadd.f32 %v11339_v21, %v11338_v20  ;;  %v12638_v20 = vld [vmem:[#allocation5] ss:$36 sps:$4 sm:$0xff]  }
 0x1dc   : > { %v13657_v48 = vadd.f32 %v11273_v39, %v11161_v44  ;;  %v11341_v52 = vpop.f32.mrf.mxu0  ;;  %v10861_v44 = vpack.c.bf16 %v5139_v29, %v5139_v29  ;;  %v12632_v39 = vld [vmem:[#allocation11 + $0xd0] sm:$0xff]   ;;  %v12640_v16 = vld [vmem:[#allocation5 + $0x4] ss:$36 sps:$4 sm:$0xff]  }
 0x1dd   : > { %v11275_v6 = vpop.f32.mrf.mxu1  ;;  %11680 = vmatprep.subr.bf16.mxu0 %v12632_v39  ;;  %7988 = vmatprep.mubr.bf16.mxu1 %v12640_v16 }
 0x1de   : > { %v11276_v47 = vadd.f32 %v11275_v6, %v11274_v45  ;;  %v12634_v45 = vld [vmem:[#allocation11 + $0x40] sm:$0xff]   ;;  %v11342_v49 = vpop.f32.mrf.mxu0  ;;  %5299 = vst [vmem:[#allocation5 + $0x8] sm:$0xf] %v10861_v44  ;;  %11681 = vmatpush3.bf16.msra.mxu0 %v12633_v55 }
 0x1df   : > { %v11277_v4 = vpop.f32.mrf.mxu1  ;;  %v11343_v58 = vadd.f32 %v11342_v49, %v11341_v52  ;;  %11572 = vmatprep.subr.bf16.mxu1 %v12634_v45  ;;  %11682 = vmatprep.subr.bf16.mxu0 %v12636_v5  ;;  %v12642_v44 = vld [vmem:[#allocation11 + $0x80] sm:$0xff]  }
 0x1e0   : > { %v13663_v43 = vadd.f32 %v11276_v47, %v13615_v7  ;;  %v13668_v7 = vadd.f32 %v11340_v13, %v13569_v26  ;;  %v11344_v24 = vpop.f32.mrf.mxu0  ;;  %11573 = vmatpush3.bf16.msra.mxu1 %v12635_v57  ;;  %v10862_v26 = vpack.c.bf16 %v5140_v11, %v5140_v11 }
 0x1e1   : > { %v11278_v42 = vpop.f32.mrf.mxu1  ;;  %v13673_v62 = vadd.f32 %v11343_v58, %v13574_v40 }
 0x1e2   : > { %v11279_v34 = vadd.f32 %v11278_v42, %v11277_v4  ;;  %v11345_v60 = vpop.f32.mrf.mxu0  ;;  %v12637_v4 = vld [vmem:[#allocation11 + $0x88] sm:$0xff]   ;;  %5300 = vst [vmem:[#allocation5 + $0x2c] sm:$0xf] %v10862_v26 }
 0x1e3   : > { %v11280_v35 = vpop.f32.mrf.mxu1  ;;  %v11346_v18 = vadd.f32 %v11345_v60, %v11344_v24  ;;  %11683 = vmatpush3.bf16.msra.mxu0 %v12637_v4  ;;  %7989 = vmatmul.mubr.bf16.vlgmr.msra.gmra.mxu1 %v12638_v20 }
 0x1e4   : > { %v13670_v59 = vadd.f32 %v11279_v34, %v11167_v14  ;;  %v11347_v27 = vpop.f32.mrf.mxu0  ;;  %v12641_v14 = vld [vmem:[#allocation11 + $0xc0] sm:$0xff]  }
 0x1e5   : > { %v11281_v6 = vpop.f32.mrf.mxu1  ;;  %v13681_v40 = vadd.f32 %v11346_v18, %v13579_v53  ;;  %11684 = vmatprep.subr.bf16.mxu0 %v12641_v14 }
 0x1e6   : > { %v11282_v9 = vadd.f32 %v11281_v6, %v11280_v35  ;;  %v11348_v29 = vpop.f32.mrf.mxu0 }
 0x1e7   : > { %v11283_v2 = vpop.f32.mrf.mxu1  ;;  %v11349_v52 = vadd.f32 %v11348_v29, %v11347_v27  ;;  %11685 = vmatpush3.bf16.msra.mxu0 %v12642_v44 }
 0x1e8   : > { %v13676_v47 = vadd.f32 %v11282_v9, %v13627_v37  ;;  %v11350_v35 = vpop.f32.mrf.mxu0 }
 0x1e9   : > { %v11284_v21 = vpop.f32.mrf.mxu1  ;;  %v13686_v41 = vadd.f32 %v11349_v52, %v13584_v63 }
 0x1ea   : > { %v11285_v13 = vadd.f32 %v11284_v21, %v11283_v2  ;;  %v11351_v45 = vpop.f32.mrf.mxu0 }
 0x1eb   : > { %v11286_v42 = vpop.f32.mrf.mxu1  ;;  %v11352_v49 = vadd.f32 %v11351_v45, %v11350_v35  ;;  %v12643_v35 = vld [vmem:[#allocation11 + $0x178] sm:$0xff]  }
 0x1ec   : > { %v13683_v37 = vadd.f32 %v11285_v13, %v11173_v22  ;;  %v11353_v57 = vpop.f32.mrf.mxu0  ;;  %11782 = vmatprep.subr.bf16.mxu1 %v12643_v35 }
 0x1ed   : > { %v11287_v34 = vpop.f32.mrf.mxu1  ;;  %v13692_v6 = vadd.f32 %v11352_v49, %v13589_v10 }
 0x1ee   : > { %v11288_v39 = vadd.f32 %v11287_v34, %v11286_v42  ;;  %v11354_v9 = vpop.f32.mrf.mxu0 }
 0x1ef   : > { %v11289_v50 = vpop.f32.mrf.mxu1  ;;  %v11355_v63 = vadd.f32 %v11354_v9, %v11353_v57  ;;  %v12651_v57 = vld [vmem:[#allocation11 + $0x1f8] sm:$0xff]  }
 0x1f0   : > { %v13689_v53 = vadd.f32 %v11288_v39, %v13520_v32  ;;  %v11356_v2 = vpop.f32.mrf.mxu0  ;;  %11894 = vmatprep.subr.bf16.mxu0 %v12651_v57 }
 0x1f1   : > { %v11290_v55 = vpop.f32.mrf.mxu1  ;;  %v13698_v32 = vadd.f32 %v11355_v63, %v13598_v30 }
 0x1f2   : > { %v11291_v58 = vadd.f32 %v11290_v55, %v11289_v50  ;;  %v11357_v4 = vpop.f32.mrf.mxu0 }
 0x1f3   : > { %v11292_v11 = vpop.f32.mrf.mxu1  ;;  %v11358_v16 = vadd.f32 %v11357_v4, %v11356_v2 }
 0x1f4   : > { %v13695_v24 = vadd.f32 %v11291_v58, %v13522_v38  ;;  %v11359_v18 = vpop.f32.mrf.mxu0 }
 0x1f5   : > { %v11293_v26 = vpop.f32.mrf.mxu1  ;;  %v13704_v38 = vadd.f32 %v11358_v16, %v13601_v0  ;;  %v12650_v0 = vld [vmem:[#allocation11 + $0x138] sm:$0xff]  }
 0x1f6   : > { %v11294_v5 = vadd.f32 %v11293_v26, %v11292_v11  ;;  %v11360_v13 = vpop.f32.mrf.mxu0  ;;  %11783 = vmatpush3.bf16.msra.mxu1 %v12650_v0 }
 0x1f7   : > { %v11295_v20 = vpop.f32.mrf.mxu1  ;;  %v11361_v42 = vadd.f32 %v11360_v13, %v11359_v18 }
 0x1f8   : > { %v13701_v60 = vadd.f32 %v11294_v5, %v13526_v46  ;;  %v11362_v29 = vpop.f32.mrf.mxu0 }
 0x1f9   : > { %v11296_v10 = vpop.f32.mrf.mxu1  ;;  %v13710_v46 = vadd.f32 %v11361_v42, %v13610_v61 }
 0x1fa   : > { %v11297_v21 = vadd.f32 %v11296_v10, %v11295_v20  ;;  %v11363_v44 = vpop.f32.mrf.mxu0 }
 0x1fb   : > { %v11298_v22 = vpop.f32.mrf.mxu1  ;;  %v11364_v39 = vadd.f32 %v11363_v44, %v11362_v29  ;;  %v12665_v44 = vld [vmem:[#allocation11 + $0x170] sm:$0xff]  }
 0x1fc   : > { %v13707_v27 = vadd.f32 %v11297_v21, %v13530_v56  ;;  %v11365_v45 = vpop.f32.mrf.mxu0  ;;  %11784 = vmatprep.subr.bf16.mxu1 %v12665_v44 }
 0x1fd   : > { %v11299_v30 = vpop.f32.mrf.mxu1  ;;  %v13716_v49 = vadd.f32 %v11364_v39, %v13613_v17 }
 0x1fe   : > { %v11300_v14 = vadd.f32 %v11299_v30, %v11298_v22  ;;  %v11366_v58 = vpop.f32.mrf.mxu0 }
 0x1ff   : > { %v11301_v52 = vpop.f32.mrf.mxu1 }
 0x200   : > { %v13713_v34 = vadd.f32 %v11300_v14, %v13534_v3  ;;  %v11367_v3 = vadd.f32 %v11366_v58, %v11365_v45  ;;  %v11368_v9 = vpop.f32.mrf.mxu0 }
 0x201   : > { %v11302_v50 = vpop.f32.mrf.mxu1 }
 0x202   : > { %v11303_v56 = vadd.f32 %v11302_v50, %v11301_v52  ;;  %v13722_v26 = vadd.f32 %v11367_v3, %v13622_v25  ;;  %v11369_v17 = vpop.f32.mrf.mxu0 }
 0x203   : > { %v11304_v55 = vpop.f32.mrf.mxu1  ;;  %v11370_v20 = vadd.f32 %v11369_v17, %v11368_v9 }
 0x204   : > { %v13719_v61 = vadd.f32 %v11303_v56, %v13538_v12  ;;  %v11371_v16 = vpop.f32.mrf.mxu0 }
 0x205   : > { %v11305_v11 = vpop.f32.mrf.mxu1  ;;  %v13728_v12 = vadd.f32 %v11370_v20, %v13625_v36  ;;  %v12666_v36 = vld [vmem:[#allocation11 + $0x130] sm:$0xff]  }
 0x206   : > { %v11306_v63 = vadd.f32 %v11305_v11, %v11304_v55  ;;  %v11372_v22 = vpop.f32.mrf.mxu0  ;;  %11785 = vmatpush3.bf16.msra.mxu1 %v12666_v36 }
 0x207   : > { %v11307_v2 = vpop.f32.mrf.mxu1  ;;  %v11373_v13 = vadd.f32 %v11372_v22, %v11371_v16  ;;  %v12682_v22 = vld [vmem:[#allocation11 + $0x128] sm:$0xff]  }
 0x208   : > { %v13725_v5 = vadd.f32 %v11306_v63, %v13542_v23  ;;  %v11374_v42 = vpop.f32.mrf.mxu0 }
 0x209   : > { %v11308_v4 = vpop.f32.mrf.mxu1  ;;  %v13734_v23 = vadd.f32 %v11373_v13, %v13634_v54 }
 0x20a   : > { %v11309_v10 = vadd.f32 %v11308_v4, %v11307_v2  ;;  %v11375_v14 = vpop.f32.mrf.mxu0 }
 0x20b   : > { %v11438_v18 = vpop.f32.mrf.mxu1  ;;  %v11376_v35 = vadd.f32 %v11375_v14, %v11374_v42 }
 0x20c   : > { %v13731_v21 = vadd.f32 %v11309_v10, %v13546_v33  ;;  %v11377_v39 = vpop.f32.mrf.mxu0 }
 0x20d   : > { %v11439_v25 = vpop.f32.mrf.mxu1  ;;  %v13740_v50 = vadd.f32 %v11376_v35, %v13637_v51 }
 0x20e   : > { %v11440_v30 = vadd.f32 %v11439_v25, %v11438_v18  ;;  %v11378_v54 = vpop.f32.mrf.mxu0  ;;  %v12681_v18 = vld [vmem:[#allocation11 + $0x168] sm:$0xff]   ;;  %v12697_v25 = vld [vmem:[#allocation11 + $0x160] sm:$0xff]  }
 0x20f   : > { %v11441_v29 = vpop.f32.mrf.mxu1  ;;  %v11379_v55 = vadd.f32 %v11378_v54, %v11377_v39  ;;  %11786 = vmatprep.subr.bf16.mxu1 %v12681_v18  ;;  %v12714_v18 = vld [vmem:[#allocation11 + $0x118] sm:$0xff]  }
 0x210   : > { %v13737_v52 = vadd.f32 %v11440_v30, %v13642_v1  ;;  %v11380_v57 = vpop.f32.mrf.mxu0  ;;  %11787 = vmatpush3.bf16.msra.mxu1 %v12682_v22 }
 0x211   : > { %v11442_v0 = vpop.f32.mrf.mxu1  ;;  %v13750_v58 = vadd.f32 %v11379_v55, %v13644_v19  ;;  %11788 = vmatprep.subr.bf16.mxu1 %v12697_v25 }
 0x212   : > { %v11443_v33 = vadd.f32 %v11442_v0, %v11441_v29  ;;  %v11381_v11 = vpop.f32.mrf.mxu0  ;;  %v12698_v29 = vld [vmem:[#allocation11 + $0x120] sm:$0xff]  }
 0x213   : > { %v13742_v45 = vpop.f32.mrf.mxu1  ;;  %v11382_v9 = vadd.f32 %v11381_v11, %v11380_v57 }
 0x214   : > { %v13745_v56 = vadd.f32 %v11443_v33, %v13647_v28  ;;  %v11383_v63 = vpop.f32.mrf.mxu0  ;;  %11789 = vmatpush3.bf16.msra.mxu1 %v12698_v29 }
 0x215   : > { %v13747_v1 = vpop.f32.mrf.mxu1  ;;  %v13757_v2 = vadd.f32 %v11382_v9, %v13650_v31 }
 0x216   : > { %v11384_v28 = vpop.f32.mrf.mxu0 }
 0x217   : > { %v13752_v3 = vpop.f32.mrf.mxu1  ;;  %v11385_v20 = vadd.f32 %v11384_v28, %v11383_v63 }
 0x218   : > { %v11386_v16 = vpop.f32.mrf.mxu0 }
 0x219   : > { %v13754_v51 = vpop.f32.mrf.mxu1  ;;  %v13764_v19 = vadd.f32 %v11385_v20, %v13657_v48 }
 0x21a   : > { %v11387_v13 = vpop.f32.mrf.mxu0 }
 0x21b   : > { %v13759_v17 = vpop.f32.mrf.mxu1  ;;  %v11388_v42 = vadd.f32 %v11387_v13, %v11386_v16  ;;  %v12713_v16 = vld [vmem:[#allocation11 + $0x158] sm:$0xff]  }
 0x21c   : > { %v11389_v31 = vpop.f32.mrf.mxu0  ;;  %11790 = vmatprep.subr.bf16.mxu1 %v12713_v16 }
 0x21d   : > { %v13761_v4 = vpop.f32.mrf.mxu1  ;;  %v13771_v14 = vadd.f32 %v11388_v42, %v13663_v43  ;;  %11791 = vmatpush3.bf16.msra.mxu1 %v12714_v18 }
 0x21e   : > { %v11390_v48 = vpop.f32.mrf.mxu0 }
 0x21f   : > { %v13766_v10 = vpop.f32.mrf.mxu1  ;;  %14825 = vst [vmem:[#allocation20_spill] sm:$0xff] %v13771_v14  ;;  %v11391_v36 = vadd.f32 %v11390_v48, %v11389_v31 }
 0x220   : > { %v11392_v0 = vpop.f32.mrf.mxu0 }
 0x221   : > { %v13768_v30 = vpop.f32.mrf.mxu1  ;;  %v13778_v39 = vadd.f32 %v11391_v36, %v13670_v59 }
 0x222   : > { %v11393_v54 = vpop.f32.mrf.mxu0 }
 0x223   : > { %v13773_v44 = vpop.f32.mrf.mxu1  ;;  %14826 = vst [vmem:[#allocation21_spill] sm:$0xff] %v13778_v39  ;;  %v11394_v55 = vadd.f32 %v11393_v54, %v11392_v0 }
 0x224   : > { %v11395_v43 = vpop.f32.mrf.mxu0 }
 0x225   : > { %v13775_v35 = vpop.f32.mrf.mxu1  ;;  %v13785_v11 = vadd.f32 %v11394_v55, %v13676_v47 }
 0x226   : > { %v11396_v63 = vpop.f32.mrf.mxu0 }
 0x227   : > { %v13780_v33 = vpop.f32.mrf.mxu1  ;;  %14827 = vst [vmem:[#allocation22_spill] sm:$0xff] %v13785_v11  ;;  %v11397_v28 = vadd.f32 %v11396_v63, %v11395_v43  ;;  %v12730_v11 = vld [vmem:[#allocation11 + $0x110] sm:$0xff]  }
 0x228   : > { %v11398_v22 = vpop.f32.mrf.mxu0 }
 0x229   : > { %v13782_v57 = vpop.f32.mrf.mxu1  ;;  %v13788_v59 = vadd.f32 %v11397_v28, %v13683_v37 }
 0x22a   : > { %v11399_v25 = vpop.f32.mrf.mxu0 }
 0x22b   : > { %v11462_v9 = vpop.f32.mrf.mxu1  ;;  %14828 = vst [vmem:[#allocation23_spill] sm:$0xff] %v13788_v59  ;;  %v11400_v42 = vadd.f32 %v11399_v25, %v11398_v22 }
 0x22c   : > { %v11401_v29 = vpop.f32.mrf.mxu0 }
 0x22d   : > { %v11463_v20 = vpop.f32.mrf.mxu1  ;;  %v13791_v47 = vadd.f32 %v11400_v42, %v13689_v53 }
 0x22e   : > { %v11402_v36 = vpop.f32.mrf.mxu0 }
 0x22f   : > { %v11465_v13 = vpop.f32.mrf.mxu1  ;;  %14829 = vst [vmem:[#allocation24_spill] sm:$0xff] %v13791_v47  ;;  %v11403_v0 = vadd.f32 %v11402_v36, %v11401_v29  ;;  %v12729_v47 = vld [vmem:[#allocation11 + $0x150] sm:$0xff]  }
 0x230   : > { %v11404_v55 = vpop.f32.mrf.mxu0  ;;  %11792 = vmatprep.subr.bf16.mxu1 %v12729_v47  ;;  %v11446_v47 = vadd.f32 %v13747_v1, %v13742_v45  ;;  %v11464_v45 = vadd.f32 %v11463_v20, %v11462_v9  ;;  %v13834_v20 = vld [vmem:[%s14790_s3] ss:$0 sm:$0xff] }
 0x231   : > { %v11466_v31 = vpop.f32.mrf.mxu1  ;;  %v13794_v43 = vadd.f32 %v11403_v0, %v13695_v24  ;;  %11793 = vmatpush3.bf16.msra.mxu1 %v12730_v11 }
 0x232   : > { %v11405_v63 = vpop.f32.mrf.mxu0  ;;  %v4290_v1 = vadd.f32 %v11446_v47, %v13655_v15 }
 0x233   : > { %v11468_v48 = vpop.f32.mrf.mxu1  ;;  %14830 = vst [vmem:[#allocation25_spill] sm:$0xff] %v13794_v43  ;;  %v11406_v28 = vadd.f32 %v11405_v63, %v11404_v55 }
 0x234   : > { %v11407_v59 = vpop.f32.mrf.mxu0 }
 0x235   : > { %v11469_v54 = vpop.f32.mrf.mxu1  ;;  %v13797_v18 = vadd.f32 %v11406_v28, %v13701_v60 }
 0x236   : > { %v11408_v25 = vpop.f32.mrf.mxu0 }
 0x237   : > { %v11471_v37 = vpop.f32.mrf.mxu1  ;;  %14831 = vst [vmem:[#allocation26_spill] sm:$0xff] %v13797_v18  ;;  %v11409_v53 = vadd.f32 %v11408_v25, %v11407_v59 }
 0x238   : > { %v11410_v29 = vpop.f32.mrf.mxu0 }
 0x239   : > { %v11472_v16 = vpop.f32.mrf.mxu1  ;;  %v13800_v36 = vadd.f32 %v11409_v53, %v13707_v27 }
 0x23a   : > { %v11411_v0 = vpop.f32.mrf.mxu0  ;;  %v11473_v15 = vadd.f32 %v11472_v16, %v11471_v37 }
 0x23b   : > { %v11474_v22 = vpop.f32.mrf.mxu1  ;;  %14832 = vst [vmem:[#allocation27_spill] sm:$0xff] %v13800_v36  ;;  %v11412_v55 = vadd.f32 %v11411_v0, %v11410_v29  ;;  %v11449_v29 = vadd.f32 %v13754_v51, %v13752_v3  ;;  %v12745_v3 = vld [vmem:[#allocation11 + $0x148] sm:$0xff]  }
 0x23c   : > { %v11413_v43 = vpop.f32.mrf.mxu0  ;;  %v12746_v51 = vld [vmem:[#allocation11 + $0x108] sm:$0xff]   ;;  %11794 = vmatprep.subr.bf16.mxu1 %v12745_v3 }
 0x23d   : > { %v11475_v42 = vpop.f32.mrf.mxu1  ;;  %v13803_v60 = vadd.f32 %v11412_v55, %v13713_v34  ;;  %v11452_v34 = vadd.f32 %v13761_v4, %v13759_v17  ;;  %v13824_v17 = vld [vmem:[%s14789_s2] ss:$0 sm:$0xff]  ;;  %v4293_v4 = vadd.f32 %v11449_v29, %v13660_v8  ;;  %11795 = vmatpush3.bf16.msra.mxu1 %v12746_v51 }
 0x23e   : > { %v11414_v18 = vpop.f32.mrf.mxu0 }
 0x23f   : > { %v11477_v24 = vpop.f32.mrf.mxu1  ;;  %14833 = vst [vmem:[#allocation28_spill] sm:$0xff] %v13803_v60  ;;  %v11415_v59 = vadd.f32 %v11414_v18, %v11413_v43  ;;  %v11455_v43 = vadd.f32 %v13768_v30, %v13766_v10  ;;  %v11467_v60 = vadd.f32 %v11466_v31, %v11465_v13  ;;  %v11470_v10 = vadd.f32 %v11469_v54, %v11468_v48 }
 0x240   : > { %v11416_v39 = vpop.f32.mrf.mxu0  ;;  %v13841_v54 = vadd.f32 %v11464_v45, %v13692_v6  ;;  %v13852_v6 = vadd.f32 %v11473_v15, %v13710_v46 }
 0x241   : > { %v11478_v63 = vpop.f32.mrf.mxu1  ;;  %v13806_v14 = vadd.f32 %v11415_v59, %v13719_v61  ;;  %v11458_v61 = vadd.f32 %v13775_v35, %v13773_v44  ;;  %v11461_v59 = vadd.f32 %v13782_v57, %v13780_v33  ;;  %v4298_v35 = vadd.f32 %v11452_v34, %v13668_v7 }
 0x242   : > { %v11417_v53 = vpop.f32.mrf.mxu0  ;;  %v13829_v33 = vadd.f32 %v11455_v43, %v13673_v62  ;;  %v11476_v57 = vadd.f32 %v11475_v42, %v11474_v22  ;;  %v11479_v9 = vadd.f32 %v11478_v63, %v11477_v24 }
 0x243   : > { %v11480_v28 = vpop.f32.mrf.mxu1  ;;  %14834 = vst [vmem:[#allocation29_spill] sm:$0xff] %v13806_v14  ;;  %v4306_v8 = vadd.f32 %v11458_v61, %v13681_v40  ;;  %v4309_v62 = vadd.f32 %v11461_v59, %v13686_v41  ;;  %v11418_v37 = vadd.f32 %v11417_v53, %v11416_v39 }
 0x244   : > { %v11419_v0 = vpop.f32.mrf.mxu0  ;;  %v13855_v39 = vadd.f32 %v11476_v57, %v13716_v49 }
 0x245   : > { %v11481_v25 = vpop.f32.mrf.mxu1  ;;  %v13864_v53 = vadd.f32 %v11418_v37, %v13725_v5 }
 0x246   : > { %v11420_v55 = vpop.f32.mrf.mxu0  ;;  %v11482_v16 = vadd.f32 %v11481_v25, %v11480_v28 }
 0x247   : > { %v11483_v27 = vpop.f32.mrf.mxu1  ;;  %v11421_v41 = vadd.f32 %v11420_v55, %v11419_v0 }
 0x248   : > { %v12072_v36 = vpop.f32.mrf.mxu0  ;;  %v13867_v0 = vadd.f32 %v11482_v16, %v13728_v12  ;;  %v12761_v16 = vld [vmem:[#allocation11 + $0x140] sm:$0xff]  }
 0x249   : > { %v11484_v11 = vpop.f32.mrf.mxu1  ;;  %v4451_v30 = vadd.f32 %v12072_v36, %v4290_v1  ;;  %v13844_v36 = vadd.f32 %v11467_v60, %v13698_v32  ;;  %v13858_v32 = vadd.f32 %v11479_v9, %v13722_v26  ;;  %v13875_v55 = vadd.f32 %v11421_v41, %v13731_v21  ;;  %11796 = vmatprep.subr.bf16.mxu1 %v12761_v16 }
 0x24a   : > { %v4442_v13 = vpop.f32.mrf.mxu0  ;;  %v11485_v22 = vadd.f32 %v11484_v11, %v11483_v27 }
 0x24b   : > { %v11486_v18 = vpop.f32.mrf.mxu1  ;;  %v4578_v31 = vmul.f32 %v13824_v17, %v4451_v30  ;;  %v4443_v7 = vadd.f32 %v4442_v13, %v13737_v52  ;;  %v13849_v52 = vadd.f32 %v11470_v10, %v13704_v38 }
 0x24c   : > { %v12073_v42 = vpop.f32.mrf.mxu0  ;;  %v13870_v49 = vadd.f32 %v11485_v22, %v13734_v23  ;;  %v12762_v22 = vld [vmem:[#allocation11 + $0x100] sm:$0xff]  }
 0x24d   : > { %v11487_v14 = vpop.f32.mrf.mxu1  ;;  %v4617_v40 = vadd.f32 %v13834_v20, %v4578_v31  ;;  %v4576_v24 = vmul.f32 %v13824_v17, %v4443_v7  ;;  %v4454_v63 = vadd.f32 %v12073_v42, %v4293_v4  ;;  %11797 = vmatpush3.bf16.msra.mxu1 %v12762_v22 }
 0x24e   : > { %v4445_v29 = vpop.f32.mrf.mxu0  ;;  %v11488_v11 = vadd.f32 %v11487_v14, %v11486_v18 }
 0x24f   : > { %v11489_v44 = vpop.f32.mrf.mxu1  ;;  %v4649_v60 = vmax.f32 %v4617_v40, 0.0  ;;  %v4615_v28 = vadd.f32 %v13834_v20, %v4576_v24  ;;  %v4579_v25 = vmul.f32 %v13824_v17, %v4454_v63  ;;  %v4446_v27 = vadd.f32 %v4445_v29, %v13745_v56 }
 0x250   : > { %v12076_v46 = vpop.f32.mrf.mxu0  ;;  %v13882_v13 = vadd.f32 %v11488_v11, %v13740_v50 }
 0x251   : > { %v11490_v48 = vpop.f32.mrf.mxu1  ;;  %4725 = vst [vmem:[#allocation3 + $0x31] sm:$0xff] %v4649_v60  ;;  %v4647_v26 = vmax.f32 %v4615_v28, 0.0  ;;  %v4618_v34 = vadd.f32 %v13834_v20, %v4579_v25  ;;  %v4577_v43 = vmul.f32 %v13824_v17, %v4446_v27  ;;  %v4467_v61 = vadd.f32 %v12076_v46, %v4306_v8  ;;  %v14835_v27 = vld [vmem:[#allocation20_spill] sm:$0xff] }
 0x252   : > { %v11491_v5 = vadd.f32 %v11490_v48, %v11489_v44  ;;  %v4458_v14 = vpop.f32.mrf.mxu0  ;;  %v10833_v18 = vpack.c.bf16 %v4649_v60, %v4649_v60 }
 0x253   : > { %v11492_v47 = vpop.f32.mrf.mxu1  ;;  %4723 = vst [vmem:[#allocation3 + $0x19] sm:$0xff] %v4647_v26  ;;  %v4650_v12 = vmax.f32 %v4618_v34, 0.0  ;;  %v4616_v59 = vadd.f32 %v13834_v20, %v4577_v43  ;;  %v4582_v23 = vmul.f32 %v13824_v17, %v4467_v61  ;;  %v4459_v45 = vadd.f32 %v4458_v14, %v4298_v35 }
 0x254   : > { %v12077_v51 = vpop.f32.mrf.mxu0  ;;  %v10831_v10 = vpack.c.bf16 %v4647_v26, %v4647_v26  ;;  %5111 = vst [vmem:[#allocation5 + $0x94] sm:$0xf] %v10833_v18  ;;  %5685 = vst [vmem:[#allocation5 + $0x58] sm:$0xf] %v10833_v18  ;;  %v13885_v8 = vadd.f32 %v11491_v5, %v13750_v58 }
 0x255   : > { %v11493_v38 = vpop.f32.mrf.mxu1  ;;  %6260 = vst [vmem:[#allocation5 + $0x1c] sm:$0xf] %v10833_v18  ;;  %4726 = vst [vmem:[#allocation3 + $0x39] sm:$0xff] %v4650_v12  ;;  %v4648_v21 = vmax.f32 %v4616_v59, 0.0  ;;  %v4621_v30 = vadd.f32 %v13834_v20, %v4582_v23  ;;  %v4580_v44 = vmul.f32 %v13824_v17, %v4459_v45  ;;  %v4470_v15 = vadd.f32 %v12077_v51, %v4309_v62 }
 0x256   : > { %v11494_v3 = vadd.f32 %v11493_v38, %v11492_v47  ;;  %v4461_v9 = vpop.f32.mrf.mxu0  ;;  %5109 = vst [vmem:[#allocation5 + $0x4c] sm:$0xf] %v10831_v10  ;;  %v10834_v35 = vpack.c.bf16 %v4650_v12, %v4650_v12  ;;  %5683 = vst [vmem:[#allocation5 + $0x10] sm:$0xf] %v10831_v10 }
 0x257   : > { %v11495_v56 = vpop.f32.mrf.mxu1  ;;  %4724 = vst [vmem:[#allocation3 + $0x21] sm:$0xff] %v4648_v21  ;;  %v4653_v31 = vmax.f32 %v4621_v30, 0.0  ;;  %v4619_v7 = vadd.f32 %v13834_v20, %v4580_v44  ;;  %v4583_v48 = vmul.f32 %v13824_v17, %v4470_v15  ;;  %v4462_v37 = vadd.f32 %v4461_v9, %v13829_v33  ;;  %v14836_v15 = vld [vmem:[#allocation21_spill] sm:$0xff] }
 0x258   : > { %v4759_v42 = vld [vmem:[#allocation3 + $0x30] sm:$0xff]  ;;  %v12080_v50 = vpop.f32.mrf.mxu0  ;;  %v13891_v24 = vadd.f32 %v11494_v3, %v13757_v2  ;;  %v10832_v58 = vpack.c.bf16 %v4648_v21, %v4648_v21  ;;  %5112 = vst [vmem:[#allocation5 + $0xb8] sm:$0xf] %v10834_v35  ;;  %5686 = vst [vmem:[#allocation5 + $0x7c] sm:$0xf] %v10834_v35 }
 0x259   : > { %v11496_v1 = vpop.f32.mrf.mxu1  ;;  %6261 = vst [vmem:[#allocation5 + $0x40] sm:$0xf] %v10834_v35  ;;  %4729 = vst [vmem:[#allocation3 + $0x61] sm:$0xff] %v4653_v31  ;;  %v4651_v47 = vmax.f32 %v4619_v7, 0.0  ;;  %v4622_v33 = vadd.f32 %v13834_v20, %v4583_v48  ;;  %v4581_v41 = vmul.f32 %v13824_v17, %v4462_v37  ;;  %v4483_v29 = vadd.f32 %v12080_v50, %v13849_v52 }
 0x25a   : > { %v11497_v4 = vadd.f32 %v11496_v1, %v11495_v56  ;;  %v4757_v28 = vld [vmem:[#allocation3 + $0x18] sm:$0xff]  ;;  %v4474_v2 = vpop.f32.mrf.mxu0  ;;  %5110 = vst [vmem:[#allocation5 + $0x70] sm:$0xf] %v10832_v58  ;;  %v10801_v25 = vpack.c.bf16 %v4759_v42, %v4759_v42  ;;  %v10837_v38 = vpack.c.bf16 %v4653_v31, %v4653_v31 }
 0x25b   : > { %v11498_v57 = vpop.f32.mrf.mxu1  ;;  %4727 = vst [vmem:[#allocation3 + $0x49] sm:$0xff] %v4651_v47  ;;  %v13902_v11 = vmax.f32 %v4622_v33, 0.0  ;;  %v4620_v46 = vadd.f32 %v13834_v20, %v4581_v41  ;;  %v4586_v26 = vmul.f32 %v13824_v17, %v4483_v29  ;;  %v4475_v52 = vadd.f32 %v4474_v2, %v13841_v54  ;;  %v14837_v29 = vld [vmem:[#allocation22_spill] sm:$0xff] }
 0x25c   : > { %v13894_v63 = vadd.f32 %v11497_v4, %v13764_v19  ;;  %v4760_v43 = vld [vmem:[#allocation3 + $0x38] sm:$0xff]  ;;  %v12081_v5 = vpop.f32.mrf.mxu0  ;;  %v10799_v18 = vpack.c.bf16 %v4757_v28, %v4757_v28  ;;  %4919 = vst [vmem:[#allocation5 + $0x90] sm:$0xf] %v10801_v25  ;;  %5493 = vst [vmem:[#allocation5 + $0x54] sm:$0xf] %v10801_v25  ;;  %v10835_v12 = vpack.c.bf16 %v4651_v47, %v4651_v47 }
 0x25d   : > { %v11499_v62 = vpop.f32.mrf.mxu1  ;;  %v5143_v61 = vld [vmem:[#allocation3 + $0x32] sm:$0xff]  ;;  %v5144_v56 = vld [vmem:[#allocation3 + $0x3a] sm:$0xff]  ;;  %5115 = vst [vmem:[#allocation5 + $0x124] sm:$0xf] %v10837_v38  ;;  %6068 = vst [vmem:[#allocation5 + $0x18] sm:$0xf] %v10801_v25  ;;  %v4625_v23 = vadd.f32 %v13834_v20, %v4586_v26  ;;  %v4584_v45 = vmul.f32 %v13824_v17, %v4475_v52  ;;  %v4486_v54 = vadd.f32 %v12081_v5, %v13852_v6 }
 0x25e   : > { %v11500_v40 = vadd.f32 %v11499_v62, %v11498_v57  ;;  %4730 = vst [vmem:[#allocation3 + $0x69] sm:$0xff] %v13902_v11  ;;  %v4652_v59 = vmax.f32 %v4620_v46, 0.0  ;;  %v4477_v3 = vpop.f32.mrf.mxu0  ;;  %v4758_v51 = vld [vmem:[#allocation3 + $0x20] sm:$0xff]  ;;  %4917 = vst [vmem:[#allocation5 + $0x48] sm:$0xf] %v10799_v18  ;;  %v10802_v4 = vpack.c.bf16 %v4760_v43, %v4760_v43  ;;  %v10865_v30 = vpack.c.bf16 %v5143_v61, %v5143_v61 }
 0x25f   : > { %v11501_v60 = vpop.f32.mrf.mxu1  ;;  %5491 = vst [vmem:[#allocation5 + $0xc] sm:$0xf] %v10799_v18  ;;  %v5141_v10 = vld [vmem:[#allocation3 + $0x1a] sm:$0xff]  ;;  %v5142_v21 = vld [vmem:[#allocation3 + $0x22] sm:$0xff]  ;;  %5113 = vst [vmem:[#allocation5 + $0xdc] sm:$0xf] %v10835_v12  ;;  %v10866_v44 = vpack.c.bf16 %v5144_v56, %v5144_v56  ;;  %v4623_v6 = vadd.f32 %v13834_v20, %v4584_v45  ;;  %v4587_v35 = vmul.f32 %v13824_v17, %v4486_v54 }
 0x260   : > { %v13900_v19 = vadd.f32 %v11500_v40, %v14835_v27  ;;  %5687 = vst [vmem:[#allocation5 + $0xa0] sm:$0xf] %v10835_v12  ;;  %6262 = vst [vmem:[#allocation5 + $0x64] sm:$0xf] %v10835_v12  ;;  %v13914_v9 = vmax.f32 %v4625_v23, 0.0  ;;  %v4478_v31 = vadd.f32 %v4477_v3, %v13844_v36  ;;  %v4763_v48 = vld [vmem:[#allocation3 + $0x60] sm:$0xff]  ;;  %v12084_v37 = vpop.f32.mrf.mxu0  ;;  %v10800_v16 = vpack.c.bf16 %v4758_v51, %v4758_v51 }
 0x261   : > { %v11502_v34 = vpop.f32.mrf.mxu1  ;;  %4728 = vst [vmem:[#allocation3 + $0x51] sm:$0xff] %v4652_v59  ;;  %4920 = vst [vmem:[#allocation5 + $0xb4] sm:$0xf] %v10802_v4  ;;  %v10863_v22 = vpack.c.bf16 %v5141_v10, %v5141_v10  ;;  %v10864_v42 = vpack.c.bf16 %v5142_v21, %v5142_v21  ;;  %v4655_v50 = vmax.f32 %v4623_v6, 0.0  ;;  %v4626_v40 = vadd.f32 %v13834_v20, %v4587_v35  ;;  %v14838_v3 = vld [vmem:[#allocation23_spill] sm:$0xff] }
 0x262   : > { %v11503_v14 = vadd.f32 %v11502_v34, %v11501_v60  ;;  %5494 = vst [vmem:[#allocation5 + $0x78] sm:$0xf] %v10802_v4  ;;  %5303 = vst [vmem:[#allocation5 + $0x98] sm:$0xf] %v10865_v30  ;;  %v4585_v58 = vmul.f32 %v13824_v17, %v4478_v31  ;;  %v4499_v36 = vadd.f32 %v12084_v37, %v13867_v0  ;;  %v4761_v33 = vld [vmem:[#allocation3 + $0x48] sm:$0xff]  ;;  %v4490_v41 = vpop.f32.mrf.mxu0 }
 0x263   : > { %v11504_v1 = vpop.f32.mrf.mxu1  ;;  %5304 = vst [vmem:[#allocation5 + $0xbc] sm:$0xf] %v10866_v44  ;;  %4733 = vst [vmem:[#allocation3 + $0x91] sm:$0xff] %v13914_v9  ;;  %v10836_v28 = vpack.c.bf16 %v4652_v59, %v4652_v59  ;;  %v10805_v2 = vpack.c.bf16 %v4763_v48, %v4763_v48  ;;  %v10838_v25 = vpack.c.bf16 %v13902_v11, %v13902_v11  ;;  %v13928_v27 = vmax.f32 %v4626_v40, 0.0  ;;  %v12646_v40 = vld [vmem:[#allocation5 + $0x4c] ss:$36 sps:$4 sm:$0xff]  }
 0x264   : > { %v13912_v57 = vadd.f32 %v11503_v14, %v14836_v15  ;;  %4918 = vst [vmem:[#allocation5 + $0x6c] sm:$0xf] %v10800_v16  ;;  %5492 = vst [vmem:[#allocation5 + $0x30] sm:$0xf] %v10800_v16  ;;  %v4624_v0 = vadd.f32 %v13834_v20, %v4585_v58  ;;  %v4590_v38 = vmul.f32 %v13824_v17, %v4499_v36  ;;  %v12085_v61 = vpop.f32.mrf.mxu0  ;;  %v12777_v16 = vld [vmem:[#allocation11 + $0x238] sm:$0xff]   ;;  %7996 = vmatprep.mubr.bf16.mxu1 %v12646_v40 }
 0x265   : > { %v11505_v7 = vpop.f32.mrf.mxu1  ;;  %5301 = vst [vmem:[#allocation5 + $0x50] sm:$0xf] %v10863_v22  ;;  %5302 = vst [vmem:[#allocation5 + $0x74] sm:$0xf] %v10864_v42  ;;  %v4491_v46 = vadd.f32 %v4490_v41, %v13855_v39  ;;  %v4764_v52 = vld [vmem:[#allocation3 + $0x68] sm:$0xff]  ;;  %v10803_v5 = vpack.c.bf16 %v4761_v33, %v4761_v33  ;;  %v10839_v11 = vpack.c.bf16 %v4655_v50, %v4655_v50  ;;  %12102 = vmatprep.subr.bf16.mxu1 %v12777_v16 }
 0x266   : > { %v11506_v62 = vadd.f32 %v11505_v7, %v11504_v1  ;;  %4731 = vst [vmem:[#allocation3 + $0x79] sm:$0xff] %v4655_v50  ;;  %v5147_v34 = vld [vmem:[#allocation3 + $0x62] sm:$0xff]  ;;  %v5148_v43 = vld [vmem:[#allocation3 + $0x6a] sm:$0xff]  ;;  %5114 = vst [vmem:[#allocation5 + $0x100] sm:$0xf] %v10836_v28  ;;  %v10841_v14 = vpack.c.bf16 %v13914_v9, %v13914_v9  ;;  %v13936_v18 = vmax.f32 %v4624_v0, 0.0  ;;  %v4629_v39 = vadd.f32 %v13834_v20, %v4590_v38  ;;  %v4493_v1 = vpop.f32.mrf.mxu0 }
 0x267   : > { %v11507_v47 = vpop.f32.mrf.mxu1  ;;  %4923 = vst [vmem:[#allocation5 + $0x120] sm:$0xf] %v10805_v2  ;;  %5116 = vst [vmem:[#allocation5 + $0x148] sm:$0xf] %v10838_v25  ;;  %v4588_v12 = vmul.f32 %v13824_v17, %v4491_v46  ;;  %v4502_v59 = vadd.f32 %v12085_v61, %v13870_v49  ;;  %v10806_v10 = vpack.c.bf16 %v4764_v52, %v4764_v52  ;;  %v12654_v36 = vld [vmem:[#allocation5 + $0x94] ss:$36 sps:$4 sm:$0xff]  }
 0x268   : > { %v13924_v60 = vadd.f32 %v11506_v62, %v14837_v29  ;;  %5497 = vst [vmem:[#allocation5 + $0xe4] sm:$0xf] %v10805_v2  ;;  %4734 = vst [vmem:[#allocation3 + $0x99] sm:$0xff] %v13928_v27  ;;  %v6294_v45 = vld [vmem:[#allocation3 + $0x4a] sm:$0xff]  ;;  %v6295_v54 = vld [vmem:[#allocation3 + $0x52] sm:$0xff]  ;;  %v10869_v21 = vpack.c.bf16 %v5147_v34, %v5147_v34  ;;  %v10870_v30 = vpack.c.bf16 %v5148_v43, %v5148_v43  ;;  %v13945_v49 = vmax.f32 %v4629_v39, 0.0  ;;  %v12088_v48 = vpop.f32.mrf.mxu0 }
 0x269   : > { %v11508_v26 = vpop.f32.mrf.mxu1  ;;  %v4762_v4 = vld [vmem:[#allocation3 + $0x50] sm:$0xff]  ;;  %4921 = vst [vmem:[#allocation5 + $0xd8] sm:$0xf] %v10803_v5  ;;  %5495 = vst [vmem:[#allocation5 + $0x9c] sm:$0xf] %v10803_v5  ;;  %v11055_v44 = vpack.c.bf16 %v6294_v45, %v6294_v45  ;;  %v11056_v15 = vpack.c.bf16 %v6295_v54, %v6295_v54  ;;  %v4627_v9 = vadd.f32 %v13834_v20, %v4588_v12 }
 0x26a   : > { %v11509_v56 = vadd.f32 %v11508_v26, %v11507_v47  ;;  %5117 = vst [vmem:[#allocation5 + $0x16c] sm:$0xf] %v10839_v11  ;;  %5119 = vst [vmem:[#allocation5 + $0x1b4] sm:$0xf] %v10841_v14  ;;  %v4767_v35 = vld [vmem:[#allocation3 + $0x90] sm:$0xff]  ;;  %v4591_v31 = vmul.f32 %v13824_v17, %v4502_v59  ;;  %v4494_v7 = vadd.f32 %v4493_v1, %v13858_v32  ;;  %v12658_v32 = vld [vmem:[#allocation11 + $0x1b8] sm:$0xff]   ;;  %v4506_v2 = vpop.f32.mrf.mxu0 }
 0x26b   : > { %v11510_v23 = vpop.f32.mrf.mxu1  ;;  %4732 = vst [vmem:[#allocation3 + $0x81] sm:$0xff] %v13936_v18  ;;  %v10804_v62 = vpack.c.bf16 %v4762_v4, %v4762_v4  ;;  %4924 = vst [vmem:[#allocation5 + $0x144] sm:$0xf] %v10806_v10  ;;  %v4659_v22 = vmax.f32 %v4627_v9, 0.0  ;;  %v4515_v42 = vadd.f32 %v12088_v48, %v13891_v24  ;;  %v12644_v50 = vld [vmem:[#allocation5 + $0x48] ss:$36 sps:$4 sm:$0xff]   ;;  %v10840_v47 = vpack.c.bf16 %v13936_v18, %v13936_v18 }
 0x26c   : > { %v13942_v51 = vadd.f32 %v11509_v56, %v14838_v3  ;;  %5498 = vst [vmem:[#allocation5 + $0x108] sm:$0xf] %v10806_v10  ;;  %5307 = vst [vmem:[#allocation5 + $0x128] sm:$0xf] %v10869_v21  ;;  %v10809_v33 = vpack.c.bf16 %v4767_v35, %v4767_v35  ;;  %v4630_v29 = vadd.f32 %v13834_v20, %v4591_v31  ;;  %v12647_v25 = vld [vmem:[#allocation5 + $0x8] ss:$36 sps:$4 sm:$0xff]   ;;  %v12089_v14 = vpop.f32.mrf.mxu0  ;;  %7997 = vmatmul.mubr.bf16.gmra.mxu1 %v12644_v50 }
 0x26d   : > { %v11511_v6 = vpop.f32.mrf.mxu1  ;;  %5308 = vst [vmem:[#allocation5 + $0x14c] sm:$0xf] %v10870_v30  ;;  %6454 = vst [vmem:[#allocation5 + $0x68] sm:$0xf] %v11055_v44  ;;  %v4765_v41 = vld [vmem:[#allocation3 + $0x78] sm:$0xff]  ;;  %v4589_v28 = vmul.f32 %v13824_v17, %v4494_v7  ;;  %v14839_v24 = vld [vmem:[#allocation24_spill] sm:$0xff]  ;;  %v10842_v38 = vpack.c.bf16 %v13928_v27, %v13928_v27  ;;  %v4594_v46 = vmul.f32 %v13824_v17, %v4515_v42  ;;  %8004 = vmatprep.mubr.bf16.mxu1 %v12654_v36 }
 0x26e   : > { %v11512_v37 = vadd.f32 %v11511_v6, %v11510_v23  ;;  %6455 = vst [vmem:[#allocation5 + $0x8c] sm:$0xf] %v11056_v15  ;;  %4737 = vst [vmem:[#allocation3 + $0xc1] sm:$0xff] %v13945_v49  ;;  %v4507_v26 = vadd.f32 %v4506_v2, %v13882_v13  ;;  %v12649_v52 = vld [vmem:[#allocation5 + $0xc] ss:$36 sps:$4 sm:$0xff]   ;;  %v13963_v43 = vpack.c.bf16 %v4765_v41, %v4765_v41  ;;  %v13967_v11 = vmax.f32 %v4630_v29, 0.0  ;;  %v4509_v21 = vpop.f32.mrf.mxu0 }
 0x26f   : > { %v11513_v58 = vpop.f32.mrf.mxu1  ;;  %5305 = vst [vmem:[#allocation5 + $0xe0] sm:$0xf] %v11055_v44  ;;  %5306 = vst [vmem:[#allocation5 + $0x104] sm:$0xf] %v11056_v15  ;;  %v13965_v61 = vpack.c.bf16 %v4659_v22, %v4659_v22  ;;  %v4768_v56 = vld [vmem:[#allocation3 + $0x98] sm:$0xff]  ;;  %v4628_v27 = vadd.f32 %v13834_v20, %v4589_v28  ;;  %v12667_v13 = vld [vmem:[#allocation11 + $0x1f0] sm:$0xff]   ;;  %v10845_v39 = vpack.c.bf16 %v13945_v49, %v13945_v49  ;;  %8149 = vmatprep.mubr.bf16.mxu0 %v12649_v52 }
 0x270   : > { %4922 = vst [vmem:[#allocation5 + $0xfc] sm:$0xf] %v10804_v62  ;;  %5496 = vst [vmem:[#allocation5 + $0xc0] sm:$0xf] %v10804_v62  ;;  %v13957_v0 = vadd.f32 %v11512_v37, %v14839_v24  ;;  %v5151_v5 = vld [vmem:[#allocation3 + $0x92] sm:$0xff]  ;;  %v5152_v12 = vld [vmem:[#allocation3 + $0x9a] sm:$0xff]  ;;  %v4633_v59 = vadd.f32 %v13834_v20, %v4594_v46  ;;  %v4592_v23 = vmul.f32 %v13824_v17, %v4507_v26  ;;  %8150 = vmatmul.mubr.bf16.vlgmr.msra.gmra.mxu0 %v12647_v25  ;;  %v12092_v16 = vpop.f32.mrf.mxu0 }
 0x271   : > { %4735 = vst [vmem:[#allocation3 + $0xa9] sm:$0xff] %v4659_v22  ;;  %v11514_v34 = vpop.f32.mrf.mxu1  ;;  %5118 = vst [vmem:[#allocation5 + $0x190] sm:$0xf] %v10840_v47  ;;  %v4518_v45 = vadd.f32 %v12089_v14, %v13894_v63  ;;  %v12657_v54 = vld [vmem:[#allocation5 + $0x54] ss:$36 sps:$4 sm:$0xff]   ;;  %v4660_v10 = vmax.f32 %v4628_v27, 0.0  ;;  %v13982_v63 = vpack.c.bf16 %v4768_v56, %v4768_v56  ;;  %v13984_v15 = vpack.c.bf16 %v5151_v5, %v5151_v5 }
 0x272   : > { %4927 = vst [vmem:[#allocation5 + $0x1b0] sm:$0xf] %v10809_v33  ;;  %5501 = vst [vmem:[#allocation5 + $0x174] sm:$0xf] %v10809_v33  ;;  %v11515_v18 = vadd.f32 %v11514_v34, %v11513_v58  ;;  %v6298_v3 = vld [vmem:[#allocation3 + $0x7a] sm:$0xff]  ;;  %v6299_v4 = vld [vmem:[#allocation3 + $0x82] sm:$0xff]  ;;  %v4631_v35 = vadd.f32 %v13834_v20, %v4592_v23  ;;  %8157 = vmatprep.mubr.bf16.mxu0 %v12657_v54  ;;  %11895 = vmatpush3.bf16.msra.mxu0 %v12658_v32  ;;  %v4522_v2 = vpop.f32.mrf.mxu0 }
 0x273   : > { %5120 = vst [vmem:[#allocation5 + $0x1d8] sm:$0xf] %v10842_v38  ;;  %v11516_v1 = vpop.f32.mrf.mxu1  ;;  %4925 = vst [vmem:[#allocation5 + $0x168] sm:$0xf] %v13963_v43  ;;  %v14840_v30 = vld [vmem:[#allocation25_spill] sm:$0xff]  ;;  %v11059_v49 = vpack.c.bf16 %v6298_v3, %v6298_v3  ;;  %v11060_v9 = vpack.c.bf16 %v6299_v4, %v6299_v4  ;;  %v4665_v6 = vmax.f32 %v4633_v59, 0.0  ;;  %v4595_v37 = vmul.f32 %v13824_v17, %v4518_v45 }
 0x274   : > { %5499 = vst [vmem:[#allocation5 + $0x12c] sm:$0xf] %v13963_v43  ;;  %5121 = vst [vmem:[#allocation5 + $0x1fc] sm:$0xf] %v13965_v61  ;;  %v13980_v44 = vadd.f32 %v11515_v18, %v14840_v30  ;;  %v12674_v7 = vld [vmem:[#allocation11 + $0x1b0] sm:$0xff]   ;;  %v4510_v62 = vadd.f32 %v4509_v21, %v13885_v8  ;;  %11896 = vmatprep.subr.bf16.mxu0 %v12667_v13  ;;  %v12683_v42 = vld [vmem:[#allocation11 + $0x1e8] sm:$0xff]   ;;  %v10844_v50 = vpack.c.bf16 %v4660_v10, %v4660_v10 }
 0x275   : > { %4738 = vst [vmem:[#allocation3 + $0xc9] sm:$0xff] %v13967_v11  ;;  %5123 = vst [vmem:[#allocation5 + $0x244] sm:$0xf] %v10845_v39  ;;  %v11517_v31 = vpop.f32.mrf.mxu1  ;;  %v4771_v48 = vld [vmem:[#allocation3 + $0xc0] sm:$0xff]  ;;  %v4663_v40 = vmax.f32 %v4631_v35, 0.0  ;;  %v4531_v58 = vadd.f32 %v12092_v16, %v13924_v60  ;;  %v13993_v32 = vld [vmem:[#allocation11 + $0x1a8] sm:$0xff]   ;;  %v13995_v8 = vpack.c.bf16 %v5152_v12, %v5152_v12  ;;  %v4634_v41 = vadd.f32 %v13834_v20, %v4595_v37 }
 0x276   : > { %4736 = vst [vmem:[#allocation3 + $0xb1] sm:$0xff] %v4660_v10  ;;  %v11518_v22 = vadd.f32 %v11517_v31, %v11516_v1  ;;  %4928 = vst [vmem:[#allocation5 + $0x1d4] sm:$0xf] %v13982_v63  ;;  %v13997_v47 = vpack.c.bf16 %v4771_v48, %v4771_v48  ;;  %v12652_v29 = vld [vmem:[#allocation5 + $0x90] ss:$36 sps:$4 sm:$0xff]   ;;  %v4593_v28 = vmul.f32 %v13824_v17, %v4510_v62  ;;  %11897 = vmatpush3.bf16.msra.mxu0 %v12674_v7  ;;  %v12699_v56 = vld [vmem:[#allocation11 + $0x1e0] sm:$0xff]  }
 0x277   : > { %5502 = vst [vmem:[#allocation5 + $0x198] sm:$0xf] %v13982_v63  ;;  %5311 = vst [vmem:[#allocation5 + $0x1b8] sm:$0xf] %v13984_v15  ;;  %v11519_v36 = vpop.f32.mrf.mxu1  ;;  %v14841_v25 = vld [vmem:[#allocation26_spill] sm:$0xff]  ;;  %v14006_v60 = vpack.c.bf16 %v13967_v11, %v13967_v11  ;;  %v4598_v38 = vmul.f32 %v13824_v17, %v4531_v58  ;;  %v4523_v46 = vadd.f32 %v4522_v2, %v13900_v19  ;;  %v14017_v11 = vmax.f32 %v4634_v41, 0.0  ;;  %v12093_v19 = vpop.f32.mrf.mxu0 }
 0x278   : > { %6458 = vst [vmem:[#allocation5 + $0xf8] sm:$0xf] %v11059_v49  ;;  %6459 = vst [vmem:[#allocation5 + $0x11c] sm:$0xf] %v11060_v9  ;;  %v4769_v33 = vld [vmem:[#allocation3 + $0xa8] sm:$0xff]  ;;  %v14002_v24 = vadd.f32 %v11518_v22, %v14841_v25  ;;  %v14015_v5 = vpack.c.bf16 %v4663_v40, %v4663_v40  ;;  %v4632_v14 = vadd.f32 %v13834_v20, %v4593_v28  ;;  %8005 = vmatmul.mubr.bf16.gmra.mxu1 %v12652_v29  ;;  %v4766_v13 = vld [vmem:[#allocation3 + $0x80] sm:$0xff] }
 0x279   : > { %4741 = vst [vmem:[#allocation3 + $0xf1] sm:$0xff] %v4665_v6  ;;  %5122 = vst [vmem:[#allocation5 + $0x220] sm:$0xf] %v10844_v50  ;;  %v12661_v26 = vld [vmem:[#allocation5 + $0xdc] ss:$36 sps:$4 sm:$0xff]   ;;  %v11520_v52 = vpop.f32.mrf.mxu1  ;;  %v14010_v34 = vpack.c.bf16 %v4769_v33, %v4769_v33  ;;  %11898 = vmatprep.subr.bf16.mxu0 %v12683_v42  ;;  %v14021_v39 = vpack.c.bf16 %v4665_v6, %v4665_v6  ;;  %v4637_v23 = vadd.f32 %v13834_v20, %v4598_v38  ;;  %v4525_v30 = vpop.f32.mrf.mxu0  ;;  %v5149_v9 = vld [vmem:[#allocation3 + $0x7a] sm:$0xff] }
 0x27a   : > { %4739 = vst [vmem:[#allocation3 + $0xd9] sm:$0xff] %v4663_v40  ;;  %5312 = vst [vmem:[#allocation5 + $0x1dc] sm:$0xf] %v13995_v8  ;;  %v12655_v27 = vld [vmem:[#allocation5 + $0x50] ss:$36 sps:$4 sm:$0xff]   ;;  %v11521_v18 = vadd.f32 %v11520_v52, %v11519_v36  ;;  %v4596_v45 = vmul.f32 %v13824_v17, %v4523_v46  ;;  %v4534_v54 = vadd.f32 %v12093_v19, %v13942_v51  ;;  %8012 = vmatprep.mubr.bf16.mxu1 %v12661_v26  ;;  %v14028_v10 = vld [vmem:[#allocation11 + $0x1a0] sm:$0xff]  }
 0x27b   : > { %4931 = vst [vmem:[#allocation5 + $0x240] sm:$0xf] %v13997_v47  ;;  %5505 = vst [vmem:[#allocation5 + $0x204] sm:$0xf] %v13997_v47  ;;  %v12664_v1 = vld [vmem:[#allocation5 + $0x9c] ss:$36 sps:$4 sm:$0xff]   ;;  %v11522_v3 = vpop.f32.mrf.mxu1  ;;  %v10808_v4 = vpack.c.bf16 %v4766_v13, %v4766_v13  ;;  %8158 = vmatmul.mubr.bf16.gmra.mxu0 %v12655_v27  ;;  %v4526_v16 = vadd.f32 %v4525_v30, %v13912_v57  ;;  %v12096_v58 = vpop.f32.mrf.mxu0  ;;  %v10871_v33 = vpack.c.bf16 %v5149_v9, %v5149_v9 }
 0x27c   : > { %5124 = vst [vmem:[#allocation5 + $0x268] sm:$0xf] %v14006_v60  ;;  %v4772_v12 = vld [vmem:[#allocation3 + $0xc8] sm:$0xff]  ;;  %4929 = vst [vmem:[#allocation5 + $0x1f8] sm:$0xf] %v14010_v34  ;;  %v14032_v21 = vmax.f32 %v4632_v14, 0.0  ;;  %v4635_v37 = vadd.f32 %v13834_v20, %v4596_v45  ;;  %v4599_v62 = vmul.f32 %v13824_v17, %v4534_v54  ;;  %8165 = vmatprep.mubr.bf16.mxu0 %v12664_v1  ;;  %11899 = vmatpush3.bf16.msra.mxu0 %v13993_v32 }
 0x27d   : > { %v5155_v59 = vld [vmem:[#allocation3 + $0xc2] sm:$0xff]  ;;  %5503 = vst [vmem:[#allocation5 + $0x1bc] sm:$0xf] %v14010_v34  ;;  %5125 = vst [vmem:[#allocation5 + $0x28c] sm:$0xf] %v14015_v5  ;;  %v14037_v6 = vpack.c.bf16 %v4772_v12, %v4772_v12  ;;  %v6302_v31 = vld [vmem:[#allocation3 + $0xaa] sm:$0xff]  ;;  %v11523_v22 = vpop.f32.mrf.mxu1  ;;  %11900 = vmatprep.subr.bf16.mxu0 %v12699_v56  ;;  %v4597_v29 = vmul.f32 %v13824_v17, %v4526_v16  ;;  %v4547_v28 = vadd.f32 %v12096_v58, %v14002_v24  ;;  %v4538_v56 = vpop.f32.mrf.mxu0 }
 0x27e   : > { %4742 = vst [vmem:[#allocation3 + $0xf9] sm:$0xff] %v14017_v11  ;;  %v14842_v49 = vld [vmem:[#allocation27_spill] sm:$0xff]  ;;  %v14039_v35 = vpack.c.bf16 %v5155_v59, %v5155_v59  ;;  %5127 = vst [vmem:[#allocation5 + $0x2d4] sm:$0xf] %v14021_v39  ;;  %v6303_v7 = vld [vmem:[#allocation3 + $0xb2] sm:$0xff]  ;;  %v14042_v48 = vmax.f32 %v4637_v23, 0.0  ;;  %v11063_v42 = vpack.c.bf16 %v6302_v31, %v6302_v31  ;;  %v11524_v36 = vadd.f32 %v11523_v22, %v11522_v3 }
 0x27f   : > { %v14035_v51 = vadd.f32 %v11521_v18, %v14842_v49  ;;  %4926 = vst [vmem:[#allocation5 + $0x18c] sm:$0xf] %v10808_v4  ;;  %5500 = vst [vmem:[#allocation5 + $0x150] sm:$0xf] %v10808_v4  ;;  %v11064_v50 = vpack.c.bf16 %v6303_v7, %v6303_v7  ;;  %v12659_v40 = vld [vmem:[#allocation5 + $0xd8] ss:$36 sps:$4 sm:$0xff]   ;;  %v4638_v32 = vadd.f32 %v13834_v20, %v4599_v62  ;;  %v11525_v2 = vpop.f32.mrf.mxu1  ;;  %v12097_v9 = vpop.f32.mrf.mxu0 }
 0x280   : > { %4740 = vst [vmem:[#allocation3 + $0xe1] sm:$0xff] %v14032_v21  ;;  %4932 = vst [vmem:[#allocation5 + $0x264] sm:$0xf] %v14037_v6  ;;  %v12715_v57 = vld [vmem:[#allocation11 + $0x1d8] sm:$0xff]   ;;  %v14053_v41 = vmax.f32 %v4635_v37, 0.0  ;;  %v4770_v38 = vld [vmem:[#allocation3 + $0xb0] sm:$0xff]  ;;  %v4636_v54 = vadd.f32 %v13834_v20, %v4597_v29  ;;  %v4602_v1 = vmul.f32 %v13824_v17, %v4547_v28  ;;  %v4539_v3 = vadd.f32 %v4538_v56, %v13957_v0 }
 0x281   : > { %5506 = vst [vmem:[#allocation5 + $0x228] sm:$0xf] %v14037_v6  ;;  %5315 = vst [vmem:[#allocation5 + $0x248] sm:$0xf] %v14039_v35  ;;  %v5150_v25 = vld [vmem:[#allocation3 + $0x82] sm:$0xff]  ;;  %v5153_v46 = vld [vmem:[#allocation3 + $0xaa] sm:$0xff]  ;;  %v10812_v18 = vpack.c.bf16 %v4770_v38, %v4770_v38  ;;  %v11526_v30 = vpop.f32.mrf.mxu1  ;;  %11901 = vmatpush3.bf16.msra.mxu0 %v14028_v10  ;;  %8013 = vmatmul.mubr.bf16.gmra.mxu1 %v12659_v40  ;;  %v10848_v62 = vpack.c.bf16 %v14032_v21, %v14032_v21  ;;  %v4541_v21 = vpop.f32.mrf.mxu0 }
 0x282   : > { %4745 = vst [vmem:[#allocation3 + $0x121] sm:$0xff] %v14042_v48  ;;  %v14058_v26 = vld [vmem:[#allocation11 + $0x198] sm:$0xff]   ;;  %6462 = vst [vmem:[#allocation5 + $0x188] sm:$0xf] %v11063_v42  ;;  %v4773_v52 = vld [vmem:[#allocation3 + $0xd8] sm:$0xff]  ;;  %v10872_v19 = vpack.c.bf16 %v5150_v25, %v5150_v25  ;;  %v10875_v12 = vpack.c.bf16 %v5153_v46, %v5153_v46  ;;  %v14066_v45 = vmax.f32 %v4638_v32, 0.0  ;;  %v11527_v31 = vadd.f32 %v11526_v30, %v11525_v2 }
 0x283   : > { %6463 = vst [vmem:[#allocation5 + $0x1ac] sm:$0xf] %v11064_v50  ;;  %v14843_v27 = vld [vmem:[#allocation28_spill] sm:$0xff]  ;;  %5309 = vst [vmem:[#allocation5 + $0x170] sm:$0xf] %v10871_v33  ;;  %v14063_v59 = vld [vmem:[#allocation11 + $0x1d0] sm:$0xff]   ;;  %v14072_v37 = vpack.c.bf16 %v4773_v52, %v4773_v52  ;;  %v4641_v10 = vadd.f32 %v13834_v20, %v4602_v1  ;;  %v4600_v22 = vmul.f32 %v13824_v17, %v4539_v3  ;;  %v11528_v40 = vpop.f32.mrf.mxu1  ;;  %11902 = vmatprep.subr.bf16.mxu0 %v12715_v57 }
 0x284   : > { %v14061_v14 = vadd.f32 %v11524_v36, %v14843_v27  ;;  %v5154_v13 = vld [vmem:[#allocation3 + $0xb2] sm:$0xff]  ;;  %v5156_v24 = vld [vmem:[#allocation3 + $0xca] sm:$0xff]  ;;  %4743 = vst [vmem:[#allocation3 + $0x109] sm:$0xff] %v14053_v41  ;;  %5310 = vst [vmem:[#allocation5 + $0x194] sm:$0xf] %v10872_v19  ;;  %v14077_v0 = vmax.f32 %v4636_v54, 0.0  ;;  %v4550_v42 = vadd.f32 %v12097_v9, %v14035_v51  ;;  %v4542_v56 = vadd.f32 %v4541_v21, %v13980_v44 }
 0x285   : > { %v4775_v23 = vld [vmem:[#allocation3 + $0xf0] sm:$0xff]  ;;  %v12662_v49 = vld [vmem:[#allocation5 + $0x98] ss:$36 sps:$4 sm:$0xff]   ;;  %4930 = vst [vmem:[#allocation5 + $0x21c] sm:$0xf] %v10812_v18  ;;  %v10876_v7 = vpack.c.bf16 %v5154_v13, %v5154_v13  ;;  %v4776_v16 = vld [vmem:[#allocation3 + $0xf8] sm:$0xff]  ;;  %v14088_v28 = vpack.c.bf16 %v5156_v24, %v5156_v24  ;;  %v4639_v46 = vadd.f32 %v13834_v20, %v4600_v22  ;;  %v11529_v27 = vpop.f32.mrf.mxu1  ;;  %11903 = vmatpush3.bf16.msra.mxu0 %v14058_v26  ;;  %v12100_v13 = vpop.f32.mrf.mxu0 }
 0x286   : > { %v12670_v4 = vld [vmem:[#allocation5 + $0x124] ss:$36 sps:$4 sm:$0xff]   ;;  %5504 = vst [vmem:[#allocation5 + $0x1e0] sm:$0xf] %v10812_v18  ;;  %5313 = vst [vmem:[#allocation5 + $0x200] sm:$0xf] %v10875_v12  ;;  %8166 = vmatmul.mubr.bf16.gmra.mxu0 %v12662_v49  ;;  %v14091_v51 = vpack.c.bf16 %v4775_v23, %v4775_v23  ;;  %v14093_v57 = vpack.c.bf16 %v4776_v16, %v4776_v16  ;;  %v4603_v52 = vmul.f32 %v13824_v17, %v4550_v42 }
 0x287   : > { %4746 = vst [vmem:[#allocation3 + $0x129] sm:$0xff] %v14066_v45  ;;  %8020 = vmatprep.mubr.bf16.mxu1 %v12670_v4  ;;  %v12673_v50 = vld [vmem:[#allocation5 + $0xe4] ss:$36 sps:$4 sm:$0xff]   ;;  %v14082_v58 = vld [vmem:[#allocation11 + $0x190] sm:$0xff]   ;;  %5314 = vst [vmem:[#allocation5 + $0x224] sm:$0xf] %v10876_v7  ;;  %v11530_v12 = vadd.f32 %v11529_v27, %v11528_v40  ;;  %v14107_v20 = vpack.c.bf16 %v14017_v11, %v14017_v11  ;;  %11904 = vmatprep.subr.bf16.mxu0 %v14063_v59  ;;  %v11531_v54 = vpop.f32.mrf.mxu1  ;;  %v4554_v49 = vpop.f32.mrf.mxu0 }
 0x288   : > { %v5159_v36 = vld [vmem:[#allocation3 + $0xf2] sm:$0xff]  ;;  %v5160_v33 = vld [vmem:[#allocation3 + $0xfa] sm:$0xff]  ;;  %4933 = vst [vmem:[#allocation5 + $0x288] sm:$0xf] %v14072_v37  ;;  %5126 = vst [vmem:[#allocation5 + $0x2b0] sm:$0xf] %v10848_v62  ;;  %8173 = vmatprep.mubr.bf16.mxu0 %v12673_v50  ;;  %v14129_v1 = vpack.c.bf16 %v14053_v41, %v14053_v41 }
 0x289   : > { %v14844_v32 = vld [vmem:[#allocation29_spill] sm:$0xff]  ;;  %5507 = vst [vmem:[#allocation5 + $0x24c] sm:$0xf] %v14072_v37  ;;  %v6307_v25 = vld [vmem:[#allocation3 + $0xe2] sm:$0xff]  ;;  %4744 = vst [vmem:[#allocation3 + $0x111] sm:$0xff] %v14077_v0  ;;  %v14096_v38 = vmax.f32 %v4641_v10, 0.0  ;;  %v4402_v30 = vadd.f32 %v11530_v12, %v13864_v53  ;;  %v14135_v7 = vpack.c.bf16 %v5159_v36, %v5159_v36  ;;  %v14137_v62 = vpack.c.bf16 %v5160_v33, %v5160_v33  ;;  %v11532_v42 = vpop.f32.mrf.mxu1  ;;  %v12101_v21 = vpop.f32.mrf.mxu0 }
 0x28a   : > { %v14085_v29 = vadd.f32 %v11527_v31, %v14844_v32  ;;  %v6306_v2 = vld [vmem:[#allocation3 + $0xda] sm:$0xff]  ;;  %v11068_v18 = vpack.c.bf16 %v6307_v25, %v6307_v25  ;;  %5316 = vst [vmem:[#allocation5 + $0x26c] sm:$0xf] %v14088_v28  ;;  %4935 = vst [vmem:[#allocation5 + $0x2d0] sm:$0xf] %v14091_v51  ;;  %v14113_v26 = vmax.f32 %v4639_v46, 0.0  ;;  %v10852_v31 = vpack.c.bf16 %v14077_v0, %v14077_v0 }
 0x28b   : > { %v11067_v19 = vpack.c.bf16 %v6306_v2, %v6306_v2  ;;  %4936 = vst [vmem:[#allocation5 + $0x2f4] sm:$0xf] %v14093_v57  ;;  %5509 = vst [vmem:[#allocation5 + $0x294] sm:$0xf] %v14091_v51  ;;  %v12747_v17 = vld [vmem:[#allocation11 + $0x1c8] sm:$0xff]   ;;  %v4779_v44 = vld [vmem:[#allocation3 + $0x120] sm:$0xff]  ;;  %v4555_v10 = vadd.f32 %v4554_v49, %v14061_v14  ;;  %11905 = vmatpush3.bf16.msra.mxu0 %v14082_v58  ;;  %v4563_v33 = vadd.f32 %v12100_v13, %v4402_v30 }
 0x28c   : > { %5510 = vst [vmem:[#allocation5 + $0x2b8] sm:$0xf] %v14093_v57  ;;  %4749 = vst [vmem:[#allocation3 + $0x151] sm:$0xff] %v14096_v38  ;;  %v14118_v24 = vld [vmem:[%s14790_s3] ss:$0 sm:$0xff]  ;;  %v4777_v3 = vld [vmem:[#allocation3 + $0x108] sm:$0xff]  ;;  %v11533_v2 = vadd.f32 %v11532_v42, %v11531_v54  ;;  %v14154_v14 = vpack.c.bf16 %v4779_v44, %v4779_v44  ;;  %11906 = vmatprep.subr.bf16.mxu0 %v12747_v17 }
 0x28d   : > { %v4642_v11 = vadd.f32 %v14118_v24, %v4603_v52  ;;  %v14124_v23 = vld [vmem:[%s14789_s2] ss:$0 sm:$0xff]  ;;  %6466 = vst [vmem:[#allocation5 + $0x218] sm:$0xf] %v11067_v19  ;;  %6467 = vst [vmem:[#allocation5 + $0x23c] sm:$0xf] %v11068_v18  ;;  %v14150_v25 = vpack.c.bf16 %v4777_v3, %v4777_v3 }
 0x28e   : > { %v4601_v59 = vmul.f32 %v14124_v23, %v4542_v56  ;;  %v12668_v4 = vld [vmem:[#allocation5 + $0x120] ss:$36 sps:$4 sm:$0xff]   ;;  %v4774_v9 = vld [vmem:[#allocation3 + $0xe0] sm:$0xff]  ;;  %5128 = vst [vmem:[#allocation5 + $0x2f8] sm:$0xf] %v14107_v20  ;;  %v14139_v41 = vld [vmem:[#allocation11 + $0x188] sm:$0xff]   ;;  %v4604_v56 = vmul.f32 %v14124_v23, %v4555_v10  ;;  %v4606_v12 = vmul.f32 %v14124_v23, %v4563_v33  ;;  %v4405_v44 = vadd.f32 %v11533_v2, %v13875_v55 }
 0x28f   : > { %5317 = vst [vmem:[#allocation5 + $0x290] sm:$0xf] %v11067_v19  ;;  %5318 = vst [vmem:[#allocation5 + $0x2b4] sm:$0xf] %v11068_v18  ;;  %v14142_v16 = vmax.f32 %v4642_v11, 0.0  ;;  %v10816_v50 = vpack.c.bf16 %v4774_v9, %v4774_v9  ;;  %v14148_v0 = vld [vmem:[#allocation11 + $0x1c0] sm:$0xff]   ;;  %8021 = vmatmul.mubr.bf16.gmra.mxu1 %v12668_v4  ;;  %v14164_v19 = vpack.c.bf16 %v14042_v48, %v14042_v48  ;;  %v4557_v11 = vpop.f32.mrf.mxu0  ;;  %11907 = vmatpush3.bf16.msra.mxu0 %v14139_v41 }
 0x290   : > { %4747 = vst [vmem:[#allocation3 + $0x139] sm:$0xff] %v14113_v26  ;;  %v4640_v53 = vadd.f32 %v14118_v24, %v4601_v59  ;;  %v12677_v22 = vld [vmem:[#allocation5 + $0x16c] ss:$36 sps:$4 sm:$0xff]   ;;  %5129 = vst [vmem:[#allocation5 + $0x31c] sm:$0xf] %v14129_v1  ;;  %v4780_v40 = vld [vmem:[#allocation3 + $0x128] sm:$0xff]  ;;  %v14173_v59 = vpack.c.bf16 %v14066_v45, %v14066_v45  ;;  %v14178_v48 = vpack.c.bf16 %v14113_v26, %v14113_v26  ;;  %11908 = vmatprep.subr.bf16.mxu0 %v14148_v0 }
 0x291   : > { %v12671_v36 = vld [vmem:[#allocation5 + $0xe0] ss:$36 sps:$4 sm:$0xff]   ;;  %v12680_v32 = vld [vmem:[#allocation5 + $0x12c] ss:$36 sps:$4 sm:$0xff]   ;;  %5130 = vst [vmem:[#allocation5 + $0x340] sm:$0xf] %v10852_v31  ;;  %8028 = vmatprep.mubr.bf16.mxu1 %v12677_v22  ;;  %v14160_v27 = vpack.c.bf16 %v4780_v40, %v4780_v40  ;;  %v4643_v3 = vadd.f32 %v14118_v24, %v4604_v56  ;;  %v4558_v4 = vadd.f32 %v4557_v11, %v14085_v29 }
 0x292   : > { %5319 = vst [vmem:[#allocation5 + $0x2d8] sm:$0xf] %v14135_v7  ;;  %5320 = vst [vmem:[#allocation5 + $0x2fc] sm:$0xf] %v14137_v62  ;;  %v5163_v58 = vld [vmem:[#allocation3 + $0x122] sm:$0xff]  ;;  %v5164_v46 = vld [vmem:[#allocation3 + $0x12a] sm:$0xff]  ;;  %8174 = vmatmul.mubr.bf16.gmra.mxu0 %v12671_v36  ;;  %v4645_v9 = vadd.f32 %v14118_v24, %v4606_v12  ;;  %v4566_v31 = vadd.f32 %v12101_v21, %v4405_v44  ;;  %v14207_v2 = vpack.c.bf16 %v14096_v38, %v14096_v38 }
 0x293   : > { %5893 = vst [vmem:[#allocation5 + $0x29c] sm:$0xf] %v14135_v7  ;;  %5894 = vst [vmem:[#allocation5 + $0x2c0] sm:$0xf] %v14137_v62  ;;  %v4672_v52 = vmax.f32 %v4640_v53, 0.0  ;;  %v6310_v18 = vld [vmem:[#allocation3 + $0x10a] sm:$0xff]  ;;  %8181 = vmatprep.mubr.bf16.mxu0 %v12680_v32  ;;  %v14194_v29 = vpack.c.bf16 %v5163_v58, %v5163_v58  ;;  %v14198_v36 = vpack.c.bf16 %v5164_v46, %v5164_v46 }
 0x294   : > { %4750 = vst [vmem:[#allocation3 + $0x159] sm:$0xff] %v14142_v16  ;;  %4934 = vst [vmem:[#allocation5 + $0x2ac] sm:$0xf] %v10816_v50  ;;  %v6311_v13 = vld [vmem:[#allocation3 + $0x112] sm:$0xff]  ;;  %v14180_v17 = vld [vmem:[#allocation3 + $0x21] sm:$0xff]  ;;  %v11071_v55 = vpack.c.bf16 %v6310_v18, %v6310_v18  ;;  %v4675_v22 = vmax.f32 %v4643_v3, 0.0  ;;  %v4607_v41 = vmul.f32 %v14124_v23, %v4566_v31  ;;  %v14211_v58 = vpack.c.bf16 %v14142_v16, %v14142_v16 }
 0x295   : > { %5508 = vst [vmem:[#allocation5 + $0x270] sm:$0xf] %v10816_v50  ;;  %4937 = vst [vmem:[#allocation5 + $0x318] sm:$0xf] %v14150_v25  ;;  %v11072_v54 = vpack.c.bf16 %v6311_v13, %v6311_v13  ;;  %v14187_v45 = vld [vmem:[#allocation3 + $0x1a] sm:$0xff]  ;;  %v14189_v26 = vld [vmem:[#allocation3 + $0x22] sm:$0xff]  ;;  %v10856_v53 = vpack.c.bf16 %v4672_v52, %v4672_v52  ;;  %v4605_v50 = vmul.f32 %v14124_v23, %v4558_v4 }
 0x296   : > { %5511 = vst [vmem:[#allocation5 + $0x2dc] sm:$0xf] %v14150_v25  ;;  %4939 = vst [vmem:[#allocation5 + $0x360] sm:$0xf] %v14154_v14  ;;  %v12770_v30 = vld [vmem:[#allocation11 + $0x180] sm:$0xff]   ;;  %v12778_v10 = vld [vmem:[#allocation12 + $0x38] sm:$0xff]   ;;  %v14219_v23 = vpack.c.bf16 %v4675_v22, %v4675_v22  ;;  %v10926_v38 = vpack.c.bf16 %v14180_v17, %v14180_v17  ;;  %v4646_v11 = vadd.f32 %v14118_v24, %v4607_v41 }
 0x297   : > { %5513 = vst [vmem:[#allocation5 + $0x324] sm:$0xf] %v14154_v14  ;;  %4748 = vst [vmem:[#allocation3 + $0x141] sm:$0xff] %v4672_v52  ;;  %v4783_v49 = vld [vmem:[#allocation3 + $0x150] sm:$0xff]  ;;  %v12675_v42 = vld [vmem:[#allocation5 + $0x168] ss:$36 sps:$4 sm:$0xff]   ;;  %v4644_v0 = vadd.f32 %v14118_v24, %v4605_v50  ;;  %v10958_v17 = vpack.c.bf16 %v14189_v26, %v14189_v26  ;;  %11909 = vmatpush3.bf16.msra.mxu0 %v12770_v30 }
 0x298   : > { %4940 = vst [vmem:[#allocation5 + $0x384] sm:$0xf] %v14160_v27  ;;  %5131 = vst [vmem:[#allocation5 + $0x364] sm:$0xf] %v14164_v19  ;;  %v12686_v40 = vld [vmem:[#allocation5 + $0x1b4] ss:$36 sps:$4 sm:$0xff]   ;;  %v14200_v33 = vpack.c.bf16 %v4783_v49, %v4783_v49  ;;  %8029 = vmatmul.mubr.bf16.gmra.mxu1 %v12675_v42  ;;  %12150 = vmatprep.subr.bf16.mxu0 %v12778_v10 }
 0x299   : > { %5514 = vst [vmem:[#allocation5 + $0x348] sm:$0xf] %v14160_v27  ;;  %5132 = vst [vmem:[#allocation5 + $0x388] sm:$0xf] %v14173_v59  ;;  %v4781_v21 = vld [vmem:[#allocation3 + $0x138] sm:$0xff]  ;;  %v4677_v32 = vmax.f32 %v4645_v9, 0.0  ;;  %8036 = vmatprep.mubr.bf16.mxu1 %v12686_v40 }
 0x29a   : > { %5133 = vst [vmem:[#allocation5 + $0x3ac] sm:$0xf] %v14178_v48  ;;  %6470 = vst [vmem:[#allocation5 + $0x2a8] sm:$0xf] %v11071_v55  ;;  %v5528_v46 = vld [vmem:[#allocation3 + $0x51] sm:$0xff]  ;;  %v14214_v56 = vpack.c.bf16 %v4781_v21, %v4781_v21  ;;  %v4678_v9 = vmax.f32 %v4646_v11, 0.0 }
 0x29b   : > { %6471 = vst [vmem:[#allocation5 + $0x2cc] sm:$0xf] %v11072_v54  ;;  %5321 = vst [vmem:[#allocation5 + $0x320] sm:$0xf] %v11071_v55  ;;  %v12678_v52 = vld [vmem:[#allocation5 + $0x128] ss:$36 sps:$4 sm:$0xff]   ;;  %v10957_v55 = vpack.c.bf16 %v14187_v45, %v14187_v45  ;;  %v10930_v41 = vpack.c.bf16 %v5528_v46, %v5528_v46 }
 0x29c   : > { %5322 = vst [vmem:[#allocation5 + $0x344] sm:$0xf] %v11072_v54  ;;  %5134 = vst [vmem:[#allocation5 + $0x3d0] sm:$0xf] %v10856_v53  ;;  %v14223_v16 = vld [vmem:[#allocation3 + $0x4a] sm:$0xff]  ;;  %v14225_v18 = vld [vmem:[#allocation3 + $0x52] sm:$0xff]  ;;  %8182 = vmatmul.mubr.bf16.gmra.mxu0 %v12678_v52 }
 0x29d   : > { %5323 = vst [vmem:[#allocation5 + $0x368] sm:$0xf] %v14194_v29  ;;  %4751 = vst [vmem:[#allocation3 + $0x169] sm:$0xff] %v4675_v22  ;;  %v4784_v13 = vld [vmem:[#allocation3 + $0x158] sm:$0xff]  ;;  %v4676_v54 = vmax.f32 %v4644_v0, 0.0  ;;  %v5911_v45 = vld [vmem:[#allocation3 + $0x50] sm:$0xff]  ;;  %v10961_v0 = vpack.c.bf16 %v14223_v16, %v14223_v16 }
 0x29e   : > { %5324 = vst [vmem:[#allocation5 + $0x38c] sm:$0xf] %v14198_v36  ;;  %4943 = vst [vmem:[#allocation5 + $0x3f0] sm:$0xf] %v14200_v33  ;;  %v5167_v12 = vld [vmem:[#allocation3 + $0x152] sm:$0xff]  ;;  %v5168_v44 = vld [vmem:[#allocation3 + $0x15a] sm:$0xff]  ;;  %v14236_v24 = vpack.c.bf16 %v4784_v13, %v4784_v13 }
 0x29f   : > { %5517 = vst [vmem:[#allocation5 + $0x3b4] sm:$0xf] %v14200_v33  ;;  %4753 = vst [vmem:[#allocation3 + $0x181] sm:$0xff] %v4677_v32  ;;  %v12689_v3 = vld [vmem:[#allocation5 + $0x174] ss:$36 sps:$4 sm:$0xff]   ;;  %v14239_v4 = vpack.c.bf16 %v5167_v12, %v5167_v12  ;;  %v14241_v49 = vpack.c.bf16 %v5168_v44, %v5168_v44  ;;  %v6314_v26 = vld [vmem:[#allocation3 + $0x13a] sm:$0xff]  ;;  %v10860_v10 = vpack.c.bf16 %v4676_v54, %v4676_v54 }
 0x2a0   : > { %5135 = vst [vmem:[#allocation5 + $0x3f4] sm:$0xf] %v14207_v2  ;;  %5136 = vst [vmem:[#allocation5 + $0x418] sm:$0xf] %v14211_v58  ;;  %v6315_v30 = vld [vmem:[#allocation3 + $0x142] sm:$0xff]  ;;  %v12932_v31 = vld [vmem:[#allocation3 + $0x32] sm:$0xff]  ;;  %v11075_v21 = vpack.c.bf16 %v6314_v26, %v6314_v26  ;;  %8189 = vmatprep.mubr.bf16.mxu0 %v12689_v3  ;;  %v10992_v44 = vpack.c.bf16 %v5911_v45, %v5911_v45 }
 0x2a1   : > { %4941 = vst [vmem:[#allocation5 + $0x3a8] sm:$0xf] %v14214_v56  ;;  %5515 = vst [vmem:[#allocation5 + $0x36c] sm:$0xf] %v14214_v56  ;;  %v14243_v53 = vpack.c.bf16 %v12932_v31, %v12932_v31  ;;  %v12933_v22 = vld [vmem:[#allocation3 + $0x3a] sm:$0xff]  ;;  %v11076_v32 = vpack.c.bf16 %v6315_v30, %v6315_v30  ;;  %v4778_v52 = vld [vmem:[#allocation3 + $0x110] sm:$0xff] }
 0x2a2   : > { %5137 = vst [vmem:[#allocation5 + $0x43c] sm:$0xf] %v14219_v23  ;;  %5684 = vst [vmem:[#allocation5 + $0x34] sm:$0xf] %v10926_v38  ;;  %v14245_v42 = vpack.c.bf16 %v12933_v22, %v12933_v22  ;;  %v12934_v50 = vld [vmem:[#allocation3 + $0x38] sm:$0xff]  ;;  %v10962_v38 = vpack.c.bf16 %v14225_v18, %v14225_v18  ;;  %v12935_v13 = vld [vmem:[#allocation3 + $0x48] sm:$0xff]  ;;  %v10820_v11 = vpack.c.bf16 %v4778_v52, %v4778_v52 }
 0x2a3   : > { %5875 = vst [vmem:[#allocation5 + $0x14] sm:$0xf] %v10957_v55  ;;  %5876 = vst [vmem:[#allocation5 + $0x38] sm:$0xf] %v10958_v17  ;;  %v10990_v40 = vpack.c.bf16 %v12934_v50, %v12934_v50  ;;  %v10991_v12 = vpack.c.bf16 %v12935_v13, %v12935_v13  ;;  %v12936_v46 = vld [vmem:[#allocation3 + $0x61] sm:$0xff]  ;;  %v12937_v17 = vld [vmem:[#allocation3 + $0x69] sm:$0xff] }
 0x2a4   : > { %4752 = vst [vmem:[#allocation3 + $0x171] sm:$0xff] %v4676_v54  ;;  %4944 = vst [vmem:[#allocation5 + $0x414] sm:$0xf] %v14236_v24  ;;  %v10931_v55 = vpack.c.bf16 %v12936_v46, %v12936_v46  ;;  %v10932_v54 = vpack.c.bf16 %v12937_v17, %v12937_v17  ;;  %v12938_v3 = vld [vmem:[#allocation3 + $0x62] sm:$0xff]  ;;  %v12939_v45 = vld [vmem:[#allocation3 + $0x6a] sm:$0xff] }
 0x2a5   : > { %5518 = vst [vmem:[#allocation5 + $0x3d8] sm:$0xf] %v14236_v24  ;;  %5327 = vst [vmem:[#allocation5 + $0x3f8] sm:$0xf] %v14239_v4  ;;  %v14257_v16 = vpack.c.bf16 %v12938_v3, %v12938_v3  ;;  %v4785_v26 = vld [vmem:[#allocation3 + $0x168] sm:$0xff]  ;;  %v14259_v30 = vpack.c.bf16 %v12939_v45, %v12939_v45 }
 0x2a6   : > { %5328 = vst [vmem:[#allocation5 + $0x41c] sm:$0xf] %v14241_v49  ;;  %4754 = vst [vmem:[#allocation3 + $0x189] sm:$0xff] %v4678_v9  ;;  %v12684_v18 = vld [vmem:[#allocation5 + $0x1b0] ss:$36 sps:$4 sm:$0xff]   ;;  %v12941_v22 = vld [vmem:[#allocation3 + $0x68] sm:$0xff] }
 0x2a7   : > { %5877 = vst [vmem:[#allocation5 + $0x5c] sm:$0xf] %v14243_v53  ;;  %5878 = vst [vmem:[#allocation5 + $0x80] sm:$0xf] %v14245_v42  ;;  %v12940_v9 = vld [vmem:[#allocation3 + $0x60] sm:$0xff]  ;;  %v10994_v50 = vpack.c.bf16 %v12941_v22, %v12941_v22  ;;  %8037 = vmatmul.mubr.bf16.gmra.mxu1 %v12684_v18 }
 0x2a8   : > { %6069 = vst [vmem:[#allocation5 + $0x3c] sm:$0xf] %v10990_v40  ;;  %6474 = vst [vmem:[#allocation5 + $0x338] sm:$0xf] %v11075_v21  ;;  %v10993_v31 = vpack.c.bf16 %v12940_v9, %v12940_v9  ;;  %v12942_v40 = vld [vmem:[#allocation3 + $0x79] sm:$0xff]  ;;  %v5919_v9 = vld [vmem:[#allocation3 + $0xb0] sm:$0xff] }
 0x2a9   : > { %6475 = vst [vmem:[#allocation5 + $0x35c] sm:$0xf] %v11076_v32  ;;  %5325 = vst [vmem:[#allocation5 + $0x3b0] sm:$0xf] %v11075_v21  ;;  %v10933_v21 = vpack.c.bf16 %v12942_v40, %v12942_v40  ;;  %v12687_v13 = vld [vmem:[#allocation5 + $0x170] ss:$36 sps:$4 sm:$0xff]  }
 0x2aa   : > { %5326 = vst [vmem:[#allocation5 + $0x3d4] sm:$0xf] %v11076_v32  ;;  %5138 = vst [vmem:[#allocation5 + $0x460] sm:$0xf] %v10860_v10  ;;  %v12693_v32 = vld [vmem:[#allocation5 + $0x1fc] ss:$36 sps:$4 sm:$0xff]   ;;  %v14261_v10 = vpack.c.bf16 %v4785_v26, %v4785_v26  ;;  %8190 = vmatmul.mubr.bf16.gmra.mxu0 %v12687_v13 }
 0x2ab   : > { %5688 = vst [vmem:[#allocation5 + $0xc4] sm:$0xf] %v10930_v41  ;;  %6263 = vst [vmem:[#allocation5 + $0x88] sm:$0xf] %v10930_v41  ;;  %v12943_v41 = vld [vmem:[#allocation3 + $0x91] sm:$0xff]  ;;  %8044 = vmatprep.mubr.bf16.mxu1 %v12693_v32 }
 0x2ac   : > { %5879 = vst [vmem:[#allocation5 + $0xa4] sm:$0xf] %v10961_v0  ;;  %5880 = vst [vmem:[#allocation5 + $0xc8] sm:$0xf] %v10962_v38  ;;  %v10935_v52 = vpack.c.bf16 %v12943_v41, %v12943_v41  ;;  %v12944_v0 = vld [vmem:[#allocation3 + $0x99] sm:$0xff]  ;;  %v6318_v3 = vld [vmem:[#allocation3 + $0x16a] sm:$0xff] }
 0x2ad   : > { %6070 = vst [vmem:[#allocation5 + $0x60] sm:$0xf] %v10991_v12  ;;  %6071 = vst [vmem:[#allocation5 + $0x84] sm:$0xf] %v10992_v44  ;;  %v10936_v38 = vpack.c.bf16 %v12944_v0, %v12944_v0  ;;  %v12696_v12 = vld [vmem:[#allocation5 + $0x1bc] ss:$36 sps:$4 sm:$0xff]   ;;  %v11079_v18 = vpack.c.bf16 %v6318_v3, %v6318_v3 }
 0x2ae   : > { %4938 = vst [vmem:[#allocation5 + $0x33c] sm:$0xf] %v10820_v11  ;;  %5512 = vst [vmem:[#allocation5 + $0x300] sm:$0xf] %v10820_v11  ;;  %v4782_v44 = vld [vmem:[#allocation3 + $0x140] sm:$0xff]  ;;  %v12945_v11 = vld [vmem:[#allocation3 + $0x90] sm:$0xff]  ;;  %8197 = vmatprep.mubr.bf16.mxu0 %v12696_v12 }
 0x2af   : > { %5689 = vst [vmem:[#allocation5 + $0xe8] sm:$0xf] %v10931_v55  ;;  %5690 = vst [vmem:[#allocation5 + $0x10c] sm:$0xf] %v10932_v54  ;;  %v10997_v46 = vpack.c.bf16 %v12945_v11, %v12945_v11  ;;  %v10824_v17 = vpack.c.bf16 %v4782_v44, %v4782_v44  ;;  %v6319_v26 = vld [vmem:[#allocation3 + $0x172] sm:$0xff]  ;;  %v5732_v0 = vld [vmem:[#allocation3 + $0xe2] sm:$0xff] }
 0x2b0   : > { %5881 = vst [vmem:[#allocation5 + $0xec] sm:$0xf] %v14257_v16  ;;  %6264 = vst [vmem:[#allocation5 + $0xac] sm:$0xf] %v10931_v55  ;;  %v12946_v55 = vld [vmem:[#allocation3 + $0xc1] sm:$0xff]  ;;  %v11080_v45 = vpack.c.bf16 %v6319_v26, %v6319_v26  ;;  %v10974_v13 = vpack.c.bf16 %v5732_v0, %v5732_v0  ;;  %v5735_v3 = vld [vmem:[#allocation3 + $0x10a] sm:$0xff] }
 0x2b1   : > { %6265 = vst [vmem:[#allocation5 + $0xd0] sm:$0xf] %v10932_v54  ;;  %5882 = vst [vmem:[#allocation5 + $0x110] sm:$0xf] %v14259_v30  ;;  %v10939_v54 = vpack.c.bf16 %v12946_v55, %v12946_v55  ;;  %v12725_v40 = vld [vmem:[#allocation5 + $0x31c] ss:$36 sps:$4 sm:$0xff]  }
 0x2b2   : > { %6072 = vst [vmem:[#allocation5 + $0xa8] sm:$0xf] %v10993_v31  ;;  %6073 = vst [vmem:[#allocation5 + $0xcc] sm:$0xf] %v10994_v50  ;;  %v11000_v50 = vpack.c.bf16 %v5919_v9, %v5919_v9  ;;  %v5923_v12 = vld [vmem:[#allocation3 + $0xe0] sm:$0xff] }
 0x2b3   : > { %5691 = vst [vmem:[#allocation5 + $0x130] sm:$0xf] %v10933_v21  ;;  %6266 = vst [vmem:[#allocation5 + $0xf4] sm:$0xf] %v10933_v21  ;;  %v12719_v21 = vld [vmem:[#allocation5 + $0x290] ss:$36 sps:$4 sm:$0xff]   ;;  %v11004_v11 = vpack.c.bf16 %v5923_v12, %v5923_v12 }
 0x2b4   : > { %4945 = vst [vmem:[#allocation5 + $0x438] sm:$0xf] %v14261_v10  ;;  %5519 = vst [vmem:[#allocation5 + $0x3fc] sm:$0xf] %v14261_v10  ;;  %v12737_v55 = vld [vmem:[#allocation5 + $0x324] ss:$36 sps:$4 sm:$0xff]  }
 0x2b5   : > { %6074 = vst [vmem:[#allocation5 + $0xf0] sm:$0xf] %v13963_v43  ;;  %5693 = vst [vmem:[#allocation5 + $0x178] sm:$0xf] %v10935_v52  ;;  %v4786_v43 = vld [vmem:[#allocation3 + $0x170] sm:$0xff]  ;;  %v12950_v12 = vld [vmem:[#allocation11 + $0x238] sm:$0xff]  }
 0x2b6   : > { %5694 = vst [vmem:[#allocation5 + $0x19c] sm:$0xf] %v10936_v38  ;;  %6268 = vst [vmem:[#allocation5 + $0x13c] sm:$0xf] %v10935_v52  ;;  %v12728_v32 = vld [vmem:[#allocation5 + $0x2dc] ss:$36 sps:$4 sm:$0xff]  }
 0x2b7   : > { %6269 = vst [vmem:[#allocation5 + $0x160] sm:$0xf] %v10936_v38  ;;  %5885 = vst [vmem:[#allocation5 + $0x17c] sm:$0xf] %v13984_v15  ;;  %v10828_v15 = vpack.c.bf16 %v4786_v43, %v4786_v43  ;;  %v5731_v52 = vld [vmem:[#allocation3 + $0xda] sm:$0xff]  ;;  %v5927_v43 = vld [vmem:[#allocation3 + $0x110] sm:$0xff] }
 0x2b8   : > { %5886 = vst [vmem:[#allocation5 + $0x1a0] sm:$0xf] %v13995_v8  ;;  %6076 = vst [vmem:[#allocation5 + $0x138] sm:$0xf] %v10997_v46  ;;  %v5362_v8 = vld [vmem:[#allocation3 + $0x188] sm:$0xff]  ;;  %v10973_v38 = vpack.c.bf16 %v5731_v52, %v5731_v52  ;;  %v12791_v52 = vld [vmem:[#allocation11 + $0x230] sm:$0xff]  }
 0x2b9   : > { %6077 = vst [vmem:[#allocation5 + $0x15c] sm:$0xf] %v13982_v63  ;;  %4942 = vst [vmem:[#allocation5 + $0x3cc] sm:$0xf] %v10824_v17  ;;  %v5361_v63 = vld [vmem:[#allocation3 + $0x180] sm:$0xff] }
 0x2ba   : > { %5516 = vst [vmem:[#allocation5 + $0x390] sm:$0xf] %v10824_v17  ;;  %5695 = vst [vmem:[#allocation5 + $0x1c0] sm:$0xf] %v13965_v61  ;;  %v12723_v44 = vld [vmem:[#allocation5 + $0x318] ss:$36 sps:$4 sm:$0xff]  }
 0x2bb   : > { %6078 = vst [vmem:[#allocation5 + $0x180] sm:$0xf] %v14010_v34  ;;  %6270 = vst [vmem:[#allocation5 + $0x184] sm:$0xf] %v13965_v61  ;;  %v12691_v61 = vld [vmem:[#allocation5 + $0x1f8] ss:$36 sps:$4 sm:$0xff]   ;;  %v10923_v34 = vpack.c.bf16 %v5361_v63, %v5361_v63  ;;  %v11008_v63 = vpack.c.bf16 %v5927_v43, %v5927_v43 }
 0x2bc   : > { %5697 = vst [vmem:[#allocation5 + $0x208] sm:$0xf] %v10939_v54  ;;  %6272 = vst [vmem:[#allocation5 + $0x1cc] sm:$0xf] %v10939_v54  ;;  %8045 = vmatmul.mubr.bf16.gmra.mxu1 %v12691_v61  ;;  %v12734_v46 = vld [vmem:[#allocation5 + $0x364] ss:$36 sps:$4 sm:$0xff]  }
 0x2bd   : > { %5698 = vst [vmem:[#allocation5 + $0x22c] sm:$0xf] %v14006_v60  ;;  %5889 = vst [vmem:[#allocation5 + $0x20c] sm:$0xf] %v14039_v35  ;;  %v10924_v35 = vpack.c.bf16 %v5362_v8, %v5362_v8  ;;  %v12726_v17 = vld [vmem:[#allocation5 + $0x2d8] ss:$36 sps:$4 sm:$0xff]  }
 0x2be   : > { %5890 = vst [vmem:[#allocation5 + $0x230] sm:$0xf] %v14088_v28  ;;  %6080 = vst [vmem:[#allocation5 + $0x1c8] sm:$0xf] %v13997_v47  ;;  %v12694_v47 = vld [vmem:[#allocation5 + $0x1b8] ss:$36 sps:$4 sm:$0xff]  }
 0x2bf   : > { %6273 = vst [vmem:[#allocation5 + $0x1f0] sm:$0xf] %v14006_v60  ;;  %6478 = vst [vmem:[#allocation5 + $0x3c8] sm:$0xf] %v11079_v18  ;;  %v12702_v60 = vld [vmem:[#allocation5 + $0x244] ss:$36 sps:$4 sm:$0xff]   ;;  %8198 = vmatmul.mubr.bf16.gmra.mxu0 %v12694_v47 }
 0x2c0   : > { %6479 = vst [vmem:[#allocation5 + $0x3ec] sm:$0xf] %v11080_v45  ;;  %5329 = vst [vmem:[#allocation5 + $0x440] sm:$0xf] %v11079_v18  ;;  %8052 = vmatprep.mubr.bf16.mxu1 %v12702_v60  ;;  %v5544_v54 = vld [vmem:[#allocation3 + $0x111] sm:$0xff]  ;;  %v5548_v47 = vld [vmem:[#allocation3 + $0x141] sm:$0xff] }
 0x2c1   : > { %5330 = vst [vmem:[#allocation5 + $0x464] sm:$0xf] %v11080_v45  ;;  %6081 = vst [vmem:[#allocation5 + $0x1ec] sm:$0xf] %v14037_v6  ;;  %v10946_v26 = vpack.c.bf16 %v5544_v54, %v5544_v54  ;;  %v5736_v18 = vld [vmem:[#allocation3 + $0x112] sm:$0xff]  ;;  %v10977_v45 = vpack.c.bf16 %v5735_v3, %v5735_v3  ;;  %v10950_v60 = vpack.c.bf16 %v5548_v47, %v5548_v47  ;;  %v6131_v54 = vld [vmem:[#allocation3 + $0x1a1] sm:$0xff] }
 0x2c2   : > { %5699 = vst [vmem:[#allocation5 + $0x250] sm:$0xf] %v14015_v5  ;;  %6274 = vst [vmem:[#allocation5 + $0x214] sm:$0xf] %v14015_v5  ;;  %v12705_v5 = vld [vmem:[#allocation5 + $0x204] ss:$36 sps:$4 sm:$0xff]  }
 0x2c3   : > { %4946 = vst [vmem:[#allocation5 + $0x45c] sm:$0xf] %v10828_v15  ;;  %5520 = vst [vmem:[#allocation5 + $0x420] sm:$0xf] %v10828_v15  ;;  %8205 = vmatprep.mubr.bf16.mxu0 %v12705_v5  ;;  %v10978_v15 = vpack.c.bf16 %v5736_v18, %v5736_v18  ;;  %v12732_v8 = vld [vmem:[#allocation5 + $0x360] ss:$36 sps:$4 sm:$0xff]   ;;  %v11052_v18 = vpack.c.bf16 %v6131_v54, %v6131_v54 }
 0x2c4   : > { %6082 = vst [vmem:[#allocation5 + $0x210] sm:$0xf] %v14072_v37  ;;  %5701 = vst [vmem:[#allocation5 + $0x298] sm:$0xf] %v14021_v39  ;;  %v12948_v37 = vld [vmem:[#allocation3 + $0x9a] sm:$0xff]  ;;  %v12819_v43 = vld [vmem:[#allocation11 + $0x220] sm:$0xff]  }
 0x2c5   : > { %5702 = vst [vmem:[#allocation5 + $0x2bc] sm:$0xf] %v14107_v20  ;;  %6276 = vst [vmem:[#allocation5 + $0x25c] sm:$0xf] %v14021_v39  ;;  %v12947_v39 = vld [vmem:[#allocation3 + $0x92] sm:$0xff]  ;;  %v5739_v5 = vld [vmem:[#allocation3 + $0x13a] sm:$0xff] }
 0x2c6   : > { %6277 = vst [vmem:[#allocation5 + $0x280] sm:$0xf] %v14107_v20  ;;  %6084 = vst [vmem:[#allocation5 + $0x258] sm:$0xf] %v14091_v51  ;;  %v11061_v6 = vpack.c.bf16 %v12947_v39, %v12947_v39  ;;  %v11062_v51 = vpack.c.bf16 %v12948_v37, %v12948_v37  ;;  %v12741_v61 = vld [vmem:[#allocation5 + $0x3ac] ss:$36 sps:$4 sm:$0xff]   ;;  %v10981_v37 = vpack.c.bf16 %v5739_v5, %v5739_v5 }
 0x2c7   : > { %6085 = vst [vmem:[#allocation5 + $0x27c] sm:$0xf] %v14093_v57  ;;  %5703 = vst [vmem:[#allocation5 + $0x2e0] sm:$0xf] %v14129_v1  ;;  %v12949_v57 = vld [vmem:[#allocation3 + $0xc2] sm:$0xff]  ;;  %v12806_v47 = vld [vmem:[#allocation12 + $0x28] sm:$0xff]  }
 0x2c8   : > { %6086 = vst [vmem:[#allocation5 + $0x2a0] sm:$0xf] %v14150_v25  ;;  %6278 = vst [vmem:[#allocation5 + $0x2a4] sm:$0xf] %v14129_v1  ;;  %v11065_v20 = vpack.c.bf16 %v12949_v57, %v12949_v57  ;;  %v12700_v1 = vld [vmem:[#allocation5 + $0x240] ss:$36 sps:$4 sm:$0xff]  }
 0x2c9   : > { %5521 = vst [vmem:[#allocation5 + $0x444] sm:$0xf] %v10923_v34  ;;  %5522 = vst [vmem:[#allocation5 + $0x468] sm:$0xf] %v10924_v35  ;;  %v12709_v25 = vld [vmem:[#allocation5 + $0x28c] ss:$36 sps:$4 sm:$0xff]   ;;  %8053 = vmatmul.mubr.bf16.gmra.mxu1 %v12700_v1 }
 0x2ca   : > { %5705 = vst [vmem:[#allocation5 + $0x328] sm:$0xf] %v14164_v19  ;;  %5706 = vst [vmem:[#allocation5 + $0x34c] sm:$0xf] %v14173_v59  ;;  %8060 = vmatprep.mubr.bf16.mxu1 %v12709_v25  ;;  %v12735_v34 = vld [vmem:[#allocation5 + $0x320] ss:$36 sps:$4 sm:$0xff]  }
 0x2cb   : > { %6280 = vst [vmem:[#allocation5 + $0x2ec] sm:$0xf] %v14164_v19  ;;  %6281 = vst [vmem:[#allocation5 + $0x310] sm:$0xf] %v14173_v59  ;;  %v11574_v19 = vpop.f32.mrf.mxu1  ;;  %v12744_v35 = vld [vmem:[#allocation5 + $0x36c] ss:$36 sps:$4 sm:$0xff]  }
 0x2cc   : > { %5897 = vst [vmem:[#allocation5 + $0x32c] sm:$0xf] %v14194_v29  ;;  %5898 = vst [vmem:[#allocation5 + $0x350] sm:$0xf] %v14198_v36  ;;  %v5740_v39 = vld [vmem:[#allocation3 + $0x142] sm:$0xff] }
 0x2cd   : > { %6088 = vst [vmem:[#allocation5 + $0x2e8] sm:$0xf] %v14154_v14  ;;  %6089 = vst [vmem:[#allocation5 + $0x30c] sm:$0xf] %v14160_v27  ;;  %v12703_v14 = vld [vmem:[#allocation5 + $0x200] ss:$36 sps:$4 sm:$0xff]   ;;  %v11575_v59 = vpop.f32.mrf.mxu1 }
 0x2ce   : > { %6472 = vst [vmem:[#allocation5 + $0x2f0] sm:$0xf] %v14194_v29  ;;  %6473 = vst [vmem:[#allocation5 + $0x314] sm:$0xf] %v14198_v36  ;;  %v12712_v27 = vld [vmem:[#allocation5 + $0x24c] ss:$36 sps:$4 sm:$0xff]   ;;  %8206 = vmatmul.mubr.bf16.gmra.mxu0 %v12703_v14 }
 0x2cf   : > { %5707 = vst [vmem:[#allocation5 + $0x370] sm:$0xf] %v14178_v48  ;;  %6090 = vst [vmem:[#allocation5 + $0x330] sm:$0xf] %v14214_v56  ;;  %8213 = vmatprep.mubr.bf16.mxu0 %v12712_v27  ;;  %v12707_v29 = vld [vmem:[#allocation5 + $0x288] ss:$36 sps:$4 sm:$0xff]  }
 0x2d0   : > { %6282 = vst [vmem:[#allocation5 + $0x334] sm:$0xf] %v14178_v48  ;;  %5709 = vst [vmem:[#allocation5 + $0x3b8] sm:$0xf] %v14207_v2  ;;  %v14325_v48 = vadd.f32 %v11575_v59, %v11574_v19  ;;  %v12718_v36 = vld [vmem:[#allocation5 + $0x2d4] ss:$36 sps:$4 sm:$0xff]  }
 0x2d1   : > { %5710 = vst [vmem:[#allocation5 + $0x3dc] sm:$0xf] %v14211_v58  ;;  %6284 = vst [vmem:[#allocation5 + $0x37c] sm:$0xf] %v14207_v2  ;;  %v12721_v2 = vld [vmem:[#allocation5 + $0x294] ss:$36 sps:$4 sm:$0xff]   ;;  %8061 = vmatmul.mubr.bf16.gmra.mxu1 %v12707_v29 }
 0x2d2   : > { %6285 = vst [vmem:[#allocation5 + $0x3a0] sm:$0xf] %v14211_v58  ;;  %5901 = vst [vmem:[#allocation5 + $0x3bc] sm:$0xf] %v14239_v4  ;;  %v5723_v58 = vld [vmem:[#allocation3 + $0x7a] sm:$0xff]  ;;  %8068 = vmatprep.mubr.bf16.mxu1 %v12718_v36  ;;  %v5552_v27 = vld [vmem:[#allocation3 + $0x171] sm:$0xff] }
 0x2d3   : > { %5902 = vst [vmem:[#allocation5 + $0x3e0] sm:$0xf] %v14241_v49  ;;  %6092 = vst [vmem:[#allocation5 + $0x378] sm:$0xf] %v14200_v33  ;;  %v12710_v33 = vld [vmem:[#allocation5 + $0x248] ss:$36 sps:$4 sm:$0xff]   ;;  %v10954_v59 = vpack.c.bf16 %v5552_v27, %v5552_v27 }
 0x2d4   : > { %6093 = vst [vmem:[#allocation5 + $0x39c] sm:$0xf] %v14236_v24  ;;  %6476 = vst [vmem:[#allocation5 + $0x380] sm:$0xf] %v14239_v4  ;;  %v5915_v56 = vld [vmem:[#allocation3 + $0x80] sm:$0xff]  ;;  %v5743_v19 = vld [vmem:[#allocation3 + $0x16a] sm:$0xff] }
 0x2d5   : > { %6477 = vst [vmem:[#allocation5 + $0x3a4] sm:$0xf] %v14241_v49  ;;  %5711 = vst [vmem:[#allocation5 + $0x400] sm:$0xf] %v14219_v23  ;;  %v10996_v4 = vpack.c.bf16 %v5915_v56, %v5915_v56  ;;  %v12716_v49 = vld [vmem:[#allocation5 + $0x2d0] ss:$36 sps:$4 sm:$0xff]   ;;  %v10985_v36 = vpack.c.bf16 %v5743_v19, %v5743_v19 }
 0x2d6   : > { %6094 = vst [vmem:[#allocation5 + $0x3c0] sm:$0xf] %v14261_v10  ;;  %6286 = vst [vmem:[#allocation5 + $0x3c4] sm:$0xf] %v14219_v23  ;;  %v10965_v23 = vpack.c.bf16 %v5723_v58, %v5723_v58  ;;  %8214 = vmatmul.mubr.bf16.gmra.mxu0 %v12710_v33  ;;  %v5540_v10 = vld [vmem:[#allocation3 + $0xe1] sm:$0xff]  ;;  %v5744_v29 = vld [vmem:[#allocation3 + $0x172] sm:$0xff] }
 0x2d7   : > { %6452 = vst [vmem:[#allocation5 + $0x20] sm:$0xf] %v14243_v53  ;;  %6453 = vst [vmem:[#allocation5 + $0x44] sm:$0xf] %v14245_v42  ;;  %8221 = vmatprep.mubr.bf16.mxu0 %v12721_v2  ;;  %v5536_v53 = vld [vmem:[#allocation3 + $0xb1] sm:$0xff]  ;;  %v10942_v41 = vpack.c.bf16 %v5540_v10, %v5540_v10  ;;  %v10986_v2 = vpack.c.bf16 %v5744_v29, %v5744_v29  ;;  %v5554_v58 = vld [vmem:[#allocation3 + $0x189] sm:$0xff] }
 0x2d8   : > { %6456 = vst [vmem:[#allocation5 + $0xb0] sm:$0xf] %v14257_v16  ;;  %6457 = vst [vmem:[#allocation5 + $0xd4] sm:$0xf] %v14259_v30  ;;  %v10938_v42 = vpack.c.bf16 %v5536_v53, %v5536_v53  ;;  %v5727_v16 = vld [vmem:[#allocation3 + $0xaa] sm:$0xff]  ;;  %v5728_v30 = vld [vmem:[#allocation3 + $0xb2] sm:$0xff] }
 0x2d9   : > { %6460 = vst [vmem:[#allocation5 + $0x140] sm:$0xf] %v11061_v6  ;;  %6461 = vst [vmem:[#allocation5 + $0x164] sm:$0xf] %v11062_v51  ;;  %v10969_v31 = vpack.c.bf16 %v5727_v16, %v5727_v16  ;;  %v10970_v22 = vpack.c.bf16 %v5728_v30, %v5728_v30  ;;  %8069 = vmatmul.mubr.bf16.gmra.mxu1 %v12716_v49  ;;  %v5931_v6 = vld [vmem:[#allocation3 + $0x140] sm:$0xff]  ;;  %v10982_v51 = vpack.c.bf16 %v5740_v39, %v5740_v39  ;;  %v5935_v33 = vld [vmem:[#allocation3 + $0x170] sm:$0xff] }
 0x2da   : > { %6464 = vst [vmem:[#allocation5 + $0x1d0] sm:$0xf] %v11065_v20  ;;  %6465 = vst [vmem:[#allocation5 + $0x1f4] sm:$0xf] %v14088_v28  ;;  %v5532_v28 = vld [vmem:[#allocation3 + $0x81] sm:$0xff]  ;;  %8076 = vmatprep.mubr.bf16.mxu1 %v12725_v40  ;;  %v11012_v57 = vpack.c.bf16 %v5931_v6, %v5931_v6  ;;  %v12862_v29 = vld [vmem:[#allocation12 + $0x8] sm:$0xff]  }
 0x2db   : > { %6468 = vst [vmem:[#allocation5 + $0x260] sm:$0xf] %v14135_v7  ;;  %6469 = vst [vmem:[#allocation5 + $0x284] sm:$0xf] %v14137_v62  ;;  %v10934_v7 = vpack.c.bf16 %v5532_v28, %v5532_v28  ;;  %v5724_v62 = vld [vmem:[#allocation3 + $0x82] sm:$0xff]  ;;  %v11016_v28 = vpack.c.bf16 %v5935_v33, %v5935_v33 }
 0x2dc   : > { %v10966_v24 = vpack.c.bf16 %v5724_v62, %v5724_v62  ;;  %5883 = vst [vmem:[#allocation5 + $0x134] sm:$0xf] %v10965_v23  ;;  %6075 = vst [vmem:[#allocation5 + $0x114] sm:$0xf] %v10996_v4  ;;  %v12739_v20 = vld [vmem:[#allocation5 + $0x3a8] ss:$36 sps:$4 sm:$0xff]  }
 0x2dd   : > { %5692 = vst [vmem:[#allocation5 + $0x154] sm:$0xf] %v10934_v7  ;;  %6267 = vst [vmem:[#allocation5 + $0x118] sm:$0xf] %v10934_v7  ;;  %v12750_v1 = vld [vmem:[#allocation5 + $0x3f4] ss:$36 sps:$4 sm:$0xff]  }
 0x2de   : > { %5884 = vst [vmem:[#allocation5 + $0x158] sm:$0xf] %v10966_v24  ;;  %5696 = vst [vmem:[#allocation5 + $0x1e4] sm:$0xf] %v10938_v42  ;;  %8222 = vmatmul.mubr.bf16.gmra.mxu0 %v12719_v21  ;;  %v12742_v25 = vld [vmem:[#allocation5 + $0x368] ss:$36 sps:$4 sm:$0xff]   ;;  %v10956_v24 = vpack.c.bf16 %v5554_v58, %v5554_v58 }
 0x2df   : > { %6271 = vst [vmem:[#allocation5 + $0x1a8] sm:$0xf] %v10938_v42  ;;  %5887 = vst [vmem:[#allocation5 + $0x1c4] sm:$0xf] %v10969_v31  ;;  %8229 = vmatprep.mubr.bf16.mxu0 %v12728_v32  ;;  %v12753_v14 = vld [vmem:[#allocation5 + $0x3b4] ss:$36 sps:$4 sm:$0xff]  }
 0x2e0   : > { %5888 = vst [vmem:[#allocation5 + $0x1e8] sm:$0xf] %v10970_v22  ;;  %6079 = vst [vmem:[#allocation5 + $0x1a4] sm:$0xf] %v11000_v50  ;;  %v5553_v7 = vld [vmem:[#allocation3 + $0x181] sm:$0xff]  ;;  %v5746_v23 = vld [vmem:[#allocation3 + $0x18a] sm:$0xff] }
 0x2e1   : > { %5700 = vst [vmem:[#allocation5 + $0x274] sm:$0xf] %v10942_v41  ;;  %6275 = vst [vmem:[#allocation5 + $0x238] sm:$0xf] %v10942_v41  ;;  %8077 = vmatmul.mubr.bf16.gmra.mxu1 %v12723_v44  ;;  %v10955_v62 = vpack.c.bf16 %v5553_v7, %v5553_v7  ;;  %v5745_v56 = vld [vmem:[#allocation3 + $0x182] sm:$0xff]  ;;  %v10988_v49 = vpack.c.bf16 %v5746_v23, %v5746_v23  ;;  %v12805_v44 = vld [vmem:[#allocation11 + $0x228] sm:$0xff]  }
 0x2e2   : > { %5891 = vst [vmem:[#allocation5 + $0x254] sm:$0xf] %v10973_v38  ;;  %5892 = vst [vmem:[#allocation5 + $0x278] sm:$0xf] %v10974_v13  ;;  %8084 = vmatprep.mubr.bf16.mxu1 %v12734_v46  ;;  %v10987_v4 = vpack.c.bf16 %v5745_v56, %v5745_v56  ;;  %v12748_v53 = vld [vmem:[#allocation5 + $0x3f0] ss:$36 sps:$4 sm:$0xff]  }
 0x2e3   : > { %6083 = vst [vmem:[#allocation5 + $0x234] sm:$0xf] %v11004_v11  ;;  %5704 = vst [vmem:[#allocation5 + $0x304] sm:$0xf] %v10946_v26  ;;  %v12757_v42 = vld [vmem:[#allocation5 + $0x43c] ss:$36 sps:$4 sm:$0xff]  }
 0x2e4   : > { %5895 = vst [vmem:[#allocation5 + $0x2e4] sm:$0xf] %v10977_v45  ;;  %6279 = vst [vmem:[#allocation5 + $0x2c8] sm:$0xf] %v10946_v26  ;;  %v5936_v16 = vld [vmem:[#allocation3 + $0x180] sm:$0xff]  ;;  %v5937_v30 = vld [vmem:[#allocation3 + $0x188] sm:$0xff] }
 0x2e5   : > { %5896 = vst [vmem:[#allocation5 + $0x308] sm:$0xf] %v10978_v15  ;;  %6087 = vst [vmem:[#allocation5 + $0x2c4] sm:$0xf] %v11008_v63  ;;  %v12751_v9 = vld [vmem:[#allocation5 + $0x3b0] ss:$36 sps:$4 sm:$0xff]   ;;  %v11017_v31 = vpack.c.bf16 %v5936_v16, %v5936_v16  ;;  %v11018_v22 = vpack.c.bf16 %v5937_v30, %v5937_v30 }
 0x2e6   : > { %8230 = vmatmul.mubr.bf16.gmra.mxu0 %v12726_v17  ;;  %5708 = vst [vmem:[#allocation5 + $0x394] sm:$0xf] %v10950_v60  ;;  %6283 = vst [vmem:[#allocation5 + $0x358] sm:$0xf] %v10950_v60  ;;  %v12760_v50 = vld [vmem:[#allocation5 + $0x3fc] ss:$36 sps:$4 sm:$0xff]  }
 0x2e7   : > { %8237 = vmatprep.mubr.bf16.mxu0 %v12737_v55  ;;  %5899 = vst [vmem:[#allocation5 + $0x374] sm:$0xf] %v10981_v37  ;;  %5900 = vst [vmem:[#allocation5 + $0x398] sm:$0xf] %v10982_v51  ;;  %v12755_v40 = vld [vmem:[#allocation5 + $0x438] ss:$36 sps:$4 sm:$0xff]  }
 0x2e8   : > { %6091 = vst [vmem:[#allocation5 + $0x354] sm:$0xf] %v11012_v57  ;;  %5712 = vst [vmem:[#allocation5 + $0x424] sm:$0xf] %v10954_v59  ;;  %v12769_v21 = vld [vmem:[#allocation5 + $0x14] ss:$36 sps:$4 sm:$0xff]  }
 0x2e9   : > { %8085 = vmatmul.mubr.bf16.gmra.mxu1 %v12732_v8  ;;  %5903 = vst [vmem:[#allocation5 + $0x404] sm:$0xf] %v10985_v36  ;;  %6287 = vst [vmem:[#allocation5 + $0x3e8] sm:$0xf] %v10954_v59  ;;  %v12758_v32 = vld [vmem:[#allocation5 + $0x3f8] ss:$36 sps:$4 sm:$0xff]  }
 0x2ea   : > { %8092 = vmatprep.mubr.bf16.mxu1 %v12741_v61  ;;  %5904 = vst [vmem:[#allocation5 + $0x428] sm:$0xf] %v10986_v2  ;;  %6095 = vst [vmem:[#allocation5 + $0x3e4] sm:$0xf] %v11016_v28  ;;  %v12766_v10 = vld [vmem:[#allocation5 + $0x444] ss:$36 sps:$4 sm:$0xff]  }
 0x2eb   : > { %5713 = vst [vmem:[#allocation5 + $0x448] sm:$0xf] %v10955_v62  ;;  %6288 = vst [vmem:[#allocation5 + $0x40c] sm:$0xf] %v10955_v62  ;;  %v12767_v41 = vld [vmem:[#allocation5 + $0x10] ss:$36 sps:$4 sm:$0xff]  }
 0x2ec   : > { %5714 = vst [vmem:[#allocation5 + $0x46c] sm:$0xf] %v10956_v24  ;;  %5905 = vst [vmem:[#allocation5 + $0x44c] sm:$0xf] %v10987_v4  ;;  %v12773_v0 = vld [vmem:[#allocation5 + $0x5c] ss:$36 sps:$4 sm:$0xff]  }
 0x2ed   : > { %5906 = vst [vmem:[#allocation5 + $0x470] sm:$0xf] %v10988_v49  ;;  %6289 = vst [vmem:[#allocation5 + $0x430] sm:$0xf] %v10956_v24  ;;  %v12764_v38 = vld [vmem:[#allocation5 + $0x440] ss:$36 sps:$4 sm:$0xff]  }
 0x2ee   : > { %8238 = vmatmul.mubr.bf16.gmra.mxu0 %v12735_v34  ;;  %6480 = vst [vmem:[#allocation5 + $0x410] sm:$0xf] %v10987_v4  ;;  %6481 = vst [vmem:[#allocation5 + $0x434] sm:$0xf] %v10988_v49  ;;  %v12776_v13 = vld [vmem:[#allocation5 + $0x1c] ss:$36 sps:$4 sm:$0xff]  }
 0x2ef   : > { %8245 = vmatprep.mubr.bf16.mxu0 %v12744_v35  ;;  %6096 = vst [vmem:[#allocation5 + $0x408] sm:$0xf] %v11017_v31  ;;  %6097 = vst [vmem:[#allocation5 + $0x42c] sm:$0xf] %v11018_v22  ;;  %v5938_v11 = vld [vmem:[#allocation3 + $0x198] sm:$0xff]  ;;  %v12792_v8 = vld [vmem:[#allocation12 + $0x30] sm:$0xff]  }
 0x2f0   : > { %v12951_v46 = vld [vmem:[#allocation2 + $0x8] sm:$0xff]  ;;  %v11019_v3 = vpack.c.bf16 %v5938_v11, %v5938_v11  ;;  %v12771_v45 = vld [vmem:[#allocation5 + $0x58] ss:$36 sps:$4 sm:$0xff]   ;;  %6291 = vst [vmem:[#allocation5 + $0x478] sm:$0xf] %v11052_v18  ;;  %v12847_v5 = vld [vmem:[#allocation11 + $0x210] sm:$0xff]  }
 0x2f1   : > { %8093 = vmatmul.mubr.bf16.gmra.mxu1 %v12739_v20  ;;  %v11020_v17 = vpack.c.bf16 %v12951_v46, %v12951_v46  ;;  %v6130_v55 = vld [vmem:[#allocation3 + $0x199] sm:$0xff]  ;;  %v12774_v63 = vld [vmem:[#allocation5 + $0x18] ss:$36 sps:$4 sm:$0xff]   ;;  %v12779_v60 = vld [vmem:[#allocation5 + $0xa0] ss:$36 sps:$4 sm:$0xff]  }
 0x2f2   : > { %8100 = vmatprep.mubr.bf16.mxu1 %v12750_v1  ;;  %v11051_v26 = vpack.c.bf16 %v6130_v55, %v6130_v55  ;;  %6098 = vst [vmem:[#allocation5 + $0x450] sm:$0xf] %v11019_v3  ;;  %v12781_v15 = vld [vmem:[#allocation5 + $0xa4] ss:$36 sps:$4 sm:$0xff]   ;;  %v12833_v34 = vld [vmem:[#allocation11 + $0x218] sm:$0xff]   ;;  %v12848_v19 = vld [vmem:[#allocation12 + $0x10] sm:$0xff]  }
 0x2f3   : > { %6099 = vst [vmem:[#allocation5 + $0x474] sm:$0xf] %v11020_v17  ;;  %v12784_v61 = vld [vmem:[#allocation5 + $0x64] ss:$36 sps:$4 sm:$0xff]   ;;  %v12952_v35 = vld [vmem:[#allocation12 + $0x38] sm:$0xff]  }
 0x2f4   : > { %6290 = vst [vmem:[#allocation5 + $0x454] sm:$0xf] %v11051_v26  ;;  %v12787_v39 = vld [vmem:[#allocation5 + $0xec] ss:$36 sps:$4 sm:$0xff]   ;;  %v12782_v6 = vld [vmem:[#allocation5 + $0x60] ss:$36 sps:$4 sm:$0xff]  }
 0x2f5   : > { %v12820_v37 = vld [vmem:[#allocation12 + $0x20] sm:$0xff]   ;;  %v12790_v51 = vld [vmem:[#allocation5 + $0xac] ss:$36 sps:$4 sm:$0xff]   ;;  %v12834_v20 = vld [vmem:[#allocation12 + $0x18] sm:$0xff]  }
 0x2f6   : > { %8246 = vmatmul.mubr.bf16.gmra.mxu0 %v12742_v25  ;;  %v12861_v57 = vld [vmem:[#allocation11 + $0x208] sm:$0xff]   ;;  %v12875_v25 = vld [vmem:[#allocation11 + $0x200] sm:$0xff]   ;;  %v12798_v59 = vld [vmem:[#allocation5 + $0xf4] ss:$36 sps:$4 sm:$0xff]  }
 0x2f7   : > { %8253 = vmatprep.mubr.bf16.mxu0 %v12753_v14  ;;  %v12785_v1 = vld [vmem:[#allocation5 + $0xe8] ss:$36 sps:$4 sm:$0xff]   ;;  %v12795_v14 = vld [vmem:[#allocation5 + $0x134] ss:$36 sps:$4 sm:$0xff]   ;;  %v12801_v33 = vld [vmem:[#allocation5 + $0x17c] ss:$36 sps:$4 sm:$0xff]  }
 0x2f8   : > { %v12788_v27 = vld [vmem:[#allocation5 + $0xa8] ss:$36 sps:$4 sm:$0xff]   ;;  %v12793_v36 = vld [vmem:[#allocation5 + $0x130] ss:$36 sps:$4 sm:$0xff]   ;;  %v12876_v28 = vld [vmem:[#allocation12] sm:$0xff]  }
 0x2f9   : > { %8101 = vmatmul.mubr.bf16.gmra.mxu1 %v12748_v53  ;;  %v12796_v2 = vld [vmem:[#allocation5 + $0xf0] ss:$36 sps:$4 sm:$0xff]   ;;  %v12804_v7 = vld [vmem:[#allocation5 + $0x13c] ss:$36 sps:$4 sm:$0xff]   ;;  %v12809_v62 = vld [vmem:[#allocation5 + $0x1c4] ss:$36 sps:$4 sm:$0xff]  }
 0x2fa   : > { %8108 = vmatprep.mubr.bf16.mxu1 %v12757_v42  ;;  %v12799_v58 = vld [vmem:[#allocation5 + $0x178] ss:$36 sps:$4 sm:$0xff]   ;;  %v12812_v23 = vld [vmem:[#allocation5 + $0x184] ss:$36 sps:$4 sm:$0xff]   ;;  %v12815_v4 = vld [vmem:[#allocation5 + $0x20c] ss:$36 sps:$4 sm:$0xff]  }
 0x2fb   : > { %v12802_v56 = vld [vmem:[#allocation5 + $0x138] ss:$36 sps:$4 sm:$0xff]   ;;  %v12807_v24 = vld [vmem:[#allocation5 + $0x1c0] ss:$36 sps:$4 sm:$0xff]   ;;  %v12818_v53 = vld [vmem:[#allocation5 + $0x1cc] ss:$36 sps:$4 sm:$0xff]  }
 0x2fc   : > { %v12810_v49 = vld [vmem:[#allocation5 + $0x180] ss:$36 sps:$4 sm:$0xff]   ;;  %v12813_v42 = vld [vmem:[#allocation5 + $0x208] ss:$36 sps:$4 sm:$0xff]   ;;  %v12823_v16 = vld [vmem:[#allocation5 + $0x254] ss:$36 sps:$4 sm:$0xff]  }
 0x2fd   : > { %v12816_v30 = vld [vmem:[#allocation5 + $0x1c8] ss:$36 sps:$4 sm:$0xff]   ;;  %v6323_v22 = vld [vmem:[#allocation3 + $0x1a2] sm:$0xff]  ;;  %v12835_v18 = vld [vmem:[#allocation5 + $0x2e0] ss:$36 sps:$4 sm:$0xff]  }
 0x2fe   : > { %8254 = vmatmul.mubr.bf16.gmra.mxu0 %v12751_v9  ;;  %v12826_v9 = vld [vmem:[#allocation5 + $0x214] ss:$36 sps:$4 sm:$0xff]   ;;  %v6322_v31 = vld [vmem:[#allocation3 + $0x19a] sm:$0xff] }
 0x2ff   : > { %8261 = vmatprep.mubr.bf16.mxu0 %v12760_v50  ;;  %v11083_v50 = vpack.c.bf16 %v6322_v31, %v6322_v31  ;;  %v12840_v11 = vld [vmem:[#allocation5 + $0x2a4] ss:$36 sps:$4 sm:$0xff]   ;;  %v12852_v31 = vld [vmem:[#allocation5 + $0x330] ss:$36 sps:$4 sm:$0xff]  }
 0x301   : > { %8109 = vmatmul.mubr.bf16.gmra.mxu1 %v12755_v40  ;;  %v11084_v40 = vpack.c.bf16 %v6323_v22, %v6323_v22  ;;  %6482 = vst [vmem:[#allocation5 + $0x458] sm:$0xf] %v11083_v50 }
 0x302   : > { %8310 = vmatprep.mubr.bf16.mxu1 %v12769_v21  ;;  %v12821_v21 = vld [vmem:[#allocation5 + $0x250] ss:$36 sps:$4 sm:$0xff]  }
 0x303   : > { %6483 = vst [vmem:[#allocation5 + $0x47c] sm:$0xf] %v11084_v40 }
 0x306   : > { %8262 = vmatmul.mubr.bf16.gmra.mxu0 %v12758_v32  ;;  %v12829_v32 = vld [vmem:[#allocation5 + $0x29c] ss:$36 sps:$4 sm:$0xff]  }
 0x307   : > { %8269 = vmatprep.mubr.bf16.mxu0 %v12766_v10  ;;  %v12824_v10 = vld [vmem:[#allocation5 + $0x210] ss:$36 sps:$4 sm:$0xff]  }
 0x309   : > { %8311 = vmatmul.mubr.bf16.vlgmr.msra.gmra.mxu1 %v12767_v41  ;;  %v11577_v41 = vpop.f32.mrf.mxu1 }
 0x30a   : > { %8318 = vmatprep.mubr.bf16.mxu1 %v12773_v0  ;;  %12103 = vmatpush3.bf16.msra.mxu1 %v12950_v12  ;;  %v12830_v12 = vld [vmem:[#allocation5 + $0x258] ss:$36 sps:$4 sm:$0xff]  }
 0x30b   : > { %12104 = vmatprep.subr.bf16.mxu1 %v12791_v52  ;;  %v11578_v0 = vpop.f32.mrf.mxu1 }
 0x30e   : > { %8270 = vmatmul.mubr.bf16.gmra.mxu0 %v12764_v38  ;;  %12105 = vmatpush3.bf16.msra.mxu1 %v12791_v52  ;;  %v12832_v52 = vld [vmem:[#allocation5 + $0x25c] ss:$36 sps:$4 sm:$0xff]  }
 0x30f   : > { %8471 = vmatprep.mubr.bf16.mxu0 %v12776_v13  ;;  %12106 = vmatprep.subr.bf16.mxu1 %v12805_v44  ;;  %v12827_v38 = vld [vmem:[#allocation5 + $0x298] ss:$36 sps:$4 sm:$0xff]   ;;  %v12837_v13 = vld [vmem:[#allocation5 + $0x2e4] ss:$36 sps:$4 sm:$0xff]  }
 0x311   : > { %8319 = vmatmul.mubr.bf16.gmra.mxu1 %v12771_v45 }
 0x312   : > { %8326 = vmatprep.mubr.bf16.mxu1 %v12781_v15  ;;  %12107 = vmatpush3.bf16.msra.mxu1 %v12805_v44 }
 0x313   : > { %12108 = vmatprep.subr.bf16.mxu1 %v12819_v43 }
 0x316   : > { %8472 = vmatmul.mubr.bf16.vlgmr.msra.gmra.mxu0 %v12774_v63  ;;  %12109 = vmatpush3.bf16.msra.mxu1 %v12819_v43 }
 0x317   : > { %8479 = vmatprep.mubr.bf16.mxu0 %v12784_v61  ;;  %12151 = vmatpush3.bf16.msra.mxu0 %v12952_v35  ;;  %v12838_v61 = vld [vmem:[#allocation5 + $0x2a0] ss:$36 sps:$4 sm:$0xff]  }
 0x318   : > { %12152 = vmatprep.subr.bf16.mxu0 %v12792_v8  ;;  %12110 = vmatprep.subr.bf16.mxu1 %v12833_v34 }
 0x319   : > { %8327 = vmatmul.mubr.bf16.gmra.mxu1 %v12779_v60 }
 0x31a   : > { %8334 = vmatprep.mubr.bf16.mxu1 %v12787_v39  ;;  %12111 = vmatpush3.bf16.msra.mxu1 %v12833_v34 }
 0x31b   : > { %12153 = vmatpush3.bf16.msra.mxu0 %v12792_v8  ;;  %12112 = vmatprep.subr.bf16.mxu1 %v12847_v5  ;;  %v12843_v8 = vld [vmem:[#allocation5 + $0x32c] ss:$36 sps:$4 sm:$0xff]  }
 0x31c   : > { %12154 = vmatprep.subr.bf16.mxu0 %v12806_v47 }
 0x31e   : > { %8480 = vmatmul.mubr.bf16.gmra.mxu0 %v12782_v6  ;;  %12113 = vmatpush3.bf16.msra.mxu1 %v12847_v5  ;;  %v12846_v5 = vld [vmem:[#allocation5 + $0x2ec] ss:$36 sps:$4 sm:$0xff]  }
 0x31f   : > { %8487 = vmatprep.mubr.bf16.mxu0 %v12790_v51  ;;  %12155 = vmatpush3.bf16.msra.mxu0 %v12806_v47  ;;  %v11579_v47 = vadd.f32 %v11578_v0, %v11577_v41 }
 0x320   : > { %12156 = vmatprep.subr.bf16.mxu0 %v12820_v37  ;;  %12114 = vmatprep.subr.bf16.mxu1 %v12861_v57 }
 0x321   : > { %8335 = vmatmul.mubr.bf16.gmra.mxu1 %v12785_v1  ;;  %v12841_v1 = vld [vmem:[#allocation5 + $0x328] ss:$36 sps:$4 sm:$0xff]  }
 0x322   : > { %8342 = vmatprep.mubr.bf16.mxu1 %v12795_v14  ;;  %12115 = vmatpush3.bf16.msra.mxu1 %v12861_v57 }
 0x323   : > { %12157 = vmatpush3.bf16.msra.mxu0 %v12820_v37  ;;  %12116 = vmatprep.subr.bf16.mxu1 %v12875_v25 }
 0x324   : > { %12158 = vmatprep.subr.bf16.mxu0 %v12834_v20 }
 0x326   : > { %8488 = vmatmul.mubr.bf16.gmra.mxu0 %v12788_v27  ;;  %12117 = vmatpush3.bf16.msra.mxu1 %v12875_v25 }
 0x327   : > { %8495 = vmatprep.mubr.bf16.mxu0 %v12798_v59  ;;  %12159 = vmatpush3.bf16.msra.mxu0 %v12834_v20  ;;  %v12851_v59 = vld [vmem:[#allocation5 + $0x374] ss:$36 sps:$4 sm:$0xff]  }
 0x328   : > { %12160 = vmatprep.subr.bf16.mxu0 %v12848_v19 }
 0x329   : > { %8343 = vmatmul.mubr.bf16.gmra.mxu1 %v12793_v36 }
 0x32a   : > { %8350 = vmatprep.mubr.bf16.mxu1 %v12801_v33 }
 0x32b   : > { %12161 = vmatpush3.bf16.msra.mxu0 %v12848_v19 }
 0x32c   : > { %12162 = vmatprep.subr.bf16.mxu0 %v12862_v29  ;;  %v11580_v44 = vpop.f32.mrf.mxu1 }
 0x32e   : > { %8496 = vmatmul.mubr.bf16.gmra.mxu0 %v12796_v2  ;;  %v11581_v17 = vpop.f32.mrf.mxu1 }
 0x32f   : > { %8503 = vmatprep.mubr.bf16.mxu0 %v12804_v7  ;;  %12163 = vmatpush3.bf16.msra.mxu0 %v12862_v29  ;;  %v11582_v55 = vadd.f32 %v11581_v17, %v11580_v44  ;;  %v12844_v29 = vld [vmem:[#allocation5 + $0x2e8] ss:$36 sps:$4 sm:$0xff]  }
 0x330   : > { %12164 = vmatprep.subr.bf16.mxu0 %v12876_v28  ;;  %v11686_v46 = vpop.f32.mrf.mxu0  ;;  %v11583_v3 = vpop.f32.mrf.mxu1 }
 0x331   : > { %8351 = vmatmul.mubr.bf16.gmra.mxu1 %v12799_v58 }
 0x332   : > { %8358 = vmatprep.mubr.bf16.mxu1 %v12809_v62  ;;  %v11687_v54 = vpop.f32.mrf.mxu0  ;;  %v11584_v43 = vpop.f32.mrf.mxu1 }
 0x333   : > { %12165 = vmatpush3.bf16.msra.mxu0 %v12876_v28  ;;  %v11688_v26 = vadd.f32 %v11687_v54, %v11686_v46  ;;  %v11585_v63 = vadd.f32 %v11584_v43, %v11583_v3  ;;  %v12854_v28 = vld [vmem:[#allocation5 + $0x334] ss:$36 sps:$4 sm:$0xff]  }
 0x334   : > { %v11689_v45 = vpop.f32.mrf.mxu0  ;;  %v12858_v54 = vld [vmem:[#allocation5 + $0x378] ss:$36 sps:$4 sm:$0xff]  }
 0x335   : > { %v14328_v15 = vadd.f32 %v11688_v26, %v14325_v48 }
 0x336   : > { %8504 = vmatmul.mubr.bf16.gmra.mxu0 %v12802_v56  ;;  %v11690_v34 = vpop.f32.mrf.mxu0 }
 0x337   : > { %8511 = vmatprep.mubr.bf16.mxu0 %v12812_v23  ;;  %v11691_v60 = vadd.f32 %v11690_v34, %v11689_v45  ;;  %v12868_v45 = vld [vmem:[#allocation5 + $0x3c4] ss:$36 sps:$4 sm:$0xff]  }
 0x338   : > { %v11586_v35 = vpop.f32.mrf.mxu1 }
 0x339   : > { %8359 = vmatmul.mubr.bf16.gmra.mxu1 %v12807_v24  ;;  %v14330_v37 = vadd.f32 %v11691_v60, %v11579_v47  ;;  %v12863_v60 = vld [vmem:[#allocation5 + $0x400] ss:$36 sps:$4 sm:$0xff]  }
 0x33a   : > { %8366 = vmatprep.mubr.bf16.mxu1 %v12815_v4  ;;  %v11587_v6 = vpop.f32.mrf.mxu1 }
 0x33b   : > { %v11692_v39 = vpop.f32.mrf.mxu0  ;;  %v11588_v51 = vadd.f32 %v11587_v6, %v11586_v35 }
 0x33c   : > { %v11589_v48 = vpop.f32.mrf.mxu1 }
 0x33d   : > { %v11693_v57 = vpop.f32.mrf.mxu0 }
 0x33e   : > { %8512 = vmatmul.mubr.bf16.gmra.mxu0 %v12810_v49  ;;  %v11694_v20 = vadd.f32 %v11693_v57, %v11692_v39  ;;  %v11590_v14 = vpop.f32.mrf.mxu1  ;;  %v12849_v49 = vld [vmem:[#allocation5 + $0x370] ss:$36 sps:$4 sm:$0xff]  }
 0x33f   : > { %8519 = vmatprep.mubr.bf16.mxu0 %v12818_v53  ;;  %v11695_v25 = vpop.f32.mrf.mxu0  ;;  %v11591_v19 = vadd.f32 %v11590_v14, %v11589_v48  ;;  %v12871_v57 = vld [vmem:[#allocation5 + $0x44c] ss:$36 sps:$4 sm:$0xff]   ;;  %v12866_v48 = vld [vmem:[#allocation5 + $0x3c0] ss:$36 sps:$4 sm:$0xff]  }
 0x340   : > { %v14332_v27 = vadd.f32 %v11694_v20, %v11582_v55  ;;  %v12865_v55 = vld [vmem:[#allocation5 + $0x404] ss:$36 sps:$4 sm:$0xff]   ;;  %v12874_v14 = vld [vmem:[#allocation5 + $0x40c] ss:$36 sps:$4 sm:$0xff]  }
 0x341   : > { %8367 = vmatmul.mubr.bf16.gmra.mxu1 %v12813_v42  ;;  %v11696_v36 = vpop.f32.mrf.mxu0  ;;  %v11592_v33 = vpop.f32.mrf.mxu1 }
 0x342   : > { %8374 = vmatprep.mubr.bf16.mxu1 %v12823_v16  ;;  %v11697_v2 = vadd.f32 %v11696_v36, %v11695_v25 }
 0x343   : > { %v11593_v58 = vpop.f32.mrf.mxu1 }
 0x344   : > { %v14334_v62 = vadd.f32 %v11697_v2, %v11585_v63  ;;  %v11594_v56 = vadd.f32 %v11593_v58, %v11592_v33 }
 0x345   : > { %v11595_v24 = vpop.f32.mrf.mxu1 }
 0x346   : > { %8520 = vmatmul.mubr.bf16.gmra.mxu0 %v12816_v30  ;;  %v11698_v7 = vpop.f32.mrf.mxu0 }
 0x347   : > { %8527 = vmatprep.mubr.bf16.mxu0 %v12826_v9  ;;  %v11596_v42 = vpop.f32.mrf.mxu1  ;;  %v12857_v9 = vld [vmem:[#allocation5 + $0x3bc] ss:$36 sps:$4 sm:$0xff]  }
 0x348   : > { %v11699_v23 = vpop.f32.mrf.mxu0  ;;  %v11597_v30 = vadd.f32 %v11596_v42, %v11595_v24 }
 0x349   : > { %8375 = vmatmul.mubr.bf16.gmra.mxu1 %v12821_v21  ;;  %v11700_v4 = vadd.f32 %v11699_v23, %v11698_v7  ;;  %v12860_v21 = vld [vmem:[#allocation5 + $0x37c] ss:$36 sps:$4 sm:$0xff]   ;;  %v12869_v7 = vld [vmem:[#allocation5 + $0x448] ss:$36 sps:$4 sm:$0xff]  }
 0x34a   : > { %8382 = vmatprep.mubr.bf16.mxu1 %v12829_v32  ;;  %v11701_v53 = vpop.f32.mrf.mxu0 }
 0x34b   : > { %v14336_v16 = vadd.f32 %v11700_v4, %v11588_v51  ;;  %v12877_v4 = vld [vmem:[#allocation5 + $0x20] ss:$36 sps:$4 sm:$0xff]  }
 0x34c   : > { %v11702_v22 = vpop.f32.mrf.mxu0 }
 0x34d   : > { %v11703_v40 = vadd.f32 %v11702_v22, %v11701_v53  ;;  %v12872_v53 = vld [vmem:[#allocation5 + $0x408] ss:$36 sps:$4 sm:$0xff]  }
 0x34e   : > { %8528 = vmatmul.mubr.bf16.gmra.mxu0 %v12824_v10 }
 0x34f   : > { %8535 = vmatprep.mubr.bf16.mxu0 %v12832_v52  ;;  %v11598_v50 = vpop.f32.mrf.mxu1  ;;  %v14338_v41 = vadd.f32 %v11703_v40, %v11591_v19 }
 0x351   : > { %8383 = vmatmul.mubr.bf16.gmra.mxu1 %v12827_v38  ;;  %v11599_v10 = vpop.f32.mrf.mxu1 }
 0x352   : > { %8390 = vmatprep.mubr.bf16.mxu1 %v12837_v13  ;;  %v11704_v32 = vpop.f32.mrf.mxu0  ;;  %v11600_v52 = vadd.f32 %v11599_v10, %v11598_v50 }
 0x353   : > { %v11601_v38 = vpop.f32.mrf.mxu1 }
 0x354   : > { %v11705_v0 = vpop.f32.mrf.mxu0 }
 0x355   : > { %v11706_v13 = vadd.f32 %v11705_v0, %v11704_v32 }
 0x356   : > { %8536 = vmatmul.mubr.bf16.gmra.mxu0 %v12830_v12  ;;  %v12855_v12 = vld [vmem:[#allocation5 + $0x3b8] ss:$36 sps:$4 sm:$0xff]   ;;  %v11707_v44 = vpop.f32.mrf.mxu0 }
 0x357   : > { %8543 = vmatprep.mubr.bf16.mxu0 %v12840_v11  ;;  %v11602_v11 = vpop.f32.mrf.mxu1  ;;  %v14340_v46 = vadd.f32 %v11706_v13, %v11594_v56  ;;  %v12881_v13 = vld [vmem:[#allocation5 + $0x68] ss:$36 sps:$4 sm:$0xff]  }
 0x358   : > { %v11603_v17 = vadd.f32 %v11602_v11, %v11601_v38  ;;  %v11708_v3 = vpop.f32.mrf.mxu0  ;;  %v12878_v38 = vld [vmem:[#allocation5 + $0x450] ss:$36 sps:$4 sm:$0xff]  }
 0x359   : > { %8391 = vmatmul.mubr.bf16.gmra.mxu1 %v12835_v18  ;;  %v11604_v26 = vpop.f32.mrf.mxu1  ;;  %v11709_v18 = vadd.f32 %v11708_v3, %v11707_v44  ;;  %v12882_v11 = vld [vmem:[#allocation5 + $0xb0] ss:$36 sps:$4 sm:$0xff]  }
 0x35a   : > { %8398 = vmatprep.mubr.bf16.mxu1 %v12843_v8 }
 0x35b   : > { %v11605_v63 = vpop.f32.mrf.mxu1  ;;  %v14342_v8 = vadd.f32 %v11709_v18, %v11597_v30 }
 0x35c   : > { %v11710_v43 = vpop.f32.mrf.mxu0 }
 0x35d   : > { %v11607_v35 = vpop.f32.mrf.mxu1 }
 0x35e   : > { %8544 = vmatmul.mubr.bf16.gmra.mxu0 %v12838_v61  ;;  %v11606_v61 = vadd.f32 %v11605_v63, %v11604_v26  ;;  %v11711_v34 = vpop.f32.mrf.mxu0 }
 0x35f   : > { %8551 = vmatprep.mubr.bf16.mxu0 %v12846_v5  ;;  %v11712_v47 = vadd.f32 %v11711_v34, %v11710_v43  ;;  %v11608_v39 = vpop.f32.mrf.mxu1 }
 0x360   : > { %v11713_v5 = vpop.f32.mrf.mxu0  ;;  %v11609_v51 = vadd.f32 %v11608_v39, %v11607_v35 }
 0x361   : > { %8399 = vmatmul.mubr.bf16.gmra.mxu1 %v12841_v1  ;;  %v14344_v6 = vadd.f32 %v11712_v47, %v11600_v52 }
 0x362   : > { %8406 = vmatprep.mubr.bf16.mxu1 %v12851_v59  ;;  %v11714_v20 = vpop.f32.mrf.mxu0 }
 0x363   : > { %v11715_v25 = vadd.f32 %v11714_v20, %v11713_v5  ;;  %v12954_v5 = vld [vmem:[%s13366_s12 + $0x8] sm:$0xff]  }
 0x366   : > { %8552 = vmatmul.mubr.bf16.gmra.mxu0 %v12844_v29  ;;  %v14346_v29 = vadd.f32 %v11715_v25, %v11603_v17  ;;  %v12953_v17 = vld [vmem:[%s13366_s12] sm:$0xff]  }
 0x367   : > { %8559 = vmatprep.mubr.bf16.mxu0 %v12854_v28  ;;  %v11610_v1 = vpop.f32.mrf.mxu1 }
 0x369   : > { %8407 = vmatmul.mubr.bf16.gmra.mxu1 %v12849_v49  ;;  %v11611_v59 = vpop.f32.mrf.mxu1  ;;  %v12880_v49 = vld [vmem:[#allocation5 + $0x454] ss:$36 sps:$4 sm:$0xff]  }
 0x36a   : > { %8414 = vmatprep.mubr.bf16.mxu1 %v12857_v9  ;;  %v11716_v19 = vpop.f32.mrf.mxu0  ;;  %v11612_v36 = vadd.f32 %v11611_v59, %v11610_v1 }
 0x36b   : > { %v11613_v2 = vpop.f32.mrf.mxu1 }
 0x36c   : > { %v11717_v33 = vpop.f32.mrf.mxu0 }
 0x36d   : > { %v11718_v28 = vadd.f32 %v11717_v33, %v11716_v19  ;;  %v11614_v56 = vpop.f32.mrf.mxu1 }
 0x36e   : > { %8560 = vmatmul.mubr.bf16.gmra.mxu0 %v12852_v31  ;;  %v11719_v58 = vpop.f32.mrf.mxu0  ;;  %v11615_v24 = vadd.f32 %v11614_v56, %v11613_v2  ;;  %v12888_v56 = vld [vmem:[#allocation5 + $0x188] ss:$36 sps:$4 sm:$0xff]  }
 0x36f   : > { %8567 = vmatprep.mubr.bf16.mxu0 %v12860_v21  ;;  %v14348_v23 = vadd.f32 %v11718_v28, %v11606_v61 }
 0x370   : > { %v11720_v42 = vpop.f32.mrf.mxu0 }
 0x371   : > { %8415 = vmatmul.mubr.bf16.gmra.mxu1 %v12855_v12  ;;  %v11721_v9 = vadd.f32 %v11720_v42, %v11719_v58  ;;  %v12957_v42 = vld [vmem:[%s13366_s12 + $0x20] sm:$0xff]  }
 0x372   : > { %8422 = vmatprep.mubr.bf16.mxu1 %v12865_v55 }
 0x373   : > { %v14350_v50 = vadd.f32 %v11721_v9, %v11609_v51 }
 0x376   : > { %8568 = vmatmul.mubr.bf16.gmra.mxu0 %v12858_v54 }
 0x377   : > { %8575 = vmatprep.mubr.bf16.mxu0 %v12868_v45 }
 0x379   : > { %8423 = vmatmul.mubr.bf16.gmra.mxu1 %v12863_v60  ;;  %v12884_v60 = vld [vmem:[#allocation5 + $0xf8] ss:$36 sps:$4 sm:$0xff]  }
 0x37a   : > { %8430 = vmatprep.mubr.bf16.mxu1 %v12871_v57  ;;  %v12886_v57 = vld [vmem:[#allocation5 + $0x140] ss:$36 sps:$4 sm:$0xff]  }
 0x37c   : > { %v11616_v30 = vpop.f32.mrf.mxu1 }
 0x37e   : > { %8576 = vmatmul.mubr.bf16.gmra.mxu0 %v12866_v48  ;;  %v11617_v22 = vpop.f32.mrf.mxu1  ;;  %v12955_v48 = vld [vmem:[%s13366_s12 + $0x10] sm:$0xff]  }
 0x37f   : > { %8583 = vmatprep.mubr.bf16.mxu0 %v12874_v14  ;;  %v11722_v31 = vpop.f32.mrf.mxu0  ;;  %v11618_v40 = vadd.f32 %v11617_v22, %v11616_v30 }
 0x380   : > { %v11619_v32 = vpop.f32.mrf.mxu1 }
 0x381   : > { %8431 = vmatmul.mubr.bf16.gmra.mxu1 %v12869_v7  ;;  %v11723_v21 = vpop.f32.mrf.mxu0 }
 0x382   : > { %12118 = vmatprep.mubr.bf16.mxu1 %v12877_v4  ;;  %v11724_v10 = vadd.f32 %v11723_v21, %v11722_v31  ;;  %v11620_v0 = vpop.f32.mrf.mxu1 }
 0x383   : > { %v11725_v52 = vpop.f32.mrf.mxu0  ;;  %v11621_v44 = vadd.f32 %v11620_v0, %v11619_v32 }
 0x384   : > { %v14352_v12 = vadd.f32 %v11724_v10, %v11612_v36 }
 0x385   : > { %v11726_v55 = vpop.f32.mrf.mxu0 }
 0x386   : > { %8584 = vmatmul.mubr.bf16.gmra.mxu0 %v12872_v53  ;;  %v11727_v3 = vadd.f32 %v11726_v55, %v11725_v52  ;;  %v12890_v53 = vld [vmem:[#allocation5 + $0x1d0] ss:$36 sps:$4 sm:$0xff]  }
 0x387   : > { %8591 = vmatprep.mubr.bf16.mxu0 %v12880_v49 }
 0x388   : > { %v14355_v45 = vadd.f32 %v11727_v3, %v11615_v24  ;;  %v12956_v24 = vld [vmem:[%s13366_s12 + $0x18] sm:$0xff]   ;;  %v12959_v3 = vld [vmem:[%s13366_s12 + $0x30] sm:$0xff]  }
 0x389   : > { %v11622_v54 = vpop.f32.mrf.mxu1  ;;  %12119 = vmatmul.mubr.bf16.vlgmr.msra.gmra.mxu1 %v12881_v13 }
 0x38a   : > { %12122 = vmatprep.mubr.bf16.mxu1 %v12882_v11  ;;  %v12958_v11 = vld [vmem:[%s13366_s12 + $0x28] sm:$0xff]  }
 0x38b   : > { %v11623_v18 = vpop.f32.mrf.mxu1 }
 0x38c   : > { %v11624_v43 = vadd.f32 %v11623_v18, %v11622_v54  ;;  %v12894_v54 = vld [vmem:[#allocation5 + $0x260] ss:$36 sps:$4 sm:$0xff]  }
 0x38d   : > { %v11625_v61 = vpop.f32.mrf.mxu1 }
 0x38e   : > { %v11728_v26 = vpop.f32.mrf.mxu0  ;;  %8592 = vmatmul.mubr.bf16.gmra.mxu0 %v12878_v38 }
 0x38f   : > { %12166 = vmatprep.mubr.bf16.mxu0 %v12953_v17  ;;  %v11626_v47 = vpop.f32.mrf.mxu1 }
 0x390   : > { %v11729_v63 = vpop.f32.mrf.mxu0  ;;  %v11627_v51 = vadd.f32 %v11626_v47, %v11625_v61 }
 0x391   : > { %v11730_v34 = vadd.f32 %v11729_v63, %v11728_v26  ;;  %v11628_v1 = vpop.f32.mrf.mxu1  ;;  %12123 = vmatmul.mubr.bf16.gmra.mxu1 %v12884_v60 }
 0x392   : > { %v11731_v35 = vpop.f32.mrf.mxu0  ;;  %12126 = vmatprep.mubr.bf16.mxu1 %v12886_v57 }
 0x393   : > { %v14358_v39 = vadd.f32 %v11730_v34, %v11618_v40  ;;  %v11629_v19 = vpop.f32.mrf.mxu1 }
 0x394   : > { %v11732_v20 = vpop.f32.mrf.mxu0  ;;  %v11630_v36 = vadd.f32 %v11629_v19, %v11628_v1  ;;  %v12961_v19 = vld [vmem:[%s13366_s12 + $0x40] sm:$0xff]  }
 0x395   : > { %v11733_v25 = vadd.f32 %v11732_v20, %v11731_v35  ;;  %v11631_v2 = vpop.f32.mrf.mxu1  ;;  %v12960_v20 = vld [vmem:[%s13366_s12 + $0x38] sm:$0xff]  }
 0x396   : > { %v11734_v14 = vpop.f32.mrf.mxu0  ;;  %12167 = vmatmul.mubr.bf16.vlgmr.msra.gmra.mxu0 %v12954_v5 }
 0x397   : > { %v14361_v59 = vadd.f32 %v11733_v25, %v11621_v44  ;;  %12170 = vmatprep.mubr.bf16.mxu0 %v12955_v48  ;;  %v11632_v58 = vpop.f32.mrf.mxu1  ;;  %v12892_v44 = vld [vmem:[#allocation5 + $0x218] ss:$36 sps:$4 sm:$0xff]   ;;  %v12896_v48 = vld [vmem:[#allocation5 + $0x2a8] ss:$36 sps:$4 sm:$0xff]  }
 0x398   : > { %v11735_v33 = vpop.f32.mrf.mxu0  ;;  %v11633_v49 = vadd.f32 %v11632_v58, %v11631_v2 }
 0x399   : > { %v11736_v28 = vadd.f32 %v11735_v33, %v11734_v14  ;;  %v11634_v9 = vpop.f32.mrf.mxu1  ;;  %12127 = vmatmul.mubr.bf16.gmra.mxu1 %v12888_v56  ;;  %v12898_v14 = vld [vmem:[#allocation5 + $0x2f0] ss:$36 sps:$4 sm:$0xff]  }
 0x39a   : > { %v11737_v7 = vpop.f32.mrf.mxu0  ;;  %12130 = vmatprep.mubr.bf16.mxu1 %v12890_v53 }
 0x39b   : > { %v14364_v4 = vadd.f32 %v11736_v28, %v11624_v43  ;;  %v11635_v40 = vpop.f32.mrf.mxu1 }
 0x39c   : > { %v11738_v30 = vpop.f32.mrf.mxu0  ;;  %v11636_v32 = vadd.f32 %v11635_v40, %v11634_v9  ;;  %v12900_v9 = vld [vmem:[#allocation5 + $0x338] ss:$36 sps:$4 sm:$0xff]  }
 0x39d   : > { %v11739_v31 = vadd.f32 %v11738_v30, %v11737_v7  ;;  %v11637_v52 = vpop.f32.mrf.mxu1 }
 0x39e   : > { %v11740_v22 = vpop.f32.mrf.mxu0  ;;  %12171 = vmatmul.mubr.bf16.gmra.mxu0 %v12956_v24 }
 0x39f   : > { %v14367_v21 = vadd.f32 %v11739_v31, %v11627_v51  ;;  %12174 = vmatprep.mubr.bf16.mxu0 %v12957_v42  ;;  %v11638_v13 = vpop.f32.mrf.mxu1  ;;  %v12962_v31 = vld [vmem:[%s13366_s12 + $0x48] sm:$0xff]  }
 0x3a0   : > { %v11741_v10 = vpop.f32.mrf.mxu0  ;;  %v11639_v55 = vadd.f32 %v11638_v13, %v11637_v52 }
 0x3a1   : > { %v11742_v0 = vadd.f32 %v11741_v10, %v11740_v22  ;;  %v11640_v18 = vpop.f32.mrf.mxu1  ;;  %12131 = vmatmul.mubr.bf16.gmra.mxu1 %v12892_v44  ;;  %v12963_v10 = vld [vmem:[%s13366_s12 + $0x50] sm:$0xff]  }
 0x3a2   : > { %v11743_v38 = vpop.f32.mrf.mxu0  ;;  %12134 = vmatprep.mubr.bf16.mxu1 %v12894_v54 }
 0x3a3   : > { %v14370_v17 = vadd.f32 %v11742_v0, %v11630_v36  ;;  %v11641_v61 = vpop.f32.mrf.mxu1 }
 0x3a4   : > { %v11744_v26 = vpop.f32.mrf.mxu0  ;;  %v11642_v35 = vadd.f32 %v11641_v61, %v11640_v18  ;;  %v12964_v61 = vld [vmem:[%s13366_s12 + $0x58] sm:$0xff]  }
 0x3a5   : > { %v11745_v43 = vadd.f32 %v11744_v26, %v11743_v38  ;;  %v11643_v60 = vpop.f32.mrf.mxu1 }
 0x3a6   : > { %v11746_v63 = vpop.f32.mrf.mxu0  ;;  %12175 = vmatmul.mubr.bf16.gmra.mxu0 %v12958_v11 }
 0x3a7   : > { %v14373_v34 = vadd.f32 %v11745_v43, %v11633_v49  ;;  %12178 = vmatprep.mubr.bf16.mxu0 %v12959_v3  ;;  %v11644_v57 = vpop.f32.mrf.mxu1 }
 0x3a8   : > { %v11747_v47 = vpop.f32.mrf.mxu0  ;;  %v11645_v25 = vadd.f32 %v11644_v57, %v11643_v60  ;;  %v12906_v60 = vld [vmem:[#allocation5 + $0x410] ss:$36 sps:$4 sm:$0xff]  }
 0x3a9   : > { %v11748_v5 = vadd.f32 %v11747_v47, %v11746_v63  ;;  %v11646_v33 = vpop.f32.mrf.mxu1  ;;  %12135 = vmatmul.mubr.bf16.gmra.mxu1 %v12896_v48  ;;  %v12904_v63 = vld [vmem:[#allocation5 + $0x3c8] ss:$36 sps:$4 sm:$0xff]  }
 0x3aa   : > { %v11749_v51 = vpop.f32.mrf.mxu0  ;;  %12138 = vmatprep.mubr.bf16.mxu1 %v12898_v14 }
 0x3ab   : > { %v14376_v1 = vadd.f32 %v11748_v5, %v11636_v32  ;;  %v11647_v7 = vpop.f32.mrf.mxu1  ;;  %v12902_v32 = vld [vmem:[#allocation5 + $0x380] ss:$36 sps:$4 sm:$0xff]  }
 0x3ac   : > { %v11750_v36 = vpop.f32.mrf.mxu0  ;;  %v11648_v56 = vadd.f32 %v11647_v7, %v11646_v33  ;;  %v12965_v5 = vld [vmem:[%s13366_s12 + $0x60] sm:$0xff]  }
 0x3ad   : > { %v11751_v2 = vadd.f32 %v11750_v36, %v11749_v51  ;;  %v11649_v49 = vpop.f32.mrf.mxu1 }
 0x3ae   : > { %v11752_v28 = vpop.f32.mrf.mxu0  ;;  %12179 = vmatmul.mubr.bf16.gmra.mxu0 %v12960_v20 }
 0x3af   : > { %v14379_v58 = vadd.f32 %v11751_v2, %v11639_v55  ;;  %12182 = vmatprep.mubr.bf16.mxu0 %v12961_v19  ;;  %v11650_v30 = vpop.f32.mrf.mxu1  ;;  %v12908_v2 = vld [vmem:[#allocation5 + $0x458] ss:$36 sps:$4 sm:$0xff]  }
 0x3b0   : > { %v11753_v24 = vpop.f32.mrf.mxu0  ;;  %v11651_v40 = vadd.f32 %v11650_v30, %v11649_v49 }
 0x3b1   : > { %v11754_v53 = vadd.f32 %v11753_v24, %v11752_v28  ;;  %v11652_v0 = vpop.f32.mrf.mxu1  ;;  %12139 = vmatmul.mubr.bf16.gmra.mxu1 %v12900_v9  ;;  %v12966_v24 = vld [vmem:[%s13366_s12 + $0x68] sm:$0xff]  }
 0x3b2   : > { %v11755_v42 = vpop.f32.mrf.mxu0  ;;  %12142 = vmatprep.mubr.bf16.mxu1 %v12902_v32 }
 0x3b3   : > { %v14382_v22 = vadd.f32 %v11754_v53, %v11642_v35  ;;  %v11653_v44 = vpop.f32.mrf.mxu1 }
 0x3b4   : > { %v11756_v52 = vpop.f32.mrf.mxu0  ;;  %v11654_v55 = vadd.f32 %v11653_v44, %v11652_v0 }
 0x3b5   : > { %v11757_v38 = vadd.f32 %v11756_v52, %v11755_v42  ;;  %v11655_v3 = vpop.f32.mrf.mxu1  ;;  %v12967_v42 = vld [vmem:[%s13366_s12 + $0x70] sm:$0xff]  }
 0x3b6   : > { %v11758_v13 = vpop.f32.mrf.mxu0  ;;  %12183 = vmatmul.mubr.bf16.gmra.mxu0 %v12962_v31 }
 0x3b7   : > { %v14385_v11 = vadd.f32 %v11757_v38, %v11645_v25  ;;  %12186 = vmatprep.mubr.bf16.mxu0 %v12963_v10  ;;  %v11656_v43 = vpop.f32.mrf.mxu1 }
 0x3b8   : > { %v11759_v54 = vpop.f32.mrf.mxu0  ;;  %v11657_v47 = vadd.f32 %v11656_v43, %v11655_v3 }
 0x3b9   : > { %v11760_v26 = vadd.f32 %v11759_v54, %v11758_v13  ;;  %v11658_v57 = vpop.f32.mrf.mxu1  ;;  %12143 = vmatmul.mubr.bf16.gmra.mxu1 %v12904_v63  ;;  %v12968_v54 = vld [vmem:[%s13366_s12 + $0x78] sm:$0xff]  }
 0x3ba   : > { %v11761_v18 = vpop.f32.mrf.mxu0  ;;  %12146 = vmatprep.mubr.bf16.mxu1 %v12906_v60 }
 0x3bb   : > { %v14388_v35 = vadd.f32 %v11760_v26, %v11648_v56  ;;  %v11659_v25 = vpop.f32.mrf.mxu1 }
 0x3bc   : > { %v11762_v51 = vpop.f32.mrf.mxu0  ;;  %v11660_v19 = vadd.f32 %v11659_v25, %v11658_v57 }
 0x3bd   : > { %v11763_v48 = vadd.f32 %v11762_v51, %v11761_v18  ;;  %v11661_v33 = vpop.f32.mrf.mxu1 }
 0x3be   : > { %v11764_v20 = vpop.f32.mrf.mxu0  ;;  %12187 = vmatmul.mubr.bf16.gmra.mxu0 %v12964_v61 }
 0x3bf   : > { %v14391_v14 = vadd.f32 %v11763_v48, %v11651_v40  ;;  %12190 = vmatprep.mubr.bf16.mxu0 %v12965_v5  ;;  %v11662_v56 = vpop.f32.mrf.mxu1 }
 0x3c0   : > { %v11765_v36 = vpop.f32.mrf.mxu0  ;;  %v11663_v53 = vadd.f32 %v11662_v56, %v11661_v33 }
 0x3c1   : > { %v11766_v28 = vadd.f32 %v11765_v36, %v11764_v20  ;;  %v11664_v9 = vpop.f32.mrf.mxu1  ;;  %12147 = vmatmul.mubr.bf16.gmra.mxu1 %v12908_v2 }
 0x3c2   : > { %v11767_v7 = vpop.f32.mrf.mxu0 }
 0x3c3   : > { %v14394_v49 = vadd.f32 %v11766_v28, %v11654_v55  ;;  %v11665_v32 = vpop.f32.mrf.mxu1 }
 0x3c4   : > { %v11768_v30 = vpop.f32.mrf.mxu0  ;;  %v11666_v52 = vadd.f32 %v11665_v32, %v11664_v9 }
 0x3c5   : > { %v11769_v31 = vadd.f32 %v11768_v30, %v11767_v7  ;;  %v11667_v38 = vpop.f32.mrf.mxu1 }
 0x3c6   : > { %v11770_v40 = vpop.f32.mrf.mxu0  ;;  %12191 = vmatmul.mubr.bf16.gmra.mxu0 %v12966_v24 }
 0x3c7   : > { %v14397_v10 = vadd.f32 %v11769_v31, %v11657_v47  ;;  %12194 = vmatprep.mubr.bf16.mxu0 %v12967_v42  ;;  %v11668_v55 = vpop.f32.mrf.mxu1 }
 0x3c8   : > { %v11771_v0 = vpop.f32.mrf.mxu0  ;;  %v11669_v26 = vadd.f32 %v11668_v55, %v11667_v38 }
 0x3c9   : > { %v11772_v13 = vadd.f32 %v11771_v0, %v11770_v40  ;;  %v11798_v43 = vpop.f32.mrf.mxu1 }
 0x3ca   : > { %v11773_v44 = vpop.f32.mrf.mxu0 }
 0x3cb   : > { %v14400_v3 = vadd.f32 %v11772_v13, %v11660_v19  ;;  %v11799_v60 = vpop.f32.mrf.mxu1 }
 0x3cc   : > { %v11774_v18 = vpop.f32.mrf.mxu0  ;;  %v11800_v47 = vadd.f32 %v11799_v60, %v11798_v43 }
 0x3cd   : > { %v11775_v63 = vadd.f32 %v11774_v18, %v11773_v44  ;;  %v11801_v57 = vpop.f32.mrf.mxu1 }
 0x3ce   : > { %v11776_v61 = vpop.f32.mrf.mxu0  ;;  %12195 = vmatmul.mubr.bf16.gmra.mxu0 %v12968_v54  ;;  %v8313_v20 = vadd.f32 %v11800_v47, %v14328_v15 }
 0x3cf   : > { %v14402_v5 = vadd.f32 %v11775_v63, %v11663_v53  ;;  %v11802_v36 = vpop.f32.mrf.mxu1 }
 0x3d0   : > { %v11777_v51 = vpop.f32.mrf.mxu0  ;;  %v11803_v19 = vadd.f32 %v11802_v36, %v11801_v57 }
 0x3d1   : > { %v11778_v48 = vadd.f32 %v11777_v51, %v11776_v61  ;;  %v11804_v28 = vpop.f32.mrf.mxu1 }
 0x3d2   : > { %v11779_v25 = vpop.f32.mrf.mxu0  ;;  %v8316_v56 = vadd.f32 %v11803_v19, %v14330_v37 }
 0x3d3   : > { %v14405_v33 = vadd.f32 %v11778_v48, %v11666_v52  ;;  %v11805_v42 = vpop.f32.mrf.mxu1 }
 0x3d4   : > { %v11780_v2 = vpop.f32.mrf.mxu0  ;;  %v11806_v30 = vadd.f32 %v11805_v42, %v11804_v28 }
 0x3d5   : > { %v11781_v7 = vadd.f32 %v11780_v2, %v11779_v25  ;;  %v11807_v31 = vpop.f32.mrf.mxu1 }
 0x3d6   : > { %v11910_v24 = vpop.f32.mrf.mxu0  ;;  %v8321_v40 = vadd.f32 %v11806_v30, %v14332_v27 }
 0x3d7   : > { %v14408_v53 = vadd.f32 %v11781_v7, %v11669_v26  ;;  %v11808_v0 = vpop.f32.mrf.mxu1 }
 0x3d8   : > { %v11911_v9 = vpop.f32.mrf.mxu0  ;;  %v11809_v52 = vadd.f32 %v11808_v0, %v11807_v31 }
 0x3d9   : > { %v11912_v15 = vadd.f32 %v11911_v9, %v11910_v24  ;;  %v11810_v44 = vpop.f32.mrf.mxu1 }
 0x3da   : > { %v11913_v32 = vpop.f32.mrf.mxu0  ;;  %v8324_v55 = vadd.f32 %v11809_v52, %v14334_v62 }
 0x3db   : > { %v14411_v38 = vadd.f32 %v11912_v15, %v8313_v20  ;;  %v11811_v18 = vpop.f32.mrf.mxu1 }
 0x3dc   : > { %v11914_v13 = vpop.f32.mrf.mxu0  ;;  %v11812_v26 = vadd.f32 %v11811_v18, %v11810_v44 }
 0x3dd   : > { %v11915_v37 = vadd.f32 %v11914_v13, %v11913_v32  ;;  %v11813_v61 = vpop.f32.mrf.mxu1 }
 0x3de   : > { %v11916_v54 = vpop.f32.mrf.mxu0  ;;  %v8329_v27 = vadd.f32 %v11812_v26, %v14336_v16 }
 0x3df   : > { %v14414_v43 = vadd.f32 %v11915_v37, %v8316_v56  ;;  %v11814_v51 = vpop.f32.mrf.mxu1 }
 0x3e0   : > { %v11917_v63 = vpop.f32.mrf.mxu0  ;;  %v11815_v57 = vadd.f32 %v11814_v51, %v11813_v61 }
 0x3e1   : > { %v11918_v60 = vadd.f32 %v11917_v63, %v11916_v54  ;;  %v11816_v25 = vpop.f32.mrf.mxu1 }
 0x3e2   : > { %v11919_v47 = vpop.f32.mrf.mxu0  ;;  %v8332_v62 = vadd.f32 %v11815_v57, %v14338_v41 }
 0x3e3   : > { %v14417_v48 = vadd.f32 %v11918_v60, %v8321_v40  ;;  %v11817_v2 = vpop.f32.mrf.mxu1 }
 0x3e4   : > { %v11920_v20 = vpop.f32.mrf.mxu0  ;;  %v11818_v28 = vadd.f32 %v11817_v2, %v11816_v25 }
 0x3e5   : > { %v11921_v36 = vadd.f32 %v11920_v20, %v11919_v47  ;;  %v11819_v24 = vpop.f32.mrf.mxu1 }
 0x3e6   : > { %v11922_v19 = vpop.f32.mrf.mxu0  ;;  %v8337_v16 = vadd.f32 %v11818_v28, %v14340_v46 }
 0x3e7   : > { %v14420_v7 = vadd.f32 %v11921_v36, %v8324_v55  ;;  %v11820_v9 = vpop.f32.mrf.mxu1 }
 0x3e8   : > { %v11923_v56 = vpop.f32.mrf.mxu0  ;;  %v11821_v31 = vadd.f32 %v11820_v9, %v11819_v24 }
 0x3e9   : > { %v11924_v42 = vadd.f32 %v11923_v56, %v11922_v19  ;;  %v11822_v32 = vpop.f32.mrf.mxu1 }
 0x3ea   : > { %v11925_v30 = vpop.f32.mrf.mxu0  ;;  %v8340_v41 = vadd.f32 %v11821_v31, %v14342_v8 }
 0x3eb   : > { %v14423_v40 = vadd.f32 %v11924_v42, %v8329_v27  ;;  %v11823_v13 = vpop.f32.mrf.mxu1 }
 0x3ec   : > { %v11926_v15 = vpop.f32.mrf.mxu0  ;;  %v11824_v44 = vadd.f32 %v11823_v13, %v11822_v32 }
 0x3ed   : > { %v11927_v0 = vadd.f32 %v11926_v15, %v11925_v30  ;;  %v11825_v54 = vpop.f32.mrf.mxu1 }
 0x3ee   : > { %v11928_v52 = vpop.f32.mrf.mxu0  ;;  %v8345_v46 = vadd.f32 %v11824_v44, %v14344_v6 }
 0x3ef   : > { %v14426_v55 = vadd.f32 %v11927_v0, %v8332_v62  ;;  %v11826_v63 = vpop.f32.mrf.mxu1 }
 0x3f0   : > { %v11929_v37 = vpop.f32.mrf.mxu0  ;;  %v11827_v61 = vadd.f32 %v11826_v63, %v11825_v54 }
 0x3f1   : > { %v11930_v18 = vadd.f32 %v11929_v37, %v11928_v52  ;;  %v11828_v47 = vpop.f32.mrf.mxu1 }
 0x3f2   : > { %v11931_v26 = vpop.f32.mrf.mxu0  ;;  %v8348_v8 = vadd.f32 %v11827_v61, %v14346_v29 }
 0x3f3   : > { %v14429_v27 = vadd.f32 %v11930_v18, %v8337_v16  ;;  %v11829_v20 = vpop.f32.mrf.mxu1 }
 0x3f4   : > { %v11932_v60 = vpop.f32.mrf.mxu0  ;;  %v11830_v25 = vadd.f32 %v11829_v20, %v11828_v47 }
 0x3f5   : > { %v11933_v51 = vadd.f32 %v11932_v60, %v11931_v26  ;;  %v11831_v19 = vpop.f32.mrf.mxu1 }
 0x3f6   : > { %v11934_v57 = vpop.f32.mrf.mxu0  ;;  %v8353_v6 = vadd.f32 %v11830_v25, %v14348_v23 }
 0x3f7   : > { %v14432_v62 = vadd.f32 %v11933_v51, %v8340_v41  ;;  %v11832_v56 = vpop.f32.mrf.mxu1 }
 0x3f8   : > { %v11935_v36 = vpop.f32.mrf.mxu0  ;;  %v11833_v24 = vadd.f32 %v11832_v56, %v11831_v19 }
 0x3f9   : > { %v11936_v2 = vadd.f32 %v11935_v36, %v11934_v57  ;;  %v11834_v30 = vpop.f32.mrf.mxu1 }
 0x3fa   : > { %v11937_v28 = vpop.f32.mrf.mxu0  ;;  %v8356_v29 = vadd.f32 %v11833_v24, %v14350_v50 }
 0x3fb   : > { %v14435_v16 = vadd.f32 %v11936_v2, %v8345_v46  ;;  %v11835_v15 = vpop.f32.mrf.mxu1 }
 0x3fc   : > { %v11938_v42 = vpop.f32.mrf.mxu0  ;;  %v11836_v32 = vadd.f32 %v11835_v15, %v11834_v30 }
 0x3fd   : > { %v11939_v9 = vadd.f32 %v11938_v42, %v11937_v28  ;;  %v11837_v52 = vpop.f32.mrf.mxu1 }
 0x3fe   : > { %v11940_v31 = vpop.f32.mrf.mxu0  ;;  %v8361_v23 = vadd.f32 %v11836_v32, %v14352_v12 }
 0x3ff   : > { %v14438_v41 = vadd.f32 %v11939_v9, %v8348_v8  ;;  %v11838_v37 = vpop.f32.mrf.mxu1 }
 0x400   : > { %v11941_v0 = vpop.f32.mrf.mxu0  ;;  %v11839_v54 = vadd.f32 %v11838_v37, %v11837_v52 }
 0x401   : > { %v11942_v13 = vadd.f32 %v11941_v0, %v11940_v31  ;;  %v11840_v26 = vpop.f32.mrf.mxu1 }
 0x402   : > { %v11943_v44 = vpop.f32.mrf.mxu0  ;;  %v8364_v50 = vadd.f32 %v11839_v54, %v14355_v45 }
 0x403   : > { %v14441_v46 = vadd.f32 %v11942_v13, %v8353_v6  ;;  %v11841_v60 = vpop.f32.mrf.mxu1 }
 0x404   : > { %v11944_v18 = vpop.f32.mrf.mxu0  ;;  %v11842_v47 = vadd.f32 %v11841_v60, %v11840_v26 }
 0x405   : > { %v11945_v63 = vadd.f32 %v11944_v18, %v11943_v44  ;;  %v11843_v57 = vpop.f32.mrf.mxu1 }
 0x406   : > { %v11946_v61 = vpop.f32.mrf.mxu0  ;;  %v8369_v12 = vadd.f32 %v11842_v47, %v14358_v39 }
 0x407   : > { %v14444_v8 = vadd.f32 %v11945_v63, %v8356_v29  ;;  %v11844_v36 = vpop.f32.mrf.mxu1 }
 0x408   : > { %v11947_v51 = vpop.f32.mrf.mxu0  ;;  %v11845_v19 = vadd.f32 %v11844_v36, %v11843_v57 }
 0x409   : > { %v11948_v20 = vadd.f32 %v11947_v51, %v11946_v61  ;;  %v11846_v28 = vpop.f32.mrf.mxu1 }
 0x40a   : > { %v11949_v25 = vpop.f32.mrf.mxu0  ;;  %v8372_v45 = vadd.f32 %v11845_v19, %v14361_v59 }
 0x40b   : > { %v14447_v6 = vadd.f32 %v11948_v20, %v8361_v23  ;;  %v11847_v42 = vpop.f32.mrf.mxu1 }
 0x40c   : > { %v11950_v2 = vpop.f32.mrf.mxu0  ;;  %v11848_v30 = vadd.f32 %v11847_v42, %v11846_v28 }
 0x40d   : > { %v11951_v56 = vadd.f32 %v11950_v2, %v11949_v25  ;;  %v11849_v31 = vpop.f32.mrf.mxu1 }
 0x40e   : > { %v11952_v24 = vpop.f32.mrf.mxu0  ;;  %v8377_v39 = vadd.f32 %v11848_v30, %v14364_v4 }
 0x40f   : > { %v14450_v29 = vadd.f32 %v11951_v56, %v8364_v50  ;;  %v11850_v0 = vpop.f32.mrf.mxu1 }
 0x410   : > { %v11953_v9 = vpop.f32.mrf.mxu0  ;;  %v11851_v52 = vadd.f32 %v11850_v0, %v11849_v31 }
 0x411   : > { %v11954_v15 = vadd.f32 %v11953_v9, %v11952_v24  ;;  %v11852_v44 = vpop.f32.mrf.mxu1 }
 0x412   : > { %v11955_v32 = vpop.f32.mrf.mxu0  ;;  %v8380_v59 = vadd.f32 %v11851_v52, %v14367_v21 }
 0x413   : > { %v14453_v23 = vadd.f32 %v11954_v15, %v8369_v12  ;;  %v11853_v18 = vpop.f32.mrf.mxu1 }
 0x414   : > { %v11956_v13 = vpop.f32.mrf.mxu0  ;;  %v11854_v26 = vadd.f32 %v11853_v18, %v11852_v44 }
 0x415   : > { %v11957_v37 = vadd.f32 %v11956_v13, %v11955_v32  ;;  %v11855_v61 = vpop.f32.mrf.mxu1 }
 0x416   : > { %v11958_v54 = vpop.f32.mrf.mxu0  ;;  %v8385_v4 = vadd.f32 %v11854_v26, %v14370_v17 }
 0x417   : > { %v14456_v50 = vadd.f32 %v11957_v37, %v8372_v45  ;;  %v11856_v51 = vpop.f32.mrf.mxu1 }
 0x418   : > { %v11959_v63 = vpop.f32.mrf.mxu0  ;;  %v11857_v57 = vadd.f32 %v11856_v51, %v11855_v61 }
 0x419   : > { %v11960_v60 = vadd.f32 %v11959_v63, %v11958_v54  ;;  %v11858_v25 = vpop.f32.mrf.mxu1 }
 0x41a   : > { %v11961_v47 = vpop.f32.mrf.mxu0  ;;  %v8388_v21 = vadd.f32 %v11857_v57, %v14373_v34 }
 0x41b   : > { %v14459_v12 = vadd.f32 %v11960_v60, %v8377_v39  ;;  %v11859_v2 = vpop.f32.mrf.mxu1 }
 0x41c   : > { %v11962_v20 = vpop.f32.mrf.mxu0  ;;  %v11860_v28 = vadd.f32 %v11859_v2, %v11858_v25 }
 0x41d   : > { %v11963_v36 = vadd.f32 %v11962_v20, %v11961_v47  ;;  %v11861_v24 = vpop.f32.mrf.mxu1 }
 0x41e   : > { %v11964_v19 = vpop.f32.mrf.mxu0  ;;  %v8393_v17 = vadd.f32 %v11860_v28, %v14376_v1 }
 0x41f   : > { %v14462_v45 = vadd.f32 %v11963_v36, %v8380_v59  ;;  %v11862_v9 = vpop.f32.mrf.mxu1 }
 0x420   : > { %v11965_v56 = vpop.f32.mrf.mxu0  ;;  %v11863_v31 = vadd.f32 %v11862_v9, %v11861_v24 }
 0x421   : > { %v11966_v42 = vadd.f32 %v11965_v56, %v11964_v19  ;;  %v11864_v32 = vpop.f32.mrf.mxu1 }
 0x422   : > { %v11967_v30 = vpop.f32.mrf.mxu0  ;;  %v8396_v34 = vadd.f32 %v11863_v31, %v14379_v58 }
 0x423   : > { %v14465_v39 = vadd.f32 %v11966_v42, %v8385_v4  ;;  %v11865_v13 = vpop.f32.mrf.mxu1 }
 0x424   : > { %v11968_v15 = vpop.f32.mrf.mxu0  ;;  %v11866_v44 = vadd.f32 %v11865_v13, %v11864_v32 }
 0x425   : > { %v11969_v0 = vadd.f32 %v11968_v15, %v11967_v30  ;;  %v11867_v54 = vpop.f32.mrf.mxu1 }
 0x426   : > { %v11970_v52 = vpop.f32.mrf.mxu0  ;;  %v8401_v1 = vadd.f32 %v11866_v44, %v14382_v22 }
 0x427   : > { %v14468_v59 = vadd.f32 %v11969_v0, %v8388_v21  ;;  %v11868_v63 = vpop.f32.mrf.mxu1 }
 0x428   : > { %v11971_v37 = vpop.f32.mrf.mxu0  ;;  %v11869_v61 = vadd.f32 %v11868_v63, %v11867_v54 }
 0x429   : > { %v11972_v18 = vadd.f32 %v11971_v37, %v11970_v52  ;;  %v11870_v47 = vpop.f32.mrf.mxu1 }
 0x42a   : > { %v11973_v26 = vpop.f32.mrf.mxu0  ;;  %v8404_v58 = vadd.f32 %v11869_v61, %v14385_v11 }
 0x42b   : > { %v14471_v4 = vadd.f32 %v11972_v18, %v8393_v17  ;;  %v11871_v20 = vpop.f32.mrf.mxu1 }
 0x42c   : > { %v11974_v60 = vpop.f32.mrf.mxu0  ;;  %v11872_v25 = vadd.f32 %v11871_v20, %v11870_v47 }
 0x42d   : > { %v11975_v51 = vadd.f32 %v11974_v60, %v11973_v26  ;;  %v11873_v19 = vpop.f32.mrf.mxu1 }
 0x42e   : > { %v11976_v57 = vpop.f32.mrf.mxu0  ;;  %v8409_v22 = vadd.f32 %v11872_v25, %v14388_v35 }
 0x42f   : > { %v14474_v21 = vadd.f32 %v11975_v51, %v8396_v34  ;;  %v11874_v56 = vpop.f32.mrf.mxu1 }
 0x430   : > { %v11977_v36 = vpop.f32.mrf.mxu0  ;;  %v11875_v24 = vadd.f32 %v11874_v56, %v11873_v19 }
 0x431   : > { %v11978_v2 = vadd.f32 %v11977_v36, %v11976_v57  ;;  %v11876_v30 = vpop.f32.mrf.mxu1 }
 0x432   : > { %v11979_v28 = vpop.f32.mrf.mxu0  ;;  %v8412_v11 = vadd.f32 %v11875_v24, %v14391_v14 }
 0x433   : > { %v14477_v17 = vadd.f32 %v11978_v2, %v8401_v1  ;;  %v11877_v15 = vpop.f32.mrf.mxu1 }
 0x434   : > { %v11980_v42 = vpop.f32.mrf.mxu0  ;;  %v11878_v32 = vadd.f32 %v11877_v15, %v11876_v30 }
 0x435   : > { %v11981_v9 = vadd.f32 %v11980_v42, %v11979_v28  ;;  %v11879_v52 = vpop.f32.mrf.mxu1 }
 0x436   : > { %v11982_v31 = vpop.f32.mrf.mxu0  ;;  %v8417_v35 = vadd.f32 %v11878_v32, %v14394_v49 }
 0x437   : > { %v14480_v34 = vadd.f32 %v11981_v9, %v8404_v58  ;;  %v11880_v37 = vpop.f32.mrf.mxu1 }
 0x438   : > { %v11983_v0 = vpop.f32.mrf.mxu0  ;;  %v11881_v54 = vadd.f32 %v11880_v37, %v11879_v52 }
 0x439   : > { %v11984_v13 = vadd.f32 %v11983_v0, %v11982_v31  ;;  %v11882_v26 = vpop.f32.mrf.mxu1 }
 0x43a   : > { %v11985_v44 = vpop.f32.mrf.mxu0  ;;  %v8420_v14 = vadd.f32 %v11881_v54, %v14397_v10 }
 0x43b   : > { %v14483_v1 = vadd.f32 %v11984_v13, %v8409_v22  ;;  %v11883_v60 = vpop.f32.mrf.mxu1 }
 0x43c   : > { %v11986_v18 = vpop.f32.mrf.mxu0  ;;  %v11884_v47 = vadd.f32 %v11883_v60, %v11882_v26  ;;  %v14514_v26 = vld [vmem:[%s14792_s5] ss:$0 sm:$0xff] }
 0x43d   : > { %v11987_v63 = vadd.f32 %v11986_v18, %v11985_v44  ;;  %v11885_v57 = vpop.f32.mrf.mxu1 }
 0x43e   : > { %v11988_v61 = vpop.f32.mrf.mxu0  ;;  %v8425_v49 = vadd.f32 %v11884_v47, %v14400_v3 }
 0x43f   : > { %v14486_v58 = vadd.f32 %v11987_v63, %v8412_v11  ;;  %v11886_v36 = vpop.f32.mrf.mxu1 }
 0x440   : > { %v11989_v51 = vpop.f32.mrf.mxu0  ;;  %v11887_v19 = vadd.f32 %v11886_v36, %v11885_v57 }
 0x441   : > { %v11990_v20 = vadd.f32 %v11989_v51, %v11988_v61  ;;  %v14491_v28 = vpop.f32.mrf.mxu1 }
 0x442   : > { %v11991_v25 = vpop.f32.mrf.mxu0  ;;  %v8428_v10 = vadd.f32 %v11887_v19, %v14402_v5 }
 0x443   : > { %v14489_v22 = vadd.f32 %v11990_v20, %v8417_v35  ;;  %v14494_v42 = vpop.f32.mrf.mxu1 }
 0x444   : > { %v11992_v2 = vpop.f32.mrf.mxu0 }
 0x445   : > { %v11993_v56 = vadd.f32 %v11992_v2, %v11991_v25  ;;  %v14498_v9 = vpop.f32.mrf.mxu1 }
 0x446   : > { %v11994_v24 = vpop.f32.mrf.mxu0 }
 0x447   : > { %v14496_v30 = vadd.f32 %v11993_v56, %v8420_v14  ;;  %v14500_v15 = vpop.f32.mrf.mxu1 }
 0x448   : > { %v11995_v11 = vpop.f32.mrf.mxu0 }
 0x449   : > { %v11996_v3 = vadd.f32 %v11995_v11, %v11994_v24  ;;  %v12120_v52 = vpop.f32.mrf.mxu1 }
 0x44a   : > { %v11997_v31 = vpop.f32.mrf.mxu0  ;;  %v8643_v18 = vadd.f32 %v12120_v52, %v14417_v48  ;;  %v14525_v48 = vld [vmem:[%s14795_s8] ss:$0 sm:$0xff] }
 0x44b   : > { %v14502_v32 = vadd.f32 %v11996_v3, %v8425_v49  ;;  %v8634_v5 = vpop.f32.mrf.mxu1  ;;  %v14531_v49 = vld [vmem:[%s14793_s6] ss:$0 sm:$0xff] }
 0x44c   : > { %v11998_v0 = vpop.f32.mrf.mxu0  ;;  %v8635_v61 = vadd.f32 %v8634_v5, %v14411_v38  ;;  %v8770_v57 = vmul.f32 %v14514_v26, %v8643_v18 }
 0x44d   : > { %v11999_v35 = vadd.f32 %v11998_v0, %v11997_v31  ;;  %v12121_v54 = vpop.f32.mrf.mxu1 }
 0x44e   : > { %v14504_v13 = vpop.f32.mrf.mxu0  ;;  %v8646_v60 = vadd.f32 %v12121_v54, %v14420_v7  ;;  %v14537_v7 = vld [vmem:[%s14796_s9] ss:$0 sm:$0xff]  ;;  %v8768_v36 = vmul.f32 %v14514_v26, %v8635_v61  ;;  %v8809_v11 = vadd.f32 %v14531_v49, %v8770_v57 }
 0x44f   : > { %v14506_v44 = vadd.f32 %v11999_v35, %v8428_v10  ;;  %v8637_v63 = vpop.f32.mrf.mxu1 }
 0x450   : > { %v14508_v37 = vpop.f32.mrf.mxu0  ;;  %v8638_v38 = vadd.f32 %v8637_v63, %v14414_v43  ;;  %v8771_v2 = vmul.f32 %v14514_v26, %v8646_v60  ;;  %v8807_v5 = vadd.f32 %v14531_v49, %v8768_v36 }
 0x451   : > { %v12124_v51 = vpop.f32.mrf.mxu1 }
 0x452   : > { %v14516_v14 = vpop.f32.mrf.mxu0  ;;  %v8659_v10 = vadd.f32 %v12124_v51, %v14429_v27  ;;  %v8769_v31 = vmul.f32 %v14514_v26, %v8638_v38  ;;  %v8810_v63 = vadd.f32 %v14531_v49, %v8771_v2 }
 0x453   : > { %v8650_v25 = vpop.f32.mrf.mxu1 }
 0x454   : > { %v14520_v47 = vpop.f32.mrf.mxu0  ;;  %v8651_v0 = vadd.f32 %v8650_v25, %v14423_v40  ;;  %v8774_v61 = vmul.f32 %v14514_v26, %v8659_v10  ;;  %v8808_v36 = vadd.f32 %v14531_v49, %v8769_v31 }
 0x455   : > { %v12125_v24 = vpop.f32.mrf.mxu1 }
 0x456   : > { %v12168_v20 = vpop.f32.mrf.mxu0  ;;  %v8662_v60 = vadd.f32 %v12125_v24, %v14432_v62 }
 0x457   : > { %v9169_v19 = vmul.f32 %v12168_v20, %v14525_v48  ;;  %v8653_v35 = vpop.f32.mrf.mxu1 }
 0x458   : > { %v9033_v56 = vpop.f32.mrf.mxu0  ;;  %v8775_v31 = vmul.f32 %v14514_v26, %v8662_v60 }
 0x459   : > { %v9208_v43 = vadd.f32 %v14537_v7, %v9169_v19  ;;  %v9167_v3 = vmul.f32 %v14525_v48, %v9033_v56  ;;  %v12128_v57 = vpop.f32.mrf.mxu1  ;;  %v8772_v19 = vmul.f32 %v14514_v26, %v8651_v0  ;;  %v8654_v56 = vadd.f32 %v8653_v35, %v14426_v55 }
 0x45a   : > { %v12169_v52 = vpop.f32.mrf.mxu0  ;;  %v8675_v55 = vadd.f32 %v12128_v57, %v14441_v46 }
 0x45b   : > { %v9240_v54 = vadd.f32 %v9208_v43, %v8809_v11  ;;  %v9206_v27 = vadd.f32 %v14537_v7, %v9167_v3  ;;  %v9170_v18 = vmul.f32 %v12169_v52, %v14525_v48  ;;  %v8666_v2 = vpop.f32.mrf.mxu1  ;;  %v8813_v3 = vadd.f32 %v14531_v49, %v8774_v61 }
 0x45c   : > { %v9036_v51 = vpop.f32.mrf.mxu0  ;;  %v8667_v61 = vadd.f32 %v8666_v2, %v14435_v16 }
 0x45d   : > { %v9272_v38 = vmax.f32 %v9240_v54, 0.0  ;;  %v9238_v20 = vadd.f32 %v9206_v27, %v8807_v5  ;;  %v9209_v40 = vadd.f32 %v14537_v7, %v9170_v18  ;;  %v9168_v25 = vmul.f32 %v14525_v48, %v9036_v51  ;;  %v12129_v52 = vpop.f32.mrf.mxu1 }
 0x45e   : > { %v12172_v11 = vpop.f32.mrf.mxu0  ;;  %v8811_v18 = vadd.f32 %v14531_v49, %v8772_v19 }
 0x45f   : > { %9304 = vst [vmem:[%s14560_s30 + $0x10] sm:$0xff] %v9272_v38  ;;  %v9270_v62 = vmax.f32 %v9238_v20, 0.0  ;;  %v9241_v10 = vadd.f32 %v9209_v40, %v8810_v63  ;;  %v9207_v24 = vadd.f32 %v14537_v7, %v9168_v25  ;;  %v9173_v43 = vmul.f32 %v12172_v11, %v14525_v48  ;;  %v8669_v60 = vpop.f32.mrf.mxu1 }
 0x460   : > { %v9049_v0 = vpop.f32.mrf.mxu0  ;;  %v8773_v63 = vmul.f32 %v14514_v26, %v8654_v56  ;;  %v8814_v40 = vadd.f32 %v14531_v49, %v8775_v31  ;;  %v8778_v25 = vmul.f32 %v14514_v26, %v8675_v55 }
 0x461   : > { %9302 = vst [vmem:[%s14560_s30] sm:$0xff] %v9270_v62  ;;  %v9273_v35 = vmax.f32 %v9241_v10, 0.0  ;;  %v9239_v5 = vadd.f32 %v9207_v24, %v8808_v36  ;;  %v9212_v54 = vadd.f32 %v14537_v7, %v9173_v43  ;;  %v9171_v27 = vmul.f32 %v14525_v48, %v9049_v0  ;;  %v12132_v56 = vpop.f32.mrf.mxu1 }
 0x462   : > { %v12173_v51 = vpop.f32.mrf.mxu0  ;;  %v8678_v36 = vadd.f32 %v12129_v52, %v14444_v8  ;;  %v8812_v10 = vadd.f32 %v14531_v49, %v8773_v63  ;;  %v8776_v24 = vmul.f32 %v14514_v26, %v8667_v61  ;;  %v8670_v43 = vadd.f32 %v8669_v60, %v14438_v41 }
 0x463   : > { %9305 = vst [vmem:[%s14560_s30 + $0x18] sm:$0xff] %v9273_v35  ;;  %v9271_v46 = vmax.f32 %v9239_v5, 0.0  ;;  %v9244_v57 = vadd.f32 %v9212_v54, %v8813_v3  ;;  %v9210_v38 = vadd.f32 %v14537_v7, %v9171_v27  ;;  %v9174_v20 = vmul.f32 %v12173_v51, %v14525_v48  ;;  %v8682_v31 = vpop.f32.mrf.mxu1 }
 0x464   : > { %v9052_v19 = vpop.f32.mrf.mxu0  ;;  %v8817_v35 = vadd.f32 %v14531_v49, %v8778_v25  ;;  %v8779_v5 = vmul.f32 %v14514_v26, %v8678_v36  ;;  %v8691_v54 = vadd.f32 %v12132_v56, %v14453_v23  ;;  %v8815_v60 = vadd.f32 %v14531_v49, %v8776_v24 }
 0x465   : > { %9303 = vst [vmem:[%s14560_s30 + $0x8] sm:$0xff] %v9271_v46  ;;  %v9276_v16 = vmax.f32 %v9244_v57, 0.0  ;;  %v9242_v11 = vadd.f32 %v9210_v38, %v8811_v18  ;;  %v9213_v2 = vadd.f32 %v14537_v7, %v9174_v20  ;;  %v9172_v62 = vmul.f32 %v14525_v48, %v9052_v19  ;;  %v12133_v18 = vpop.f32.mrf.mxu1 }
 0x466   : > { %v12176_v3 = vpop.f32.mrf.mxu0  ;;  %v8777_v46 = vmul.f32 %v14514_v26, %v8670_v43  ;;  %v8683_v57 = vadd.f32 %v8682_v31, %v14447_v6  ;;  %v8818_v19 = vadd.f32 %v14531_v49, %v8779_v5  ;;  %v8782_v56 = vmul.f32 %v14514_v26, %v8691_v54 }
 0x467   : > { %9308 = vst [vmem:[%s14560_s30 + $0x30] sm:$0xff] %v9276_v16  ;;  %v9274_v8 = vmax.f32 %v9242_v11, 0.0  ;;  %v9245_v55 = vadd.f32 %v9213_v2, %v8814_v40  ;;  %v9211_v0 = vadd.f32 %v14537_v7, %v9172_v62  ;;  %v9177_v52 = vmul.f32 %v12176_v3, %v14525_v48  ;;  %v8685_v20 = vpop.f32.mrf.mxu1 }
 0x468   : > { %v9065_v27 = vpop.f32.mrf.mxu0  ;;  %v8694_v16 = vadd.f32 %v12133_v18, %v14456_v50  ;;  %v8816_v43 = vadd.f32 %v14531_v49, %v8777_v46  ;;  %v8780_v3 = vmul.f32 %v14514_v26, %v8683_v57  ;;  %v8686_v31 = vadd.f32 %v8685_v20, %v14450_v29 }
 0x469   : > { %9306 = vst [vmem:[%s14560_s30 + $0x20] sm:$0xff] %v9274_v8  ;;  %v9277_v41 = vmax.f32 %v9245_v55, 0.0  ;;  %v9243_v63 = vadd.f32 %v9211_v0, %v8812_v10  ;;  %v9216_v61 = vadd.f32 %v14537_v7, %v9177_v52  ;;  %v9175_v51 = vmul.f32 %v14525_v48, %v9065_v27  ;;  %v12136_v2 = vpop.f32.mrf.mxu1 }
 0x46a   : > { %v12177_v38 = vpop.f32.mrf.mxu0  ;;  %v8821_v5 = vadd.f32 %v14531_v49, %v8782_v56  ;;  %v8783_v54 = vmul.f32 %v14514_v26, %v8694_v16  ;;  %v8707_v27 = vadd.f32 %v12136_v2, %v14465_v39  ;;  %v8781_v46 = vmul.f32 %v14514_v26, %v8686_v31 }
 0x46b   : > { %9309 = vst [vmem:[%s14560_s30 + $0x38] sm:$0xff] %v9277_v41  ;;  %v9275_v23 = vmax.f32 %v9243_v63, 0.0  ;;  %v9248_v40 = vadd.f32 %v9216_v61, %v8817_v35  ;;  %v9214_v25 = vadd.f32 %v14537_v7, %v9175_v51  ;;  %v9178_v36 = vmul.f32 %v12177_v38, %v14525_v48  ;;  %v8698_v55 = vpop.f32.mrf.mxu1 }
 0x46c   : > { %v9068_v11 = vpop.f32.mrf.mxu0  ;;  %v8699_v57 = vadd.f32 %v8698_v55, %v14459_v12 }
 0x46d   : > { %9307 = vst [vmem:[%s14560_s30 + $0x28] sm:$0xff] %v9275_v23  ;;  %v9280_v6 = vmax.f32 %v9248_v40, 0.0  ;;  %v9246_v62 = vadd.f32 %v9214_v25, %v8815_v60  ;;  %v9217_v10 = vadd.f32 %v14537_v7, %v9178_v36  ;;  %v9176_v24 = vmul.f32 %v14525_v48, %v9068_v11  ;;  %v12137_v41 = vpop.f32.mrf.mxu1 }
 0x46e   : > { %v12180_v8 = vpop.f32.mrf.mxu0  ;;  %v8819_v60 = vadd.f32 %v14531_v49, %v8780_v3  ;;  %v8822_v36 = vadd.f32 %v14531_v49, %v8783_v54  ;;  %v8710_v56 = vadd.f32 %v12137_v41, %v14468_v59 }
 0x46f   : > { %9312 = vst [vmem:[%s14560_s30 + $0x50] sm:$0xff] %v9280_v6  ;;  %v9278_v50 = vmax.f32 %v9246_v62, 0.0  ;;  %v9249_v0 = vadd.f32 %v9217_v10, %v8818_v19  ;;  %v9215_v52 = vadd.f32 %v14537_v7, %v9176_v24  ;;  %v9181_v35 = vmul.f32 %v12180_v8, %v14525_v48  ;;  %v8701_v20 = vpop.f32.mrf.mxu1 }
 0x470   : > { %v9081_v18 = vpop.f32.mrf.mxu0  ;;  %v8786_v19 = vmul.f32 %v14514_v26, %v8707_v27  ;;  %v8820_v10 = vadd.f32 %v14531_v49, %v8781_v46  ;;  %v8784_v24 = vmul.f32 %v14514_v26, %v8699_v57 }
 0x471   : > { %9310 = vst [vmem:[%s14560_s30 + $0x40] sm:$0xff] %v9278_v50  ;;  %v9281_v29 = vmax.f32 %v9249_v0, 0.0  ;;  %v9247_v63 = vadd.f32 %v9215_v52, %v8816_v43  ;;  %v9220_v61 = vadd.f32 %v14537_v7, %v9181_v35  ;;  %v9179_v51 = vmul.f32 %v14525_v48, %v9081_v18  ;;  %v12140_v11 = vpop.f32.mrf.mxu1 }
 0x472   : > { %v12181_v38 = vpop.f32.mrf.mxu0  ;;  %v8702_v43 = vadd.f32 %v8701_v20, %v14462_v45  ;;  %v8825_v0 = vadd.f32 %v14531_v49, %v8786_v19  ;;  %v8787_v52 = vmul.f32 %v14514_v26, %v8710_v56  ;;  %v8723_v35 = vadd.f32 %v12140_v11, %v14477_v17 }
 0x473   : > { %9313 = vst [vmem:[%s14560_s30 + $0x58] sm:$0xff] %v9281_v29  ;;  %v9279_v39 = vmax.f32 %v9247_v63, 0.0  ;;  %v9252_v23 = vadd.f32 %v9220_v61, %v8821_v5  ;;  %v9218_v40 = vadd.f32 %v14537_v7, %v9179_v51  ;;  %v9182_v25 = vmul.f32 %v12181_v38, %v14525_v48  ;;  %v8714_v31 = vpop.f32.mrf.mxu1 }
 0x474   : > { %v9084_v16 = vpop.f32.mrf.mxu0  ;;  %v11890_v29 = vadd.f32 %v14494_v42, %v14491_v28  ;;  %v8823_v63 = vadd.f32 %v14531_v49, %v8784_v24  ;;  %v8785_v61 = vmul.f32 %v14514_v26, %v8702_v43  ;;  %v8715_v51 = vadd.f32 %v8714_v31, %v14471_v4 }
 0x475   : > { %9311 = vst [vmem:[%s14560_s30 + $0x48] sm:$0xff] %v9279_v39  ;;  %v9284_v12 = vmax.f32 %v9252_v23, 0.0  ;;  %v9250_v2 = vadd.f32 %v9218_v40, %v8819_v60  ;;  %v9221_v6 = vadd.f32 %v14537_v7, %v9182_v25  ;;  %v9180_v62 = vmul.f32 %v14525_v48, %v9084_v16  ;;  %v12141_v54 = vpop.f32.mrf.mxu1 }
 0x476   : > { %v12184_v3 = vpop.f32.mrf.mxu0  ;;  %v8826_v39 = vadd.f32 %v14531_v49, %v8787_v52  ;;  %v8790_v28 = vmul.f32 %v14514_v26, %v8723_v35  ;;  %v8726_v42 = vadd.f32 %v12141_v54, %v14480_v34  ;;  %v8433_v56 = vadd.f32 %v11890_v29, %v14405_v33 }
 0x477   : > { %9316 = vst [vmem:[%s14560_s30 + $0x70] sm:$0xff] %v9284_v12  ;;  %v9282_v59 = vmax.f32 %v9250_v2, 0.0  ;;  %v9253_v8 = vadd.f32 %v9221_v6, %v8822_v36  ;;  %v9219_v55 = vadd.f32 %v14537_v7, %v9180_v62  ;;  %v9185_v50 = vmul.f32 %v12184_v3, %v14525_v48  ;;  %v8717_v60 = vpop.f32.mrf.mxu1 }
 0x478   : > { %v9097_v5 = vpop.f32.mrf.mxu0  ;;  %v8824_v16 = vadd.f32 %v14531_v49, %v8785_v61  ;;  %v8788_v11 = vmul.f32 %v14514_v26, %v8715_v51  ;;  %v8718_v12 = vadd.f32 %v8717_v60, %v14474_v21  ;;  %v12002_v43 = vadd.f32 %v14508_v37, %v14504_v13 }
 0x479   : > { %9314 = vst [vmem:[%s14560_s30 + $0x60] sm:$0xff] %v9282_v59  ;;  %v9285_v45 = vmax.f32 %v9253_v8, 0.0  ;;  %v9251_v27 = vadd.f32 %v9219_v55, %v8820_v10  ;;  %v9224_v18 = vadd.f32 %v14537_v7, %v9185_v50  ;;  %v9183_v41 = vmul.f32 %v14525_v48, %v9097_v5  ;;  %v12144_v40 = vpop.f32.mrf.mxu1 }
 0x47a   : > { %v12185_v17 = vpop.f32.mrf.mxu0  ;;  %v8829_v33 = vadd.f32 %v14531_v49, %v8790_v28  ;;  %v8791_v3 = vmul.f32 %v14514_v26, %v8726_v42  ;;  %v8739_v31 = vadd.f32 %v12144_v40, %v14489_v22  ;;  %v11893_v52 = vadd.f32 %v14500_v15, %v14498_v9 }
 0x47b   : > { %9317 = vst [vmem:[%s14560_s30 + $0x78] sm:$0xff] %v9285_v45  ;;  %v9283_v46 = vmax.f32 %v9251_v27, 0.0  ;;  %v9256_v57 = vadd.f32 %v9224_v18, %v8825_v0  ;;  %v9222_v38 = vadd.f32 %v14537_v7, %v9183_v41  ;;  %v9186_v20 = vmul.f32 %v12185_v17, %v14525_v48  ;;  %v8730_v34 = vpop.f32.mrf.mxu1 }
 0x47c   : > { %v9100_v23 = vpop.f32.mrf.mxu0  ;;  %v8827_v13 = vadd.f32 %v14531_v49, %v8788_v11  ;;  %v8789_v37 = vmul.f32 %v14514_v26, %v8718_v12  ;;  %v8731_v35 = vadd.f32 %v8730_v34, %v14483_v1  ;;  %v8830_v41 = vadd.f32 %v14531_v49, %v8791_v3 }
 0x47d   : > { %9315 = vst [vmem:[%s14560_s30 + $0x68] sm:$0xff] %v9283_v46  ;;  %v9288_v4 = vmax.f32 %v9256_v57, 0.0  ;;  %v9254_v25 = vadd.f32 %v9222_v38, %v8823_v63  ;;  %v9225_v36 = vadd.f32 %v14537_v7, %v9186_v20  ;;  %v9184_v19 = vmul.f32 %v14525_v48, %v9100_v23  ;;  %v12145_v59 = vpop.f32.mrf.mxu1 }
 0x47e   : > { %v12188_v2 = vpop.f32.mrf.mxu0  ;;  %v8794_v9 = vmul.f32 %v14514_v26, %v8739_v31  ;;  %v8742_v15 = vadd.f32 %v12145_v59, %v14496_v30  ;;  %v8594_v63 = vadd.f32 %v12002_v43, %v8433_v56  ;;  %v12005_v46 = vadd.f32 %v14520_v47, %v14516_v14 }
 0x47f   : > { %9320 = vst [vmem:[%s14560_s30 + $0x90] sm:$0xff] %v9288_v4  ;;  %v9286_v6 = vmax.f32 %v9254_v25, 0.0  ;;  %v9257_v62 = vadd.f32 %v9225_v36, %v8826_v39  ;;  %v9223_v10 = vadd.f32 %v14537_v7, %v9184_v19  ;;  %v9189_v24 = vmul.f32 %v12188_v2, %v14525_v48  ;;  %v8733_v5 = vpop.f32.mrf.mxu1 }
 0x480   : > { %v9113_v21 = vpop.f32.mrf.mxu0  ;;  %v8828_v57 = vadd.f32 %v14531_v49, %v8789_v37  ;;  %v8792_v38 = vmul.f32 %v14514_v26, %v8731_v35  ;;  %v8734_v30 = vadd.f32 %v8733_v5, %v14486_v58  ;;  %v8436_v4 = vadd.f32 %v11893_v52, %v14408_v53 }
 0x481   : > { %9318 = vst [vmem:[%s14560_s30 + $0x80] sm:$0xff] %v9286_v6  ;;  %v9289_v8 = vmax.f32 %v9257_v62, 0.0  ;;  %v9255_v55 = vadd.f32 %v9223_v10, %v8824_v16  ;;  %v9228_v50 = vadd.f32 %v14537_v7, %v9189_v24  ;;  %v9187_v0 = vmul.f32 %v14525_v48, %v9113_v21  ;;  %v12148_v61 = vpop.f32.mrf.mxu1 }
 0x482   : > { %v12189_v22 = vpop.f32.mrf.mxu0  ;;  %v8833_v14 = vadd.f32 %v14531_v49, %v8794_v9  ;;  %v8795_v47 = vmul.f32 %v14514_v26, %v8742_v15  ;;  %v8755_v25 = vadd.f32 %v12148_v61, %v8594_v63  ;;  %v8831_v12 = vadd.f32 %v14531_v49, %v8792_v38 }
 0x483   : > { %9321 = vst [vmem:[%s14560_s30 + $0x98] sm:$0xff] %v9289_v8  ;;  %v9287_v54 = vmax.f32 %v9255_v55, 0.0  ;;  %v9260_v45 = vadd.f32 %v9228_v50, %v8829_v33  ;;  %v9226_v27 = vadd.f32 %v14537_v7, %v9187_v0  ;;  %v9190_v18 = vmul.f32 %v12189_v22, %v14525_v48  ;;  %v8746_v39 = vpop.f32.mrf.mxu1 }
 0x484   : > { %v9116_v29 = vpop.f32.mrf.mxu0  ;;  %v8793_v53 = vmul.f32 %v14514_v26, %v8734_v30  ;;  %v8747_v2 = vadd.f32 %v8746_v39, %v14502_v32  ;;  %v8597_v34 = vadd.f32 %v12005_v46, %v8436_v4  ;;  %v8834_v3 = vadd.f32 %v14531_v49, %v8795_v47 }
 0x485   : > { %9319 = vst [vmem:[%s14560_s30 + $0x88] sm:$0xff] %v9287_v54  ;;  %v9292_v1 = vmax.f32 %v9260_v45, 0.0  ;;  %v9258_v51 = vadd.f32 %v9226_v27, %v8827_v13  ;;  %v9229_v17 = vadd.f32 %v14537_v7, %v9190_v18  ;;  %v9188_v60 = vmul.f32 %v14525_v48, %v9116_v29  ;;  %v12149_v19 = vpop.f32.mrf.mxu1 }
 0x486   : > { %v12192_v20 = vpop.f32.mrf.mxu0  ;;  %v8798_v31 = vmul.f32 %v14514_v26, %v8755_v25  ;;  %v8758_v21 = vadd.f32 %v12149_v19, %v8597_v34  ;;  %v8832_v0 = vadd.f32 %v14531_v49, %v8793_v53  ;;  %v8796_v52 = vmul.f32 %v14514_v26, %v8747_v2 }
 0x487   : > { %9324 = vst [vmem:[%s14560_s30 + $0xb0] sm:$0xff] %v9292_v1  ;;  %v9290_v28 = vmax.f32 %v9258_v51, 0.0  ;;  %v9261_v42 = vadd.f32 %v9229_v17, %v8830_v41  ;;  %v9227_v23 = vadd.f32 %v14537_v7, %v9188_v60  ;;  %v9193_v40 = vmul.f32 %v12192_v20, %v14525_v48  ;;  %v8749_v33 = vpop.f32.mrf.mxu1 }
 0x488   : > { %v9129_v36 = vpop.f32.mrf.mxu0  ;;  %v8750_v13 = vadd.f32 %v8749_v33, %v14506_v44  ;;  %v8837_v45 = vadd.f32 %v14531_v49, %v8798_v31  ;;  %v8799_v27 = vmul.f32 %v14514_v26, %v8758_v21  ;;  %v8835_v29 = vadd.f32 %v14531_v49, %v8796_v52 }
 0x489   : > { %9322 = vst [vmem:[%s14560_s30 + $0xa0] sm:$0xff] %v9290_v28  ;;  %v9293_v58 = vmax.f32 %v9261_v42, 0.0  ;;  %v9259_v56 = vadd.f32 %v9227_v23, %v8828_v57  ;;  %v9232_v16 = vadd.f32 %v14537_v7, %v9193_v40  ;;  %v9191_v11 = vmul.f32 %v14525_v48, %v9129_v36 }
 0x48a   : > { %v12193_v6 = vpop.f32.mrf.mxu0  ;;  %v8797_v63 = vmul.f32 %v14514_v26, %v8750_v13  ;;  %v8838_v46 = vadd.f32 %v14531_v49, %v8799_v27 }
 0x48b   : > { %9325 = vst [vmem:[%s14560_s30 + $0xb8] sm:$0xff] %v9293_v58  ;;  %v9291_v62 = vmax.f32 %v9259_v56, 0.0  ;;  %v9264_v10 = vadd.f32 %v9232_v16, %v8833_v14  ;;  %v9230_v24 = vadd.f32 %v14537_v7, %v9191_v11  ;;  %v9194_v43 = vmul.f32 %v12193_v6, %v14525_v48 }
 0x48c   : > { %v9132_v59 = vpop.f32.mrf.mxu0  ;;  %v8836_v39 = vadd.f32 %v14531_v49, %v8797_v63 }
 0x48d   : > { %9323 = vst [vmem:[%s14560_s30 + $0xa8] sm:$0xff] %v9291_v62  ;;  %v9296_v8 = vmax.f32 %v9264_v10, 0.0  ;;  %v9262_v32 = vadd.f32 %v9230_v24, %v8831_v12  ;;  %v9233_v55 = vadd.f32 %v14537_v7, %v9194_v43  ;;  %v9192_v50 = vmul.f32 %v14525_v48, %v9132_v59 }
 0x48e   : > { %v12196_v37 = vpop.f32.mrf.mxu0 }
 0x48f   : > { %9328 = vst [vmem:[%s14560_s30 + $0xd0] sm:$0xff] %v9296_v8  ;;  %v9294_v35 = vmax.f32 %v9262_v32, 0.0  ;;  %v9265_v22 = vadd.f32 %v9233_v55, %v8834_v3  ;;  %v9231_v5 = vadd.f32 %v14537_v7, %v9192_v50  ;;  %v9197_v54 = vmul.f32 %v12196_v37, %v14525_v48 }
 0x490   : > { %v9145_v18 = vpop.f32.mrf.mxu0 }
 0x491   : > { %9326 = vst [vmem:[%s14560_s30 + $0xc0] sm:$0xff] %v9294_v35  ;;  %v9297_v41 = vmax.f32 %v9265_v22, 0.0  ;;  %v9263_v9 = vadd.f32 %v9231_v5, %v8832_v0  ;;  %v9236_v44 = vadd.f32 %v14537_v7, %v9197_v54  ;;  %v9195_v15 = vmul.f32 %v14525_v48, %v9145_v18 }
 0x492   : > { %v12197_v61 = vpop.f32.mrf.mxu0 }
 0x493   : > { %9329 = vst [vmem:[%s14560_s30 + $0xd8] sm:$0xff] %v9297_v41  ;;  %v9295_v1 = vmax.f32 %v9263_v9, 0.0  ;;  %v9268_v51 = vadd.f32 %v9236_v44, %v8837_v45  ;;  %v9234_v17 = vadd.f32 %v14537_v7, %v9195_v15  ;;  %v9198_v60 = vmul.f32 %v12197_v61, %v14525_v48 }
 0x494   : > { %v9148_v57 = vpop.f32.mrf.mxu0 }
 0x495   : > { %9327 = vst [vmem:[%s14560_s30 + $0xc8] sm:$0xff] %v9295_v1  ;;  %v9300_v38 = vmax.f32 %v9268_v51, 0.0  ;;  %v9266_v30 = vadd.f32 %v9234_v17, %v8835_v29  ;;  %v9237_v26 = vadd.f32 %v14537_v7, %v9198_v60  ;;  %v9196_v20 = vmul.f32 %v14525_v48, %v9148_v57 }
 0x497   : > { %9332 = vst [vmem:[%s14560_s30 + $0xf0] sm:$0xff] %v9300_v38  ;;  %v9298_v28 = vmax.f32 %v9266_v30, 0.0  ;;  %v9269_v42 = vadd.f32 %v9237_v26, %v8838_v46  ;;  %v9235_v23 = vadd.f32 %v14537_v7, %v9196_v20 }
 0x499   : > { %9330 = vst [vmem:[%s14560_s30 + $0xe0] sm:$0xff] %v9298_v28  ;;  %v9301_v40 = vmax.f32 %v9269_v42, 0.0  ;;  %v9267_v4 = vadd.f32 %v9235_v23, %v8836_v39 }
 0x49b   : > { %9333 = vst [vmem:[%s14560_s30 + $0xf8] sm:$0xff] %v9301_v40  ;;  %v9299_v48 = vmax.f32 %v9267_v4, 0.0 }
 0x49d   : > { %9331 = vst [vmem:[%s14560_s30 + $0xe8] sm:$0xff] %v9299_v48 }
 0x49e   : > { %13088 = shalt.err (!%p13085_p10)
}
 0x49f   : > { %s13089_s12 = scalar_lea.hbm %s14740_s23, 4096  ;;  %s13093_s21 = scalar_lea.hbm %s14797_s10, 8192 }
 0x4a0   : > { %p13090_p6 = scmp.ne.s32.totalorder %s14740_s23, %s13089_s12  ;;  %p13094_p3 = scmp.lt.s32.totalorder %s14740_s23, %s14797_s10 }
 0x4a1   : > { %p13095_p11 = scmp.lt.s32.totalorder %s13093_s21, %s13089_s12 }
 0x4a2   : > { %p13091_p4 = pnand %p13090_p6, %p14845_p1 }
 0x4a3   : > { %p13096_p5 = por %p13095_p11, %p13094_p3 }
 0x4a4   : > { %p13092_p8 = pneg %p13091_p4 }
 0x4a6   : > { %p13097_p7 = pnand %p13096_p5, %p13092_p8 }
 0x4a8   : > { %13100 = shalt.err (!%p13097_p7)
}
 0x4a9   : > { %s13158_s24 = smov 128   ;;  %s13159_s27 = smov 8  }
 0x4aa   : > { %12228 = dma.vmem_to_hbm [thread:$0]  (%p14845_p1), %s14742_s18, 4096, %s14740_s23, %s9335_s4, %s13158_s24, %s13158_s24, %s13159_s27  }
 0x4ab PF: > { %s9363_s29 = sand.u32 1, %s13135_s13   ;;  %p14846_p12 = scmp.ne.s32.totalorder %s14808_s20, 0 }
 0x4ac   : > { %p14847_p9 = scmp.ge.s32.totalorder %s13147_s16, 2  ;;  %s9364_s17 = scalar_lea.sflag [#allocation8], %s9363_s29 }
 0x4ae   : > { %p12245_p13 = pnand %p14847_p9, %p14846_p12 }
 0x4b0   : > { %p12246_p0 = pneg %p12245_p13 }
 0x4b2   : > { %13130 = dma.done.wait (%p12246_p0), %s9364_s17, 4096  }
 0x4b3   : > { %13132 = vsyncadd (%p12246_p0), %s9364_s17, 4294963200  ;;  %s14848_s22 = sld [smem:[#allocation19_spill]]  ;;  %p25_p2 = scmp.ge.s32.totalorder %s13304_s26, 4  }
 0x4b4   : > { %s14849_s13 = smov %s13139_s14  ;;  %s14850_s14 = smov %s13143_s15 }
 0x4b5   : > { %s14852_s16 = smov %s13304_s26  ;;  %27 = sbr.rel (!%p25_p2) target bundleno = 11 (0xb), region = 123 }
 0x4b9   : > { %s14851_s15 = smov %s14848_s22 }
 0x4ba   :  { %9369 = vsyncpa [#allocation7], 1 }
 0x4bb   :  { %9371 = vsyncpa [#allocation7 + $0x1], 1 }
 0x4bc   :  { %9372 = vsyncpa [#allocation10], 1 }
 0x4bd   :  { %9373 = vsyncpa [#allocation13], 1 }
 0x4be   :  { %9374 = vsyncpa [#allocation8], 1 }
 0x4bf   :  { %9376 = vsyncpa [#allocation8 + $0x1], 1 }

</bundles_post_ra>
